<compile_context>
chip_gen: v7x
topology: tpu7x:2x2x1
jax: 0.10.0
libtpu: 0.0.40
codegen_flags: <defaults>
</compile_context>

<pallas_src>
import jax
import jax.numpy as jnp
from jax.experimental import pallas as pl
from jax.experimental.pallas import tpu as pltpu

EPS = 1e-5


def bn_relu_kernel(x_ref, gamma_ref, beta_ref, o_ref):
    # x_ref: (N, TC, HW) slab; gamma_ref/beta_ref: (1, TC, 1)
    x = x_ref[...].astype(jnp.float32)
    n, tc, hw = x.shape
    inv_l = 1.0 / float(n * hw)

    # Two-pass moments: robust vs E[x^2]-E[x]^2 cancellation, and free in wall
    # time because the block is VMEM-resident (kernel is HBM-bound).
    mean = jnp.sum(x, axis=(0, 2), keepdims=True) * inv_l          # (1, TC, 1)
    xc = x - mean
    var = jnp.sum(xc * xc, axis=(0, 2), keepdims=True) * inv_l     # biased var
    inv = jax.lax.rsqrt(var + EPS)

    scale = inv * gamma_ref[...]                                   # (1, TC, 1)
    y = xc * scale + beta_ref[...]                                 # mul+add/elem
    o_ref[...] = jnp.maximum(y, 0.0).astype(o_ref.dtype)


def _pick_tile_c(N, C, HW, dtype):
    """Channel-tile size per chip generation + VMEM guard for larger N."""
    kind = ""
    try:
        kind = jax.devices()[0].device_kind.lower()
    except Exception:
        pass
    # v7x has 2 TensorCores/chip: a 4-step grid gives an even 2:2 megacore
    # split of the "parallel" channel axis (vs 2:1 with 3 steps).  Single-TC
    # v5e/v6e keep the 3-step grid (fewer ~0.35us pipeline steps).
    tile_c = 728 if "v7" in kind else 968
    # VMEM guard: in+out f32 blocks, double-buffered, must stay modest even if
    # the batch grows (v7x scoped VMEM is the tightest).
    budget = 16 * 1024 * 1024
    bytes_per_c = N * HW * 4 * 4  # f32 in + out, double-buffered
    while tile_c > 8 and tile_c * bytes_per_c > budget:
        tile_c = max(8, ((tile_c // 2) // 8) * 8)
    # Sub-32-bit inputs pack two rows per sublane: keep tile_c a multiple of 16.
    if jnp.dtype(dtype).itemsize == 2:
        tile_c = max(16, (tile_c // 16) * 16)
    return min(tile_c, ((C + 7) // 8) * 8)


def batchnorm_relu(x_nchw, gamma, beta, *, tile_c=None):
    """x_nchw: (N, C, H, W).  Training-mode BN (batch stats, biased var) + ReLU."""
    N, C, H, W = x_nchw.shape
    HW = H * W
    if tile_c is None:
        tile_c = _pick_tile_c(N, C, HW, x_nchw.dtype)
    assert tile_c % 8 == 0, tile_c

    # Zero-copy reshape (no HBM transpose): channels stay the 2nd axis and the
    # per-channel reduction runs over axes (0, 2) inside the kernel.
    x_nc_hw = x_nchw.reshape(N, C, HW)
    g = gamma.reshape(1, C, 1).astype(jnp.float32)
    b = beta.reshape(1, C, 1).astype(jnp.float32)

    # Ragged last block is safe: channels are independent; padded channels
    # compute throwaway stats and their output rows are masked on writeback.
    grid = (pl.cdiv(C, tile_c),)

    cost = pl.CostEstimate(
        flops=7 * N * C * HW,
        transcendentals=C,
        bytes_accessed=2 * N * C * HW * x_nchw.dtype.itemsize + 2 * C * 4,
    )

    out = pl.pallas_call(
        bn_relu_kernel,
        out_shape=jax.ShapeDtypeStruct((N, C, HW), x_nchw.dtype),
        grid_spec=pltpu.PrefetchScalarGridSpec(
            num_scalar_prefetch=0,
            grid=grid,
            in_specs=[
                pl.BlockSpec((N, tile_c, HW), lambda i: (0, i, 0)),
                pl.BlockSpec((1, tile_c, 1), lambda i: (0, i, 0)),
                pl.BlockSpec((1, tile_c, 1), lambda i: (0, i, 0)),
            ],
            out_specs=pl.BlockSpec((N, tile_c, HW), lambda i: (0, i, 0)),
        ),
        compiler_params=pltpu.CompilerParams(
            dimension_semantics=("parallel",)),
        cost_estimate=cost,
    )(x_nc_hw, g, b)

    return out.reshape(N, C, H, W)


def batchnorm_relu_ref(x, gamma, beta):
    xf = x.astype(jnp.float32)
    mean = jnp.mean(xf, axis=(0, 2, 3), keepdims=True)
    var = jnp.mean((xf - mean) ** 2, axis=(0, 2, 3), keepdims=True)
    y = (xf - mean) * jax.lax.rsqrt(var + EPS)
    y = y * gamma.reshape(1, -1, 1, 1) + beta.reshape(1, -1, 1, 1)
    return jnp.maximum(y, 0.0).astype(x.dtype)


if __name__ == "__main__":
    # Shape implied by the module: BatchNorm2d(2904) on (1, 2904, 14, 14).
    N, C, H, W = 1, 2904, 14, 14

    key = jax.random.PRNGKey(0)
    kx, kg, kb = jax.random.split(key, 3)
    # Non-zero mean to exercise the two-pass variance path (realistic activations).
    x = 3.0 + jax.random.normal(kx, (N, C, H, W), dtype=jnp.float32)
    gamma = 1.0 + 0.1 * jax.random.normal(kg, (C,), dtype=jnp.float32)
    beta = 0.1 * jax.random.normal(kb, (C,), dtype=jnp.float32)

    out = jax.block_until_ready(batchnorm_relu(x, gamma, beta))
    ref = jax.block_until_ready(batchnorm_relu_ref(x, gamma, beta))

    assert out.shape == (N, C, H, W) and out.dtype == x.dtype
    assert jnp.allclose(out, ref, atol=1e-4, rtol=1e-4), float(
        jnp.max(jnp.abs(out - ref)))
    print("KERNEL_OK")
</pallas_src>

<mosaic_0001>
module attributes {stable_mosaic.version = 11 : i64} {
  func.func @bn_relu_kernel(%arg0: i32, %arg1: memref<1x968x196xf32, #tpu.memory_space<vmem>>, %arg2: memref<1x968x1xf32, #tpu.memory_space<vmem>>, %arg3: memref<1x968x1xf32, #tpu.memory_space<vmem>>, %arg4: memref<1x968x196xf32, #tpu.memory_space<vmem>>) attributes {dimension_semantics = [#tpu.dimension_semantics<parallel>], iteration_bounds = array<i64: 3>, scalar_prefetch = 0 : i64, scratch_operands = 0 : i64, tpu.core_type = #tpu.core_type<tc>, window_params = [{transform_indices = @transform_0, window_bounds = array<i64: 1, 968, 196>}, {transform_indices = @transform_1, window_bounds = array<i64: 1, 968, 1>}, {transform_indices = @transform_2, window_bounds = array<i64: 1, 968, 1>}, {transform_indices = @transform_3, window_bounds = array<i64: 1, 968, 196>}]} {
    %c0 = arith.constant 0 : index
    %c0_0 = arith.constant 0 : index
    %c0_1 = arith.constant 0 : index
    %0 = vector.load %arg1[%c0, %c0_0, %c0_1] : memref<1x968x196xf32, #tpu.memory_space<vmem>>, vector<1x968x196xf32>
    %cst = arith.constant dense<0.000000e+00> : vector<968xf32>
    %1 = vector.multi_reduction <add>, %0, %cst [0, 2] : vector<1x968x196xf32> to vector<968xf32>
    %2 = vector.shape_cast %1 : vector<968xf32> to vector<1x968x1xf32>
    %cst_2 = arith.constant 0.00510204071 : f32
    %3 = vector.broadcast %cst_2 : f32 to vector<1x968x1xf32>
    %4 = arith.mulf %2, %3 : vector<1x968x1xf32>
    %5 = vector.broadcast %4 : vector<1x968x1xf32> to vector<1x968x196xf32>
    %6 = arith.subf %0, %5 : vector<1x968x196xf32>
    %7 = arith.mulf %6, %6 : vector<1x968x196xf32>
    %cst_3 = arith.constant dense<0.000000e+00> : vector<968xf32>
    %8 = vector.multi_reduction <add>, %7, %cst_3 [0, 2] : vector<1x968x196xf32> to vector<968xf32>
    %9 = vector.shape_cast %8 : vector<968xf32> to vector<1x968x1xf32>
    %cst_4 = arith.constant 0.00510204071 : f32
    %10 = vector.broadcast %cst_4 : f32 to vector<1x968x1xf32>
    %11 = arith.mulf %9, %10 : vector<1x968x1xf32>
    %cst_5 = arith.constant 9.99999974E-6 : f32
    %12 = vector.broadcast %cst_5 : f32 to vector<1x968x1xf32>
    %13 = arith.addf %11, %12 : vector<1x968x1xf32>
    %14 = math.rsqrt %13 : vector<1x968x1xf32>
    %c0_6 = arith.constant 0 : index
    %c0_7 = arith.constant 0 : index
    %c0_8 = arith.constant 0 : index
    %15 = vector.load %arg2[%c0_6, %c0_7, %c0_8] : memref<1x968x1xf32, #tpu.memory_space<vmem>>, vector<1x968x1xf32>
    %16 = arith.mulf %14, %15 : vector<1x968x1xf32>
    %17 = vector.broadcast %16 : vector<1x968x1xf32> to vector<1x968x196xf32>
    %18 = arith.mulf %6, %17 : vector<1x968x196xf32>
    %c0_9 = arith.constant 0 : index
    %c0_10 = arith.constant 0 : index
    %c0_11 = arith.constant 0 : index
    %19 = vector.load %arg3[%c0_9, %c0_10, %c0_11] : memref<1x968x1xf32, #tpu.memory_space<vmem>>, vector<1x968x1xf32>
    %20 = vector.broadcast %19 : vector<1x968x1xf32> to vector<1x968x196xf32>
    %21 = arith.addf %18, %20 : vector<1x968x196xf32>
    %cst_12 = arith.constant 0.000000e+00 : f32
    %22 = vector.broadcast %cst_12 : f32 to vector<1x968x196xf32>
    %23 = arith.maximumf %21, %22 : vector<1x968x196xf32>
    %c0_13 = arith.constant 0 : index
    %c0_14 = arith.constant 0 : index
    %c0_15 = arith.constant 0 : index
    %24 = vector.load %arg4[%c0_13, %c0_14, %c0_15] : memref<1x968x196xf32, #tpu.memory_space<vmem>>, vector<1x968x196xf32>
    tpu.vector_store %arg4[%c0_13, %c0_14, %c0_15], %23 {strides = array<i32>} : memref<1x968x196xf32, #tpu.memory_space<vmem>>, vector<1x968x196xf32>,
    return
  }
  func.func @transform_0(%arg0: i32) -> (i32, i32, i32) {
    %c0_i32 = arith.constant 0 : i32
    %c0_i32_0 = arith.constant 0 : i32
    %c0_i32_1 = arith.constant 0 : i32
    return %c0_i32, %arg0, %c0_i32_0 : i32, i32, i32
  }
  func.func @transform_1(%arg0: i32) -> (i32, i32, i32) {
    %c0_i32 = arith.constant 0 : i32
    %c0_i32_0 = arith.constant 0 : i32
    %c0_i32_1 = arith.constant 0 : i32
    return %c0_i32, %arg0, %c0_i32_0 : i32, i32, i32
  }
  func.func @transform_2(%arg0: i32) -> (i32, i32, i32) {
    %c0_i32 = arith.constant 0 : i32
    %c0_i32_0 = arith.constant 0 : i32
    %c0_i32_1 = arith.constant 0 : i32
    return %c0_i32, %arg0, %c0_i32_0 : i32, i32, i32
  }
  func.func @transform_3(%arg0: i32) -> (i32, i32, i32) {
    %c0_i32 = arith.constant 0 : i32
    %c0_i32_0 = arith.constant 0 : i32
    %c0_i32_1 = arith.constant 0 : i32
    return %c0_i32, %arg0, %c0_i32_0 : i32, i32, i32
  }
}

</mosaic_0001>

<bundles_post_ra>
// kernel: tpu_custom_call.1
= control target key start
LH: loop header
LB: loop body
LE: loop exit
PB: predicated region body
PF: predicated region fallthrough
CT: control target
= control target key end

     0   :  { %s5564_s12 = smov 0   ;;  %s9358_s0 = inlined_call_operand.vmem [shape: f32[1,2904,196], index: 0, kind: input, shape index: {}]   ;;  %s9359_s1 = inlined_call_operand.vmem [shape: f32[1,2904,1], index: 1, kind: input, shape index: {}]   ;;  %s9360_s2 = inlined_call_operand.vmem [shape: f32[1,2904,1], index: 2, kind: input, shape index: {}]   ;;  %s9361_s3 = inlined_call_operand.vmem [shape: f32[1,2904,196], index: 3, kind: output, shape index: {}]  }
   0x1 LB: > { %s5025_s13 = sadd.s32 4294967295, %s5541_s12   ;;  %p5029_p0 = scmp.ge.s32.totalorder %s5541_s12, 1  ;;  %s5541_s12 = sphi %s5564_s12, %s13_s12  }
   0x2   : > { %p161_p1 = scmp.lt.s32.totalorder %s5541_s12, 4 }
   0x4   : > { %p162_p2 = pnand %p5029_p0, %p161_p1 }
   0x6   : > { %165 = sbr.rel (%p162_p2) target bundleno = 1147 (0x47b), region = 32 }
   0xd   : > { %s197_s14 = smul.u32 121, %s5025_s13  ;;  %vm465_vm0 = vcmask 556032  }
   0xf   : > { %p198_p3 = scmp.lt.s32.totalorder %s197_s14, 362 }
  0x11   : > { %s10337_s14 = smov (!%p198_p3, %s197_s14), 362 }
  0x12   : > { %s5038_s15 = sshll.u32 %s10337_s14, 4  ;;  %s5032_s19 = sshll.u32 %s10337_s14, 3 }
  0x13   : > { %s5580_s18 = scalar_lea.vmem %s9358_s0, %s5038_s15  ;;  %s7763_s22 = scalar_lea.vmem %s9359_s1, %s5032_s19 }
  0x14   : > { %v227_v0 = vld [vmem:[%s5580_s18 + $0x20] sm:$0xff]  ;;  %v228_v1 = vld [vmem:[%s5580_s18 + $0x28] sm:$0xff]  ;;  %v229_v5 = vld [vmem:[%s5580_s18 + $0x30] sm:$0xff]  ;;  %s8230_s25 = scalar_lea.vmem %s9360_s2, %s5032_s19  ;;  %s8440_s28 = scalar_lea.vmem %s9361_s3, %s5038_s15 }
  0x15   : > { %v223_v2 = vld [vmem:[%s5580_s18] sm:$0xff]  ;;  %v474_v3 = vsel %vm465_vm0, %v228_v1, 0.0  ;;  %v224_v4 = vld [vmem:[%s5580_s18 + $0x8] sm:$0xff]  ;;  %v230_v6 = vld [vmem:[%s5580_s18 + $0x38] sm:$0xff] }
  0x16   : > { %v475_v7 = vadd.f32 %v474_v3, %v227_v0  ;;  %v466_v8 = vsel %vm465_vm0, %v224_v4, 0.0  ;;  %v478_v9 = vsel %vm465_vm0, %v230_v6, 0.0  ;;  %v225_v10 = vld [vmem:[%s5580_s18 + $0x10] sm:$0xff]  ;;  %v226_v11 = vld [vmem:[%s5580_s18 + $0x18] sm:$0xff]  ;;  %v232_v15 = vld [vmem:[%s5580_s18 + $0x48] sm:$0xff] }
  0x17   : > { %v467_v12 = vadd.f32 %v466_v8, %v223_v2  ;;  %v470_v13 = vsel %vm465_vm0, %v226_v11, 0.0  ;;  %v234_v14 = vld [vmem:[%s5580_s18 + $0x58] sm:$0xff]  ;;  %v479_v16 = vadd.f32 %v478_v9, %v229_v5  ;;  %v233_v18 = vld [vmem:[%s5580_s18 + $0x50] sm:$0xff]  ;;  %v231_v20 = vld [vmem:[%s5580_s18 + $0x40] sm:$0xff]  ;;  %v482_v21 = vsel %vm465_vm0, %v232_v15, 0.0 }
  0x18   : > { %476 = vadd.xlane.f32.xlu1 %v475_v7  ;;  %v471_v17 = vadd.f32 %v470_v13, %v225_v10  ;;  %v486_v19 = vsel %vm465_vm0, %v234_v14, 0.0  ;;  %v238_v22 = vld [vmem:[%s5580_s18 + $0x78] sm:$0xff]  ;;  %v236_v23 = vld [vmem:[%s5580_s18 + $0x68] sm:$0xff]  ;;  %v483_v25 = vadd.f32 %v482_v21, %v231_v20  ;;  %v237_v26 = vld [vmem:[%s5580_s18 + $0x70] sm:$0xff] }
  0x19   : > { %468 = vadd.xlane.f32.xlu0 %v467_v12  ;;  %v487_v24 = vadd.f32 %v486_v19, %v233_v18  ;;  %v494_v27 = vsel %vm465_vm0, %v238_v22, 0.0  ;;  %v235_v28 = vld [vmem:[%s5580_s18 + $0x60] sm:$0xff]  ;;  %v490_v29 = vsel %vm465_vm0, %v236_v23, 0.0  ;;  %v242_v30 = vld [vmem:[%s5580_s18 + $0x98] sm:$0xff]  ;;  %v240_v31 = vld [vmem:[%s5580_s18 + $0x88] sm:$0xff] }
  0x1a   : > { %v495_v32 = vadd.f32 %v494_v27, %v237_v26  ;;  %v491_v33 = vadd.f32 %v490_v29, %v235_v28  ;;  %v241_v34 = vld [vmem:[%s5580_s18 + $0x90] sm:$0xff]  ;;  %v502_v35 = vsel %vm465_vm0, %v242_v30, 0.0  ;;  %v239_v36 = vld [vmem:[%s5580_s18 + $0x80] sm:$0xff]  ;;  %v498_v37 = vsel %vm465_vm0, %v240_v31, 0.0  ;;  %v246_v38 = vld [vmem:[%s5580_s18 + $0xb8] sm:$0xff] }
  0x1b   : > { %v244_v39 = vld [vmem:[%s5580_s18 + $0xa8] sm:$0xff]  ;;  %v503_v40 = vadd.f32 %v502_v35, %v241_v34  ;;  %v499_v41 = vadd.f32 %v498_v37, %v239_v36  ;;  %v245_v42 = vld [vmem:[%s5580_s18 + $0xb0] sm:$0xff]  ;;  %v510_v43 = vsel %vm465_vm0, %v246_v38, 0.0  ;;  %v243_v44 = vld [vmem:[%s5580_s18 + $0xa0] sm:$0xff] }
  0x1c   : > { %480 = vadd.xlane.f32.xlu1 %v479_v16  ;;  %v506_v45 = vsel %vm465_vm0, %v244_v39, 0.0  ;;  %v250_v46 = vld [vmem:[%s5580_s18 + $0xd8] sm:$0xff]  ;;  %v248_v47 = vld [vmem:[%s5580_s18 + $0xc8] sm:$0xff]  ;;  %v511_v48 = vadd.f32 %v510_v43, %v245_v42  ;;  %v249_v50 = vld [vmem:[%s5580_s18 + $0xd0] sm:$0xff] }
  0x1d   : > { %472 = vadd.xlane.f32.xlu0 %v471_v17  ;;  %v507_v49 = vadd.f32 %v506_v45, %v243_v44  ;;  %v518_v51 = vsel %vm465_vm0, %v250_v46, 0.0  ;;  %v247_v52 = vld [vmem:[%s5580_s18 + $0xc0] sm:$0xff]  ;;  %v514_v53 = vsel %vm465_vm0, %v248_v47, 0.0  ;;  %v254_v54 = vld [vmem:[%s5580_s18 + $0xf8] sm:$0xff]  ;;  %v252_v55 = vld [vmem:[%s5580_s18 + $0xe8] sm:$0xff] }
  0x1e   : > { %v519_v56 = vadd.f32 %v518_v51, %v249_v50  ;;  %v515_v57 = vadd.f32 %v514_v53, %v247_v52  ;;  %v253_v58 = vld [vmem:[%s5580_s18 + $0xf0] sm:$0xff]  ;;  %v526_v59 = vsel %vm465_vm0, %v254_v54, 0.0  ;;  %v251_v60 = vld [vmem:[%s5580_s18 + $0xe0] sm:$0xff]  ;;  %v522_v61 = vsel %vm465_vm0, %v252_v55, 0.0  ;;  %v258_v62 = vld [vmem:[%s5580_s18 + $0x118] sm:$0xff] }
  0x1f   : > { %v256_v63 = vld [vmem:[%s5580_s18 + $0x108] sm:$0xff]  ;;  %v527_v0 = vadd.f32 %v526_v59, %v253_v58  ;;  %v523_v1 = vadd.f32 %v522_v61, %v251_v60  ;;  %v257_v2 = vld [vmem:[%s5580_s18 + $0x110] sm:$0xff]  ;;  %v534_v3 = vsel %vm465_vm0, %v258_v62, 0.0  ;;  %v255_v4 = vld [vmem:[%s5580_s18 + $0x100] sm:$0xff] }
  0x20   : > { %488 = vadd.xlane.f32.xlu1 %v487_v24  ;;  %v530_v5 = vsel %vm465_vm0, %v256_v63, 0.0  ;;  %v262_v6 = vld [vmem:[%s5580_s18 + $0x138] sm:$0xff]  ;;  %v260_v7 = vld [vmem:[%s5580_s18 + $0x128] sm:$0xff]  ;;  %v535_v8 = vadd.f32 %v534_v3, %v257_v2  ;;  %v261_v10 = vld [vmem:[%s5580_s18 + $0x130] sm:$0xff] }
  0x21   : > { %484 = vadd.xlane.f32.xlu0 %v483_v25  ;;  %v531_v9 = vadd.f32 %v530_v5, %v255_v4  ;;  %v542_v11 = vsel %vm465_vm0, %v262_v6, 0.0  ;;  %v259_v12 = vld [vmem:[%s5580_s18 + $0x120] sm:$0xff]  ;;  %v538_v13 = vsel %vm465_vm0, %v260_v7, 0.0  ;;  %v266_v14 = vld [vmem:[%s5580_s18 + $0x158] sm:$0xff]  ;;  %v264_v15 = vld [vmem:[%s5580_s18 + $0x148] sm:$0xff] }
  0x22   : > { %v543_v16 = vadd.f32 %v542_v11, %v261_v10  ;;  %v539_v17 = vadd.f32 %v538_v13, %v259_v12  ;;  %v265_v18 = vld [vmem:[%s5580_s18 + $0x150] sm:$0xff]  ;;  %v550_v19 = vsel %vm465_vm0, %v266_v14, 0.0  ;;  %v263_v20 = vld [vmem:[%s5580_s18 + $0x140] sm:$0xff]  ;;  %v546_v21 = vsel %vm465_vm0, %v264_v15, 0.0  ;;  %v270_v22 = vld [vmem:[%s5580_s18 + $0x178] sm:$0xff] }
  0x23   : > { %v268_v23 = vld [vmem:[%s5580_s18 + $0x168] sm:$0xff]  ;;  %v551_v24 = vadd.f32 %v550_v19, %v265_v18  ;;  %v547_v25 = vadd.f32 %v546_v21, %v263_v20  ;;  %v269_v26 = vld [vmem:[%s5580_s18 + $0x170] sm:$0xff]  ;;  %v558_v27 = vsel %vm465_vm0, %v270_v22, 0.0  ;;  %v267_v28 = vld [vmem:[%s5580_s18 + $0x160] sm:$0xff] }
  0x24   : > { %496 = vadd.xlane.f32.xlu1 %v495_v32  ;;  %v554_v29 = vsel %vm465_vm0, %v268_v23, 0.0  ;;  %v274_v30 = vld [vmem:[%s5580_s18 + $0x198] sm:$0xff]  ;;  %v272_v31 = vld [vmem:[%s5580_s18 + $0x188] sm:$0xff]  ;;  %v559_v32 = vadd.f32 %v558_v27, %v269_v26  ;;  %v273_v34 = vld [vmem:[%s5580_s18 + $0x190] sm:$0xff] }
  0x25   : > { %492 = vadd.xlane.f32.xlu0 %v491_v33  ;;  %v555_v33 = vadd.f32 %v554_v29, %v267_v28  ;;  %v566_v35 = vsel %vm465_vm0, %v274_v30, 0.0  ;;  %v271_v36 = vld [vmem:[%s5580_s18 + $0x180] sm:$0xff]  ;;  %v562_v37 = vsel %vm465_vm0, %v272_v31, 0.0  ;;  %v278_v38 = vld [vmem:[%s5580_s18 + $0x1b8] sm:$0xff]  ;;  %v276_v39 = vld [vmem:[%s5580_s18 + $0x1a8] sm:$0xff] }
  0x26   : > { %v277_v42 = vld [vmem:[%s5580_s18 + $0x1b0] sm:$0xff]  ;;  %v574_v43 = vsel %vm465_vm0, %v278_v38, 0.0  ;;  %v275_v44 = vld [vmem:[%s5580_s18 + $0x1a0] sm:$0xff]  ;;  %v570_v45 = vsel %vm465_vm0, %v276_v39, 0.0  ;;  %v282_v46 = vld [vmem:[%s5580_s18 + $0x1d8] sm:$0xff] }
  0x27   : > { %v280_v47 = vld [vmem:[%s5580_s18 + $0x1c8] sm:$0xff]  ;;  %v281_v50 = vld [vmem:[%s5580_s18 + $0x1d0] sm:$0xff]  ;;  %v582_v51 = vsel %vm465_vm0, %v282_v46, 0.0  ;;  %v279_v52 = vld [vmem:[%s5580_s18 + $0x1c0] sm:$0xff] }
  0x28   : > { %504 = vadd.xlane.f32.xlu1 %v503_v40  ;;  %v567_v40 = vadd.f32 %v566_v35, %v273_v34  ;;  %v578_v53 = vsel %vm465_vm0, %v280_v47, 0.0  ;;  %v286_v54 = vld [vmem:[%s5580_s18 + $0x1f8] sm:$0xff]  ;;  %v284_v55 = vld [vmem:[%s5580_s18 + $0x1e8] sm:$0xff]  ;;  %v285_v58 = vld [vmem:[%s5580_s18 + $0x1f0] sm:$0xff] }
  0x29   : > { %500 = vadd.xlane.f32.xlu0 %v499_v41  ;;  %v563_v41 = vadd.f32 %v562_v37, %v271_v36  ;;  %v590_v59 = vsel %vm465_vm0, %v286_v54, 0.0  ;;  %v283_v60 = vld [vmem:[%s5580_s18 + $0x1e0] sm:$0xff]  ;;  %v586_v61 = vsel %vm465_vm0, %v284_v55, 0.0  ;;  %v290_v62 = vld [vmem:[%s5580_s18 + $0x218] sm:$0xff]  ;;  %v288_v63 = vld [vmem:[%s5580_s18 + $0x208] sm:$0xff] }
  0x2a   : > { %v289_v2 = vld [vmem:[%s5580_s18 + $0x210] sm:$0xff]  ;;  %v598_v3 = vsel %vm465_vm0, %v290_v62, 0.0  ;;  %v287_v4 = vld [vmem:[%s5580_s18 + $0x200] sm:$0xff]  ;;  %v594_v5 = vsel %vm465_vm0, %v288_v63, 0.0  ;;  %v294_v6 = vld [vmem:[%s5580_s18 + $0x238] sm:$0xff] }
  0x2b   : > { %v292_v7 = vld [vmem:[%s5580_s18 + $0x228] sm:$0xff]  ;;  %v293_v10 = vld [vmem:[%s5580_s18 + $0x230] sm:$0xff]  ;;  %v606_v11 = vsel %vm465_vm0, %v294_v6, 0.0  ;;  %v291_v12 = vld [vmem:[%s5580_s18 + $0x220] sm:$0xff] }
  0x2c   : > { %512 = vadd.xlane.f32.xlu1 %v511_v48  ;;  %v575_v48 = vadd.f32 %v574_v43, %v277_v42  ;;  %v602_v13 = vsel %vm465_vm0, %v292_v7, 0.0  ;;  %v298_v14 = vld [vmem:[%s5580_s18 + $0x258] sm:$0xff]  ;;  %v296_v15 = vld [vmem:[%s5580_s18 + $0x248] sm:$0xff]  ;;  %v297_v18 = vld [vmem:[%s5580_s18 + $0x250] sm:$0xff] }
  0x2d   : > { %508 = vadd.xlane.f32.xlu0 %v507_v49  ;;  %v571_v49 = vadd.f32 %v570_v45, %v275_v44  ;;  %v614_v19 = vsel %vm465_vm0, %v298_v14, 0.0  ;;  %v295_v20 = vld [vmem:[%s5580_s18 + $0x240] sm:$0xff]  ;;  %v610_v21 = vsel %vm465_vm0, %v296_v15, 0.0  ;;  %v302_v22 = vld [vmem:[%s5580_s18 + $0x278] sm:$0xff]  ;;  %v300_v23 = vld [vmem:[%s5580_s18 + $0x268] sm:$0xff] }
  0x2e   : > { %v301_v26 = vld [vmem:[%s5580_s18 + $0x270] sm:$0xff]  ;;  %v622_v27 = vsel %vm465_vm0, %v302_v22, 0.0  ;;  %v299_v28 = vld [vmem:[%s5580_s18 + $0x260] sm:$0xff]  ;;  %v618_v29 = vsel %vm465_vm0, %v300_v23, 0.0  ;;  %v306_v30 = vld [vmem:[%s5580_s18 + $0x298] sm:$0xff] }
  0x2f   : > { %v304_v31 = vld [vmem:[%s5580_s18 + $0x288] sm:$0xff]  ;;  %v305_v34 = vld [vmem:[%s5580_s18 + $0x290] sm:$0xff]  ;;  %v630_v35 = vsel %vm465_vm0, %v306_v30, 0.0  ;;  %v303_v36 = vld [vmem:[%s5580_s18 + $0x280] sm:$0xff] }
  0x30   : > { %520 = vadd.xlane.f32.xlu1 %v519_v56  ;;  %v583_v56 = vadd.f32 %v582_v51, %v281_v50  ;;  %v626_v37 = vsel %vm465_vm0, %v304_v31, 0.0  ;;  %v310_v38 = vld [vmem:[%s5580_s18 + $0x2b8] sm:$0xff]  ;;  %v308_v39 = vld [vmem:[%s5580_s18 + $0x2a8] sm:$0xff]  ;;  %v309_v42 = vld [vmem:[%s5580_s18 + $0x2b0] sm:$0xff] }
  0x31   : > { %516 = vadd.xlane.f32.xlu0 %v515_v57  ;;  %v579_v57 = vadd.f32 %v578_v53, %v279_v52  ;;  %v638_v43 = vsel %vm465_vm0, %v310_v38, 0.0  ;;  %v307_v44 = vld [vmem:[%s5580_s18 + $0x2a0] sm:$0xff]  ;;  %v634_v45 = vsel %vm465_vm0, %v308_v39, 0.0  ;;  %v314_v46 = vld [vmem:[%s5580_s18 + $0x2d8] sm:$0xff]  ;;  %v312_v47 = vld [vmem:[%s5580_s18 + $0x2c8] sm:$0xff] }
  0x32   : > { %v313_v50 = vld [vmem:[%s5580_s18 + $0x2d0] sm:$0xff]  ;;  %v646_v51 = vsel %vm465_vm0, %v314_v46, 0.0  ;;  %v311_v52 = vld [vmem:[%s5580_s18 + $0x2c0] sm:$0xff]  ;;  %v642_v53 = vsel %vm465_vm0, %v312_v47, 0.0  ;;  %v318_v54 = vld [vmem:[%s5580_s18 + $0x2f8] sm:$0xff] }
  0x33   : > { %v316_v55 = vld [vmem:[%s5580_s18 + $0x2e8] sm:$0xff]  ;;  %v322_v62 = vld [vmem:[%s5580_s18 + $0x318] sm:$0xff] }
  0x34   : > { %528 = vadd.xlane.f32.xlu1 %v527_v0  ;;  %v591_v0 = vadd.f32 %v590_v59, %v285_v58  ;;  %v317_v58 = vld [vmem:[%s5580_s18 + $0x2f0] sm:$0xff]  ;;  %v654_v59 = vsel %vm465_vm0, %v318_v54, 0.0  ;;  %v320_v63 = vld [vmem:[%s5580_s18 + $0x308] sm:$0xff]  ;;  %v326_v6 = vld [vmem:[%s5580_s18 + $0x338] sm:$0xff] }
  0x35   : > { %524 = vadd.xlane.f32.xlu0 %v523_v1  ;;  %v587_v1 = vadd.f32 %v586_v61, %v283_v60  ;;  %v315_v60 = vld [vmem:[%s5580_s18 + $0x2e0] sm:$0xff]  ;;  %v650_v61 = vsel %vm465_vm0, %v316_v55, 0.0  ;;  %v324_v7 = vld [vmem:[%s5580_s18 + $0x328] sm:$0xff]  ;;  %v330_v14 = vld [vmem:[%s5580_s18 + $0x358] sm:$0xff] }
  0x36   : > { %v328_v15 = vld [vmem:[%s5580_s18 + $0x348] sm:$0xff]  ;;  %v334_v22 = vld [vmem:[%s5580_s18 + $0x378] sm:$0xff] }
  0x37   : > { %v332_v23 = vld [vmem:[%s5580_s18 + $0x368] sm:$0xff]  ;;  %v338_v30 = vld [vmem:[%s5580_s18 + $0x398] sm:$0xff] }
  0x38   : > { %536 = vadd.xlane.f32.xlu1 %v535_v8  ;;  %v599_v8 = vadd.f32 %v598_v3, %v289_v2  ;;  %v321_v2 = vld [vmem:[%s5580_s18 + $0x310] sm:$0xff]  ;;  %v662_v3 = vsel %vm465_vm0, %v322_v62, 0.0  ;;  %v336_v31 = vld [vmem:[%s5580_s18 + $0x388] sm:$0xff]  ;;  %v342_v38 = vld [vmem:[%s5580_s18 + $0x3b8] sm:$0xff] }
  0x39   : > { %532 = vadd.xlane.f32.xlu0 %v531_v9  ;;  %v595_v9 = vadd.f32 %v594_v5, %v287_v4  ;;  %v319_v4 = vld [vmem:[%s5580_s18 + $0x300] sm:$0xff]  ;;  %v658_v5 = vsel %vm465_vm0, %v320_v63, 0.0  ;;  %v340_v39 = vld [vmem:[%s5580_s18 + $0x3a8] sm:$0xff]  ;;  %v346_v46 = vld [vmem:[%s5580_s18 + $0x3d8] sm:$0xff] }
  0x3a   : > { %v344_v47 = vld [vmem:[%s5580_s18 + $0x3c8] sm:$0xff]  ;;  %v350_v54 = vld [vmem:[%s5580_s18 + $0x3f8] sm:$0xff] }
  0x3b   : > { %v348_v55 = vld [vmem:[%s5580_s18 + $0x3e8] sm:$0xff]  ;;  %v354_v62 = vld [vmem:[%s5580_s18 + $0x418] sm:$0xff] }
  0x3c   : > { %544 = vadd.xlane.f32.xlu1 %v543_v16  ;;  %v607_v16 = vadd.f32 %v606_v11, %v293_v10  ;;  %v325_v10 = vld [vmem:[%s5580_s18 + $0x330] sm:$0xff]  ;;  %v670_v11 = vsel %vm465_vm0, %v326_v6, 0.0  ;;  %v352_v63 = vld [vmem:[%s5580_s18 + $0x408] sm:$0xff]  ;;  %v358_v6 = vld [vmem:[%s5580_s18 + $0x438] sm:$0xff] }
  0x3d   : > { %540 = vadd.xlane.f32.xlu0 %v539_v17  ;;  %v603_v17 = vadd.f32 %v602_v13, %v291_v12  ;;  %v323_v12 = vld [vmem:[%s5580_s18 + $0x320] sm:$0xff]  ;;  %v666_v13 = vsel %vm465_vm0, %v324_v7, 0.0  ;;  %v356_v7 = vld [vmem:[%s5580_s18 + $0x428] sm:$0xff] }
  0x40   : > { %552 = vadd.xlane.f32.xlu1 %v551_v24  ;;  %v615_v24 = vadd.f32 %v614_v19, %v297_v18  ;;  %v329_v18 = vld [vmem:[%s5580_s18 + $0x350] sm:$0xff]  ;;  %v678_v19 = vsel %vm465_vm0, %v330_v14, 0.0  ;;  %v362_v14 = vld [vmem:[%s5580_s18 + $0x458] sm:$0xff] }
  0x41   : > { %548 = vadd.xlane.f32.xlu0 %v547_v25  ;;  %v611_v25 = vadd.f32 %v610_v21, %v295_v20  ;;  %v327_v20 = vld [vmem:[%s5580_s18 + $0x340] sm:$0xff]  ;;  %v674_v21 = vsel %vm465_vm0, %v328_v15, 0.0  ;;  %v360_v15 = vld [vmem:[%s5580_s18 + $0x448] sm:$0xff] }
  0x44   : > { %560 = vadd.xlane.f32.xlu1 %v559_v32  ;;  %v623_v32 = vadd.f32 %v622_v27, %v301_v26  ;;  %v333_v26 = vld [vmem:[%s5580_s18 + $0x370] sm:$0xff]  ;;  %v686_v27 = vsel %vm465_vm0, %v334_v22, 0.0  ;;  %v366_v22 = vld [vmem:[%s5580_s18 + $0x478] sm:$0xff] }
  0x45   : > { %556 = vadd.xlane.f32.xlu0 %v555_v33  ;;  %v619_v33 = vadd.f32 %v618_v29, %v299_v28  ;;  %v331_v28 = vld [vmem:[%s5580_s18 + $0x360] sm:$0xff]  ;;  %v682_v29 = vsel %vm465_vm0, %v332_v23, 0.0  ;;  %v364_v23 = vld [vmem:[%s5580_s18 + $0x468] sm:$0xff] }
  0x48   : > { %568 = vadd.xlane.f32.xlu1 %v567_v40  ;;  %v631_v40 = vadd.f32 %v630_v35, %v305_v34  ;;  %v337_v34 = vld [vmem:[%s5580_s18 + $0x390] sm:$0xff]  ;;  %v694_v35 = vsel %vm465_vm0, %v338_v30, 0.0  ;;  %v370_v30 = vld [vmem:[%s5580_s18 + $0x498] sm:$0xff] }
  0x49   : > { %564 = vadd.xlane.f32.xlu0 %v563_v41  ;;  %v627_v41 = vadd.f32 %v626_v37, %v303_v36  ;;  %v335_v36 = vld [vmem:[%s5580_s18 + $0x380] sm:$0xff]  ;;  %v690_v37 = vsel %vm465_vm0, %v336_v31, 0.0  ;;  %v368_v31 = vld [vmem:[%s5580_s18 + $0x488] sm:$0xff] }
  0x4c   : > { %576 = vadd.xlane.f32.xlu1 %v575_v48  ;;  %v639_v48 = vadd.f32 %v638_v43, %v309_v42  ;;  %v341_v42 = vld [vmem:[%s5580_s18 + $0x3b0] sm:$0xff]  ;;  %v702_v43 = vsel %vm465_vm0, %v342_v38, 0.0  ;;  %v374_v38 = vld [vmem:[%s5580_s18 + $0x4b8] sm:$0xff] }
  0x4d   : > { %572 = vadd.xlane.f32.xlu0 %v571_v49  ;;  %v635_v49 = vadd.f32 %v634_v45, %v307_v44  ;;  %v339_v44 = vld [vmem:[%s5580_s18 + $0x3a0] sm:$0xff]  ;;  %v698_v45 = vsel %vm465_vm0, %v340_v39, 0.0  ;;  %v372_v39 = vld [vmem:[%s5580_s18 + $0x4a8] sm:$0xff] }
  0x50   : > { %584 = vadd.xlane.f32.xlu1 %v583_v56  ;;  %v647_v56 = vadd.f32 %v646_v51, %v313_v50  ;;  %v345_v50 = vld [vmem:[%s5580_s18 + $0x3d0] sm:$0xff]  ;;  %v710_v51 = vsel %vm465_vm0, %v346_v46, 0.0  ;;  %v371_v46 = vld [vmem:[%s5580_s18 + $0x4a0] sm:$0xff] }
  0x51   : > { %580 = vadd.xlane.f32.xlu0 %v579_v57  ;;  %v643_v57 = vadd.f32 %v642_v53, %v311_v52  ;;  %v343_v52 = vld [vmem:[%s5580_s18 + $0x3c0] sm:$0xff]  ;;  %v706_v53 = vsel %vm465_vm0, %v344_v47, 0.0  ;;  %v762_v47 = vsel %vm465_vm0, %v372_v39, 0.0  ;;  %v397_v39 = vld [vmem:[%s5580_s18 + $0x570] sm:$0xff] }
  0x54   : > { %592 = vadd.xlane.f32.xlu1 %v591_v0  ;;  %v655_v0 = vadd.f32 %v654_v59, %v317_v58  ;;  %v349_v58 = vld [vmem:[%s5580_s18 + $0x3f0] sm:$0xff]  ;;  %v718_v59 = vsel %vm465_vm0, %v350_v54, 0.0 }
  0x55   : > { %588 = vadd.xlane.f32.xlu0 %v587_v1  ;;  %v651_v1 = vadd.f32 %v650_v61, %v315_v60  ;;  %v347_v60 = vld [vmem:[%s5580_s18 + $0x3e0] sm:$0xff]  ;;  %v714_v61 = vsel %vm465_vm0, %v348_v55, 0.0 }
  0x58   : > { %600 = vadd.xlane.f32.xlu1 %v599_v8  ;;  %v663_v8 = vadd.f32 %v662_v3, %v321_v2  ;;  %v353_v2 = vld [vmem:[%s5580_s18 + $0x410] sm:$0xff]  ;;  %v726_v3 = vsel %vm465_vm0, %v354_v62, 0.0 }
  0x59   : > { %596 = vadd.xlane.f32.xlu0 %v595_v9  ;;  %v659_v9 = vadd.f32 %v658_v5, %v319_v4  ;;  %v351_v4 = vld [vmem:[%s5580_s18 + $0x400] sm:$0xff]  ;;  %v722_v5 = vsel %vm465_vm0, %v352_v63, 0.0  ;;  %v381_v63 = vld [vmem:[%s5580_s18 + $0x4f0] sm:$0xff] }
  0x5c   : > { %608 = vadd.xlane.f32.xlu1 %v607_v16  ;;  %v671_v16 = vadd.f32 %v670_v11, %v325_v10  ;;  %v357_v10 = vld [vmem:[%s5580_s18 + $0x430] sm:$0xff]  ;;  %v734_v11 = vsel %vm465_vm0, %v358_v6, 0.0 }
  0x5d   : > { %604 = vadd.xlane.f32.xlu0 %v603_v17  ;;  %v667_v17 = vadd.f32 %v666_v13, %v323_v12  ;;  %v355_v12 = vld [vmem:[%s5580_s18 + $0x420] sm:$0xff]  ;;  %v730_v13 = vsel %vm465_vm0, %v356_v7, 0.0 }
  0x60   : > { %616 = vadd.xlane.f32.xlu1 %v615_v24  ;;  %v679_v24 = vadd.f32 %v678_v19, %v329_v18  ;;  %v361_v18 = vld [vmem:[%s5580_s18 + $0x450] sm:$0xff]  ;;  %v742_v19 = vsel %vm465_vm0, %v362_v14, 0.0  ;;  %v390_v14 = vld [vmem:[%s5580_s18 + $0x538] sm:$0xff] }
  0x61   : > { %612 = vadd.xlane.f32.xlu0 %v611_v25  ;;  %v675_v25 = vadd.f32 %v674_v21, %v327_v20  ;;  %v359_v20 = vld [vmem:[%s5580_s18 + $0x440] sm:$0xff]  ;;  %v738_v21 = vsel %vm465_vm0, %v360_v15, 0.0  ;;  %v388_v15 = vld [vmem:[%s5580_s18 + $0x528] sm:$0xff] }
  0x64   : > { %624 = vadd.xlane.f32.xlu1 %v623_v32  ;;  %v687_v32 = vadd.f32 %v686_v27, %v333_v26  ;;  %v365_v26 = vld [vmem:[%s5580_s18 + $0x470] sm:$0xff]  ;;  %v750_v27 = vsel %vm465_vm0, %v366_v22, 0.0  ;;  %v387_v22 = vld [vmem:[%s5580_s18 + $0x520] sm:$0xff] }
  0x65   : > { %620 = vadd.xlane.f32.xlu0 %v619_v33  ;;  %v683_v33 = vadd.f32 %v682_v29, %v331_v28  ;;  %v363_v28 = vld [vmem:[%s5580_s18 + $0x460] sm:$0xff]  ;;  %v746_v29 = vsel %vm465_vm0, %v364_v23, 0.0  ;;  %v794_v23 = vsel %vm465_vm0, %v388_v15, 0.0 }
  0x68   : > { %632 = vadd.xlane.f32.xlu1 %v631_v40  ;;  %v695_v40 = vadd.f32 %v694_v35, %v337_v34  ;;  %v369_v34 = vld [vmem:[%s5580_s18 + $0x490] sm:$0xff]  ;;  %v758_v35 = vsel %vm465_vm0, %v370_v30, 0.0 }
  0x69   : > { %628 = vadd.xlane.f32.xlu0 %v627_v41  ;;  %v691_v41 = vadd.f32 %v690_v37, %v335_v36  ;;  %v367_v36 = vld [vmem:[%s5580_s18 + $0x480] sm:$0xff]  ;;  %v754_v37 = vsel %vm465_vm0, %v368_v31, 0.0 }
  0x6c   : > { %640 = vadd.xlane.f32.xlu1 %v639_v48  ;;  %v703_v48 = vadd.f32 %v702_v43, %v341_v42  ;;  %v755_v42 = vadd.f32 %v754_v37, %v367_v36  ;;  %v373_v43 = vld [vmem:[%s5580_s18 + $0x4b0] sm:$0xff] }
  0x6d   : > { %636 = vadd.xlane.f32.xlu0 %v635_v49  ;;  %v699_v49 = vadd.f32 %v698_v45, %v339_v44  ;;  %v766_v44 = vsel %vm465_vm0, %v374_v38, 0.0 }
  0x70   : > { %648 = vadd.xlane.f32.xlu1 %v647_v56  ;;  %v711_v56 = vadd.f32 %v710_v51, %v345_v50  ;;  %v767_v50 = vadd.f32 %v766_v44, %v373_v43  ;;  %v395_v43 = vld [vmem:[%s5580_s18 + $0x560] sm:$0xff] }
  0x71   : > { %644 = vadd.xlane.f32.xlu0 %v643_v57  ;;  %v707_v57 = vadd.f32 %v706_v53, %v343_v52  ;;  %v763_v52 = vadd.f32 %v762_v47, %v371_v46  ;;  %v377_v53 = vld [vmem:[%s5580_s18 + $0x4d0] sm:$0xff]  ;;  %v402_v46 = vld [vmem:[%s5580_s18 + $0x598] sm:$0xff]  ;;  %v400_v47 = vld [vmem:[%s5580_s18 + $0x588] sm:$0xff] }
  0x74   : > { %656 = vadd.xlane.f32.xlu1 %v655_v0  ;;  %v719_v0 = vadd.f32 %v718_v59, %v349_v58  ;;  %v382_v58 = vld [vmem:[%s5580_s18 + $0x4f8] sm:$0xff]  ;;  %v380_v59 = vld [vmem:[%s5580_s18 + $0x4e8] sm:$0xff] }
  0x75   : > { %652 = vadd.xlane.f32.xlu0 %v651_v1  ;;  %v715_v1 = vadd.f32 %v714_v61, %v347_v60 }
  0x78   : > { %664 = vadd.xlane.f32.xlu1 %v663_v8  ;;  %v727_v8 = vadd.f32 %v726_v3, %v353_v2  ;;  %v379_v2 = vld [vmem:[%s5580_s18 + $0x4e0] sm:$0xff]  ;;  %v778_v3 = vsel %vm465_vm0, %v380_v59, 0.0  ;;  %v404_v59 = vld [vmem:[%s5580_s18 + $0x5a8] sm:$0xff] }
  0x79   : > { %660 = vadd.xlane.f32.xlu0 %v659_v9  ;;  %v723_v9 = vadd.f32 %v722_v5, %v351_v4  ;;  %v386_v4 = vld [vmem:[%s5580_s18 + $0x518] sm:$0xff]  ;;  %v384_v5 = vld [vmem:[%s5580_s18 + $0x508] sm:$0xff] }
  0x7c   : > { %672 = vadd.xlane.f32.xlu1 %v671_v16  ;;  %v735_v16 = vadd.f32 %v734_v11, %v357_v10  ;;  %v790_v10 = vsel %vm465_vm0, %v386_v4, 0.0  ;;  %v403_v4 = vld [vmem:[%s5580_s18 + $0x5a0] sm:$0xff] }
  0x7d   : > { %668 = vadd.xlane.f32.xlu0 %v667_v17  ;;  %v731_v17 = vadd.f32 %v730_v13, %v355_v12  ;;  %v383_v12 = vld [vmem:[%s5580_s18 + $0x500] sm:$0xff]  ;;  %v786_v13 = vsel %vm465_vm0, %v384_v5, 0.0  ;;  %v826_v5 = vsel %vm465_vm0, %v404_v59, 0.0 }
  0x80   : > { %680 = vadd.xlane.f32.xlu1 %v679_v24  ;;  %v743_v24 = vadd.f32 %v742_v19, %v361_v18  ;;  %v787_v18 = vadd.f32 %v786_v13, %v383_v12  ;;  %v389_v19 = vld [vmem:[%s5580_s18 + $0x530] sm:$0xff]  ;;  %v827_v12 = vadd.f32 %v826_v5, %v403_v4 }
  0x81   : > { %676 = vadd.xlane.f32.xlu0 %v675_v25  ;;  %v739_v25 = vadd.f32 %v738_v21, %v359_v20  ;;  %v798_v20 = vsel %vm465_vm0, %v390_v14, 0.0  ;;  %v409_v13 = vld [vmem:[%s5580_s18 + $0x5d0] sm:$0xff] }
  0x82   : > { %v425_v5 = vld [vmem:[%s5580_s18 + $0x650] sm:$0xff] }
  0x84   : > { %688 = vadd.xlane.f32.xlu1 %v687_v32  ;;  %v751_v32 = vadd.f32 %v750_v27, %v365_v26  ;;  %v799_v26 = vadd.f32 %v798_v20, %v389_v19  ;;  %v414_v19 = vld [vmem:[%s5580_s18 + $0x5f8] sm:$0xff]  ;;  %v412_v20 = vld [vmem:[%s5580_s18 + $0x5e8] sm:$0xff] }
  0x85   : > { %684 = vadd.xlane.f32.xlu0 %v683_v33  ;;  %v747_v33 = vadd.f32 %v746_v29, %v363_v28  ;;  %v795_v28 = vadd.f32 %v794_v23, %v387_v22  ;;  %v393_v29 = vld [vmem:[%s5580_s18 + $0x550] sm:$0xff] }
  0x88   : > { %696 = vadd.xlane.f32.xlu1 %v695_v40  ;;  %v759_v40 = vadd.f32 %v758_v35, %v369_v34  ;;  %v398_v34 = vld [vmem:[%s5580_s18 + $0x578] sm:$0xff]  ;;  %v396_v35 = vld [vmem:[%s5580_s18 + $0x568] sm:$0xff] }
  0x89   : > { %692 = vadd.xlane.f32.xlu0 %v691_v41  ;;  %v810_v44 = vsel %vm465_vm0, %v396_v35, 0.0 }
  0x8c   : > { %704 = vadd.xlane.f32.xlu1 %v703_v48  ;;  %v378_v48 = vld [vmem:[%s5580_s18 + $0x4d8] sm:$0xff] }
  0x8d   : > { %700 = vadd.xlane.f32.xlu0 %v699_v49  ;;  %v376_v49 = vld [vmem:[%s5580_s18 + $0x4c8] sm:$0xff]  ;;  %v774_v54 = vsel %vm465_vm0, %v378_v48, 0.0 }
  0x8e   : > { %v775_v60 = vadd.f32 %v774_v54, %v377_v53  ;;  %v822_v53 = vsel %vm465_vm0, %v402_v46, 0.0  ;;  %v422_v46 = vld [vmem:[%s5580_s18 + $0x638] sm:$0xff] }
  0x90   : > { %712 = vadd.xlane.f32.xlu1 %v711_v56  ;;  %v375_v56 = vld [vmem:[%s5580_s18 + $0x4c0] sm:$0xff] }
  0x91   : > { %708 = vadd.xlane.f32.xlu0 %v707_v57  ;;  %v770_v57 = vsel %vm465_vm0, %v376_v49, 0.0 }
  0x92   : > { %v771_v62 = vadd.f32 %v770_v57, %v375_v56  ;;  %v399_v56 = vld [vmem:[%s5580_s18 + $0x580] sm:$0xff]  ;;  %v818_v57 = vsel %vm465_vm0, %v400_v47, 0.0  ;;  %v420_v47 = vld [vmem:[%s5580_s18 + $0x628] sm:$0xff] }
  0x93   : > { %v858_v59 = vsel %vm465_vm0, %v420_v47, 0.0  ;;  %v436_v47 = vld [vmem:[%s5580_s18 + $0x6a8] sm:$0xff] }
  0x94   : > { %720 = vadd.xlane.f32.xlu1 %v719_v0  ;;  %v782_v0 = vsel %vm465_vm0, %v382_v58, 0.0  ;;  %v406_v58 = vld [vmem:[%s5580_s18 + $0x5b8] sm:$0xff] }
  0x95   : > { %716 = vadd.xlane.f32.xlu0 %v715_v1  ;;  %v783_v6 = vadd.f32 %v782_v0, %v381_v63  ;;  %v819_v63 = vadd.f32 %v818_v57, %v399_v56  ;;  %v405_v0 = vld [vmem:[%s5580_s18 + $0x5b0] sm:$0xff]  ;;  %v862_v56 = vsel %vm465_vm0, %v422_v46, 0.0  ;;  %v438_v46 = vld [vmem:[%s5580_s18 + $0x6b8] sm:$0xff] }
  0x98   : > { %728 = vadd.xlane.f32.xlu1 %v727_v8  ;;  %v779_v8 = vadd.f32 %v778_v3, %v379_v2  ;;  %v830_v2 = vsel %vm465_vm0, %v406_v58, 0.0  ;;  %v419_v58 = vld [vmem:[%s5580_s18 + $0x620] sm:$0xff] }
  0x99   : > { %724 = vadd.xlane.f32.xlu0 %v723_v9  ;;  %v385_v9 = vld [vmem:[%s5580_s18 + $0x510] sm:$0xff]  ;;  %v859_v4 = vadd.f32 %v858_v59, %v419_v58  ;;  %v894_v58 = vsel %vm465_vm0, %v438_v46, 0.0 }
  0x9c   : > { %736 = vadd.xlane.f32.xlu1 %v735_v16  ;;  %v791_v16 = vadd.f32 %v790_v10, %v385_v9  ;;  %v831_v9 = vadd.f32 %v830_v2, %v405_v0 }
  0x9d   : > { %732 = vadd.xlane.f32.xlu0 %v731_v17 }
  0xa0   : > { %744 = vadd.xlane.f32.xlu1 %v743_v24  ;;  %v394_v24 = vld [vmem:[%s5580_s18 + $0x558] sm:$0xff] }
  0xa1   : > { %740 = vadd.xlane.f32.xlu0 %v739_v25  ;;  %v392_v25 = vld [vmem:[%s5580_s18 + $0x548] sm:$0xff]  ;;  %v806_v30 = vsel %vm465_vm0, %v394_v24, 0.0 }
  0xa2   : > { %v807_v36 = vadd.f32 %v806_v30, %v393_v29  ;;  %v411_v29 = vld [vmem:[%s5580_s18 + $0x5e0] sm:$0xff]  ;;  %v842_v30 = vsel %vm465_vm0, %v412_v20, 0.0  ;;  %v429_v20 = vld [vmem:[%s5580_s18 + $0x670] sm:$0xff] }
  0xa4   : > { %752 = vadd.xlane.f32.xlu1 %v751_v32  ;;  %v391_v32 = vld [vmem:[%s5580_s18 + $0x540] sm:$0xff] }
  0xa5   : > { %748 = vadd.xlane.f32.xlu0 %v747_v33  ;;  %v5806_v41 = vpop.xlane.xlu1 %476  ;;  %v802_v33 = vsel %vm465_vm0, %v392_v25, 0.0  ;;  %v413_v25 = vld [vmem:[%s5580_s18 + $0x5f0] sm:$0xff] }
  0xa6   : > { %v5810_v45 = vpop.xlane.xlu0 %468  ;;  %v803_v38 = vadd.f32 %v802_v33, %v391_v32  ;;  %v418_v32 = vld [vmem:[%s5580_s18 + $0x618] sm:$0xff]  ;;  %v416_v33 = vld [vmem:[%s5580_s18 + $0x608] sm:$0xff] }
  0xa8   : > { %760 = vadd.xlane.f32.xlu1 %v759_v40  ;;  %v814_v40 = vsel %vm465_vm0, %v398_v34, 0.0 }
  0xa9   : > { %756 = vadd.xlane.f32.xlu0 %v755_v42  ;;  %v5816_v51 = vpop.xlane.xlu1 %480  ;;  %v815_v48 = vadd.f32 %v814_v40, %v397_v39  ;;  %v854_v39 = vsel %vm465_vm0, %v418_v32, 0.0 }
  0xaa   : > { %v5820_v55 = vpop.xlane.xlu0 %472 }
  0xac   : > { %768 = vadd.xlane.f32.xlu1 %v767_v50  ;;  %v811_v50 = vadd.f32 %v810_v44, %v395_v43  ;;  %v415_v43 = vld [vmem:[%s5580_s18 + $0x600] sm:$0xff]  ;;  %v850_v44 = vsel %vm465_vm0, %v416_v33, 0.0 }
  0xad   : > { %764 = vadd.xlane.f32.xlu0 %v763_v52  ;;  %v5826_v61 = vpop.xlane.xlu1 %488  ;;  %v401_v52 = vld [vmem:[%s5580_s18 + $0x590] sm:$0xff] }
  0xae   : > { %v5830_v1 = vpop.xlane.xlu0 %484 }
  0xb0   : > { %776 = vadd.xlane.f32.xlu1 %v775_v60  ;;  %v823_v60 = vadd.f32 %v822_v53, %v401_v52  ;;  %v851_v52 = vadd.f32 %v850_v44, %v415_v43  ;;  %v421_v53 = vld [vmem:[%s5580_s18 + $0x630] sm:$0xff]  ;;  %v431_v43 = vld [vmem:[%s5580_s18 + $0x680] sm:$0xff] }
  0xb1   : > { %772 = vadd.xlane.f32.xlu0 %v771_v62  ;;  %v5836_v7 = vpop.xlane.xlu1 %496  ;;  %v863_v0 = vadd.f32 %v862_v56, %v421_v53  ;;  %v437_v56 = vld [vmem:[%s5580_s18 + $0x6b0] sm:$0xff] }
  0xb2   : > { %v5840_v11 = vpop.xlane.xlu0 %492 }
  0xb4   : > { %784 = vadd.xlane.f32.xlu1 %v783_v6  ;;  %v410_v6 = vld [vmem:[%s5580_s18 + $0x5d8] sm:$0xff] }
  0xb5   : > { %780 = vadd.xlane.f32.xlu0 %v779_v8  ;;  %v5846_v17 = vpop.xlane.xlu1 %504  ;;  %v408_v8 = vld [vmem:[%s5580_s18 + $0x5c8] sm:$0xff]  ;;  %v838_v14 = vsel %vm465_vm0, %v410_v6, 0.0 }
  0xb6   : > { %v5850_v21 = vpop.xlane.xlu0 %500  ;;  %v839_v22 = vadd.f32 %v838_v14, %v409_v13  ;;  %v430_v13 = vld [vmem:[%s5580_s18 + $0x678] sm:$0xff]  ;;  %v428_v14 = vld [vmem:[%s5580_s18 + $0x668] sm:$0xff] }
  0xb8   : > { %792 = vadd.xlane.f32.xlu1 %v791_v16  ;;  %v407_v16 = vld [vmem:[%s5580_s18 + $0x5c0] sm:$0xff] }
  0xb9   : > { %788 = vadd.xlane.f32.xlu0 %v787_v18  ;;  %v5856_v27 = vpop.xlane.xlu1 %512  ;;  %v834_v18 = vsel %vm465_vm0, %v408_v8, 0.0 }
  0xba   : > { %v5860_v31 = vpop.xlane.xlu0 %508  ;;  %v835_v24 = vadd.f32 %v834_v18, %v407_v16 }
  0xbc   : > { %800 = vadd.xlane.f32.xlu1 %v799_v26  ;;  %v846_v26 = vsel %vm465_vm0, %v414_v19, 0.0 }
  0xbd   : > { %796 = vadd.xlane.f32.xlu0 %v795_v28  ;;  %v5866_v37 = vpop.xlane.xlu1 %520  ;;  %v847_v34 = vadd.f32 %v846_v26, %v413_v25  ;;  %v427_v25 = vld [vmem:[%s5580_s18 + $0x660] sm:$0xff]  ;;  %v874_v26 = vsel %vm465_vm0, %v428_v14, 0.0 }
  0xbe   : > { %v5870_v42 = vpop.xlane.xlu0 %516 }
  0xc0   : > { %808 = vadd.xlane.f32.xlu1 %v807_v36  ;;  %v843_v36 = vadd.f32 %v842_v30, %v411_v29  ;;  %v434_v29 = vld [vmem:[%s5580_s18 + $0x698] sm:$0xff]  ;;  %v432_v30 = vld [vmem:[%s5580_s18 + $0x688] sm:$0xff] }
  0xc1   : > { %804 = vadd.xlane.f32.xlu0 %v803_v38  ;;  %v5876_v49 = vpop.xlane.xlu1 %528  ;;  %v417_v38 = vld [vmem:[%s5580_s18 + $0x610] sm:$0xff]  ;;  %v882_v44 = vsel %vm465_vm0, %v432_v30, 0.0 }
  0xc2   : > { %v5880_v54 = vpop.xlane.xlu0 %524  ;;  %v883_v53 = vadd.f32 %v882_v44, %v431_v43  ;;  %v445_v30 = vld [vmem:[%s5580_s18 + $0x6f0] sm:$0xff]  ;;  %v450_v43 = vld [vmem:[%s5580_s18 + $0x718] sm:$0xff]  ;;  %v448_v44 = vld [vmem:[%s5580_s18 + $0x708] sm:$0xff] }
  0xc4   : > { %816 = vadd.xlane.f32.xlu1 %v815_v48  ;;  %v855_v48 = vadd.f32 %v854_v39, %v417_v38  ;;  %v886_v38 = vsel %vm465_vm0, %v434_v29, 0.0 }
  0xc5   : > { %812 = vadd.xlane.f32.xlu0 %v811_v50  ;;  %v5886_v62 = vpop.xlane.xlu1 %536 }
  0xc6   : > { %v5890_v3 = vpop.xlane.xlu0 %532 }
  0xc8   : > { %824 = vadd.xlane.f32.xlu1 %v823_v60  ;;  %v426_v60 = vld [vmem:[%s5580_s18 + $0x658] sm:$0xff] }
  0xc9   : > { %820 = vadd.xlane.f32.xlu0 %v819_v63  ;;  %v5896_v10 = vpop.xlane.xlu1 %544  ;;  %v424_v63 = vld [vmem:[%s5580_s18 + $0x648] sm:$0xff]  ;;  %v870_v6 = vsel %vm465_vm0, %v426_v60, 0.0  ;;  %v435_v60 = vld [vmem:[%s5580_s18 + $0x6a0] sm:$0xff] }
  0xca   : > { %v5900_v15 = vpop.xlane.xlu0 %540  ;;  %v871_v16 = vadd.f32 %v870_v6, %v425_v5  ;;  %v895_v5 = vadd.f32 %v894_v58, %v437_v56  ;;  %v918_v56 = vsel %vm465_vm0, %v450_v43, 0.0 }
  0xcc   : > { %832 = vadd.xlane.f32.xlu1 %v831_v9  ;;  %v423_v9 = vld [vmem:[%s5580_s18 + $0x640] sm:$0xff] }
  0xcd   : > { %828 = vadd.xlane.f32.xlu0 %v827_v12  ;;  %v5906_v23 = vpop.xlane.xlu1 %552  ;;  %v866_v12 = vsel %vm465_vm0, %v424_v63, 0.0  ;;  %v890_v63 = vsel %vm465_vm0, %v436_v47, 0.0 }
  0xce   : > { %v5910_v28 = vpop.xlane.xlu0 %548  ;;  %v867_v19 = vadd.f32 %v866_v12, %v423_v9  ;;  %v891_v9 = vadd.f32 %v890_v63, %v435_v60  ;;  %v441_v12 = vld [vmem:[%s5580_s18 + $0x6d0] sm:$0xff]  ;;  %v447_v60 = vld [vmem:[%s5580_s18 + $0x700] sm:$0xff]  ;;  %v914_v63 = vsel %vm465_vm0, %v448_v44, 0.0 }
  0xcf   : > { %v457_v44 = vld [vmem:[%s5580_s18 + $0x750] sm:$0xff] }
  0xd0   : > { %840 = vadd.xlane.f32.xlu1 %v839_v22  ;;  %v878_v22 = vsel %vm465_vm0, %v430_v13, 0.0 }
  0xd1   : > { %836 = vadd.xlane.f32.xlu0 %v835_v24  ;;  %v5916_v35 = vpop.xlane.xlu1 %560  ;;  %v879_v32 = vadd.f32 %v878_v22, %v429_v20  ;;  %v446_v20 = vld [vmem:[%s5580_s18 + $0x6f8] sm:$0xff]  ;;  %v444_v22 = vld [vmem:[%s5580_s18 + $0x6e8] sm:$0xff] }
  0xd2   : > { %v5920_v40 = vpop.xlane.xlu0 %556 }
  0xd4   : > { %848 = vadd.xlane.f32.xlu1 %v847_v34  ;;  %v875_v34 = vadd.f32 %v874_v26, %v427_v25 }
  0xd5   : > { %844 = vadd.xlane.f32.xlu0 %v843_v36  ;;  %v5926_v50 = vpop.xlane.xlu1 %568  ;;  %v433_v36 = vld [vmem:[%s5580_s18 + $0x690] sm:$0xff] }
  0xd6   : > { %v5930_v57 = vpop.xlane.xlu0 %564 }
  0xd8   : > { %856 = vadd.xlane.f32.xlu1 %v855_v48  ;;  %v887_v48 = vadd.f32 %v886_v38, %v433_v36  ;;  %v443_v36 = vld [vmem:[%s5580_s18 + $0x6e0] sm:$0xff]  ;;  %v906_v38 = vsel %vm465_vm0, %v444_v22, 0.0 }
  0xd9   : > { %852 = vadd.xlane.f32.xlu0 %v851_v52  ;;  %v5936_v2 = vpop.xlane.xlu1 %576 }
  0xda   : > { %v5940_v8 = vpop.xlane.xlu0 %572 }
  0xdc   : > { %864 = vadd.xlane.f32.xlu1 %v863_v0  ;;  %v442_v0 = vld [vmem:[%s5580_s18 + $0x6d8] sm:$0xff] }
  0xdd   : > { %860 = vadd.xlane.f32.xlu0 %v859_v4  ;;  %v5946_v18 = vpop.xlane.xlu1 %584  ;;  %v440_v4 = vld [vmem:[%s5580_s18 + $0x6c8] sm:$0xff]  ;;  %v902_v13 = vsel %vm465_vm0, %v442_v0, 0.0  ;;  %v454_v0 = vld [vmem:[%s5580_s18 + $0x738] sm:$0xff] }
  0xde   : > { %v5950_v24 = vpop.xlane.xlu0 %580  ;;  %v903_v25 = vadd.f32 %v902_v13, %v441_v12  ;;  %v915_v12 = vadd.f32 %v914_v63, %v447_v60  ;;  %v453_v13 = vld [vmem:[%s5580_s18 + $0x730] sm:$0xff]  ;;  %v5293_v60 = vld [vmem:[%s5580_s18 + $0x8] sm:$0xff] }
  0xe0   : > { %872 = vadd.xlane.f32.xlu1 %v871_v16  ;;  %v439_v16 = vld [vmem:[%s5580_s18 + $0x6c0] sm:$0xff] }
  0xe1   : > { %868 = vadd.xlane.f32.xlu0 %v867_v19  ;;  %v5956_v33 = vpop.xlane.xlu1 %592  ;;  %v898_v19 = vsel %vm465_vm0, %v440_v4, 0.0  ;;  %v452_v4 = vld [vmem:[%s5580_s18 + $0x728] sm:$0xff] }
  0xe2   : > { %v5960_v39 = vpop.xlane.xlu0 %588  ;;  %v899_v29 = vadd.f32 %v898_v19, %v439_v16  ;;  %v926_v16 = vsel %vm465_vm0, %v454_v0, 0.0  ;;  %v922_v22 = vsel %vm465_vm0, %v452_v4, 0.0  ;;  %v460_v0 = vld [vmem:[%s5580_s18 + $0x768] sm:$0xff] }
  0xe4   : > { %880 = vadd.xlane.f32.xlu1 %v879_v32  ;;  %v910_v32 = vsel %vm465_vm0, %v446_v20, 0.0  ;;  %v451_v20 = vld [vmem:[%s5580_s18 + $0x720] sm:$0xff] }
  0xe5   : > { %876 = vadd.xlane.f32.xlu0 %v875_v34  ;;  %v5966_v52 = vpop.xlane.xlu1 %600  ;;  %v911_v46 = vadd.f32 %v910_v32, %v445_v30  ;;  %v456_v30 = vld [vmem:[%s5580_s18 + $0x748] sm:$0xff]  ;;  %v927_v32 = vadd.f32 %v926_v16, %v453_v13  ;;  %v923_v43 = vadd.f32 %v922_v22, %v451_v20  ;;  %v953_v13 = vmul.f32 0.0051020407, %v5816_v51  ;;  %v461_v22 = vld [vmem:[%s5580_s18 + $0x770] sm:$0xff] }
  0xe6   : > { %v5970_v59 = vpop.xlane.xlu0 %596 }
  0xe8   : > { %888 = vadd.xlane.f32.xlu1 %v887_v48  ;;  %v907_v48 = vadd.f32 %v906_v38, %v443_v36  ;;  %v952_v36 = vmul.f32 0.0051020407, %v5806_v41  ;;  %v951_v41 = vmul.f32 0.0051020407, %v5820_v55  ;;  %v5295_v55 = vld [vmem:[%s5580_s18] sm:$0xff] }
  0xe9   : > { %884 = vadd.xlane.f32.xlu0 %v883_v53  ;;  %v5976_v6 = vpop.xlane.xlu1 %608  ;;  %v449_v53 = vld [vmem:[%s5580_s18 + $0x710] sm:$0xff] }
  0xea   : > { %v5980_v14 = vpop.xlane.xlu0 %604 }
  0xec   : > { %896 = vadd.xlane.f32.xlu1 %v895_v5  ;;  %v919_v5 = vadd.f32 %v918_v56, %v449_v53  ;;  %v455_v53 = vld [vmem:[%s5580_s18 + $0x740] sm:$0xff]  ;;  %v462_v56 = vld [vmem:[%s5580_s18 + $0x778] sm:$0xff] }
  0xed   : > { %892 = vadd.xlane.f32.xlu0 %v891_v9  ;;  %v5986_v26 = vpop.xlane.xlu1 %616 }
  0xee   : > { %v5990_v34 = vpop.xlane.xlu0 %612 }
  0xf0   : > { %904 = vadd.xlane.f32.xlu1 %v903_v25  ;;  %v458_v25 = vld [vmem:[%s5580_s18 + $0x758] sm:$0xff] }
  0xf1   : > { %900 = vadd.xlane.f32.xlu0 %v899_v29  ;;  %v5996_v47 = vpop.xlane.xlu1 %624  ;;  %v950_v29 = vmul.f32 0.0051020407, %v5810_v45  ;;  %v930_v45 = vsel %vm465_vm0, %v456_v30, 0.0 }
  0xf2   : > { %v6000_v58 = vpop.xlane.xlu0 %620  ;;  %v931_v20 = vadd.f32 %v930_v45, %v455_v53  ;;  %v954_v53 = vmul.f32 0.0051020407, %v5830_v1  ;;  %v464_v45 = vld [vmem:[%s5580_s18 + $0x788] sm:$0xff] }
  0xf3   : > { %v6028_v63 = vsub.f32 %v5293_v60, %v950_v29  ;;  %v6041_v30 = vsub.f32 %v5295_v55, %v950_v29  ;;  %v5298_v55 = vld [vmem:[%s5580_s18 + $0x38] sm:$0xff] }
  0xf4   : > { %912 = vadd.xlane.f32.xlu1 %v911_v46  ;;  %v934_v46 = vsel %vm465_vm0, %v458_v25, 0.0  ;;  %v942_v25 = vsel %vm465_vm0, %v462_v56, 0.0  ;;  %v5297_v56 = vld [vmem:[%s5580_s18 + $0x20] sm:$0xff] }
  0xf5   : > { %908 = vadd.xlane.f32.xlu0 %v907_v48  ;;  %v6006_v9 = vpop.xlane.xlu1 %632  ;;  %9674 = vst [vmem:[#allocation2_spill] sm:$0xff] %v6028_v63  ;;  %v935_v4 = vadd.f32 %v934_v46, %v457_v44  ;;  %9677 = vst [vmem:[#allocation5_spill] sm:$0xff] %v6041_v30  ;;  %v459_v44 = vld [vmem:[%s5580_s18 + $0x760] sm:$0xff]  ;;  %v938_v46 = vsel %vm465_vm0, %v460_v0, 0.0  ;;  %v1314_v51 = vmul.f32 %v6028_v63, %v6028_v63 }
  0xf6   : > { %v6010_v19 = vpop.xlane.xlu0 %628  ;;  %v943_v29 = vadd.f32 %v942_v25, %v461_v22  ;;  %v939_v63 = vadd.f32 %v938_v46, %v459_v44  ;;  %v1313_v1 = vmul.f32 %v6041_v30, %v6041_v30  ;;  %v463_v25 = vld [vmem:[%s5580_s18 + $0x780] sm:$0xff]  ;;  %v956_v44 = vmul.f32 0.0051020407, %v5840_v11 }
  0xf8   : > { %920 = vadd.xlane.f32.xlu1 %v919_v5  ;;  %v5294_v5 = vld [vmem:[%s5580_s18 + $0x28] sm:$0xff] }
  0xf9   : > { %916 = vadd.xlane.f32.xlu0 %v915_v12  ;;  %v6018_v38 = vpop.xlane.xlu1 %640  ;;  %v6033_v12 = vsub.f32 %v5294_v5, %v952_v36  ;;  %v6055_v5 = vsub.f32 %v5297_v56, %v952_v36  ;;  %v946_v56 = vsel %vm465_vm0, %v464_v45, 0.0 }
  0xfa   : > { %v6022_v48 = vpop.xlane.xlu0 %636  ;;  %v947_v30 = vadd.f32 %v946_v56, %v463_v25  ;;  %v5304_v25 = vld [vmem:[%s5580_s18 + $0x68] sm:$0xff] }
  0xfb   : > { %9675 = vst [vmem:[#allocation3_spill] sm:$0xff] %v6033_v12  ;;  %9680 = vst [vmem:[#allocation8_spill] sm:$0xff] %v6055_v5  ;;  %v1318_v0 = vmul.f32 %v6033_v12, %v6033_v12  ;;  %v6105_v56 = vsub.f32 %v5304_v25, %v956_v44  ;;  %v959_v25 = vmul.f32 0.0051020407, %v5846_v17 }
  0xfc   : > { %928 = vadd.xlane.f32.xlu1 %v927_v32 }
  0xfd   : > { %924 = vadd.xlane.f32.xlu0 %v923_v43  ;;  %v6036_v16 = vpop.xlane.xlu1 %648  ;;  %v5296_v43 = vld [vmem:[%s5580_s18 + $0x18] sm:$0xff]  ;;  %v1563_v11 = vsel %vm465_vm0, %v1318_v0, 0.0  ;;  %9688 = vst [vmem:[#allocation16_spill] sm:$0xff] %v6105_v56  ;;  %v958_v0 = vmul.f32 0.0051020407, %v5850_v21  ;;  %v1326_v17 = vmul.f32 %v6105_v56, %v6105_v56 }
  0xfe   : > { %9676 = vst [vmem:[#allocation4_spill] sm:$0xff] %v6036_v16  ;;  %v6043_v32 = vpop.xlane.xlu0 %644  ;;  %v6050_v60 = vsub.f32 %v5296_v43, %v951_v41  ;;  %v6060_v16 = vsub.f32 %v5298_v55, %v953_v13  ;;  %v5300_v55 = vld [vmem:[%s5580_s18 + $0x48] sm:$0xff] }
  0xff   : > { %9678 = vst [vmem:[#allocation6_spill] sm:$0xff] %v6043_v32  ;;  %v5299_v32 = vld [vmem:[%s5580_s18 + $0x10] sm:$0xff]  ;;  %v6077_v12 = vsub.f32 %v5300_v55, %v954_v53 }
 0x100   : > { %9679 = vst [vmem:[#allocation7_spill] sm:$0xff] %v6050_v60  ;;  %936 = vadd.xlane.f32.xlu1 %v935_v4  ;;  %9681 = vst [vmem:[#allocation9_spill] sm:$0xff] %v6060_v16  ;;  %v6067_v36 = vsub.f32 %v5299_v32, %v951_v41  ;;  %v955_v4 = vmul.f32 0.0051020407, %v5826_v61  ;;  %v1555_v41 = vsel %vm465_vm0, %v1314_v51, 0.0  ;;  %v1317_v61 = vmul.f32 %v6055_v5, %v6055_v5  ;;  %v5301_v32 = vld [vmem:[%s5580_s18 + $0x30] sm:$0xff] }
 0x101   : > { %932 = vadd.xlane.f32.xlu0 %v931_v20  ;;  %v6062_v43 = vpop.xlane.xlu1 %656  ;;  %v1316_v20 = vmul.f32 %v6050_v60, %v6050_v60  ;;  %9683 = vst [vmem:[#allocation11_spill] sm:$0xff] %v6077_v12  ;;  %v6084_v46 = vsub.f32 %v5301_v32, %v953_v13  ;;  %v1320_v45 = vmul.f32 %v6060_v16, %v6060_v16  ;;  %v957_v60 = vmul.f32 0.0051020407, %v5836_v7  ;;  %v5302_v5 = vld [vmem:[%s5580_s18 + $0x58] sm:$0xff] }
 0x102   : > { %9682 = vst [vmem:[#allocation10_spill] sm:$0xff] %v6067_v36  ;;  %v6070_v22 = vpop.xlane.xlu0 %652  ;;  %v1315_v51 = vmul.f32 %v6067_v36, %v6067_v36  ;;  %v6095_v13 = vsub.f32 %v5302_v5, %v955_v4  ;;  %v1556_v7 = vadd.f32 %v1555_v41, %v1313_v1  ;;  %v5306_v1 = vld [vmem:[%s5580_s18 + $0x78] sm:$0xff] }
 0x103   : > { %9684 = vst [vmem:[#allocation12_spill] sm:$0xff] %v6084_v46  ;;  %v1559_v36 = vsel %vm465_vm0, %v1316_v20, 0.0  ;;  %v1319_v5 = vmul.f32 %v6084_v46, %v6084_v46  ;;  %v6115_v41 = vsub.f32 %v5306_v1, %v957_v60  ;;  %v1567_v21 = vsel %vm465_vm0, %v1320_v45, 0.0  ;;  %v5309_v46 = vld [vmem:[%s5580_s18 + $0x70] sm:$0xff] }
 0x104   : > { %944 = vadd.xlane.f32.xlu1 %v943_v29  ;;  %9686 = vst [vmem:[#allocation14_spill] sm:$0xff] %v6095_v13  ;;  %v5303_v29 = vld [vmem:[%s5580_s18 + $0x40] sm:$0xff]  ;;  %v1324_v20 = vmul.f32 %v6095_v13, %v6095_v13  ;;  %v960_v45 = vmul.f32 0.0051020407, %v5860_v31  ;;  %v961_v31 = vmul.f32 0.0051020407, %v5856_v27 }
 0x105   : > { %940 = vadd.xlane.f32.xlu0 %v939_v63  ;;  %v6089_v55 = vpop.xlane.xlu1 %664  ;;  %v6098_v32 = vsub.f32 %v5303_v29, %v954_v53  ;;  %v1322_v63 = vmul.f32 %v6077_v12, %v6077_v12  ;;  %v1564_v53 = vadd.f32 %v1563_v11, %v1317_v61  ;;  %v5305_v29 = vld [vmem:[%s5580_s18 + $0x50] sm:$0xff]  ;;  %9690 = vst [vmem:[#allocation18_spill] sm:$0xff] %v6115_v41 }
 0x106   : > { %9685 = vst [vmem:[#allocation13_spill] sm:$0xff] %v6089_v55  ;;  %v6100_v16 = vpop.xlane.xlu0 %660  ;;  %v6112_v55 = vsub.f32 %v5305_v29, %v955_v4  ;;  %v5307_v4 = vld [vmem:[%s5580_s18 + $0x60] sm:$0xff]  ;;  %v1560_v29 = vadd.f32 %v1559_v36, %v1315_v51  ;;  %v1328_v51 = vmul.f32 %v6115_v41, %v6115_v41  ;;  %v5312_v41 = vld [vmem:[%s5580_s18 + $0xa8] sm:$0xff] }
 0x107   : > { %9687 = vst [vmem:[#allocation15_spill] sm:$0xff] %v6098_v32  ;;  %v1321_v61 = vmul.f32 %v6098_v32, %v6098_v32  ;;  %v6126_v11 = vsub.f32 %v5307_v4, %v956_v44  ;;  %v1571_v13 = vsel %vm465_vm0, %v1322_v63, 0.0  ;;  %v6138_v32 = vsub.f32 %v5309_v46, %v957_v60  ;;  %v5310_v4 = vld [vmem:[%s5580_s18 + $0x98] sm:$0xff]  ;;  %v5311_v46 = vld [vmem:[%s5580_s18 + $0x80] sm:$0xff] }
 0x108   : > { %1557 = vadd.xlane.f32.xlu1 %v1556_v7  ;;  %9689 = vst [vmem:[#allocation17_spill] sm:$0xff] %v6112_v55  ;;  %v1568_v44 = vadd.f32 %v1567_v21, %v1319_v5  ;;  %v1323_v36 = vmul.f32 %v6112_v55, %v6112_v55  ;;  %v6145_v56 = vsub.f32 %v5310_v4, %v959_v25  ;;  %v1579_v55 = vsel %vm465_vm0, %v1326_v17, 0.0 }
 0x109   : > { %948 = vadd.xlane.f32.xlu0 %v947_v30  ;;  %v6118_v12 = vpop.xlane.xlu1 %672  ;;  %9691 = vst [vmem:[#allocation19_spill] sm:$0xff] %v6126_v11  ;;  %v5308_v30 = vld [vmem:[%s5580_s18 + $0x88] sm:$0xff]  ;;  %9693 = vst [vmem:[#allocation21_spill] sm:$0xff] %v6138_v32  ;;  %v1325_v60 = vmul.f32 %v6126_v11, %v6126_v11  ;;  %v6153_v5 = vsub.f32 %v5311_v46, %v958_v0  ;;  %v1572_v21 = vadd.f32 %v1571_v13, %v1321_v61  ;;  %v5313_v46 = vld [vmem:[%s5580_s18 + $0x90] sm:$0xff] }
 0x10a   : > { %v6128_v7 = vpop.xlane.xlu0 %668  ;;  %v6133_v1 = vsub.f32 %v5308_v30, %v958_v0  ;;  %9694 = vst [vmem:[#allocation22_spill] sm:$0xff] %v6145_v56  ;;  %v1575_v30 = vsel %vm465_vm0, %v1324_v20, 0.0  ;;  %v6161_v27 = vsub.f32 %v5312_v41, %v960_v45  ;;  %v1327_v0 = vmul.f32 %v6138_v32, %v6138_v32  ;;  %v5314_v20 = vld [vmem:[%s5580_s18 + $0xb8] sm:$0xff] }
 0x10b   : > { %9696 = vst [vmem:[#allocation24_spill] sm:$0xff] %v6153_v5  ;;  %v6168_v11 = vsub.f32 %v5313_v46, %v959_v25  ;;  %v1332_v13 = vmul.f32 %v6145_v56, %v6145_v56  ;;  %v6173_v61 = vsub.f32 %v5314_v20, %v961_v31  ;;  %v963_v41 = vmul.f32 0.0051020407, %v5866_v37  ;;  %v5315_v46 = vld [vmem:[%s5580_s18 + $0xa0] sm:$0xff]  ;;  %v5316_v37 = vld [vmem:[%s5580_s18 + $0xc8] sm:$0xff] }
 0x10c   : > { %9692 = vst [vmem:[#allocation20_spill] sm:$0xff] %v6133_v1  ;;  %1565 = vadd.xlane.f32.xlu1 %v1564_v53  ;;  %v1330_v4 = vmul.f32 %v6133_v1, %v6133_v1  ;;  %9697 = vst [vmem:[#allocation25_spill] sm:$0xff] %v6161_v27  ;;  %v1583_v17 = vsel %vm465_vm0, %v1328_v51, 0.0  ;;  %v1329_v25 = vmul.f32 %v6153_v5, %v6153_v5  ;;  %v964_v51 = vmul.f32 0.0051020407, %v5880_v54  ;;  %v5317_v5 = vld [vmem:[%s5580_s18 + $0xb0] sm:$0xff] }
 0x10d   : > { %1561 = vadd.xlane.f32.xlu0 %v1560_v29  ;;  %v6148_v63 = vpop.xlane.xlu1 %680  ;;  %v962_v29 = vmul.f32 0.0051020407, %v5870_v42  ;;  %9698 = vst [vmem:[#allocation26_spill] sm:$0xff] %v6168_v11  ;;  %9699 = vst [vmem:[#allocation27_spill] sm:$0xff] %v6173_v61  ;;  %v1580_v56 = vadd.f32 %v1579_v55, %v1325_v60  ;;  %v1576_v20 = vadd.f32 %v1575_v30, %v1323_v36  ;;  %v5318_v60 = vld [vmem:[%s5580_s18 + $0xd8] sm:$0xff] }
 0x10e   : > { %9695 = vst [vmem:[#allocation23_spill] sm:$0xff] %v6148_v63  ;;  %v6155_v53 = vpop.xlane.xlu0 %676  ;;  %v1334_v1 = vmul.f32 %v6161_v27, %v6161_v27  ;;  %v6194_v63 = vsub.f32 %v5317_v5, %v961_v31  ;;  %v1331_v55 = vmul.f32 %v6168_v11, %v6168_v11  ;;  %v1336_v36 = vmul.f32 %v6173_v61, %v6173_v61  ;;  %v5319_v31 = vld [vmem:[%s5580_s18 + $0xc0] sm:$0xff] }
 0x10f   : > { %v6201_v30 = vsub.f32 %v5318_v60, %v963_v41  ;;  %v6209_v5 = vsub.f32 %v5319_v31, %v962_v29  ;;  %v5321_v31 = vld [vmem:[%s5580_s18 + $0xd0] sm:$0xff] }
 0x110   : > { %1573 = vadd.xlane.f32.xlu1 %v1572_v21  ;;  %v6182_v21 = vsub.f32 %v5315_v46, %v960_v45  ;;  %9703 = vst [vmem:[#allocation31_spill] sm:$0xff] %v6194_v63  ;;  %v1584_v45 = vadd.f32 %v1583_v17, %v1327_v0  ;;  %v965_v0 = vmul.f32 0.0051020407, %v5876_v49  ;;  %v1595_v61 = vsel %vm465_vm0, %v1334_v1, 0.0 }
 0x111   : > { %1569 = vadd.xlane.f32.xlu0 %v1568_v44  ;;  %v6176_v42 = vpop.xlane.xlu1 %688  ;;  %v6189_v44 = vsub.f32 %v5316_v37, %v962_v29  ;;  %9704 = vst [vmem:[#allocation32_spill] sm:$0xff] %v6201_v30  ;;  %9705 = vst [vmem:[#allocation33_spill] sm:$0xff] %v6209_v5  ;;  %v1335_v29 = vmul.f32 %v6194_v63, %v6194_v63  ;;  %v6224_v49 = vsub.f32 %v5321_v31, %v963_v41  ;;  %v5322_v63 = vld [vmem:[%s5580_s18 + $0xf8] sm:$0xff] }
 0x112   : > { %9700 = vst [vmem:[#allocation28_spill] sm:$0xff] %v6176_v42  ;;  %9701 = vst [vmem:[#allocation29_spill] sm:$0xff] %v6182_v21  ;;  %v6184_v32 = vpop.xlane.xlu0 %684  ;;  %v1587_v42 = vsel %vm465_vm0, %v1330_v4, 0.0  ;;  %v1591_v4 = vsel %vm465_vm0, %v1332_v13, 0.0  ;;  %v966_v13 = vmul.f32 0.0051020407, %v5890_v3  ;;  %v1337_v1 = vmul.f32 %v6209_v5, %v6209_v5 }
 0x113   : > { %9702 = vst [vmem:[#allocation30_spill] sm:$0xff] %v6189_v44  ;;  %v1588_v46 = vadd.f32 %v1587_v42, %v1329_v25  ;;  %v1338_v37 = vmul.f32 %v6189_v44, %v6189_v44  ;;  %9707 = vst [vmem:[#allocation35_spill] sm:$0xff] %v6224_v49  ;;  %v1340_v42 = vmul.f32 %v6201_v30, %v6201_v30  ;;  %v967_v25 = vmul.f32 0.0051020407, %v5886_v62 }
 0x114   : > { %1581 = vadd.xlane.f32.xlu1 %v1580_v56  ;;  %v1333_v56 = vmul.f32 %v6182_v21, %v6182_v21  ;;  %v1592_v11 = vadd.f32 %v1591_v4, %v1331_v55  ;;  %v1599_v3 = vsel %vm465_vm0, %v1336_v36, 0.0  ;;  %v6235_v41 = vsub.f32 %v5322_v63, %v965_v0  ;;  %v5324_v55 = vld [vmem:[%s5580_s18 + $0x108] sm:$0xff] }
 0x115   : > { %1577 = vadd.xlane.f32.xlu0 %v1576_v20  ;;  %v6203_v54 = vpop.xlane.xlu1 %696  ;;  %v5320_v20 = vld [vmem:[%s5580_s18 + $0xe8] sm:$0xff]  ;;  %v6245_v4 = vsub.f32 %v5324_v55, %v966_v13  ;;  %v968_v36 = vmul.f32 0.0051020407, %v5900_v15  ;;  %v1603_v44 = vsel %vm465_vm0, %v1338_v37, 0.0  ;;  %v1339_v63 = vmul.f32 %v6224_v49, %v6224_v49  ;;  %v5329_v49 = vld [vmem:[%s5580_s18 + $0x110] sm:$0xff] }
 0x116   : > { %v6212_v17 = vpop.xlane.xlu0 %692  ;;  %v6217_v60 = vsub.f32 %v5320_v20, %v964_v51  ;;  %9708 = vst [vmem:[#allocation36_spill] sm:$0xff] %v6235_v41  ;;  %v1596_v62 = vadd.f32 %v1595_v61, %v1333_v56  ;;  %v5326_v61 = vld [vmem:[%s5580_s18 + $0x118] sm:$0xff]  ;;  %v969_v55 = vmul.f32 0.0051020407, %v5896_v10  ;;  %v1607_v15 = vsel %vm465_vm0, %v1340_v42, 0.0 }
 0x117   : > { %9710 = vst [vmem:[#allocation38_spill] sm:$0xff] %v6245_v4  ;;  %v6255_v56 = vsub.f32 %v5326_v61, %v967_v25  ;;  %v1344_v37 = vmul.f32 %v6235_v41, %v6235_v41  ;;  %v1346_v10 = vmul.f32 %v6245_v4, %v6245_v4  ;;  %v970_v42 = vmul.f32 0.0051020407, %v5910_v28 }
 0x118   : > { %9706 = vst [vmem:[#allocation34_spill] sm:$0xff] %v6217_v60  ;;  %1589 = vadd.xlane.f32.xlu1 %v1588_v46  ;;  %v5323_v46 = vld [vmem:[%s5580_s18 + $0xe0] sm:$0xff]  ;;  %v971_v28 = vmul.f32 0.0051020407, %v5906_v23 }
 0x119   : > { %1585 = vadd.xlane.f32.xlu0 %v1584_v45  ;;  %v6229_v20 = vpop.xlane.xlu1 %704  ;;  %v6238_v31 = vsub.f32 %v5323_v46, %v964_v51  ;;  %v1342_v45 = vmul.f32 %v6217_v60, %v6217_v60  ;;  %v1600_v51 = vadd.f32 %v1599_v3, %v1335_v29  ;;  %v5325_v46 = vld [vmem:[%s5580_s18 + $0xf0] sm:$0xff]  ;;  %9712 = vst [vmem:[#allocation40_spill] sm:$0xff] %v6255_v56 }
 0x11a   : > { %v6240_v30 = vpop.xlane.xlu0 %700  ;;  %v6252_v5 = vsub.f32 %v5325_v46, %v965_v0  ;;  %v5327_v0 = vld [vmem:[%s5580_s18 + $0x100] sm:$0xff]  ;;  %v1604_v46 = vadd.f32 %v1603_v44, %v1337_v1  ;;  %v1348_v1 = vmul.f32 %v6255_v56, %v6255_v56  ;;  %v5332_v56 = vld [vmem:[%s5580_s18 + $0x148] sm:$0xff] }
 0x11b   : > { %9709 = vst [vmem:[#allocation37_spill] sm:$0xff] %v6238_v31  ;;  %v1341_v29 = vmul.f32 %v6238_v31, %v6238_v31  ;;  %v6266_v3 = vsub.f32 %v5327_v0, %v966_v13  ;;  %v1611_v41 = vsel %vm465_vm0, %v1342_v45, 0.0  ;;  %v6278_v31 = vsub.f32 %v5329_v49, %v967_v25  ;;  %v5330_v0 = vld [vmem:[%s5580_s18 + $0x138] sm:$0xff]  ;;  %v5331_v25 = vld [vmem:[%s5580_s18 + $0x120] sm:$0xff] }
 0x11c   : > { %1597 = vadd.xlane.f32.xlu1 %v1596_v62  ;;  %9711 = vst [vmem:[#allocation39_spill] sm:$0xff] %v6252_v5  ;;  %v1608_v13 = vadd.f32 %v1607_v15, %v1339_v63  ;;  %v1343_v44 = vmul.f32 %v6252_v5, %v6252_v5  ;;  %v6285_v4 = vsub.f32 %v5330_v0, %v969_v55  ;;  %v1619_v5 = vsel %vm465_vm0, %v1346_v10, 0.0 }
 0x11d   : > { %1593 = vadd.xlane.f32.xlu0 %v1592_v11  ;;  %v6258_v60 = vpop.xlane.xlu1 %712  ;;  %9713 = vst [vmem:[#allocation41_spill] sm:$0xff] %v6266_v3  ;;  %v5328_v11 = vld [vmem:[%s5580_s18 + $0x128] sm:$0xff]  ;;  %9715 = vst [vmem:[#allocation43_spill] sm:$0xff] %v6278_v31  ;;  %v1345_v49 = vmul.f32 %v6266_v3, %v6266_v3  ;;  %v6293_v63 = vsub.f32 %v5331_v25, %v968_v36  ;;  %v6301_v23 = vsub.f32 %v5332_v56, %v970_v42  ;;  %v5333_v25 = vld [vmem:[%s5580_s18 + $0x130] sm:$0xff] }
 0x11e   : > { %v6268_v62 = vpop.xlane.xlu0 %708  ;;  %v6273_v61 = vsub.f32 %v5328_v11, %v968_v36  ;;  %9716 = vst [vmem:[#allocation44_spill] sm:$0xff] %v6285_v4  ;;  %v1615_v11 = vsel %vm465_vm0, %v1344_v37, 0.0  ;;  %v1347_v36 = vmul.f32 %v6278_v31, %v6278_v31  ;;  %v6308_v3 = vsub.f32 %v5333_v25, %v969_v55  ;;  %v5334_v37 = vld [vmem:[%s5580_s18 + $0x158] sm:$0xff]  ;;  %v5335_v25 = vld [vmem:[%s5580_s18 + $0x140] sm:$0xff] }
 0x11f   : > { %9717 = vst [vmem:[#allocation45_spill] sm:$0xff] %v6293_v63  ;;  %9718 = vst [vmem:[#allocation46_spill] sm:$0xff] %v6301_v23  ;;  %v973_v56 = vmul.f32 0.0051020407, %v5916_v35  ;;  %v1623_v10 = vsel %vm465_vm0, %v1348_v1, 0.0  ;;  %v1349_v55 = vmul.f32 %v6293_v63, %v6293_v63  ;;  %v5336_v35 = vld [vmem:[%s5580_s18 + $0x168] sm:$0xff] }
 0x120   : > { %9714 = vst [vmem:[#allocation42_spill] sm:$0xff] %v6273_v61  ;;  %1605 = vadd.xlane.f32.xlu1 %v1604_v46  ;;  %v1612_v46 = vadd.f32 %v1611_v41, %v1341_v29  ;;  %v1350_v0 = vmul.f32 %v6273_v61, %v6273_v61  ;;  %9719 = vst [vmem:[#allocation47_spill] sm:$0xff] %v6308_v3  ;;  %v1352_v41 = vmul.f32 %v6285_v4, %v6285_v4  ;;  %v5337_v63 = vld [vmem:[%s5580_s18 + $0x150] sm:$0xff] }
 0x121   : > { %1601 = vadd.xlane.f32.xlu0 %v1600_v51  ;;  %v6288_v45 = vpop.xlane.xlu1 %720  ;;  %v972_v51 = vmul.f32 0.0051020407, %v5920_v40  ;;  %v6313_v29 = vsub.f32 %v5334_v37, %v971_v28  ;;  %v1620_v4 = vadd.f32 %v1619_v5, %v1345_v49  ;;  %v1616_v37 = vadd.f32 %v1615_v11, %v1343_v44  ;;  %v5338_v49 = vld [vmem:[%s5580_s18 + $0x178] sm:$0xff] }
 0x122   : > { %v6295_v15 = vpop.xlane.xlu0 %716  ;;  %v1354_v61 = vmul.f32 %v6301_v23, %v6301_v23  ;;  %v974_v1 = vmul.f32 0.0051020407, %v5930_v57  ;;  %v1627_v27 = vsel %vm465_vm0, %v1350_v0, 0.0  ;;  %v6334_v21 = vsub.f32 %v5337_v63, %v971_v28  ;;  %v5339_v28 = vld [vmem:[%s5580_s18 + $0x160] sm:$0xff] }
 0x123   : > { %9720 = vst [vmem:[#allocation48_spill] sm:$0xff] %v6313_v29  ;;  %v1351_v5 = vmul.f32 %v6308_v3, %v6308_v3  ;;  %v1356_v44 = vmul.f32 %v6313_v29, %v6313_v29  ;;  %v6341_v11 = vsub.f32 %v5338_v49, %v973_v56  ;;  %v1631_v0 = vsel %vm465_vm0, %v1352_v41, 0.0 }
 0x124   : > { %1613 = vadd.xlane.f32.xlu1 %v1612_v46  ;;  %v6322_v46 = vsub.f32 %v5335_v25, %v970_v42  ;;  %9723 = vst [vmem:[#allocation51_spill] sm:$0xff] %v6334_v21  ;;  %v1624_v42 = vadd.f32 %v1623_v10, %v1347_v36  ;;  %v6349_v63 = vsub.f32 %v5339_v28, %v972_v51  ;;  %v975_v36 = vmul.f32 0.0051020407, %v5926_v50  ;;  %v5341_v28 = vld [vmem:[%s5580_s18 + $0x170] sm:$0xff] }
 0x125   : > { %1609 = vadd.xlane.f32.xlu0 %v1608_v13  ;;  %v6316_v40 = vpop.xlane.xlu1 %728  ;;  %v6329_v13 = vsub.f32 %v5336_v35, %v972_v51  ;;  %9724 = vst [vmem:[#allocation52_spill] sm:$0xff] %v6341_v11  ;;  %v1628_v25 = vadd.f32 %v1627_v27, %v1349_v55  ;;  %v976_v41 = vmul.f32 0.0051020407, %v5940_v8  ;;  %v1635_v29 = vsel %vm465_vm0, %v1354_v61, 0.0 }
 0x126   : > { %9721 = vst [vmem:[#allocation49_spill] sm:$0xff] %v6322_v46  ;;  %v6324_v31 = vpop.xlane.xlu0 %724  ;;  %9725 = vst [vmem:[#allocation53_spill] sm:$0xff] %v6349_v63  ;;  %v1355_v51 = vmul.f32 %v6334_v21, %v6334_v21  ;;  %v6364_v50 = vsub.f32 %v5341_v28, %v973_v56  ;;  %v1360_v27 = vmul.f32 %v6341_v11, %v6341_v11  ;;  %v977_v55 = vmul.f32 0.0051020407, %v5936_v2  ;;  %v5342_v21 = vld [vmem:[%s5580_s18 + $0x198] sm:$0xff] }
 0x127   : > { %9722 = vst [vmem:[#allocation50_spill] sm:$0xff] %v6329_v13  ;;  %v1358_v35 = vmul.f32 %v6329_v13, %v6329_v13  ;;  %v1632_v3 = vadd.f32 %v1631_v0, %v1351_v5  ;;  %v1639_v8 = vsel %vm465_vm0, %v1356_v44, 0.0  ;;  %v1357_v61 = vmul.f32 %v6349_v63, %v6349_v63  ;;  %v5344_v5 = vld [vmem:[%s5580_s18 + $0x1a8] sm:$0xff] }
 0x128   : > { %1621 = vadd.xlane.f32.xlu1 %v1620_v4  ;;  %v1353_v4 = vmul.f32 %v6322_v46, %v6322_v46  ;;  %9727 = vst [vmem:[#allocation55_spill] sm:$0xff] %v6364_v50  ;;  %v6375_v56 = vsub.f32 %v5342_v21, %v975_v36  ;;  %v6385_v0 = vsub.f32 %v5344_v5, %v976_v41  ;;  %v978_v44 = vmul.f32 0.0051020407, %v5950_v24 }
 0x129   : > { %1617 = vadd.xlane.f32.xlu0 %v1616_v37  ;;  %v6343_v57 = vpop.xlane.xlu1 %736  ;;  %v5340_v37 = vld [vmem:[%s5580_s18 + $0x188] sm:$0xff]  ;;  %v1643_v13 = vsel %vm465_vm0, %v1358_v35, 0.0  ;;  %v1359_v21 = vmul.f32 %v6364_v50, %v6364_v50  ;;  %v979_v5 = vmul.f32 0.0051020407, %v5946_v18  ;;  %v1647_v24 = vsel %vm465_vm0, %v1360_v27, 0.0  ;;  %v5349_v50 = vld [vmem:[%s5580_s18 + $0x1b0] sm:$0xff] }
 0x12a   : > { %v6352_v10 = vpop.xlane.xlu0 %732  ;;  %v6357_v49 = vsub.f32 %v5340_v37, %v974_v1  ;;  %9728 = vst [vmem:[#allocation56_spill] sm:$0xff] %v6375_v56  ;;  %v1636_v2 = vadd.f32 %v1635_v29, %v1353_v4  ;;  %9730 = vst [vmem:[#allocation58_spill] sm:$0xff] %v6385_v0  ;;  %v5346_v29 = vld [vmem:[%s5580_s18 + $0x1b8] sm:$0xff]  ;;  %v1364_v35 = vmul.f32 %v6375_v56, %v6375_v56  ;;  %v980_v27 = vmul.f32 0.0051020407, %v5960_v39 }
 0x12b   : > { %v6395_v4 = vsub.f32 %v5346_v29, %v977_v55  ;;  %v1366_v18 = vmul.f32 %v6385_v0, %v6385_v0  ;;  %v981_v39 = vmul.f32 0.0051020407, %v5956_v33 }
 0x12c   : > { %9726 = vst [vmem:[#allocation54_spill] sm:$0xff] %v6357_v49  ;;  %1629 = vadd.xlane.f32.xlu1 %v1628_v25  ;;  %v5343_v25 = vld [vmem:[%s5580_s18 + $0x180] sm:$0xff] }
 0x12d   : > { %1625 = vadd.xlane.f32.xlu0 %v1624_v42  ;;  %v6369_v37 = vpop.xlane.xlu1 %744  ;;  %v6378_v28 = vsub.f32 %v5343_v25, %v974_v1  ;;  %v1362_v42 = vmul.f32 %v6357_v49, %v6357_v49  ;;  %v1640_v1 = vadd.f32 %v1639_v8, %v1355_v51  ;;  %v5345_v25 = vld [vmem:[%s5580_s18 + $0x190] sm:$0xff]  ;;  %9732 = vst [vmem:[#allocation60_spill] sm:$0xff] %v6395_v4 }
 0x12e   : > { %v6380_v11 = vpop.xlane.xlu0 %740  ;;  %v6392_v63 = vsub.f32 %v5345_v25, %v975_v36  ;;  %v5347_v36 = vld [vmem:[%s5580_s18 + $0x1a0] sm:$0xff]  ;;  %v1644_v25 = vadd.f32 %v1643_v13, %v1357_v61  ;;  %v1368_v61 = vmul.f32 %v6395_v4, %v6395_v4  ;;  %v5352_v4 = vld [vmem:[%s5580_s18 + $0x1e8] sm:$0xff] }
 0x12f   : > { %9729 = vst [vmem:[#allocation57_spill] sm:$0xff] %v6378_v28  ;;  %v1361_v51 = vmul.f32 %v6378_v28, %v6378_v28  ;;  %v6406_v8 = vsub.f32 %v5347_v36, %v976_v41  ;;  %v1651_v56 = vsel %vm465_vm0, %v1362_v42, 0.0  ;;  %v6418_v28 = vsub.f32 %v5349_v50, %v977_v55  ;;  %v5350_v36 = vld [vmem:[%s5580_s18 + $0x1d8] sm:$0xff]  ;;  %v5351_v55 = vld [vmem:[%s5580_s18 + $0x1c0] sm:$0xff] }
 0x130   : > { %1637 = vadd.xlane.f32.xlu1 %v1636_v2  ;;  %9731 = vst [vmem:[#allocation59_spill] sm:$0xff] %v6392_v63  ;;  %v1648_v41 = vadd.f32 %v1647_v24, %v1359_v21  ;;  %v1363_v13 = vmul.f32 %v6392_v63, %v6392_v63  ;;  %v6425_v0 = vsub.f32 %v5350_v36, %v979_v5  ;;  %v1659_v63 = vsel %vm465_vm0, %v1366_v18, 0.0 }
 0x131   : > { %1633 = vadd.xlane.f32.xlu0 %v1632_v3  ;;  %v6398_v49 = vpop.xlane.xlu1 %752  ;;  %9733 = vst [vmem:[#allocation61_spill] sm:$0xff] %v6406_v8  ;;  %v5348_v3 = vld [vmem:[%s5580_s18 + $0x1c8] sm:$0xff]  ;;  %9735 = vst [vmem:[#allocation63_spill] sm:$0xff] %v6418_v28  ;;  %v1365_v50 = vmul.f32 %v6406_v8, %v6406_v8  ;;  %v6433_v21 = vsub.f32 %v5351_v55, %v978_v44  ;;  %v6441_v33 = vsub.f32 %v5352_v4, %v980_v27  ;;  %v5353_v55 = vld [vmem:[%s5580_s18 + $0x1d0] sm:$0xff] }
 0x132   : > { %v6408_v2 = vpop.xlane.xlu0 %748  ;;  %v6413_v29 = vsub.f32 %v5348_v3, %v978_v44  ;;  %9736 = vst [vmem:[#allocation64_spill] sm:$0xff] %v6425_v0  ;;  %v1655_v3 = vsel %vm465_vm0, %v1364_v35, 0.0  ;;  %v1367_v44 = vmul.f32 %v6418_v28, %v6418_v28  ;;  %v6448_v8 = vsub.f32 %v5353_v55, %v979_v5  ;;  %v5354_v35 = vld [vmem:[%s5580_s18 + $0x1f8] sm:$0xff]  ;;  %v5355_v55 = vld [vmem:[%s5580_s18 + $0x1e0] sm:$0xff] }
 0x133   : > { %9737 = vst [vmem:[#allocation65_spill] sm:$0xff] %v6433_v21  ;;  %9738 = vst [vmem:[#allocation66_spill] sm:$0xff] %v6441_v33  ;;  %v983_v4 = vmul.f32 0.0051020407, %v5966_v52  ;;  %v1663_v18 = vsel %vm465_vm0, %v1368_v61, 0.0  ;;  %v1369_v5 = vmul.f32 %v6433_v21, %v6433_v21  ;;  %v5356_v52 = vld [vmem:[%s5580_s18 + $0x208] sm:$0xff] }
 0x134   : > { %9734 = vst [vmem:[#allocation62_spill] sm:$0xff] %v6413_v29  ;;  %1645 = vadd.xlane.f32.xlu1 %v1644_v25  ;;  %v1652_v25 = vadd.f32 %v1651_v56, %v1361_v51  ;;  %v1370_v36 = vmul.f32 %v6413_v29, %v6413_v29  ;;  %9739 = vst [vmem:[#allocation67_spill] sm:$0xff] %v6448_v8  ;;  %v1372_v56 = vmul.f32 %v6425_v0, %v6425_v0  ;;  %v5357_v21 = vld [vmem:[%s5580_s18 + $0x1f0] sm:$0xff] }
 0x135   : > { %1641 = vadd.xlane.f32.xlu0 %v1640_v1  ;;  %v6428_v42 = vpop.xlane.xlu1 %760  ;;  %v982_v1 = vmul.f32 0.0051020407, %v5970_v59  ;;  %v6453_v51 = vsub.f32 %v5354_v35, %v981_v39  ;;  %v1660_v0 = vadd.f32 %v1659_v63, %v1365_v50  ;;  %v1656_v35 = vadd.f32 %v1655_v3, %v1363_v13  ;;  %v5358_v50 = vld [vmem:[%s5580_s18 + $0x218] sm:$0xff] }
 0x136   : > { %v6435_v24 = vpop.xlane.xlu0 %756  ;;  %v1374_v29 = vmul.f32 %v6441_v33, %v6441_v33  ;;  %v984_v61 = vmul.f32 0.0051020407, %v5980_v14  ;;  %v1667_v23 = vsel %vm465_vm0, %v1370_v36, 0.0  ;;  %v6474_v46 = vsub.f32 %v5357_v21, %v981_v39  ;;  %v5359_v39 = vld [vmem:[%s5580_s18 + $0x200] sm:$0xff] }
 0x137   : > { %9740 = vst [vmem:[#allocation68_spill] sm:$0xff] %v6453_v51  ;;  %v1371_v63 = vmul.f32 %v6448_v8, %v6448_v8  ;;  %v1376_v13 = vmul.f32 %v6453_v51, %v6453_v51  ;;  %v6481_v3 = vsub.f32 %v5358_v50, %v983_v4  ;;  %v1671_v36 = vsel %vm465_vm0, %v1372_v56, 0.0  ;;  %v9764_v33 = vld [vmem:[#allocation6_spill] sm:$0xff] }
 0x138   : > { %1653 = vadd.xlane.f32.xlu1 %v1652_v25  ;;  %v6462_v25 = vsub.f32 %v5355_v55, %v980_v27  ;;  %9743 = vst [vmem:[#allocation71_spill] sm:$0xff] %v6474_v46  ;;  %v1664_v27 = vadd.f32 %v1663_v18, %v1367_v44  ;;  %v6489_v21 = vsub.f32 %v5359_v39, %v982_v1  ;;  %v985_v44 = vmul.f32 0.0051020407, %v5976_v6  ;;  %v5361_v39 = vld [vmem:[%s5580_s18 + $0x210] sm:$0xff] }
 0x139   : > { %1649 = vadd.xlane.f32.xlu0 %v1648_v41  ;;  %v6456_v59 = vpop.xlane.xlu1 %768  ;;  %v6469_v41 = vsub.f32 %v5356_v52, %v982_v1  ;;  %9744 = vst [vmem:[#allocation72_spill] sm:$0xff] %v6481_v3  ;;  %v1668_v55 = vadd.f32 %v1667_v23, %v1369_v5  ;;  %v986_v56 = vmul.f32 0.0051020407, %v5990_v34  ;;  %v1675_v51 = vsel %vm465_vm0, %v1374_v29, 0.0 }
 0x13a   : > { %9741 = vst [vmem:[#allocation69_spill] sm:$0xff] %v6462_v25  ;;  %v6464_v28 = vpop.xlane.xlu0 %764  ;;  %9745 = vst [vmem:[#allocation73_spill] sm:$0xff] %v6489_v21  ;;  %v1375_v1 = vmul.f32 %v6474_v46, %v6474_v46  ;;  %v6504_v6 = vsub.f32 %v5361_v39, %v983_v4  ;;  %v1380_v23 = vmul.f32 %v6481_v3, %v6481_v3  ;;  %v987_v5 = vmul.f32 0.0051020407, %v5986_v26  ;;  %v5362_v46 = vld [vmem:[%s5580_s18 + $0x238] sm:$0xff] }
 0x13b   : > { %9742 = vst [vmem:[#allocation70_spill] sm:$0xff] %v6469_v41  ;;  %v1378_v52 = vmul.f32 %v6469_v41, %v6469_v41  ;;  %v1672_v8 = vadd.f32 %v1671_v36, %v1371_v63  ;;  %v1679_v34 = vsel %vm465_vm0, %v1376_v13, 0.0  ;;  %v1377_v29 = vmul.f32 %v6489_v21, %v6489_v21  ;;  %v5364_v63 = vld [vmem:[%s5580_s18 + $0x248] sm:$0xff] }
 0x13c   : > { %1661 = vadd.xlane.f32.xlu1 %v1660_v0  ;;  %v1373_v0 = vmul.f32 %v6462_v25, %v6462_v25  ;;  %9747 = vst [vmem:[#allocation75_spill] sm:$0xff] %v6504_v6  ;;  %v6515_v4 = vsub.f32 %v5362_v46, %v985_v44  ;;  %v6525_v36 = vsub.f32 %v5364_v63, %v986_v56  ;;  %v988_v13 = vmul.f32 0.0051020407, %v6000_v58 }
 0x13d   : > { %1657 = vadd.xlane.f32.xlu0 %v1656_v35  ;;  %v6483_v14 = vpop.xlane.xlu1 %776  ;;  %v5360_v35 = vld [vmem:[%s5580_s18 + $0x228] sm:$0xff]  ;;  %v1683_v41 = vsel %vm465_vm0, %v1378_v52, 0.0  ;;  %v1379_v46 = vmul.f32 %v6504_v6, %v6504_v6  ;;  %v989_v63 = vmul.f32 0.0051020407, %v5996_v47  ;;  %v1687_v58 = vsel %vm465_vm0, %v1380_v23, 0.0  ;;  %v5369_v6 = vld [vmem:[%s5580_s18 + $0x250] sm:$0xff] }
 0x13e   : > { %v6492_v18 = vpop.xlane.xlu0 %772  ;;  %v6497_v50 = vsub.f32 %v5360_v35, %v984_v61  ;;  %9748 = vst [vmem:[#allocation76_spill] sm:$0xff] %v6515_v4  ;;  %v1676_v26 = vadd.f32 %v1675_v51, %v1373_v0  ;;  %9750 = vst [vmem:[#allocation78_spill] sm:$0xff] %v6525_v36  ;;  %v5366_v51 = vld [vmem:[%s5580_s18 + $0x258] sm:$0xff]  ;;  %v1384_v52 = vmul.f32 %v6515_v4, %v6515_v4  ;;  %v990_v23 = vmul.f32 0.0051020407, %v6010_v19 }
 0x13f   : > { %v6535_v0 = vsub.f32 %v5366_v51, %v987_v5  ;;  %v1386_v47 = vmul.f32 %v6525_v36, %v6525_v36  ;;  %v991_v19 = vmul.f32 0.0051020407, %v6006_v9 }
 0x140   : > { %9746 = vst [vmem:[#allocation74_spill] sm:$0xff] %v6497_v50  ;;  %1669 = vadd.xlane.f32.xlu1 %v1668_v55  ;;  %v5363_v55 = vld [vmem:[%s5580_s18 + $0x220] sm:$0xff] }
 0x141   : > { %1665 = vadd.xlane.f32.xlu0 %v1664_v27  ;;  %v6509_v35 = vpop.xlane.xlu1 %784  ;;  %v6518_v39 = vsub.f32 %v5363_v55, %v984_v61  ;;  %v1382_v27 = vmul.f32 %v6497_v50, %v6497_v50  ;;  %v1680_v61 = vadd.f32 %v1679_v34, %v1375_v1  ;;  %v5365_v55 = vld [vmem:[%s5580_s18 + $0x230] sm:$0xff]  ;;  %9752 = vst [vmem:[#allocation80_spill] sm:$0xff] %v6535_v0 }
 0x142   : > { %v6520_v3 = vpop.xlane.xlu0 %780  ;;  %v6532_v21 = vsub.f32 %v5365_v55, %v985_v44  ;;  %v5367_v44 = vld [vmem:[%s5580_s18 + $0x240] sm:$0xff]  ;;  %v1684_v55 = vadd.f32 %v1683_v41, %v1377_v29  ;;  %v1388_v29 = vmul.f32 %v6535_v0, %v6535_v0  ;;  %v5372_v0 = vld [vmem:[%s5580_s18 + $0x288] sm:$0xff] }
 0x143   : > { %9749 = vst [vmem:[#allocation77_spill] sm:$0xff] %v6518_v39  ;;  %v1381_v1 = vmul.f32 %v6518_v39, %v6518_v39  ;;  %v6546_v34 = vsub.f32 %v5367_v44, %v986_v56  ;;  %v1691_v4 = vsel %vm465_vm0, %v1382_v27, 0.0  ;;  %v6558_v39 = vsub.f32 %v5369_v6, %v987_v5  ;;  %v5370_v44 = vld [vmem:[%s5580_s18 + $0x278] sm:$0xff]  ;;  %v5371_v5 = vld [vmem:[%s5580_s18 + $0x260] sm:$0xff] }
 0x144   : > { %1677 = vadd.xlane.f32.xlu1 %v1676_v26  ;;  %9751 = vst [vmem:[#allocation79_spill] sm:$0xff] %v6532_v21  ;;  %v1688_v56 = vadd.f32 %v1687_v58, %v1379_v46  ;;  %v1383_v41 = vmul.f32 %v6532_v21, %v6532_v21  ;;  %v6565_v36 = vsub.f32 %v5370_v44, %v989_v63  ;;  %v1699_v21 = vsel %vm465_vm0, %v1386_v47, 0.0 }
 0x145   : > { %1673 = vadd.xlane.f32.xlu0 %v1672_v8  ;;  %v6538_v50 = vpop.xlane.xlu1 %792  ;;  %9753 = vst [vmem:[#allocation81_spill] sm:$0xff] %v6546_v34  ;;  %v5368_v8 = vld [vmem:[%s5580_s18 + $0x268] sm:$0xff]  ;;  %9755 = vst [vmem:[#allocation83_spill] sm:$0xff] %v6558_v39  ;;  %v1385_v6 = vmul.f32 %v6546_v34, %v6546_v34  ;;  %v6573_v46 = vsub.f32 %v5371_v5, %v988_v13  ;;  %v6581_v9 = vsub.f32 %v5372_v0, %v990_v23  ;;  %v5373_v5 = vld [vmem:[%s5580_s18 + $0x270] sm:$0xff] }
 0x146   : > { %v6548_v26 = vpop.xlane.xlu0 %788  ;;  %v6553_v51 = vsub.f32 %v5368_v8, %v988_v13  ;;  %9756 = vst [vmem:[#allocation84_spill] sm:$0xff] %v6565_v36  ;;  %v1695_v8 = vsel %vm465_vm0, %v1384_v52, 0.0  ;;  %v1387_v13 = vmul.f32 %v6558_v39, %v6558_v39  ;;  %v6588_v34 = vsub.f32 %v5373_v5, %v989_v63  ;;  %v5374_v52 = vld [vmem:[%s5580_s18 + $0x298] sm:$0xff]  ;;  %v5375_v5 = vld [vmem:[%s5580_s18 + $0x280] sm:$0xff] }
 0x147   : > { %9757 = vst [vmem:[#allocation85_spill] sm:$0xff] %v6573_v46  ;;  %9758 = vst [vmem:[#allocation86_spill] sm:$0xff] %v6581_v9  ;;  %v993_v0 = vmul.f32 0.0051020407, %v6018_v38  ;;  %v1703_v47 = vsel %vm465_vm0, %v1388_v29, 0.0  ;;  %v1389_v63 = vmul.f32 %v6573_v46, %v6573_v46  ;;  %v5376_v38 = vld [vmem:[%s5580_s18 + $0x2a8] sm:$0xff] }
 0x148   : > { %9754 = vst [vmem:[#allocation82_spill] sm:$0xff] %v6553_v51  ;;  %1685 = vadd.xlane.f32.xlu1 %v1684_v55  ;;  %v1692_v55 = vadd.f32 %v1691_v4, %v1381_v1  ;;  %v1390_v44 = vmul.f32 %v6553_v51, %v6553_v51  ;;  %9759 = vst [vmem:[#allocation87_spill] sm:$0xff] %v6588_v34  ;;  %v1392_v4 = vmul.f32 %v6565_v36, %v6565_v36  ;;  %v5377_v46 = vld [vmem:[%s5580_s18 + $0x290] sm:$0xff] }
 0x149   : > { %1681 = vadd.xlane.f32.xlu0 %v1680_v61  ;;  %v6568_v27 = vpop.xlane.xlu1 %800  ;;  %v992_v61 = vmul.f32 0.0051020407, %v6022_v48  ;;  %v6593_v1 = vsub.f32 %v5374_v52, %v991_v19  ;;  %v1700_v36 = vadd.f32 %v1699_v21, %v1385_v6  ;;  %v1696_v52 = vadd.f32 %v1695_v8, %v1383_v41  ;;  %v5378_v6 = vld [vmem:[%s5580_s18 + $0x2b8] sm:$0xff] }
 0x14a   : > { %v6575_v58 = vpop.xlane.xlu0 %796  ;;  %v1394_v51 = vmul.f32 %v6581_v9, %v6581_v9  ;;  %v994_v29 = vmul.f32 0.0051020407, %v9764_v33  ;;  %v1707_v25 = vsel %vm465_vm0, %v1390_v44, 0.0  ;;  %v1391_v21 = vmul.f32 %v6588_v34, %v6588_v34 }
 0x14b   : > { %9760 = vst [vmem:[#allocation88_spill] sm:$0xff] %v6593_v1  ;;  %v1396_v41 = vmul.f32 %v6593_v1, %v6593_v1  ;;  %v6621_v8 = vsub.f32 %v5378_v6, %v993_v0  ;;  %v1711_v44 = vsel %vm465_vm0, %v1392_v4, 0.0  ;;  %v996_v4 = vmul.f32 0.0051020407, %v6070_v22 }
 0x14c   : > { %1693 = vadd.xlane.f32.xlu1 %v1692_v55  ;;  %v6602_v55 = vsub.f32 %v5375_v5, %v990_v23  ;;  %v1704_v23 = vadd.f32 %v1703_v47, %v1387_v13  ;;  %v9768_v13 = vld [vmem:[#allocation4_spill] sm:$0xff]  ;;  %v1715_v34 = vsel %vm465_vm0, %v1394_v51, 0.0 }
 0x14d   : > { %1689 = vadd.xlane.f32.xlu0 %v1688_v56  ;;  %v6596_v48 = vpop.xlane.xlu1 %808  ;;  %v6609_v56 = vsub.f32 %v5376_v38, %v992_v61  ;;  %9766 = vst [vmem:[#allocation92_spill] sm:$0xff] %v6621_v8  ;;  %v995_v47 = vmul.f32 0.0051020407, %v9768_v13  ;;  %v1708_v38 = vadd.f32 %v1707_v25, %v1389_v63  ;;  %v1400_v25 = vmul.f32 %v6621_v8, %v6621_v8 }
 0x14e   : > { %9761 = vst [vmem:[#allocation89_spill] sm:$0xff] %v6596_v48  ;;  %9762 = vst [vmem:[#allocation90_spill] sm:$0xff] %v6602_v55  ;;  %v6604_v39 = vpop.xlane.xlu0 %804  ;;  %v6614_v48 = vsub.f32 %v5377_v46, %v991_v19  ;;  %v5379_v19 = vld [vmem:[%s5580_s18 + $0x2a0] sm:$0xff]  ;;  %v997_v63 = vmul.f32 0.0051020407, %v6062_v43  ;;  %v1719_v22 = vsel %vm465_vm0, %v1396_v41, 0.0 }
 0x14f   : > { %9763 = vst [vmem:[#allocation91_spill] sm:$0xff] %v6609_v56  ;;  %v6629_v46 = vsub.f32 %v5379_v19, %v992_v61  ;;  %v1398_v6 = vmul.f32 %v6609_v56, %v6609_v56  ;;  %v5381_v19 = vld [vmem:[%s5580_s18 + $0x2b0] sm:$0xff]  ;;  %v1712_v56 = vadd.f32 %v1711_v44, %v1391_v21  ;;  %v5384_v21 = vld [vmem:[%s5580_s18 + $0x2e8] sm:$0xff]  ;;  %v998_v41 = vmul.f32 0.0051020407, %v6100_v16 }
 0x150   : > { %9765 = vst [vmem:[#allocation6_spill] sm:$0xff] %v6614_v48  ;;  %1701 = vadd.xlane.f32.xlu1 %v1700_v36  ;;  %v1393_v36 = vmul.f32 %v6602_v55, %v6602_v55  ;;  %v1395_v61 = vmul.f32 %v6614_v48, %v6614_v48  ;;  %v6644_v13 = vsub.f32 %v5381_v19, %v993_v0  ;;  %v5382_v48 = vld [vmem:[%s5580_s18 + $0x2d8] sm:$0xff]  ;;  %v1727_v16 = vsel %vm465_vm0, %v1400_v25, 0.0 }
 0x151   : > { %1697 = vadd.xlane.f32.xlu0 %v1696_v52  ;;  %v6623_v33 = vpop.xlane.xlu1 %816  ;;  %9767 = vst [vmem:[#allocation93_spill] sm:$0xff] %v6629_v46  ;;  %v5380_v52 = vld [vmem:[%s5580_s18 + $0x2c8] sm:$0xff]  ;;  %v1397_v51 = vmul.f32 %v6629_v46, %v6629_v46  ;;  %v6655_v0 = vsub.f32 %v5382_v48, %v995_v47  ;;  %v6665_v44 = vsub.f32 %v5384_v21, %v996_v4  ;;  %v1723_v46 = vsel %vm465_vm0, %v1398_v6, 0.0 }
 0x152   : > { %v6632_v5 = vpop.xlane.xlu0 %812  ;;  %v6637_v1 = vsub.f32 %v5380_v52, %v994_v29  ;;  %9770 = vst [vmem:[#allocation94_spill] sm:$0xff] %v6644_v13  ;;  %v1716_v43 = vadd.f32 %v1715_v34, %v1393_v36  ;;  %v1399_v48 = vmul.f32 %v6644_v13, %v6644_v13  ;;  %v5386_v34 = vld [vmem:[%s5580_s18 + $0x2f8] sm:$0xff]  ;;  %v1000_v25 = vmul.f32 0.0051020407, %v6128_v7  ;;  %v5389_v13 = vld [vmem:[%s5580_s18 + $0x2f0] sm:$0xff] }
 0x153   : > { %9771 = vst [vmem:[#allocation95_spill] sm:$0xff] %v6655_v0  ;;  %9773 = vst [vmem:[#allocation97_spill] sm:$0xff] %v6665_v44  ;;  %v6675_v36 = vsub.f32 %v5386_v34, %v997_v63  ;;  %v1404_v6 = vmul.f32 %v6655_v0, %v6655_v0  ;;  %v1001_v7 = vmul.f32 0.0051020407, %v6118_v12 }
 0x154   : > { %9769 = vst [vmem:[#allocation4_spill] sm:$0xff] %v6637_v1  ;;  %1709 = vadd.xlane.f32.xlu1 %v1708_v38  ;;  %v5383_v38 = vld [vmem:[%s5580_s18 + $0x2c0] sm:$0xff] }
 0x155   : > { %1705 = vadd.xlane.f32.xlu0 %v1704_v23  ;;  %v6649_v52 = vpop.xlane.xlu1 %824  ;;  %v6658_v19 = vsub.f32 %v5383_v38, %v994_v29  ;;  %v1402_v23 = vmul.f32 %v6637_v1, %v6637_v1  ;;  %v1720_v29 = vadd.f32 %v1719_v22, %v1395_v61  ;;  %v5385_v38 = vld [vmem:[%s5580_s18 + $0x2d0] sm:$0xff]  ;;  %9775 = vst [vmem:[#allocation99_spill] sm:$0xff] %v6675_v36  ;;  %v9776_v1 = vld [vmem:[#allocation13_spill] sm:$0xff] }
 0x156   : > { %v6660_v8 = vpop.xlane.xlu0 %820  ;;  %v6672_v9 = vsub.f32 %v5385_v38, %v995_v47  ;;  %v999_v21 = vmul.f32 0.0051020407, %v9776_v1  ;;  %v5387_v47 = vld [vmem:[%s5580_s18 + $0x2e0] sm:$0xff]  ;;  %v1724_v38 = vadd.f32 %v1723_v46, %v1397_v51  ;;  %v1406_v1 = vmul.f32 %v6665_v44, %v6665_v44 }
 0x157   : > { %9772 = vst [vmem:[#allocation96_spill] sm:$0xff] %v6658_v19  ;;  %v1401_v61 = vmul.f32 %v6658_v19, %v6658_v19  ;;  %v6686_v22 = vsub.f32 %v5387_v47, %v996_v4  ;;  %v1731_v0 = vsel %vm465_vm0, %v1402_v23, 0.0  ;;  %v6698_v19 = vsub.f32 %v5389_v13, %v997_v63  ;;  %v5390_v47 = vld [vmem:[%s5580_s18 + $0x318] sm:$0xff]  ;;  %v5391_v63 = vld [vmem:[%s5580_s18 + $0x300] sm:$0xff] }
 0x158   : > { %1717 = vadd.xlane.f32.xlu1 %v1716_v43  ;;  %9774 = vst [vmem:[#allocation98_spill] sm:$0xff] %v6672_v9  ;;  %v1728_v4 = vadd.f32 %v1727_v16, %v1399_v48  ;;  %v1403_v46 = vmul.f32 %v6672_v9, %v6672_v9  ;;  %v1408_v51 = vmul.f32 %v6675_v36, %v6675_v36  ;;  %v5392_v36 = vld [vmem:[%s5580_s18 + $0x328] sm:$0xff]  ;;  %v1739_v9 = vsel %vm465_vm0, %v1406_v1, 0.0 }
 0x159   : > { %1713 = vadd.xlane.f32.xlu0 %v1712_v56  ;;  %v6678_v55 = vpop.xlane.xlu1 %832  ;;  %9777 = vst [vmem:[#allocation13_spill] sm:$0xff] %v6686_v22  ;;  %v5388_v56 = vld [vmem:[%s5580_s18 + $0x308] sm:$0xff]  ;;  %9779 = vst [vmem:[#allocation101_spill] sm:$0xff] %v6698_v19  ;;  %v6705_v44 = vsub.f32 %v5390_v47, %v999_v21  ;;  %v1405_v13 = vmul.f32 %v6686_v22, %v6686_v22  ;;  %v6713_v48 = vsub.f32 %v5391_v63, %v998_v41  ;;  %v5393_v63 = vld [vmem:[%s5580_s18 + $0x310] sm:$0xff] }
 0x15a   : > { %v6688_v43 = vpop.xlane.xlu0 %828  ;;  %v6693_v34 = vsub.f32 %v5388_v56, %v998_v41  ;;  %v1735_v56 = vsel %vm465_vm0, %v1404_v6, 0.0  ;;  %v6721_v12 = vsub.f32 %v5392_v36, %v1000_v25  ;;  %v1407_v41 = vmul.f32 %v6698_v19, %v6698_v19  ;;  %v5394_v6 = vld [vmem:[%s5580_s18 + $0x338] sm:$0xff]  ;;  %v9787_v36 = vld [vmem:[#allocation23_spill] sm:$0xff] }
 0x15b   : > { %9780 = vst [vmem:[#allocation102_spill] sm:$0xff] %v6705_v44  ;;  %9782 = vst [vmem:[#allocation104_spill] sm:$0xff] %v6713_v48  ;;  %v6728_v22 = vsub.f32 %v5393_v63, %v999_v21  ;;  %v1743_v1 = vsel %vm465_vm0, %v1408_v51, 0.0  ;;  %v1409_v21 = vmul.f32 %v6713_v48, %v6713_v48  ;;  %v5395_v63 = vld [vmem:[%s5580_s18 + $0x320] sm:$0xff]  ;;  %v1004_v51 = vmul.f32 0.0051020407, %v6184_v32 }
 0x15c   : > { %9778 = vst [vmem:[#allocation100_spill] sm:$0xff] %v6693_v34  ;;  %1725 = vadd.xlane.f32.xlu1 %v1724_v38  ;;  %v1732_v38 = vadd.f32 %v1731_v0, %v1401_v61  ;;  %v1410_v47 = vmul.f32 %v6693_v34, %v6693_v34  ;;  %9784 = vst [vmem:[#allocation106_spill] sm:$0xff] %v6721_v12  ;;  %v1412_v0 = vmul.f32 %v6705_v44, %v6705_v44  ;;  %v5397_v48 = vld [vmem:[%s5580_s18 + $0x330] sm:$0xff] }
 0x15d   : > { %1721 = vadd.xlane.f32.xlu0 %v1720_v29  ;;  %v6708_v23 = vpop.xlane.xlu1 %840  ;;  %v1002_v29 = vmul.f32 0.0051020407, %v6155_v53  ;;  %9785 = vst [vmem:[#allocation107_spill] sm:$0xff] %v6728_v22  ;;  %v6733_v61 = vsub.f32 %v5394_v6, %v1001_v7  ;;  %v1003_v34 = vmul.f32 0.0051020407, %v9787_v36  ;;  %v1740_v44 = vadd.f32 %v1739_v9, %v1405_v13  ;;  %v5396_v36 = vld [vmem:[%s5580_s18 + $0x348] sm:$0xff] }
 0x15e   : > { %9781 = vst [vmem:[#allocation103_spill] sm:$0xff] %v6708_v23  ;;  %v6715_v16 = vpop.xlane.xlu0 %836  ;;  %v1736_v6 = vadd.f32 %v1735_v56, %v1403_v46  ;;  %v1414_v23 = vmul.f32 %v6721_v12, %v6721_v12  ;;  %v1411_v9 = vmul.f32 %v6728_v22, %v6728_v22  ;;  %v5398_v13 = vld [vmem:[%s5580_s18 + $0x358] sm:$0xff] }
 0x15f   : > { %9783 = vst [vmem:[#allocation105_spill] sm:$0xff] %v6715_v16  ;;  %9786 = vst [vmem:[#allocation108_spill] sm:$0xff] %v6733_v61  ;;  %v6754_v16 = vsub.f32 %v5397_v48, %v1001_v7  ;;  %v1416_v46 = vmul.f32 %v6733_v61, %v6733_v61  ;;  %v6761_v56 = vsub.f32 %v5398_v13, %v1003_v34  ;;  %v5399_v7 = vld [vmem:[%s5580_s18 + $0x340] sm:$0xff] }
 0x160   : > { %1733 = vadd.xlane.f32.xlu1 %v1732_v38  ;;  %v6742_v38 = vsub.f32 %v5395_v63, %v1000_v25  ;;  %v1744_v25 = vadd.f32 %v1743_v1, %v1407_v41  ;;  %v6769_v48 = vsub.f32 %v5399_v7, %v1002_v29  ;;  %v9794_v41 = vld [vmem:[#allocation28_spill] sm:$0xff]  ;;  %v1755_v22 = vsel %vm465_vm0, %v1414_v23, 0.0 }
 0x161   : > { %1729 = vadd.xlane.f32.xlu0 %v1728_v4  ;;  %v6736_v53 = vpop.xlane.xlu1 %848  ;;  %v6749_v4 = vsub.f32 %v5396_v36, %v1002_v29  ;;  %9791 = vst [vmem:[#allocation111_spill] sm:$0xff] %v6754_v16  ;;  %9792 = vst [vmem:[#allocation112_spill] sm:$0xff] %v6761_v56  ;;  %v1005_v1 = vmul.f32 0.0051020407, %v9794_v41  ;;  %v1415_v29 = vmul.f32 %v6754_v16, %v6754_v16  ;;  %v5401_v7 = vld [vmem:[%s5580_s18 + $0x350] sm:$0xff]  ;;  %v5402_v16 = vld [vmem:[%s5580_s18 + $0x378] sm:$0xff] }
 0x162   : > { %9788 = vst [vmem:[#allocation23_spill] sm:$0xff] %v6736_v53  ;;  %9789 = vst [vmem:[#allocation109_spill] sm:$0xff] %v6742_v38  ;;  %v6744_v19 = vpop.xlane.xlu0 %844  ;;  %v1747_v53 = vsel %vm465_vm0, %v1410_v47, 0.0  ;;  %v1751_v47 = vsel %vm465_vm0, %v1412_v0, 0.0  ;;  %v1006_v0 = vmul.f32 0.0051020407, %v6212_v17  ;;  %v6784_v41 = vsub.f32 %v5401_v7, %v1003_v34 }
 0x163   : > { %9790 = vst [vmem:[#allocation110_spill] sm:$0xff] %v6749_v4  ;;  %9793 = vst [vmem:[#allocation113_spill] sm:$0xff] %v6769_v48  ;;  %v1748_v36 = vadd.f32 %v1747_v53, %v1409_v21  ;;  %v1418_v13 = vmul.f32 %v6749_v4, %v6749_v4  ;;  %v1420_v53 = vmul.f32 %v6761_v56, %v6761_v56  ;;  %v1007_v21 = vmul.f32 0.0051020407, %v6203_v54 }
 0x164   : > { %1741 = vadd.xlane.f32.xlu1 %v1740_v44  ;;  %v1413_v44 = vmul.f32 %v6742_v38, %v6742_v38  ;;  %9796 = vst [vmem:[#allocation114_spill] sm:$0xff] %v6784_v41  ;;  %v1752_v4 = vadd.f32 %v1751_v47, %v1411_v9  ;;  %v1759_v17 = vsel %vm465_vm0, %v1416_v46, 0.0  ;;  %v1417_v23 = vmul.f32 %v6769_v48, %v6769_v48  ;;  %v5404_v9 = vld [vmem:[%s5580_s18 + $0x388] sm:$0xff] }
 0x165   : > { %1737 = vadd.xlane.f32.xlu0 %v1736_v6  ;;  %v6763_v32 = vpop.xlane.xlu1 %856  ;;  %v5400_v6 = vld [vmem:[%s5580_s18 + $0x368] sm:$0xff]  ;;  %v6795_v34 = vsub.f32 %v5402_v16, %v1005_v1  ;;  %v6805_v47 = vsub.f32 %v5404_v9, %v1006_v0  ;;  %v1008_v46 = vmul.f32 0.0051020407, %v6240_v30  ;;  %v1763_v48 = vsel %vm465_vm0, %v1418_v13, 0.0 }
 0x166   : > { %v6772_v63 = vpop.xlane.xlu0 %852  ;;  %v6777_v61 = vsub.f32 %v5400_v6, %v1004_v51  ;;  %v1756_v54 = vadd.f32 %v1755_v22, %v1413_v44  ;;  %v1419_v16 = vmul.f32 %v6784_v41, %v6784_v41  ;;  %v5406_v22 = vld [vmem:[%s5580_s18 + $0x398] sm:$0xff]  ;;  %v1009_v9 = vmul.f32 0.0051020407, %v6229_v20  ;;  %v5409_v41 = vld [vmem:[%s5580_s18 + $0x390] sm:$0xff] }
 0x167   : > { %9797 = vst [vmem:[#allocation115_spill] sm:$0xff] %v6795_v34  ;;  %9799 = vst [vmem:[#allocation117_spill] sm:$0xff] %v6805_v47  ;;  %v6815_v44 = vsub.f32 %v5406_v22, %v1007_v21  ;;  %v1767_v30 = vsel %vm465_vm0, %v1420_v53, 0.0  ;;  %v1424_v13 = vmul.f32 %v6795_v34, %v6795_v34  ;;  %v1426_v20 = vmul.f32 %v6805_v47, %v6805_v47 }
 0x168   : > { %9795 = vst [vmem:[#allocation28_spill] sm:$0xff] %v6777_v61  ;;  %1749 = vadd.xlane.f32.xlu1 %v1748_v36  ;;  %v5403_v36 = vld [vmem:[%s5580_s18 + $0x360] sm:$0xff]  ;;  %v1010_v53 = vmul.f32 0.0051020407, %v6268_v62  ;;  %v1011_v62 = vmul.f32 0.0051020407, %v6258_v60 }
 0x169   : > { %1745 = vadd.xlane.f32.xlu0 %v1744_v25  ;;  %v6789_v6 = vpop.xlane.xlu1 %864  ;;  %v6798_v7 = vsub.f32 %v5403_v36, %v1004_v51  ;;  %v1422_v25 = vmul.f32 %v6777_v61, %v6777_v61  ;;  %v1760_v51 = vadd.f32 %v1759_v17, %v1415_v29  ;;  %v5405_v36 = vld [vmem:[%s5580_s18 + $0x370] sm:$0xff]  ;;  %9801 = vst [vmem:[#allocation119_spill] sm:$0xff] %v6815_v44 }
 0x16a   : > { %v6800_v56 = vpop.xlane.xlu0 %860  ;;  %v6812_v12 = vsub.f32 %v5405_v36, %v1005_v1  ;;  %v5407_v1 = vld [vmem:[%s5580_s18 + $0x380] sm:$0xff]  ;;  %v1764_v36 = vadd.f32 %v1763_v48, %v1417_v23  ;;  %v1428_v23 = vmul.f32 %v6815_v44, %v6815_v44  ;;  %v5412_v44 = vld [vmem:[%s5580_s18 + $0x3c8] sm:$0xff] }
 0x16b   : > { %9798 = vst [vmem:[#allocation116_spill] sm:$0xff] %v6798_v7  ;;  %v1421_v29 = vmul.f32 %v6798_v7, %v6798_v7  ;;  %v6826_v17 = vsub.f32 %v5407_v1, %v1006_v0  ;;  %v1771_v34 = vsel %vm465_vm0, %v1422_v25, 0.0  ;;  %v6838_v7 = vsub.f32 %v5409_v41, %v1007_v21  ;;  %v5410_v1 = vld [vmem:[%s5580_s18 + $0x3b8] sm:$0xff]  ;;  %v5411_v21 = vld [vmem:[%s5580_s18 + $0x3a0] sm:$0xff] }
 0x16c   : > { %1757 = vadd.xlane.f32.xlu1 %v1756_v54  ;;  %9800 = vst [vmem:[#allocation118_spill] sm:$0xff] %v6812_v12  ;;  %v1768_v0 = vadd.f32 %v1767_v30, %v1419_v16  ;;  %v1423_v48 = vmul.f32 %v6812_v12, %v6812_v12  ;;  %v6845_v47 = vsub.f32 %v5410_v1, %v1009_v9  ;;  %v1779_v12 = vsel %vm465_vm0, %v1426_v20, 0.0 }
 0x16d   : > { %1753 = vadd.xlane.f32.xlu0 %v1752_v4  ;;  %v6818_v61 = vpop.xlane.xlu1 %872  ;;  %9802 = vst [vmem:[#allocation120_spill] sm:$0xff] %v6826_v17  ;;  %v5408_v4 = vld [vmem:[%s5580_s18 + $0x3a8] sm:$0xff]  ;;  %9804 = vst [vmem:[#allocation122_spill] sm:$0xff] %v6838_v7  ;;  %v1425_v41 = vmul.f32 %v6826_v17, %v6826_v17  ;;  %v6853_v16 = vsub.f32 %v5411_v21, %v1008_v46  ;;  %v6861_v60 = vsub.f32 %v5412_v44, %v1010_v53  ;;  %v5413_v21 = vld [vmem:[%s5580_s18 + $0x3b0] sm:$0xff] }
 0x16e   : > { %v6828_v54 = vpop.xlane.xlu0 %868  ;;  %v6833_v22 = vsub.f32 %v5408_v4, %v1008_v46  ;;  %9805 = vst [vmem:[#allocation123_spill] sm:$0xff] %v6845_v47  ;;  %v1775_v4 = vsel %vm465_vm0, %v1424_v13, 0.0  ;;  %v1427_v46 = vmul.f32 %v6838_v7, %v6838_v7  ;;  %v6868_v17 = vsub.f32 %v5413_v21, %v1009_v9  ;;  %v5414_v13 = vld [vmem:[%s5580_s18 + $0x3d8] sm:$0xff]  ;;  %v5415_v21 = vld [vmem:[%s5580_s18 + $0x3c0] sm:$0xff] }
 0x16f   : > { %9806 = vst [vmem:[#allocation124_spill] sm:$0xff] %v6853_v16  ;;  %9807 = vst [vmem:[#allocation125_spill] sm:$0xff] %v6861_v60  ;;  %v1013_v44 = vmul.f32 0.0051020407, %v6288_v45  ;;  %v1783_v20 = vsel %vm465_vm0, %v1428_v23, 0.0  ;;  %v1429_v9 = vmul.f32 %v6853_v16, %v6853_v16  ;;  %v5416_v45 = vld [vmem:[%s5580_s18 + $0x3e8] sm:$0xff] }
 0x170   : > { %9803 = vst [vmem:[#allocation121_spill] sm:$0xff] %v6833_v22  ;;  %1765 = vadd.xlane.f32.xlu1 %v1764_v36  ;;  %v1772_v36 = vadd.f32 %v1771_v34, %v1421_v29  ;;  %v1430_v1 = vmul.f32 %v6833_v22, %v6833_v22  ;;  %9808 = vst [vmem:[#allocation126_spill] sm:$0xff] %v6868_v17  ;;  %v1432_v34 = vmul.f32 %v6845_v47, %v6845_v47  ;;  %v5417_v16 = vld [vmem:[%s5580_s18 + $0x3d0] sm:$0xff] }
 0x171   : > { %1761 = vadd.xlane.f32.xlu0 %v1760_v51  ;;  %v6848_v25 = vpop.xlane.xlu1 %880  ;;  %v1012_v51 = vmul.f32 0.0051020407, %v6295_v15  ;;  %v6873_v29 = vsub.f32 %v5414_v13, %v1011_v62  ;;  %v1780_v47 = vadd.f32 %v1779_v12, %v1425_v41  ;;  %v1776_v13 = vadd.f32 %v1775_v4, %v1423_v48  ;;  %v5418_v41 = vld [vmem:[%s5580_s18 + $0x3f8] sm:$0xff] }
 0x172   : > { %v6855_v30 = vpop.xlane.xlu0 %876  ;;  %v1434_v22 = vmul.f32 %v6861_v60, %v6861_v60  ;;  %v1014_v23 = vmul.f32 0.0051020407, %v6324_v31  ;;  %v1787_v38 = vsel %vm465_vm0, %v1430_v1, 0.0  ;;  %v1431_v12 = vmul.f32 %v6868_v17, %v6868_v17 }
 0x173   : > { %9809 = vst [vmem:[#allocation127_spill] sm:$0xff] %v6873_v29  ;;  %v1436_v48 = vmul.f32 %v6873_v29, %v6873_v29  ;;  %v6901_v4 = vsub.f32 %v5418_v41, %v1013_v44  ;;  %v1791_v1 = vsel %vm465_vm0, %v1432_v34, 0.0  ;;  %v1016_v34 = vmul.f32 0.0051020407, %v6352_v10 }
 0x174   : > { %1773 = vadd.xlane.f32.xlu1 %v1772_v36  ;;  %v6882_v36 = vsub.f32 %v5415_v21, %v1010_v53  ;;  %v1784_v53 = vadd.f32 %v1783_v20, %v1427_v46  ;;  %v1015_v46 = vmul.f32 0.0051020407, %v6316_v40  ;;  %v1788_v21 = vadd.f32 %v1787_v38, %v1429_v9 }
 0x175   : > { %1769 = vadd.xlane.f32.xlu0 %v1768_v0  ;;  %v6876_v15 = vpop.xlane.xlu1 %888  ;;  %v6889_v0 = vsub.f32 %v5416_v45, %v1012_v51  ;;  %9814 = vst [vmem:[#allocation132_spill] sm:$0xff] %v6901_v4  ;;  %v1795_v29 = vsel %vm465_vm0, %v1434_v22, 0.0  ;;  %v1440_v38 = vmul.f32 %v6901_v4, %v6901_v4  ;;  %v1017_v9 = vmul.f32 0.0051020407, %v6343_v57 }
 0x176   : > { %9810 = vst [vmem:[#allocation128_spill] sm:$0xff] %v6876_v15  ;;  %9811 = vst [vmem:[#allocation129_spill] sm:$0xff] %v6882_v36  ;;  %v6884_v7 = vpop.xlane.xlu0 %884  ;;  %v6894_v15 = vsub.f32 %v5417_v16, %v1011_v62  ;;  %v5419_v62 = vld [vmem:[%s5580_s18 + $0x3e0] sm:$0xff]  ;;  %v1792_v17 = vadd.f32 %v1791_v1, %v1431_v12  ;;  %v1799_v10 = vsel %vm465_vm0, %v1436_v48, 0.0  ;;  %v5424_v12 = vld [vmem:[%s5580_s18 + $0x428] sm:$0xff] }
 0x177   : > { %9812 = vst [vmem:[#allocation130_spill] sm:$0xff] %v6889_v0  ;;  %v6909_v16 = vsub.f32 %v5419_v62, %v1012_v51  ;;  %v1438_v45 = vmul.f32 %v6889_v0, %v6889_v0  ;;  %v5421_v62 = vld [vmem:[%s5580_s18 + $0x3f0] sm:$0xff]  ;;  %v6945_v1 = vsub.f32 %v5424_v12, %v1016_v34  ;;  %v1018_v48 = vmul.f32 0.0051020407, %v6380_v11 }
 0x178   : > { %9813 = vst [vmem:[#allocation131_spill] sm:$0xff] %v6894_v15  ;;  %1781 = vadd.xlane.f32.xlu1 %v1780_v47  ;;  %v1433_v47 = vmul.f32 %v6882_v36, %v6882_v36  ;;  %v1435_v51 = vmul.f32 %v6894_v15, %v6894_v15  ;;  %v6924_v40 = vsub.f32 %v5421_v62, %v1013_v44  ;;  %v5422_v15 = vld [vmem:[%s5580_s18 + $0x418] sm:$0xff]  ;;  %v1019_v12 = vmul.f32 0.0051020407, %v6369_v37  ;;  %v5437_v36 = vld [vmem:[%s5580_s18 + $0x470] sm:$0xff] }
 0x179   : > { %1777 = vadd.xlane.f32.xlu0 %v1776_v13  ;;  %v6903_v31 = vpop.xlane.xlu1 %896  ;;  %9815 = vst [vmem:[#allocation133_spill] sm:$0xff] %v6909_v16  ;;  %v5420_v13 = vld [vmem:[%s5580_s18 + $0x408] sm:$0xff]  ;;  %v1437_v22 = vmul.f32 %v6909_v16, %v6909_v16  ;;  %v6935_v44 = vsub.f32 %v5422_v15, %v1015_v46  ;;  %9820 = vst [vmem:[#allocation138_spill] sm:$0xff] %v6945_v1  ;;  %v1803_v0 = vsel %vm465_vm0, %v1438_v45, 0.0  ;;  %v1807_v11 = vsel %vm465_vm0, %v1440_v38, 0.0 }
 0x17a   : > { %v6912_v20 = vpop.xlane.xlu0 %892  ;;  %v6917_v41 = vsub.f32 %v5420_v13, %v1014_v23  ;;  %9817 = vst [vmem:[#allocation135_spill] sm:$0xff] %v6924_v40  ;;  %v1796_v57 = vadd.f32 %v1795_v29, %v1433_v47  ;;  %v1439_v15 = vmul.f32 %v6924_v40, %v6924_v40  ;;  %v5426_v29 = vld [vmem:[%s5580_s18 + $0x438] sm:$0xff]  ;;  %v1446_v37 = vmul.f32 %v6945_v1, %v6945_v1  ;;  %v5429_v40 = vld [vmem:[%s5580_s18 + $0x430] sm:$0xff] }
 0x17b   : > { %9818 = vst [vmem:[#allocation136_spill] sm:$0xff] %v6935_v44  ;;  %v6955_v47 = vsub.f32 %v5426_v29, %v1017_v9  ;;  %v1444_v45 = vmul.f32 %v6935_v44, %v6935_v44  ;;  %v1020_v38 = vmul.f32 0.0051020407, %v6408_v2  ;;  %v1021_v2 = vmul.f32 0.0051020407, %v6398_v49 }
 0x17c   : > { %9816 = vst [vmem:[#allocation134_spill] sm:$0xff] %v6917_v41  ;;  %1789 = vadd.xlane.f32.xlu1 %v1788_v21  ;;  %v5423_v21 = vld [vmem:[%s5580_s18 + $0x400] sm:$0xff]  ;;  %v1024_v60 = vmul.f32 0.0051020407, %v6464_v28 }
 0x17d   : > { %1785 = vadd.xlane.f32.xlu0 %v1784_v53  ;;  %v6929_v13 = vpop.xlane.xlu1 %904  ;;  %v6938_v62 = vsub.f32 %v5423_v21, %v1014_v23  ;;  %v1442_v53 = vmul.f32 %v6917_v41, %v6917_v41  ;;  %v1800_v23 = vadd.f32 %v1799_v10, %v1435_v51  ;;  %v5425_v21 = vld [vmem:[%s5580_s18 + $0x410] sm:$0xff]  ;;  %9822 = vst [vmem:[#allocation140_spill] sm:$0xff] %v6955_v47 }
 0x17e   : > { %v6940_v4 = vpop.xlane.xlu0 %900  ;;  %v6952_v16 = vsub.f32 %v5425_v21, %v1015_v46  ;;  %v5427_v46 = vld [vmem:[%s5580_s18 + $0x420] sm:$0xff]  ;;  %v1804_v21 = vadd.f32 %v1803_v0, %v1437_v22  ;;  %v1448_v22 = vmul.f32 %v6955_v47, %v6955_v47  ;;  %v5432_v47 = vld [vmem:[%s5580_s18 + $0x468] sm:$0xff] }
 0x17f   : > { %9819 = vst [vmem:[#allocation137_spill] sm:$0xff] %v6938_v62  ;;  %v1441_v51 = vmul.f32 %v6938_v62, %v6938_v62  ;;  %v6966_v10 = vsub.f32 %v5427_v46, %v1016_v34  ;;  %v1811_v44 = vsel %vm465_vm0, %v1442_v53, 0.0  ;;  %v6978_v62 = vsub.f32 %v5429_v40, %v1017_v9  ;;  %v5430_v46 = vld [vmem:[%s5580_s18 + $0x458] sm:$0xff]  ;;  %v5431_v9 = vld [vmem:[%s5580_s18 + $0x440] sm:$0xff] }
 0x180   : > { %1797 = vadd.xlane.f32.xlu1 %v1796_v57  ;;  %9821 = vst [vmem:[#allocation139_spill] sm:$0xff] %v6952_v16  ;;  %v1808_v34 = vadd.f32 %v1807_v11, %v1439_v15  ;;  %v1443_v0 = vmul.f32 %v6952_v16, %v6952_v16  ;;  %v6985_v1 = vsub.f32 %v5430_v46, %v1019_v12  ;;  %v1819_v16 = vsel %vm465_vm0, %v1446_v37, 0.0 }
 0x181   : > { %1793 = vadd.xlane.f32.xlu0 %v1792_v17  ;;  %v6958_v41 = vpop.xlane.xlu1 %912  ;;  %9823 = vst [vmem:[#allocation141_spill] sm:$0xff] %v6966_v10  ;;  %v5428_v17 = vld [vmem:[%s5580_s18 + $0x448] sm:$0xff]  ;;  %9825 = vst [vmem:[#allocation143_spill] sm:$0xff] %v6978_v62  ;;  %v1445_v40 = vmul.f32 %v6966_v10, %v6966_v10  ;;  %v6993_v15 = vsub.f32 %v5431_v9, %v1018_v48  ;;  %v7001_v49 = vsub.f32 %v5432_v47, %v1020_v38  ;;  %v5433_v9 = vld [vmem:[%s5580_s18 + $0x450] sm:$0xff] }
 0x182   : > { %v6968_v57 = vpop.xlane.xlu0 %908  ;;  %v6973_v29 = vsub.f32 %v5428_v17, %v1018_v48  ;;  %9826 = vst [vmem:[#allocation144_spill] sm:$0xff] %v6985_v1  ;;  %v1815_v17 = vsel %vm465_vm0, %v1444_v45, 0.0  ;;  %v1447_v48 = vmul.f32 %v6978_v62, %v6978_v62  ;;  %v7008_v10 = vsub.f32 %v5433_v9, %v1019_v12  ;;  %v5434_v45 = vld [vmem:[%s5580_s18 + $0x478] sm:$0xff] }
 0x183   : > { %9827 = vst [vmem:[#allocation145_spill] sm:$0xff] %v6993_v15  ;;  %9828 = vst [vmem:[#allocation146_spill] sm:$0xff] %v7001_v49  ;;  %v1023_v47 = vmul.f32 0.0051020407, %v6428_v42  ;;  %v1823_v37 = vsel %vm465_vm0, %v1448_v22, 0.0  ;;  %v5543_v62 = vmov 0   ;;  %v1449_v12 = vmul.f32 %v6993_v15, %v6993_v15 }
 0x184   : > { %9824 = vst [vmem:[#allocation142_spill] sm:$0xff] %v6973_v29  ;;  %1805 = vadd.xlane.f32.xlu1 %v1804_v21  ;;  %v1812_v21 = vadd.f32 %v1811_v44, %v1441_v51  ;;  %v1450_v46 = vmul.f32 %v6973_v29, %v6973_v29  ;;  %9829 = vst [vmem:[#allocation147_spill] sm:$0xff] %v7008_v10  ;;  %v1452_v44 = vmul.f32 %v6985_v1, %v6985_v1 }
 0x185   : > { %1801 = vadd.xlane.f32.xlu0 %v1800_v23  ;;  %v6988_v53 = vpop.xlane.xlu1 %920  ;;  %v1022_v23 = vmul.f32 0.0051020407, %v6435_v24  ;;  %v7013_v51 = vsub.f32 %v5434_v45, %v1021_v2  ;;  %5050 = vset.pattern.permute.xlu1 %v5543_v62  ;;  %v1820_v45 = vadd.f32 %v1819_v16, %v1445_v40  ;;  %v1816_v29 = vadd.f32 %v1815_v17, %v1443_v0  ;;  %v5438_v0 = vld [vmem:[%s5580_s18 + $0x498] sm:$0xff] }
 0x186   : > { %v6995_v11 = vpop.xlane.xlu0 %916  ;;  %5049 = vset.pattern.permute.xlu0 %v5543_v62  ;;  %v1454_v42 = vmul.f32 %v7001_v49, %v7001_v49  ;;  %v1827_v15 = vsel %vm465_vm0, %v1450_v46, 0.0  ;;  %v1451_v16 = vmul.f32 %v7008_v10, %v7008_v10  ;;  %v7041_v40 = vsub.f32 %v5438_v0, %v1023_v47 }
 0x187   : > { %9830 = vst [vmem:[#allocation148_spill] sm:$0xff] %v7013_v51  ;;  %v1456_v62 = vmul.f32 %v7013_v51, %v7013_v51  ;;  %v1831_v17 = vsel %vm465_vm0, %v1452_v44, 0.0  ;;  %v1026_v44 = vmul.f32 0.0051020407, %v6492_v18 }
 0x188   : > { %1813 = vadd.xlane.f32.xlu1 %v1812_v21  ;;  %v5435_v21 = vld [vmem:[%s5580_s18 + $0x460] sm:$0xff]  ;;  %9834 = vst [vmem:[#allocation152_spill] sm:$0xff] %v7041_v40  ;;  %v1835_v51 = vsel %vm465_vm0, %v1454_v42, 0.0  ;;  %v1832_v10 = vadd.f32 %v1831_v17, %v1451_v16  ;;  %v5444_v16 = vld [vmem:[%s5580_s18 + $0x4c8] sm:$0xff] }
 0x189   : > { %1809 = vadd.xlane.f32.xlu0 %v1808_v34  ;;  %v7016_v24 = vpop.xlane.xlu1 %928  ;;  %v7022_v9 = vsub.f32 %v5435_v21, %v1020_v38  ;;  %v5436_v34 = vld [vmem:[%s5580_s18 + $0x488] sm:$0xff]  ;;  %v7034_v38 = vsub.f32 %v5437_v36, %v1021_v2  ;;  %v1824_v21 = vadd.f32 %v1823_v37, %v1447_v48  ;;  %v5439_v2 = vld [vmem:[%s5580_s18 + $0x480] sm:$0xff]  ;;  %v1025_v48 = vmul.f32 0.0051020407, %v6456_v59 }
 0x18a   : > { %v7024_v1 = vpop.xlane.xlu0 %924  ;;  %v7029_v22 = vsub.f32 %v5436_v34, %v1022_v23  ;;  %v7049_v46 = vsub.f32 %v5439_v2, %v1022_v23  ;;  %v5441_v2 = vld [vmem:[%s5580_s18 + $0x490] sm:$0xff]  ;;  %v1839_v18 = vsel %vm465_vm0, %v1456_v62, 0.0  ;;  %v7085_v17 = vsub.f32 %v5444_v16, %v1026_v44 }
 0x18b   : > { %9831 = vst [vmem:[#allocation149_spill] sm:$0xff] %v7022_v9  ;;  %9833 = vst [vmem:[#allocation151_spill] sm:$0xff] %v7034_v38  ;;  %v1453_v36 = vmul.f32 %v7022_v9, %v7022_v9  ;;  %v1455_v23 = vmul.f32 %v7034_v38, %v7034_v38  ;;  %v7064_v59 = vsub.f32 %v5441_v2, %v1023_v47  ;;  %v5442_v38 = vld [vmem:[%s5580_s18 + $0x4b8] sm:$0xff]  ;;  %v1028_v62 = vmul.f32 0.0051020407, %v6520_v3 }
 0x18c   : > { %9832 = vst [vmem:[#allocation150_spill] sm:$0xff] %v7029_v22  ;;  %1821 = vadd.xlane.f32.xlu1 %v1820_v45  ;;  %9835 = vst [vmem:[#allocation153_spill] sm:$0xff] %v7049_v46  ;;  %v1828_v45 = vadd.f32 %v1827_v15, %v1449_v12  ;;  %v1458_v34 = vmul.f32 %v7029_v22, %v7029_v22  ;;  %v1460_v15 = vmul.f32 %v7041_v40, %v7041_v40 }
 0x18d   : > { %1817 = vadd.xlane.f32.xlu0 %v1816_v29  ;;  %v7043_v28 = vpop.xlane.xlu1 %936  ;;  %v5440_v29 = vld [vmem:[%s5580_s18 + $0x4a8] sm:$0xff]  ;;  %9837 = vst [vmem:[#allocation155_spill] sm:$0xff] %v7064_v59  ;;  %v1027_v12 = vmul.f32 0.0051020407, %v6483_v14  ;;  %v1457_v42 = vmul.f32 %v7049_v46, %v7049_v46  ;;  %v7075_v47 = vsub.f32 %v5442_v38, %v1025_v48  ;;  %v1836_v14 = vadd.f32 %v1835_v51, %v1453_v36  ;;  %v5446_v51 = vld [vmem:[%s5580_s18 + $0x4d8] sm:$0xff] }
 0x18e   : > { %v7052_v37 = vpop.xlane.xlu0 %932  ;;  %v7057_v0 = vsub.f32 %v5440_v29, %v1024_v60  ;;  %9840 = vst [vmem:[#allocation158_spill] sm:$0xff] %v7085_v17  ;;  %v1843_v22 = vsel %vm465_vm0, %v1458_v34, 0.0  ;;  %v1459_v38 = vmul.f32 %v7064_v59, %v7064_v59  ;;  %v1029_v16 = vmul.f32 0.0051020407, %v6509_v35  ;;  %v5449_v59 = vld [vmem:[%s5580_s18 + $0x4d0] sm:$0xff] }
 0x18f   : > { %9838 = vst [vmem:[#allocation156_spill] sm:$0xff] %v7075_v47  ;;  %v7095_v36 = vsub.f32 %v5446_v51, %v1027_v12  ;;  %v1847_v3 = vsel %vm465_vm0, %v1460_v15, 0.0  ;;  %v1464_v34 = vmul.f32 %v7075_v47, %v7075_v47  ;;  %v1466_v35 = vmul.f32 %v7085_v17, %v7085_v17 }
 0x190   : > { %9836 = vst [vmem:[#allocation154_spill] sm:$0xff] %v7057_v0  ;;  %1829 = vadd.xlane.f32.xlu1 %v1828_v45  ;;  %v5443_v45 = vld [vmem:[%s5580_s18 + $0x4a0] sm:$0xff]  ;;  %v1030_v15 = vmul.f32 0.0051020407, %v6548_v26  ;;  %v1031_v26 = vmul.f32 0.0051020407, %v6538_v50 }
 0x191   : > { %1825 = vadd.xlane.f32.xlu0 %v1824_v21  ;;  %v7069_v29 = vpop.xlane.xlu1 %944  ;;  %v7078_v2 = vsub.f32 %v5443_v45, %v1024_v60  ;;  %v1462_v21 = vmul.f32 %v7057_v0, %v7057_v0  ;;  %v1840_v60 = vadd.f32 %v1839_v18, %v1455_v23  ;;  %v5445_v45 = vld [vmem:[%s5580_s18 + $0x4b0] sm:$0xff]  ;;  %9842 = vst [vmem:[#allocation160_spill] sm:$0xff] %v7095_v36 }
 0x192   : > { %v7080_v40 = vpop.xlane.xlu0 %940  ;;  %v7092_v46 = vsub.f32 %v5445_v45, %v1025_v48  ;;  %v5447_v48 = vld [vmem:[%s5580_s18 + $0x4c0] sm:$0xff]  ;;  %v1844_v45 = vadd.f32 %v1843_v22, %v1457_v42  ;;  %v1468_v42 = vmul.f32 %v7095_v36, %v7095_v36  ;;  %v5452_v36 = vld [vmem:[%s5580_s18 + $0x508] sm:$0xff] }
 0x193   : > { %9839 = vst [vmem:[#allocation157_spill] sm:$0xff] %v7078_v2  ;;  %v1461_v23 = vmul.f32 %v7078_v2, %v7078_v2  ;;  %v7106_v18 = vsub.f32 %v5447_v48, %v1026_v44  ;;  %v1851_v47 = vsel %vm465_vm0, %v1462_v21, 0.0  ;;  %v7118_v2 = vsub.f32 %v5449_v59, %v1027_v12  ;;  %v5450_v48 = vld [vmem:[%s5580_s18 + $0x4f8] sm:$0xff]  ;;  %v5451_v12 = vld [vmem:[%s5580_s18 + $0x4e0] sm:$0xff] }
 0x194   : > { %1837 = vadd.xlane.f32.xlu1 %v1836_v14  ;;  %9841 = vst [vmem:[#allocation159_spill] sm:$0xff] %v7092_v46  ;;  %v1848_v44 = vadd.f32 %v1847_v3, %v1459_v38  ;;  %v1463_v22 = vmul.f32 %v7092_v46, %v7092_v46  ;;  %v7125_v17 = vsub.f32 %v5450_v48, %v1029_v16  ;;  %v1859_v46 = vsel %vm465_vm0, %v1466_v35, 0.0 }
 0x195   : > { %1833 = vadd.xlane.f32.xlu0 %v1832_v10  ;;  %v7098_v0 = vpop.xlane.xlu1 %1557  ;;  %9843 = vst [vmem:[#allocation161_spill] sm:$0xff] %v7106_v18  ;;  %v5448_v10 = vld [vmem:[%s5580_s18 + $0x4e8] sm:$0xff]  ;;  %9845 = vst [vmem:[#allocation163_spill] sm:$0xff] %v7118_v2  ;;  %v1465_v59 = vmul.f32 %v7106_v18, %v7106_v18  ;;  %v7133_v38 = vsub.f32 %v5451_v12, %v1028_v62  ;;  %v7141_v50 = vsub.f32 %v5452_v36, %v1030_v15  ;;  %v5453_v12 = vld [vmem:[%s5580_s18 + $0x4f0] sm:$0xff] }
 0x196   : > { %v7108_v14 = vpop.xlane.xlu0 %948  ;;  %v7113_v51 = vsub.f32 %v5448_v10, %v1028_v62  ;;  %9846 = vst [vmem:[#allocation164_spill] sm:$0xff] %v7125_v17  ;;  %v1855_v10 = vsel %vm465_vm0, %v1464_v34, 0.0  ;;  %v1467_v62 = vmul.f32 %v7118_v2, %v7118_v2  ;;  %v7148_v18 = vsub.f32 %v5453_v12, %v1029_v16  ;;  %v5454_v34 = vld [vmem:[%s5580_s18 + $0x518] sm:$0xff]  ;;  %v5455_v12 = vld [vmem:[%s5580_s18 + $0x500] sm:$0xff] }
 0x197   : > { %9847 = vst [vmem:[#allocation165_spill] sm:$0xff] %v7133_v38  ;;  %9848 = vst [vmem:[#allocation166_spill] sm:$0xff] %v7141_v50  ;;  %v1033_v36 = vmul.f32 0.0051020407, %v6568_v27  ;;  %v1863_v35 = vsel %vm465_vm0, %v1468_v42, 0.0  ;;  %v1469_v16 = vmul.f32 %v7133_v38, %v7133_v38  ;;  %v5456_v27 = vld [vmem:[%s5580_s18 + $0x528] sm:$0xff] }
 0x198   : > { %9844 = vst [vmem:[#allocation162_spill] sm:$0xff] %v7113_v51  ;;  %1845 = vadd.xlane.f32.xlu1 %v1844_v45  ;;  %v1852_v45 = vadd.f32 %v1851_v47, %v1461_v23  ;;  %v1470_v48 = vmul.f32 %v7113_v51, %v7113_v51  ;;  %9849 = vst [vmem:[#allocation167_spill] sm:$0xff] %v7148_v18  ;;  %v1472_v47 = vmul.f32 %v7125_v17, %v7125_v17  ;;  %v5457_v38 = vld [vmem:[%s5580_s18 + $0x510] sm:$0xff] }
 0x199   : > { %1841 = vadd.xlane.f32.xlu0 %v1840_v60  ;;  %v7128_v21 = vpop.xlane.xlu1 %1565  ;;  %v1032_v60 = vmul.f32 0.0051020407, %v6575_v58  ;;  %v7153_v23 = vsub.f32 %v5454_v34, %v1031_v26  ;;  %v1860_v17 = vadd.f32 %v1859_v46, %v1465_v59  ;;  %v1856_v34 = vadd.f32 %v1855_v10, %v1463_v22  ;;  %v5458_v59 = vld [vmem:[%s5580_s18 + $0x538] sm:$0xff] }
 0x19a   : > { %v7135_v3 = vpop.xlane.xlu0 %1561  ;;  %v1474_v51 = vmul.f32 %v7141_v50, %v7141_v50  ;;  %v1034_v42 = vmul.f32 0.0051020407, %v6604_v39  ;;  %v1867_v49 = vsel %vm465_vm0, %v1470_v48, 0.0  ;;  %v7174_v9 = vsub.f32 %v5457_v38, %v1031_v26  ;;  %v5459_v26 = vld [vmem:[%s5580_s18 + $0x520] sm:$0xff] }
 0x19b   : > { %9850 = vst [vmem:[#allocation168_spill] sm:$0xff] %v7153_v23  ;;  %v1471_v46 = vmul.f32 %v7148_v18, %v7148_v18  ;;  %v1476_v22 = vmul.f32 %v7153_v23, %v7153_v23  ;;  %v7181_v10 = vsub.f32 %v5458_v59, %v1033_v36  ;;  %v1871_v48 = vsel %vm465_vm0, %v1472_v47, 0.0 }
 0x19c   : > { %1853 = vadd.xlane.f32.xlu1 %v1852_v45  ;;  %v7162_v45 = vsub.f32 %v5455_v12, %v1030_v15  ;;  %9853 = vst [vmem:[#allocation171_spill] sm:$0xff] %v7174_v9  ;;  %v1864_v15 = vadd.f32 %v1863_v35, %v1467_v62  ;;  %v7189_v38 = vsub.f32 %v5459_v26, %v1032_v60  ;;  %v9856_v62 = vld [vmem:[#allocation89_spill] sm:$0xff]  ;;  %v1036_v47 = vmul.f32 0.0051020407, %v6632_v5  ;;  %v5461_v26 = vld [vmem:[%s5580_s18 + $0x530] sm:$0xff] }
 0x19d   : > { %1849 = vadd.xlane.f32.xlu0 %v1848_v44  ;;  %v7156_v58 = vpop.xlane.xlu1 %1573  ;;  %v7169_v44 = vsub.f32 %v5456_v27, %v1032_v60  ;;  %9854 = vst [vmem:[#allocation172_spill] sm:$0xff] %v7181_v10  ;;  %v1035_v35 = vmul.f32 0.0051020407, %v9856_v62  ;;  %v1868_v27 = vadd.f32 %v1867_v49, %v1469_v16  ;;  %v1875_v18 = vsel %vm465_vm0, %v1474_v51, 0.0 }
 0x19e   : > { %9851 = vst [vmem:[#allocation169_spill] sm:$0xff] %v7162_v45  ;;  %v7164_v2 = vpop.xlane.xlu0 %1569  ;;  %9855 = vst [vmem:[#allocation173_spill] sm:$0xff] %v7189_v38  ;;  %v1475_v60 = vmul.f32 %v7174_v9, %v7174_v9  ;;  %v7204_v62 = vsub.f32 %v5461_v26, %v1033_v36  ;;  %v1480_v49 = vmul.f32 %v7181_v10, %v7181_v10  ;;  %v1037_v16 = vmul.f32 0.0051020407, %v6623_v33  ;;  %v5462_v9 = vld [vmem:[%s5580_s18 + $0x558] sm:$0xff] }
 0x19f   : > { %9852 = vst [vmem:[#allocation170_spill] sm:$0xff] %v7169_v44  ;;  %v1478_v59 = vmul.f32 %v7169_v44, %v7169_v44  ;;  %v1872_v44 = vadd.f32 %v1871_v48, %v1471_v46  ;;  %v1879_v5 = vsel %vm465_vm0, %v1476_v22, 0.0  ;;  %v1477_v51 = vmul.f32 %v7189_v38, %v7189_v38  ;;  %v5464_v46 = vld [vmem:[%s5580_s18 + $0x568] sm:$0xff] }
 0x1a0   : > { %1861 = vadd.xlane.f32.xlu1 %v1860_v17  ;;  %v1473_v17 = vmul.f32 %v7162_v45, %v7162_v45  ;;  %9858 = vst [vmem:[#allocation174_spill] sm:$0xff] %v7204_v62  ;;  %v7215_v36 = vsub.f32 %v5462_v9, %v1035_v35  ;;  %v7225_v48 = vsub.f32 %v5464_v46, %v1036_v47  ;;  %v1038_v22 = vmul.f32 0.0051020407, %v6660_v8 }
 0x1a1   : > { %1857 = vadd.xlane.f32.xlu0 %v1856_v34  ;;  %v7183_v39 = vpop.xlane.xlu1 %1581  ;;  %v5460_v34 = vld [vmem:[%s5580_s18 + $0x548] sm:$0xff]  ;;  %v1883_v38 = vsel %vm465_vm0, %v1478_v59, 0.0  ;;  %v1479_v9 = vmul.f32 %v7204_v62, %v7204_v62  ;;  %v1039_v46 = vmul.f32 0.0051020407, %v6649_v52  ;;  %v1887_v8 = vsel %vm465_vm0, %v1480_v49, 0.0  ;;  %v5469_v62 = vld [vmem:[%s5580_s18 + $0x570] sm:$0xff] }
 0x1a2   : > { %v7192_v12 = vpop.xlane.xlu0 %1577  ;;  %v7197_v23 = vsub.f32 %v5460_v34, %v1034_v42  ;;  %9859 = vst [vmem:[#allocation175_spill] sm:$0xff] %v7215_v36  ;;  %v1876_v33 = vadd.f32 %v1875_v18, %v1473_v17  ;;  %9861 = vst [vmem:[#allocation177_spill] sm:$0xff] %v7225_v48  ;;  %v5466_v18 = vld [vmem:[%s5580_s18 + $0x578] sm:$0xff]  ;;  %v1484_v59 = vmul.f32 %v7215_v36, %v7215_v36  ;;  %v1040_v49 = vmul.f32 0.0051020407, %v6688_v43 }
 0x1a3   : > { %v7235_v17 = vsub.f32 %v5466_v18, %v1037_v16  ;;  %v1486_v52 = vmul.f32 %v7225_v48, %v7225_v48  ;;  %v1041_v43 = vmul.f32 0.0051020407, %v6678_v55 }
 0x1a4   : > { %9857 = vst [vmem:[#allocation89_spill] sm:$0xff] %v7197_v23  ;;  %1869 = vadd.xlane.f32.xlu1 %v1868_v27  ;;  %v5463_v27 = vld [vmem:[%s5580_s18 + $0x540] sm:$0xff] }
 0x1a5   : > { %1865 = vadd.xlane.f32.xlu0 %v1864_v15  ;;  %v7209_v34 = vpop.xlane.xlu1 %1589  ;;  %v7218_v26 = vsub.f32 %v5463_v27, %v1034_v42  ;;  %v1482_v15 = vmul.f32 %v7197_v23, %v7197_v23  ;;  %v1880_v42 = vadd.f32 %v1879_v5, %v1475_v60  ;;  %v5465_v27 = vld [vmem:[%s5580_s18 + $0x550] sm:$0xff]  ;;  %9863 = vst [vmem:[#allocation179_spill] sm:$0xff] %v7235_v17 }
 0x1a6   : > { %v7220_v10 = vpop.xlane.xlu0 %1585  ;;  %v7232_v50 = vsub.f32 %v5465_v27, %v1035_v35  ;;  %v5467_v35 = vld [vmem:[%s5580_s18 + $0x560] sm:$0xff]  ;;  %v1884_v27 = vadd.f32 %v1883_v38, %v1477_v51  ;;  %v1488_v51 = vmul.f32 %v7235_v17, %v7235_v17  ;;  %v5472_v17 = vld [vmem:[%s5580_s18 + $0x5a8] sm:$0xff] }
 0x1a7   : > { %9860 = vst [vmem:[#allocation176_spill] sm:$0xff] %v7218_v26  ;;  %v1481_v60 = vmul.f32 %v7218_v26, %v7218_v26  ;;  %v7246_v5 = vsub.f32 %v5467_v35, %v1036_v47  ;;  %v1891_v36 = vsel %vm465_vm0, %v1482_v15, 0.0  ;;  %v7258_v26 = vsub.f32 %v5469_v62, %v1037_v16  ;;  %v5470_v35 = vld [vmem:[%s5580_s18 + $0x598] sm:$0xff]  ;;  %v5471_v16 = vld [vmem:[%s5580_s18 + $0x580] sm:$0xff] }
 0x1a8   : > { %1877 = vadd.xlane.f32.xlu1 %v1876_v33  ;;  %9862 = vst [vmem:[#allocation178_spill] sm:$0xff] %v7232_v50  ;;  %v1888_v47 = vadd.f32 %v1887_v8, %v1479_v9  ;;  %v1483_v38 = vmul.f32 %v7232_v50, %v7232_v50  ;;  %v7265_v48 = vsub.f32 %v5470_v35, %v1039_v46 }
 0x1a9   : > { %1873 = vadd.xlane.f32.xlu0 %v1872_v44  ;;  %v7238_v23 = vpop.xlane.xlu1 %1597  ;;  %9865 = vst [vmem:[#allocation181_spill] sm:$0xff] %v7246_v5  ;;  %v5468_v44 = vld [vmem:[%s5580_s18 + $0x588] sm:$0xff]  ;;  %9867 = vst [vmem:[#allocation183_spill] sm:$0xff] %v7258_v26  ;;  %v1485_v62 = vmul.f32 %v7246_v5, %v7246_v5  ;;  %v7273_v9 = vsub.f32 %v5471_v16, %v1038_v22  ;;  %v7281_v55 = vsub.f32 %v5472_v17, %v1040_v49  ;;  %v5473_v16 = vld [vmem:[%s5580_s18 + $0x590] sm:$0xff] }
 0x1aa   : > { %9864 = vst [vmem:[#allocation180_spill] sm:$0xff] %v7238_v23  ;;  %v7248_v33 = vpop.xlane.xlu0 %1593  ;;  %v7253_v18 = vsub.f32 %v5468_v44, %v1038_v22  ;;  %9868 = vst [vmem:[#allocation184_spill] sm:$0xff] %v7265_v48  ;;  %v1895_v44 = vsel %vm465_vm0, %v1484_v59, 0.0  ;;  %v1899_v5 = vsel %vm465_vm0, %v1486_v52, 0.0  ;;  %v1487_v22 = vmul.f32 %v7258_v26, %v7258_v26  ;;  %v5474_v59 = vld [vmem:[%s5580_s18 + $0x5b8] sm:$0xff]  ;;  %v9875_v17 = vld [vmem:[#allocation103_spill] sm:$0xff] }
 0x1ab   : > { %9870 = vst [vmem:[#allocation186_spill] sm:$0xff] %v7273_v9  ;;  %9871 = vst [vmem:[#allocation187_spill] sm:$0xff] %v7281_v55  ;;  %v7288_v45 = vsub.f32 %v5473_v16, %v1039_v46  ;;  %v1903_v52 = vsel %vm465_vm0, %v1488_v51, 0.0  ;;  %v1489_v46 = vmul.f32 %v7273_v9, %v7273_v9  ;;  %v5475_v16 = vld [vmem:[%s5580_s18 + $0x5a0] sm:$0xff]  ;;  %v1044_v51 = vmul.f32 0.0051020407, %v6744_v19 }
 0x1ac   : > { %9866 = vst [vmem:[#allocation182_spill] sm:$0xff] %v7253_v18  ;;  %1885 = vadd.xlane.f32.xlu1 %v1884_v27  ;;  %v1892_v27 = vadd.f32 %v1891_v36, %v1481_v60  ;;  %v1490_v35 = vmul.f32 %v7253_v18, %v7253_v18  ;;  %v1492_v36 = vmul.f32 %v7265_v48, %v7265_v48  ;;  %v1043_v18 = vmul.f32 0.0051020407, %v9875_v17  ;;  %v5476_v17 = vld [vmem:[%s5580_s18 + $0x5c8] sm:$0xff]  ;;  %v5477_v9 = vld [vmem:[%s5580_s18 + $0x5b0] sm:$0xff] }
 0x1ad   : > { %1881 = vadd.xlane.f32.xlu0 %v1880_v42  ;;  %v7268_v15 = vpop.xlane.xlu1 %1605  ;;  %v9872_v42 = vld [vmem:[#allocation105_spill] sm:$0xff]  ;;  %v7293_v60 = vsub.f32 %v5474_v59, %v1041_v43  ;;  %v1900_v48 = vadd.f32 %v1899_v5, %v1485_v62  ;;  %v1896_v59 = vadd.f32 %v1895_v44, %v1483_v38  ;;  %v7314_v23 = vsub.f32 %v5477_v9, %v1041_v43  ;;  %v5479_v43 = vld [vmem:[%s5580_s18 + $0x5c0] sm:$0xff] }
 0x1ae   : > { %9869 = vst [vmem:[#allocation185_spill] sm:$0xff] %v7268_v15  ;;  %v7275_v8 = vpop.xlane.xlu0 %1601  ;;  %v1042_v50 = vmul.f32 0.0051020407, %v9872_v42  ;;  %9873 = vst [vmem:[#allocation105_spill] sm:$0xff] %v7288_v45  ;;  %v1494_v15 = vmul.f32 %v7281_v55, %v7281_v55  ;;  %v1491_v5 = vmul.f32 %v7288_v45, %v7288_v45  ;;  %v5478_v62 = vld [vmem:[%s5580_s18 + $0x5d8] sm:$0xff] }
 0x1af   : > { %9874 = vst [vmem:[#allocation188_spill] sm:$0xff] %v7293_v60  ;;  %9879 = vst [vmem:[#allocation191_spill] sm:$0xff] %v7314_v23  ;;  %v1496_v38 = vmul.f32 %v7293_v60, %v7293_v60  ;;  %v7321_v44 = vsub.f32 %v5478_v62, %v1043_v18 }
 0x1b0   : > { %1893 = vadd.xlane.f32.xlu1 %v1892_v27  ;;  %v7302_v27 = vsub.f32 %v5475_v16, %v1040_v49  ;;  %v1904_v49 = vadd.f32 %v1903_v52, %v1487_v22  ;;  %v7329_v9 = vsub.f32 %v5479_v43, %v1042_v50  ;;  %v9882_v22 = vld [vmem:[#allocation23_spill] sm:$0xff]  ;;  %v1915_v45 = vsel %vm465_vm0, %v1494_v15, 0.0  ;;  %v5481_v43 = vld [vmem:[%s5580_s18 + $0x5d0] sm:$0xff] }
 0x1b1   : > { %1889 = vadd.xlane.f32.xlu0 %v1888_v47  ;;  %v7296_v42 = vpop.xlane.xlu1 %1613  ;;  %v7309_v47 = vsub.f32 %v5476_v17, %v1042_v50  ;;  %9880 = vst [vmem:[#allocation192_spill] sm:$0xff] %v7321_v44  ;;  %v1045_v52 = vmul.f32 0.0051020407, %v9882_v22  ;;  %v1495_v50 = vmul.f32 %v7314_v23, %v7314_v23  ;;  %v7344_v22 = vsub.f32 %v5481_v43, %v1043_v18  ;;  %v5482_v23 = vld [vmem:[%s5580_s18 + $0x5f8] sm:$0xff] }
 0x1b2   : > { %9876 = vst [vmem:[#allocation103_spill] sm:$0xff] %v7296_v42  ;;  %9877 = vst [vmem:[#allocation189_spill] sm:$0xff] %v7302_v27  ;;  %v7304_v26 = vpop.xlane.xlu0 %1609  ;;  %v1907_v42 = vsel %vm465_vm0, %v1490_v35, 0.0  ;;  %v1911_v35 = vsel %vm465_vm0, %v1492_v36, 0.0  ;;  %v1046_v36 = vmul.f32 0.0051020407, %v6772_v63  ;;  %v1497_v15 = vmul.f32 %v7329_v9, %v7329_v9 }
 0x1b3   : > { %9878 = vst [vmem:[#allocation190_spill] sm:$0xff] %v7309_v47  ;;  %9881 = vst [vmem:[#allocation193_spill] sm:$0xff] %v7329_v9  ;;  %v1908_v17 = vadd.f32 %v1907_v42, %v1489_v46  ;;  %v1498_v62 = vmul.f32 %v7309_v47, %v7309_v47  ;;  %v1500_v42 = vmul.f32 %v7321_v44, %v7321_v44  ;;  %v1047_v46 = vmul.f32 0.0051020407, %v6763_v32 }
 0x1b4   : > { %1901 = vadd.xlane.f32.xlu1 %v1900_v48  ;;  %v1493_v48 = vmul.f32 %v7302_v27, %v7302_v27  ;;  %9884 = vst [vmem:[#allocation194_spill] sm:$0xff] %v7344_v22  ;;  %v1912_v47 = vadd.f32 %v1911_v35, %v1491_v5  ;;  %v1919_v63 = vsel %vm465_vm0, %v1496_v38, 0.0  ;;  %v7355_v18 = vsub.f32 %v5482_v23, %v1045_v52  ;;  %v5484_v5 = vld [vmem:[%s5580_s18 + $0x608] sm:$0xff] }
 0x1b5   : > { %1897 = vadd.xlane.f32.xlu0 %v1896_v59  ;;  %v7323_v19 = vpop.xlane.xlu1 %1621  ;;  %v5480_v59 = vld [vmem:[%s5580_s18 + $0x5e8] sm:$0xff]  ;;  %v7365_v35 = vsub.f32 %v5484_v5, %v1046_v36  ;;  %v1048_v38 = vmul.f32 0.0051020407, %v6800_v56  ;;  %v1923_v9 = vsel %vm465_vm0, %v1498_v62, 0.0  ;;  %v1499_v23 = vmul.f32 %v7344_v22, %v7344_v22  ;;  %v5489_v22 = vld [vmem:[%s5580_s18 + $0x610] sm:$0xff] }
 0x1b6   : > { %v7332_v16 = vpop.xlane.xlu0 %1617  ;;  %v7337_v60 = vsub.f32 %v5480_v59, %v1044_v51  ;;  %9885 = vst [vmem:[#allocation195_spill] sm:$0xff] %v7355_v18  ;;  %v1916_v32 = vadd.f32 %v1915_v45, %v1493_v48  ;;  %v5486_v45 = vld [vmem:[%s5580_s18 + $0x618] sm:$0xff]  ;;  %v1049_v5 = vmul.f32 0.0051020407, %v6789_v6  ;;  %v1927_v56 = vsel %vm465_vm0, %v1500_v42, 0.0 }
 0x1b7   : > { %9887 = vst [vmem:[#allocation197_spill] sm:$0xff] %v7365_v35  ;;  %v7375_v48 = vsub.f32 %v5486_v45, %v1047_v46  ;;  %v1504_v62 = vmul.f32 %v7355_v18, %v7355_v18  ;;  %v1506_v6 = vmul.f32 %v7365_v35, %v7365_v35  ;;  %v1050_v42 = vmul.f32 0.0051020407, %v6828_v54 }
 0x1b8   : > { %9883 = vst [vmem:[#allocation23_spill] sm:$0xff] %v7337_v60  ;;  %1909 = vadd.xlane.f32.xlu1 %v1908_v17  ;;  %v5483_v17 = vld [vmem:[%s5580_s18 + $0x5e0] sm:$0xff]  ;;  %v1051_v54 = vmul.f32 0.0051020407, %v6818_v61 }
 0x1b9   : > { %1905 = vadd.xlane.f32.xlu0 %v1904_v49  ;;  %v7349_v59 = vpop.xlane.xlu1 %1629  ;;  %v7358_v43 = vsub.f32 %v5483_v17, %v1044_v51  ;;  %v1502_v49 = vmul.f32 %v7337_v60, %v7337_v60  ;;  %v1920_v51 = vadd.f32 %v1919_v63, %v1495_v50  ;;  %v5485_v17 = vld [vmem:[%s5580_s18 + $0x5f0] sm:$0xff]  ;;  %9889 = vst [vmem:[#allocation199_spill] sm:$0xff] %v7375_v48 }
 0x1ba   : > { %v7360_v44 = vpop.xlane.xlu0 %1625  ;;  %v7372_v55 = vsub.f32 %v5485_v17, %v1045_v52  ;;  %v5487_v52 = vld [vmem:[%s5580_s18 + $0x600] sm:$0xff]  ;;  %v1924_v17 = vadd.f32 %v1923_v9, %v1497_v15  ;;  %v1508_v15 = vmul.f32 %v7375_v48, %v7375_v48  ;;  %v5492_v48 = vld [vmem:[%s5580_s18 + $0x648] sm:$0xff] }
 0x1bb   : > { %9886 = vst [vmem:[#allocation196_spill] sm:$0xff] %v7358_v43  ;;  %v1501_v50 = vmul.f32 %v7358_v43, %v7358_v43  ;;  %v7386_v63 = vsub.f32 %v5487_v52, %v1046_v36  ;;  %v1931_v18 = vsel %vm465_vm0, %v1502_v49, 0.0  ;;  %v7398_v43 = vsub.f32 %v5489_v22, %v1047_v46  ;;  %v5490_v52 = vld [vmem:[%s5580_s18 + $0x638] sm:$0xff]  ;;  %v5491_v46 = vld [vmem:[%s5580_s18 + $0x620] sm:$0xff] }
 0x1bc   : > { %1917 = vadd.xlane.f32.xlu1 %v1916_v32  ;;  %9888 = vst [vmem:[#allocation198_spill] sm:$0xff] %v7372_v55  ;;  %v1928_v36 = vadd.f32 %v1927_v56, %v1499_v23  ;;  %v1503_v9 = vmul.f32 %v7372_v55, %v7372_v55  ;;  %v7405_v35 = vsub.f32 %v5490_v52, %v1049_v5  ;;  %v1939_v55 = vsel %vm465_vm0, %v1506_v6, 0.0 }
 0x1bd   : > { %1913 = vadd.xlane.f32.xlu0 %v1912_v47  ;;  %v7378_v60 = vpop.xlane.xlu1 %1637  ;;  %9890 = vst [vmem:[#allocation200_spill] sm:$0xff] %v7386_v63  ;;  %v5488_v47 = vld [vmem:[%s5580_s18 + $0x628] sm:$0xff]  ;;  %9892 = vst [vmem:[#allocation202_spill] sm:$0xff] %v7398_v43  ;;  %v1505_v22 = vmul.f32 %v7386_v63, %v7386_v63  ;;  %v7413_v23 = vsub.f32 %v5491_v46, %v1048_v38  ;;  %v7421_v61 = vsub.f32 %v5492_v48, %v1050_v42  ;;  %v5493_v46 = vld [vmem:[%s5580_s18 + $0x630] sm:$0xff] }
 0x1be   : > { %v7388_v32 = vpop.xlane.xlu0 %1633  ;;  %v7393_v45 = vsub.f32 %v5488_v47, %v1048_v38  ;;  %9893 = vst [vmem:[#allocation203_spill] sm:$0xff] %v7405_v35  ;;  %v1935_v47 = vsel %vm465_vm0, %v1504_v62, 0.0  ;;  %v1507_v38 = vmul.f32 %v7398_v43, %v7398_v43  ;;  %v7428_v63 = vsub.f32 %v5493_v46, %v1049_v5  ;;  %v5494_v62 = vld [vmem:[%s5580_s18 + $0x658] sm:$0xff]  ;;  %v5495_v46 = vld [vmem:[%s5580_s18 + $0x640] sm:$0xff] }
 0x1bf   : > { %9894 = vst [vmem:[#allocation204_spill] sm:$0xff] %v7413_v23  ;;  %9895 = vst [vmem:[#allocation205_spill] sm:$0xff] %v7421_v61  ;;  %v1053_v48 = vmul.f32 0.0051020407, %v6848_v25  ;;  %v1943_v6 = vsel %vm465_vm0, %v1508_v15, 0.0  ;;  %v1509_v5 = vmul.f32 %v7413_v23, %v7413_v23  ;;  %v5496_v25 = vld [vmem:[%s5580_s18 + $0x668] sm:$0xff] }
 0x1c0   : > { %9891 = vst [vmem:[#allocation201_spill] sm:$0xff] %v7393_v45  ;;  %1925 = vadd.xlane.f32.xlu1 %v1924_v17  ;;  %v1932_v17 = vadd.f32 %v1931_v18, %v1501_v50  ;;  %v1510_v52 = vmul.f32 %v7393_v45, %v7393_v45  ;;  %9896 = vst [vmem:[#allocation206_spill] sm:$0xff] %v7428_v63  ;;  %v1512_v18 = vmul.f32 %v7405_v35, %v7405_v35  ;;  %v5497_v23 = vld [vmem:[%s5580_s18 + $0x650] sm:$0xff] }
 0x1c1   : > { %1921 = vadd.xlane.f32.xlu0 %v1920_v51  ;;  %v7408_v49 = vpop.xlane.xlu1 %1645  ;;  %v1052_v51 = vmul.f32 0.0051020407, %v6855_v30  ;;  %v7433_v50 = vsub.f32 %v5494_v62, %v1051_v54  ;;  %v1940_v35 = vadd.f32 %v1939_v55, %v1505_v22  ;;  %v1936_v62 = vadd.f32 %v1935_v47, %v1503_v9  ;;  %v5498_v22 = vld [vmem:[%s5580_s18 + $0x678] sm:$0xff] }
 0x1c2   : > { %v7415_v56 = vpop.xlane.xlu0 %1641  ;;  %v1514_v45 = vmul.f32 %v7421_v61, %v7421_v61  ;;  %v1054_v15 = vmul.f32 0.0051020407, %v6884_v7  ;;  %v1947_v27 = vsel %vm465_vm0, %v1510_v52, 0.0  ;;  %v1511_v55 = vmul.f32 %v7428_v63, %v7428_v63 }
 0x1c3   : > { %9897 = vst [vmem:[#allocation207_spill] sm:$0xff] %v7433_v50  ;;  %v1516_v9 = vmul.f32 %v7433_v50, %v7433_v50  ;;  %v7461_v47 = vsub.f32 %v5498_v22, %v1053_v48  ;;  %v1951_v52 = vsel %vm465_vm0, %v1512_v18, 0.0  ;;  %v1056_v18 = vmul.f32 0.0051020407, %v6912_v20 }
 0x1c4   : > { %1933 = vadd.xlane.f32.xlu1 %v1932_v17  ;;  %v7442_v17 = vsub.f32 %v5495_v46, %v1050_v42  ;;  %v1944_v42 = vadd.f32 %v1943_v6, %v1507_v38  ;;  %v9904_v38 = vld [vmem:[#allocation128_spill] sm:$0xff]  ;;  %v1955_v63 = vsel %vm465_vm0, %v1514_v45, 0.0 }
 0x1c5   : > { %1929 = vadd.xlane.f32.xlu0 %v1928_v36  ;;  %v7436_v30 = vpop.xlane.xlu1 %1653  ;;  %v7449_v36 = vsub.f32 %v5496_v25, %v1052_v51  ;;  %9902 = vst [vmem:[#allocation212_spill] sm:$0xff] %v7461_v47  ;;  %v1055_v6 = vmul.f32 0.0051020407, %v9904_v38  ;;  %v1948_v25 = vadd.f32 %v1947_v27, %v1509_v5  ;;  %v1520_v27 = vmul.f32 %v7461_v47, %v7461_v47 }
 0x1c6   : > { %9898 = vst [vmem:[#allocation208_spill] sm:$0xff] %v7436_v30  ;;  %9899 = vst [vmem:[#allocation209_spill] sm:$0xff] %v7442_v17  ;;  %v7444_v43 = vpop.xlane.xlu0 %1649  ;;  %v7454_v30 = vsub.f32 %v5497_v23, %v1051_v54  ;;  %v5499_v54 = vld [vmem:[%s5580_s18 + $0x660] sm:$0xff]  ;;  %v1057_v5 = vmul.f32 0.0051020407, %v6903_v31  ;;  %v1959_v20 = vsel %vm465_vm0, %v1516_v9, 0.0 }
 0x1c7   : > { %9900 = vst [vmem:[#allocation210_spill] sm:$0xff] %v7449_v36  ;;  %v7469_v23 = vsub.f32 %v5499_v54, %v1052_v51  ;;  %v1518_v22 = vmul.f32 %v7449_v36, %v7449_v36  ;;  %v5501_v54 = vld [vmem:[%s5580_s18 + $0x670] sm:$0xff]  ;;  %v1952_v36 = vadd.f32 %v1951_v52, %v1511_v55  ;;  %v5504_v55 = vld [vmem:[%s5580_s18 + $0x6a8] sm:$0xff]  ;;  %v1058_v9 = vmul.f32 0.0051020407, %v6940_v4 }
 0x1c8   : > { %9901 = vst [vmem:[#allocation211_spill] sm:$0xff] %v7454_v30  ;;  %1941 = vadd.xlane.f32.xlu1 %v1940_v35  ;;  %v1513_v35 = vmul.f32 %v7442_v17, %v7442_v17  ;;  %v1515_v51 = vmul.f32 %v7454_v30, %v7454_v30  ;;  %v7484_v38 = vsub.f32 %v5501_v54, %v1053_v48  ;;  %v5502_v30 = vld [vmem:[%s5580_s18 + $0x698] sm:$0xff]  ;;  %v1967_v4 = vsel %vm465_vm0, %v1520_v27, 0.0 }
 0x1c9   : > { %1937 = vadd.xlane.f32.xlu0 %v1936_v62  ;;  %v7463_v7 = vpop.xlane.xlu1 %1661  ;;  %9903 = vst [vmem:[#allocation213_spill] sm:$0xff] %v7469_v23  ;;  %v5500_v62 = vld [vmem:[%s5580_s18 + $0x688] sm:$0xff]  ;;  %v1517_v45 = vmul.f32 %v7469_v23, %v7469_v23  ;;  %v7495_v48 = vsub.f32 %v5502_v30, %v1055_v6  ;;  %v7505_v52 = vsub.f32 %v5504_v55, %v1056_v18  ;;  %v1963_v23 = vsel %vm465_vm0, %v1518_v22, 0.0 }
 0x1ca   : > { %v7472_v46 = vpop.xlane.xlu0 %1657  ;;  %v7477_v50 = vsub.f32 %v5500_v62, %v1054_v15  ;;  %9906 = vst [vmem:[#allocation214_spill] sm:$0xff] %v7484_v38  ;;  %v1956_v31 = vadd.f32 %v1955_v63, %v1513_v35  ;;  %v1519_v30 = vmul.f32 %v7484_v38, %v7484_v38  ;;  %v5506_v63 = vld [vmem:[%s5580_s18 + $0x6b8] sm:$0xff]  ;;  %v1059_v55 = vmul.f32 0.0051020407, %v6929_v13  ;;  %v5509_v38 = vld [vmem:[%s5580_s18 + $0x6b0] sm:$0xff] }
 0x1cb   : > { %9907 = vst [vmem:[#allocation215_spill] sm:$0xff] %v7495_v48  ;;  %9909 = vst [vmem:[#allocation217_spill] sm:$0xff] %v7505_v52  ;;  %v7515_v35 = vsub.f32 %v5506_v63, %v1057_v5  ;;  %v1524_v22 = vmul.f32 %v7495_v48, %v7495_v48  ;;  %v1526_v13 = vmul.f32 %v7505_v52, %v7505_v52  ;;  %v1060_v27 = vmul.f32 0.0051020407, %v6968_v57 }
 0x1cc   : > { %9905 = vst [vmem:[#allocation128_spill] sm:$0xff] %v7477_v50  ;;  %1949 = vadd.xlane.f32.xlu1 %v1948_v25  ;;  %v5503_v25 = vld [vmem:[%s5580_s18 + $0x680] sm:$0xff]  ;;  %v1061_v57 = vmul.f32 0.0051020407, %v6958_v41 }
 0x1cd   : > { %1945 = vadd.xlane.f32.xlu0 %v1944_v42  ;;  %v7489_v62 = vpop.xlane.xlu1 %1669  ;;  %v7498_v54 = vsub.f32 %v5503_v25, %v1054_v15  ;;  %v1522_v42 = vmul.f32 %v7477_v50, %v7477_v50  ;;  %v1960_v15 = vadd.f32 %v1959_v20, %v1515_v51  ;;  %v5505_v25 = vld [vmem:[%s5580_s18 + $0x690] sm:$0xff]  ;;  %9911 = vst [vmem:[#allocation219_spill] sm:$0xff] %v7515_v35 }
 0x1ce   : > { %v7500_v47 = vpop.xlane.xlu0 %1665  ;;  %v7512_v61 = vsub.f32 %v5505_v25, %v1055_v6  ;;  %v5507_v6 = vld [vmem:[%s5580_s18 + $0x6a0] sm:$0xff]  ;;  %v1964_v25 = vadd.f32 %v1963_v23, %v1517_v45  ;;  %v1528_v45 = vmul.f32 %v7515_v35, %v7515_v35  ;;  %v5512_v35 = vld [vmem:[%s5580_s18 + $0x6e8] sm:$0xff] }
 0x1cf   : > { %9908 = vst [vmem:[#allocation216_spill] sm:$0xff] %v7498_v54  ;;  %v1521_v51 = vmul.f32 %v7498_v54, %v7498_v54  ;;  %v7526_v20 = vsub.f32 %v5507_v6, %v1056_v18  ;;  %v1971_v48 = vsel %vm465_vm0, %v1522_v42, 0.0  ;;  %v7538_v54 = vsub.f32 %v5509_v38, %v1057_v5  ;;  %v5510_v6 = vld [vmem:[%s5580_s18 + $0x6d8] sm:$0xff]  ;;  %v5511_v5 = vld [vmem:[%s5580_s18 + $0x6c0] sm:$0xff] }
 0x1d0   : > { %1957 = vadd.xlane.f32.xlu1 %v1956_v31  ;;  %9910 = vst [vmem:[#allocation218_spill] sm:$0xff] %v7512_v61  ;;  %v1968_v18 = vadd.f32 %v1967_v4, %v1519_v30  ;;  %v1523_v23 = vmul.f32 %v7512_v61, %v7512_v61  ;;  %v7545_v52 = vsub.f32 %v5510_v6, %v1059_v55  ;;  %v1979_v61 = vsel %vm465_vm0, %v1526_v13, 0.0 }
 0x1d1   : > { %1953 = vadd.xlane.f32.xlu0 %v1952_v36  ;;  %v7518_v50 = vpop.xlane.xlu1 %1677  ;;  %9912 = vst [vmem:[#allocation220_spill] sm:$0xff] %v7526_v20  ;;  %v5508_v36 = vld [vmem:[%s5580_s18 + $0x6c8] sm:$0xff]  ;;  %9914 = vst [vmem:[#allocation222_spill] sm:$0xff] %v7538_v54  ;;  %v1525_v38 = vmul.f32 %v7526_v20, %v7526_v20  ;;  %v7553_v30 = vsub.f32 %v5511_v5, %v1058_v9  ;;  %v7561_v41 = vsub.f32 %v5512_v35, %v1060_v27  ;;  %v5513_v5 = vld [vmem:[%s5580_s18 + $0x6d0] sm:$0xff] }
 0x1d2   : > { %v7528_v31 = vpop.xlane.xlu0 %1673  ;;  %v7533_v63 = vsub.f32 %v5508_v36, %v1058_v9  ;;  %9915 = vst [vmem:[#allocation223_spill] sm:$0xff] %v7545_v52  ;;  %v1975_v36 = vsel %vm465_vm0, %v1524_v22, 0.0  ;;  %v1527_v9 = vmul.f32 %v7538_v54, %v7538_v54  ;;  %v7568_v20 = vsub.f32 %v5513_v5, %v1059_v55  ;;  %v5514_v22 = vld [vmem:[%s5580_s18 + $0x6f8] sm:$0xff]  ;;  %v5515_v5 = vld [vmem:[%s5580_s18 + $0x6e0] sm:$0xff] }
 0x1d3   : > { %9916 = vst [vmem:[#allocation224_spill] sm:$0xff] %v7553_v30  ;;  %9917 = vst [vmem:[#allocation225_spill] sm:$0xff] %v7561_v41  ;;  %v1063_v35 = vmul.f32 0.0051020407, %v6988_v53  ;;  %v1983_v13 = vsel %vm465_vm0, %v1528_v45, 0.0  ;;  %v1529_v55 = vmul.f32 %v7553_v30, %v7553_v30  ;;  %v1534_v53 = vmul.f32 %v7561_v41, %v7561_v41 }
 0x1d4   : > { %9913 = vst [vmem:[#allocation221_spill] sm:$0xff] %v7533_v63  ;;  %1965 = vadd.xlane.f32.xlu1 %v1964_v25  ;;  %v1972_v25 = vadd.f32 %v1971_v48, %v1521_v51  ;;  %v1530_v6 = vmul.f32 %v7533_v63, %v7533_v63  ;;  %9918 = vst [vmem:[#allocation226_spill] sm:$0xff] %v7568_v20  ;;  %v1532_v48 = vmul.f32 %v7545_v52, %v7545_v52 }
 0x1d5   : > { %1961 = vadd.xlane.f32.xlu0 %v1960_v15  ;;  %v7548_v42 = vpop.xlane.xlu1 %1685  ;;  %v1062_v15 = vmul.f32 0.0051020407, %v6995_v11  ;;  %v7573_v51 = vsub.f32 %v5514_v22, %v1061_v57  ;;  %v1980_v52 = vadd.f32 %v1979_v61, %v1525_v38  ;;  %v1976_v22 = vadd.f32 %v1975_v36, %v1523_v23  ;;  %v5518_v38 = vld [vmem:[%s5580_s18 + $0x718] sm:$0xff] }
 0x1d6   : > { %v7555_v4 = vpop.xlane.xlu0 %1681  ;;  %v1064_v45 = vmul.f32 0.0051020407, %v7024_v1  ;;  %v1987_v17 = vsel %vm465_vm0, %v1530_v6, 0.0  ;;  %v1531_v30 = vmul.f32 %v7568_v20, %v7568_v20  ;;  %v7601_v36 = vsub.f32 %v5518_v38, %v1063_v35  ;;  %v5519_v6 = vld [vmem:[%s5580_s18 + $0x700] sm:$0xff]  ;;  %v5520_v38 = vld [vmem:[%s5580_s18 + $0x728] sm:$0xff] }
 0x1d7   : > { %9919 = vst [vmem:[#allocation227_spill] sm:$0xff] %v7573_v51  ;;  %v1536_v23 = vmul.f32 %v7573_v51, %v7573_v51  ;;  %v1991_v1 = vsel %vm465_vm0, %v1532_v48, 0.0  ;;  %v1066_v48 = vmul.f32 0.0051020407, %v7052_v37  ;;  %v1995_v20 = vsel %vm465_vm0, %v1534_v53, 0.0 }
 0x1d8   : > { %1973 = vadd.xlane.f32.xlu1 %v1972_v25  ;;  %v7582_v25 = vsub.f32 %v5515_v5, %v1060_v27  ;;  %v1984_v27 = vadd.f32 %v1983_v13, %v1527_v9  ;;  %v5517_v5 = vld [vmem:[%s5580_s18 + $0x6f0] sm:$0xff]  ;;  %9923 = vst [vmem:[#allocation231_spill] sm:$0xff] %v7601_v36  ;;  %v7609_v9 = vsub.f32 %v5519_v6, %v1062_v15 }
 0x1d9   : > { %1969 = vadd.xlane.f32.xlu0 %v1968_v18  ;;  %v7576_v11 = vpop.xlane.xlu1 %1693  ;;  %v5516_v18 = vld [vmem:[%s5580_s18 + $0x708] sm:$0xff]  ;;  %v7596_v61 = vsub.f32 %v5517_v5, %v1061_v57  ;;  %v1065_v57 = vmul.f32 0.0051020407, %v7016_v24  ;;  %v1988_v5 = vadd.f32 %v1987_v17, %v1529_v55  ;;  %v7617_v51 = vsub.f32 %v5520_v38, %v1064_v45  ;;  %v5521_v6 = vld [vmem:[%s5580_s18 + $0x710] sm:$0xff] }
 0x1da   : > { %9920 = vst [vmem:[#allocation228_spill] sm:$0xff] %v7582_v25  ;;  %v7584_v54 = vpop.xlane.xlu0 %1689  ;;  %v7589_v63 = vsub.f32 %v5516_v18, %v1062_v15  ;;  %9924 = vst [vmem:[#allocation232_spill] sm:$0xff] %v7609_v9  ;;  %v1992_v15 = vadd.f32 %v1991_v1, %v1531_v30  ;;  %v7624_v17 = vsub.f32 %v5521_v6, %v1063_v35  ;;  %v1999_v38 = vsel %vm465_vm0, %v1536_v23, 0.0  ;;  %v5522_v30 = vld [vmem:[%s5580_s18 + $0x738] sm:$0xff]  ;;  %v5523_v1 = vld [vmem:[%s5580_s18 + $0x720] sm:$0xff] }
 0x1db   : > { %9922 = vst [vmem:[#allocation230_spill] sm:$0xff] %v7596_v61  ;;  %9925 = vst [vmem:[#allocation233_spill] sm:$0xff] %v7617_v51  ;;  %v1535_v24 = vmul.f32 %v7596_v61, %v7596_v61  ;;  %v1540_v55 = vmul.f32 %v7601_v36, %v7601_v36  ;;  %v1537_v37 = vmul.f32 %v7609_v9, %v7609_v9  ;;  %v5524_v36 = vld [vmem:[%s5580_s18 + $0x748] sm:$0xff]  ;;  %v1068_v23 = vmul.f32 0.0051020407, %v7080_v40 }
 0x1dc   : > { %9921 = vst [vmem:[#allocation229_spill] sm:$0xff] %v7589_v63  ;;  %1981 = vadd.xlane.f32.xlu1 %v1980_v52  ;;  %v1533_v52 = vmul.f32 %v7582_v25, %v7582_v25  ;;  %9926 = vst [vmem:[#allocation234_spill] sm:$0xff] %v7624_v17  ;;  %v7634_v53 = vsub.f32 %v5522_v30, %v1065_v57  ;;  %v7644_v61 = vsub.f32 %v5524_v36, %v1066_v48 }
 0x1dd   : > { %1977 = vadd.xlane.f32.xlu0 %v1976_v22  ;;  %v7603_v18 = vpop.xlane.xlu1 %1701  ;;  %v1538_v22 = vmul.f32 %v7589_v63, %v7589_v63  ;;  %v1067_v30 = vmul.f32 0.0051020407, %v7043_v28  ;;  %v2000_v36 = vadd.f32 %v1999_v38, %v1535_v24  ;;  %v5527_v24 = vld [vmem:[%s5580_s18 + $0x768] sm:$0xff] }
 0x1de   : > { %v7612_v13 = vpop.xlane.xlu0 %1697  ;;  %9927 = vst [vmem:[#allocation235_spill] sm:$0xff] %v7634_v53  ;;  %v1996_v6 = vadd.f32 %v1995_v20, %v1533_v52  ;;  %9929 = vst [vmem:[#allocation237_spill] sm:$0xff] %v7644_v61  ;;  %v1544_v40 = vmul.f32 %v7634_v53, %v7634_v53  ;;  %v7669_v38 = vsub.f32 %v5527_v24, %v1068_v23  ;;  %v5528_v53 = vld [vmem:[%s5580_s18 + $0x758] sm:$0xff]  ;;  %v5529_v24 = vld [vmem:[%s5580_s18 + $0x750] sm:$0xff] }
 0x1df   : > { %v2003_v9 = vsel %vm465_vm0, %v1538_v22, 0.0  ;;  %v5526_v22 = vld [vmem:[%s5580_s18 + $0x740] sm:$0xff] }
 0x1e0   : > { %1989 = vadd.xlane.f32.xlu1 %v1988_v5  ;;  %v7637_v5 = vsub.f32 %v5523_v1, %v1064_v45  ;;  %v1539_v45 = vmul.f32 %v7624_v17, %v7624_v17  ;;  %v5525_v1 = vld [vmem:[%s5580_s18 + $0x730] sm:$0xff]  ;;  %9932 = vst [vmem:[#allocation240_spill] sm:$0xff] %v7669_v38 }
 0x1e1   : > { %1985 = vadd.xlane.f32.xlu0 %v1984_v27  ;;  %v7628_v63 = vpop.xlane.xlu1 %1709  ;;  %v1542_v27 = vmul.f32 %v7617_v51, %v7617_v51  ;;  %v7652_v20 = vsub.f32 %v5525_v1, %v1065_v57  ;;  %v2007_v51 = vsel %vm465_vm0, %v1540_v55, 0.0  ;;  %v2004_v57 = vadd.f32 %v2003_v9, %v1537_v37 }
 0x1e2   : > { %9928 = vst [vmem:[#allocation236_spill] sm:$0xff] %v7637_v5  ;;  %v7639_v35 = vpop.xlane.xlu0 %1705  ;;  %v1541_v28 = vmul.f32 %v7637_v5, %v7637_v5  ;;  %v1070_v55 = vmul.f32 0.0051020407, %v7108_v14  ;;  %v7674_v5 = vsub.f32 %v5528_v53, %v1067_v30 }
 0x1e3   : > { %9930 = vst [vmem:[#allocation238_spill] sm:$0xff] %v7652_v20  ;;  %v2011_v1 = vsel %vm465_vm0, %v1542_v27, 0.0  ;;  %v1543_v9 = vmul.f32 %v7652_v20, %v7652_v20  ;;  %v5530_v27 = vld [vmem:[%s5580_s18 + $0x760] sm:$0xff]  ;;  %v5531_v20 = vld [vmem:[%s5580_s18 + $0x788] sm:$0xff] }
 0x1e4   : > { %1997 = vadd.xlane.f32.xlu1 %v1996_v6  ;;  %v7662_v6 = vsub.f32 %v5526_v22, %v1066_v48  ;;  %9933 = vst [vmem:[#allocation241_spill] sm:$0xff] %v7674_v5  ;;  %v1069_v48 = vmul.f32 0.0051020407, %v7069_v29  ;;  %v2008_v22 = vadd.f32 %v2007_v51, %v1539_v45  ;;  %v7687_v53 = vsub.f32 %v5530_v27, %v1068_v23 }
 0x1e5   : > { %1993 = vadd.xlane.f32.xlu0 %v1992_v15  ;;  %v7654_v52 = vpop.xlane.xlu1 %1717  ;;  %v1546_v15 = vmul.f32 %v7644_v61, %v7644_v61  ;;  %v7682_v61 = vsub.f32 %v5529_v24, %v1067_v30  ;;  %v7694_v41 = vsub.f32 %v5531_v20, %v1070_v55  ;;  %v2015_v30 = vsel %vm465_vm0, %v1544_v40, 0.0  ;;  %v5532_v24 = vld [vmem:[%s5580_s18 + $0x778] sm:$0xff]  ;;  %v5533_v20 = vld [vmem:[%s5580_s18 + $0x780] sm:$0xff] }
 0x1e6   : > { %9931 = vst [vmem:[#allocation239_spill] sm:$0xff] %v7662_v6  ;;  %v7664_v17 = vpop.xlane.xlu0 %1713  ;;  %v1545_v14 = vmul.f32 %v7662_v6, %v7662_v6  ;;  %9935 = vst [vmem:[#allocation243_spill] sm:$0xff] %v7687_v53  ;;  %v1548_v45 = vmul.f32 %v7674_v5, %v7674_v5  ;;  %v7701_v23 = vsub.f32 %v5532_v24, %v1069_v48  ;;  %v5534_v6 = vld [vmem:[%s5580_s18 + $0x770] sm:$0xff] }
 0x1e7   : > { %9934 = vst [vmem:[#allocation242_spill] sm:$0xff] %v7682_v61  ;;  %9936 = vst [vmem:[#allocation244_spill] sm:$0xff] %v7694_v41  ;;  %v2019_v51 = vsel %vm465_vm0, %v1546_v15, 0.0  ;;  %v7708_v27 = vsub.f32 %v5533_v20, %v1070_v55  ;;  %v2016_v40 = vadd.f32 %v2015_v30, %v1543_v9  ;;  %v1547_v5 = vmul.f32 %v7682_v61, %v7682_v61 }
 0x1e8   : > { %2005 = vadd.xlane.f32.xlu1 %v2004_v57  ;;  %v2012_v57 = vadd.f32 %v2011_v1, %v1541_v28  ;;  %9937 = vst [vmem:[#allocation245_spill] sm:$0xff] %v7701_v23  ;;  %v1549_v1 = vmul.f32 %v7687_v53, %v7687_v53  ;;  %v2020_v15 = vadd.f32 %v2019_v51, %v1545_v14  ;;  %v2023_v55 = vsel %vm465_vm0, %v1548_v45, 0.0 }
 0x1e9   : > { %2001 = vadd.xlane.f32.xlu0 %v2000_v36  ;;  %v7679_v37 = vpop.xlane.xlu1 %1725  ;;  %v1550_v36 = vmul.f32 %v7669_v38, %v7669_v38  ;;  %9938 = vst [vmem:[#allocation246_spill] sm:$0xff] %v7708_v27  ;;  %v7715_v24 = vsub.f32 %v5534_v6, %v1069_v48  ;;  %v1552_v53 = vmul.f32 %v7701_v23, %v7701_v23  ;;  %v2040_v6 = vmul.f32 0.0051020407, %v7135_v3 }
 0x1ea   : > { %v7689_v29 = vpop.xlane.xlu0 %1721  ;;  %v1553_v9 = vmul.f32 %v7708_v27, %v7708_v27  ;;  %v2024_v30 = vadd.f32 %v2023_v55, %v1547_v5  ;;  %v2411_v27 = vld [vmem:[%s7763_s22 + $0x48] sm:$0xff] }
 0x1eb   : > { %9939 = vst [vmem:[#allocation247_spill] sm:$0xff] %v7715_v24  ;;  %v2031_v45 = vsel %vm465_vm0, %v1552_v53, 0.0  ;;  %v2161_v23 = vadd.f32 1e-05, %v2040_v6  ;;  %v2042_v53 = vmul.f32 0.0051020407, %v7164_v2 }
 0x1ec   : > { %2013 = vadd.xlane.f32.xlu1 %v2012_v57  ;;  %v2027_v57 = vsel %vm465_vm0, %v1550_v36, 0.0  ;;  %v1551_v36 = vmul.f32 %v7715_v24, %v7715_v24 }
 0x1ed   : > { %2009 = vadd.xlane.f32.xlu0 %v2008_v22  ;;  %v7703_v28 = vpop.xlane.xlu1 %1733  ;;  %v1554_v22 = vmul.f32 %v7694_v41, %v7694_v41  ;;  %v2028_v51 = vadd.f32 %v2027_v57, %v1549_v1  ;;  %v2039_v1 = vmul.f32 0.0051020407, %v7098_v0  ;;  %5051 = vrsqrt.f32 %v2161_v23 }
 0x1ee   : > { %v7710_v38 = vpop.xlane.xlu0 %1729  ;;  %v2032_v41 = vadd.f32 %v2031_v45, %v1551_v36  ;;  %v2043_v0 = vmul.f32 0.0051020407, %v7156_v58  ;;  %v2050_v23 = vmul.f32 0.0051020407, %v7275_v8  ;;  %v2403_v45 = vld [vmem:[%s7763_s22 + $0x8] sm:$0xff] }
 0x1ef   : > { %v2035_v20 = vsel %vm465_vm0, %v1554_v22, 0.0  ;;  %v2160_v55 = vadd.f32 1e-05, %v2039_v1 }
 0x1f0   : > { %2021 = vadd.xlane.f32.xlu1 %v2020_v15  ;;  %v2036_v3 = vadd.f32 %v2035_v20, %v1553_v9  ;;  %v2163_v9 = vadd.f32 1e-05, %v2042_v53  ;;  %v2164_v36 = vadd.f32 1e-05, %v2043_v0  ;;  %v2171_v8 = vadd.f32 1e-05, %v2050_v23 }
 0x1f1   : > { %2017 = vadd.xlane.f32.xlu0 %v2016_v40  ;;  %v7723_v14 = vpop.xlane.xlu1 %1741  ;;  %v2041_v40 = vmul.f32 0.0051020407, %v7128_v21  ;;  %v2048_v21 = vmul.f32 0.0051020407, %v7248_v33  ;;  %v2052_v20 = vmul.f32 0.0051020407, %v7304_v26 }
 0x1f2   : > { %v7728_v48 = vpop.xlane.xlu0 %1737  ;;  %v2404_v0 = vld [vmem:[%s7763_s22 + $0x10] sm:$0xff] }
 0x1f3   : > { %v2162_v22 = vadd.f32 1e-05, %v2041_v40 }
 0x1f4   : > { %2029 = vadd.xlane.f32.xlu1 %v2028_v51  ;;  %v2169_v51 = vadd.f32 1e-05, %v2048_v21  ;;  %v2054_v21 = vmul.f32 0.0051020407, %v7332_v16  ;;  %v2405_v16 = vld [vmem:[%s7763_s22 + $0x18] sm:$0xff] }
 0x1f5   : > { %2025 = vadd.xlane.f32.xlu0 %v2024_v30  ;;  %v7734_v15 = vpop.xlane.xlu1 %1749  ;;  %5053 = vrsqrt.f32 %v2162_v22  ;;  %v2044_v30 = vmul.f32 0.0051020407, %v7192_v12  ;;  %v2045_v12 = vmul.f32 0.0051020407, %v7183_v39  ;;  %v2046_v39 = vmul.f32 0.0051020407, %v7220_v10 }
 0x1f6   : > { %v7737_v61 = vpop.xlane.xlu0 %1745  ;;  %5055 = vrsqrt.f32 %v2160_v55  ;;  %v2173_v55 = vadd.f32 1e-05, %v2052_v20  ;;  %v2056_v20 = vmul.f32 0.0051020407, %v7360_v44  ;;  %v2047_v10 = vmul.f32 0.0051020407, %v7209_v34 }
 0x1f7   : > { %5057 = vrsqrt.f32 %v2163_v9  ;;  %v5052_v58 = vpop.eup %5051 }
 0x1f8   : > { %2037 = vadd.xlane.f32.xlu1 %v2036_v3  ;;  %5059 = vrsqrt.f32 %v2169_v51  ;;  %v2165_v3 = vadd.f32 1e-05, %v2044_v30  ;;  %v2524_v22 = vmul.f32 %v5052_v58, %v2403_v45  ;;  %v2166_v51 = vadd.f32 1e-05, %v2045_v12 }
 0x1f9   : > { %2033 = vadd.xlane.f32.xlu0 %v2032_v41  ;;  %v7740_v5 = vpop.xlane.xlu1 %1757  ;;  %5061 = vrsqrt.f32 %v2164_v36  ;;  %v2402_v36 = vld [vmem:[%s7763_s22] sm:$0xff]  ;;  %v2177_v44 = vadd.f32 1e-05, %v2056_v20  ;;  %v2168_v34 = vadd.f32 1e-05, %v2047_v10 }
 0x1fa   : > { %v7743_v57 = vpop.xlane.xlu0 %1753  ;;  %5063 = vrsqrt.f32 %v2171_v8  ;;  %v2175_v8 = vadd.f32 1e-05, %v2054_v21  ;;  %v2058_v21 = vmul.f32 0.0051020407, %v7388_v32  ;;  %v2060_v20 = vmul.f32 0.0051020407, %v7415_v56 }
 0x1fb   : > { %5065 = vrsqrt.f32 %v2165_v3  ;;  %v2167_v3 = vadd.f32 1e-05, %v2046_v39  ;;  %v9941_v39 = vld [vmem:[#allocation180_spill] sm:$0xff] }
 0x1fc   : > { %5067 = vrsqrt.f32 %v2173_v55  ;;  %v2179_v32 = vadd.f32 1e-05, %v2058_v21  ;;  %v2181_v56 = vadd.f32 1e-05, %v2060_v20  ;;  %v2062_v21 = vmul.f32 0.0051020407, %v7444_v43 }
 0x1fd   : > { %v7746_v6 = vpop.xlane.xlu1 %1765  ;;  %5069 = vrsqrt.f32 %v2166_v51  ;;  %v2064_v20 = vmul.f32 0.0051020407, %v7472_v46 }
 0x1fe   : > { %v7749_v41 = vpop.xlane.xlu0 %1761  ;;  %5071 = vrsqrt.f32 %v2175_v8  ;;  %v2183_v43 = vadd.f32 1e-05, %v2062_v21  ;;  %v2066_v21 = vmul.f32 0.0051020407, %v7500_v47 }
 0x1ff   : > { %v5054_v53 = vpop.eup %5053  ;;  %5073 = vrsqrt.f32 %v2167_v3  ;;  %v9943_v3 = vld [vmem:[#allocation185_spill] sm:$0xff]  ;;  %v2185_v46 = vadd.f32 1e-05, %v2064_v20  ;;  %v2068_v20 = vmul.f32 0.0051020407, %v7528_v31 }
 0x200   : > { %v5056_v26 = vpop.eup %5055  ;;  %v2525_v30 = vmul.f32 %v5054_v53, %v2404_v0  ;;  %v2406_v0 = vld [vmem:[%s7763_s22 + $0x20] sm:$0xff]  ;;  %5075 = vrsqrt.f32 %v2177_v44  ;;  %v2187_v47 = vadd.f32 1e-05, %v2066_v21  ;;  %v2070_v21 = vmul.f32 0.0051020407, %v7555_v4 }
 0x201   : > { %v7753_v2 = vpop.xlane.xlu1 %1773  ;;  %v5058_v58 = vpop.eup %5057  ;;  %5077 = vrsqrt.f32 %v2168_v34  ;;  %v2189_v31 = vadd.f32 1e-05, %v2068_v20  ;;  %v2072_v20 = vmul.f32 0.0051020407, %v7584_v54 }
 0x202   : > { %v7756_v33 = vpop.xlane.xlu0 %1769  ;;  %v5060_v12 = vpop.eup %5059  ;;  %v2526_v53 = vmul.f32 %v5058_v58, %v2405_v16  ;;  %v2407_v16 = vld [vmem:[%s7763_s22 + $0x28] sm:$0xff]  ;;  %5079 = vrsqrt.f32 %v2179_v32  ;;  %v2191_v4 = vadd.f32 1e-05, %v2070_v21  ;;  %v2074_v21 = vmul.f32 0.0051020407, %v7612_v13 }
 0x203   : > { %v5062_v55 = vpop.eup %5061  ;;  %v2193_v54 = vadd.f32 1e-05, %v2072_v20  ;;  %v2076_v20 = vmul.f32 0.0051020407, %v7639_v35 }
 0x204   : > { %v5064_v51 = vpop.eup %5063  ;;  %v2527_v58 = vmul.f32 %v5062_v55, %v2406_v0  ;;  %v2408_v0 = vld [vmem:[%s7763_s22 + $0x30] sm:$0xff]  ;;  %v2195_v13 = vadd.f32 1e-05, %v2074_v21  ;;  %v2078_v21 = vmul.f32 0.0051020407, %v7664_v17 }
 0x205   : > { %v7767_v40 = vpop.xlane.xlu1 %1781  ;;  %v5066_v8 = vpop.eup %5065  ;;  %v2197_v35 = vadd.f32 1e-05, %v2076_v20  ;;  %v2080_v20 = vmul.f32 0.0051020407, %v7689_v29 }
 0x206   : > { %v7770_v1 = vpop.xlane.xlu0 %1777  ;;  %v2528_v55 = vmul.f32 %v5066_v8, %v2407_v16  ;;  %v2409_v16 = vld [vmem:[%s7763_s22 + $0x38] sm:$0xff]  ;;  %v2199_v17 = vadd.f32 1e-05, %v2078_v21  ;;  %v2082_v21 = vmul.f32 0.0051020407, %v7710_v38 }
 0x207   : > { %v2201_v29 = vadd.f32 1e-05, %v2080_v20  ;;  %v2084_v20 = vmul.f32 0.0051020407, %v7728_v48 }
 0x208   : > { %v2203_v38 = vadd.f32 1e-05, %v2082_v21  ;;  %v2086_v21 = vmul.f32 0.0051020407, %v7737_v61 }
 0x209   : > { %v7774_v9 = vpop.xlane.xlu1 %1789  ;;  %2651 = vperm.xlu1 %5050, %v2524_v22   ;;  %v2523_v22 = vmul.f32 %v5056_v26, %v2402_v36  ;;  %v2532_v26 = vmul.f32 %v5060_v12, %v2411_v27  ;;  %v2049_v36 = vmul.f32 0.0051020407, %v9941_v39  ;;  %v5068_v12 = vpop.eup %5067  ;;  %v2051_v39 = vmul.f32 0.0051020407, %v9943_v3 }
 0x20a   : > { %v7777_v23 = vpop.xlane.xlu0 %1785  ;;  %v5070_v44 = vpop.eup %5069  ;;  %v2205_v48 = vadd.f32 1e-05, %v2084_v20  ;;  %v2207_v61 = vadd.f32 1e-05, %v2086_v21  ;;  %v2088_v20 = vmul.f32 0.0051020407, %v7743_v57 }
 0x20b   : > { %v2170_v10 = vadd.f32 1e-05, %v2049_v36  ;;  %v5072_v34 = vpop.eup %5071  ;;  %v2172_v36 = vadd.f32 1e-05, %v2051_v39  ;;  %v2529_v8 = vmul.f32 %v5070_v44, %v2408_v0  ;;  %v2410_v0 = vld [vmem:[%s7763_s22 + $0x40] sm:$0xff] }
 0x20c   : > { %v5074_v32 = vpop.eup %5073  ;;  %v2209_v57 = vadd.f32 1e-05, %v2088_v20  ;;  %v2090_v21 = vmul.f32 0.0051020407, %v7749_v41  ;;  %v2092_v20 = vmul.f32 0.0051020407, %v7756_v33 }
 0x20d   : > { %v7782_v45 = vpop.xlane.xlu1 %1797  ;;  %2656 = vperm.xlu1 %5050, %v2525_v30   ;;  %5081 = vrsqrt.f32 %v2170_v10  ;;  %v5076_v10 = vpop.eup %5075  ;;  %v2530_v44 = vmul.f32 %v5074_v32, %v2409_v16  ;;  %v2412_v16 = vld [vmem:[%s7763_s22 + $0x50] sm:$0xff] }
 0x20e   : > { %v7785_v24 = vpop.xlane.xlu0 %1793  ;;  %5083 = vrsqrt.f32 %v2181_v56  ;;  %v5078_v56 = vpop.eup %5077  ;;  %v2211_v41 = vadd.f32 1e-05, %v2090_v21  ;;  %v2213_v33 = vadd.f32 1e-05, %v2092_v20  ;;  %v2094_v21 = vmul.f32 0.0051020407, %v7770_v1 }
 0x20f   : > { %2646 = vperm.xlu0 %5049, %v2523_v22   ;;  %v2413_v22 = vld [vmem:[%s7763_s22 + $0x58] sm:$0xff]  ;;  %5085 = vrsqrt.f32 %v2172_v36  ;;  %v5080_v36 = vpop.eup %5079  ;;  %v2531_v32 = vmul.f32 %v5078_v56, %v2410_v0  ;;  %v2414_v0 = vld [vmem:[%s7763_s22 + $0x60] sm:$0xff]  ;;  %v2096_v20 = vmul.f32 0.0051020407, %v7777_v23 }
 0x210   : > { %v2534_v27 = vmul.f32 %v5064_v51, %v2413_v22  ;;  %v9944_v22 = vld [vmem:[#allocation103_spill] sm:$0xff]  ;;  %5087 = vrsqrt.f32 %v2183_v43  ;;  %v2215_v1 = vadd.f32 1e-05, %v2094_v21  ;;  %v2098_v21 = vmul.f32 0.0051020407, %v7785_v24 }
 0x211   : > { %v7790_v30 = vpop.xlane.xlu1 %1805  ;;  %2661 = vperm.xlu1 %5050, %v2526_v53   ;;  %v2053_v3 = vmul.f32 0.0051020407, %v9944_v22  ;;  %v2217_v23 = vadd.f32 1e-05, %v2096_v20 }
 0x212   : > { %9940 = vst [vmem:[#allocation248_spill] sm:$0xff] %v7790_v30  ;;  %v7793_v25 = vpop.xlane.xlu0 %1801  ;;  %v2219_v24 = vadd.f32 1e-05, %v2098_v21 }
 0x213   : > { %2691 = vperm.xlu0 %5049, %v2532_v26   ;;  %v2415_v26 = vld [vmem:[%s7763_s22 + $0x68] sm:$0xff]  ;;  %v2174_v39 = vadd.f32 1e-05, %v2053_v3  ;;  %v2057_v3 = vmul.f32 0.0051020407, %v7349_v59 }
 0x214   : > { %v2536_v51 = vmul.f32 %v5068_v12, %v2415_v26  ;;  %v2055_v26 = vmul.f32 0.0051020407, %v7323_v19  ;;  %v2100_v20 = vmul.f32 0.0051020407, %v7793_v25 }
 0x215   : > { %v7798_v53 = vpop.xlane.xlu1 %1813  ;;  %2666 = vperm.xlu1 %5050, %v2527_v58   ;;  %5089 = vrsqrt.f32 %v2174_v39  ;;  %v2178_v59 = vadd.f32 1e-05, %v2057_v3  ;;  %v2061_v3 = vmul.f32 0.0051020407, %v7408_v49 }
 0x216   : > { %9942 = vst [vmem:[#allocation180_spill] sm:$0xff] %v7798_v53  ;;  %v7801_v30 = vpop.xlane.xlu0 %1809  ;;  %v2176_v19 = vadd.f32 1e-05, %v2055_v26  ;;  %5091 = vrsqrt.f32 %v2185_v46  ;;  %v2059_v26 = vmul.f32 0.0051020407, %v7378_v60 }
 0x217   : > { %2701 = vperm.xlu0 %5049, %v2534_v27   ;;  %v2417_v27 = vld [vmem:[%s7763_s22 + $0x78] sm:$0xff]  ;;  %v5082_v43 = vpop.eup %5081  ;;  %v2182_v49 = vadd.f32 1e-05, %v2061_v3  ;;  %v2221_v25 = vadd.f32 1e-05, %v2100_v20 }
 0x218   : > { %v2538_v12 = vmul.f32 %v5072_v34, %v2417_v27  ;;  %v5084_v39 = vpop.eup %5083  ;;  %5093 = vrsqrt.f32 %v2176_v19  ;;  %v2533_v56 = vmul.f32 %v5082_v43, %v2412_v16  ;;  %v2180_v60 = vadd.f32 1e-05, %v2059_v26  ;;  %v2416_v16 = vld [vmem:[%s7763_s22 + $0x70] sm:$0xff] }
 0x219   : > { %v7806_v58 = vpop.xlane.xlu1 %1821  ;;  %2671 = vperm.xlu1 %5050, %v2528_v55   ;;  %v5086_v46 = vpop.eup %5085  ;;  %5095 = vrsqrt.f32 %v2187_v47  ;;  %v9946_v26 = vld [vmem:[#allocation208_spill] sm:$0xff]  ;;  %v2102_v21 = vmul.f32 0.0051020407, %v7801_v30 }
 0x21a   : > { %v7809_v53 = vpop.xlane.xlu0 %1817  ;;  %v5088_v19 = vpop.eup %5087  ;;  %5097 = vrsqrt.f32 %v2178_v59  ;;  %v2535_v43 = vmul.f32 %v5086_v46, %v2414_v0  ;;  %v2418_v0 = vld [vmem:[%s7763_s22 + $0x80] sm:$0xff] }
 0x21b   : > { %2711 = vperm.xlu0 %5049, %v2536_v51   ;;  %v2419_v51 = vld [vmem:[%s7763_s22 + $0x88] sm:$0xff]  ;;  %5099 = vrsqrt.f32 %v2189_v31  ;;  %v2223_v30 = vadd.f32 1e-05, %v2102_v21  ;;  %v2104_v20 = vmul.f32 0.0051020407, %v7809_v53 }
 0x21c   : > { %v2540_v34 = vmul.f32 %v5076_v10, %v2419_v51  ;;  %5101 = vrsqrt.f32 %v2180_v60 }
 0x21d   : > { %v7814_v55 = vpop.xlane.xlu1 %1829  ;;  %2676 = vperm.xlu1 %5050, %v2529_v8   ;;  %5103 = vrsqrt.f32 %v2191_v4  ;;  %v2225_v53 = vadd.f32 1e-05, %v2104_v20 }
 0x21e   : > { %v7817_v22 = vpop.xlane.xlu0 %1825  ;;  %5105 = vrsqrt.f32 %v2182_v49 }
 0x21f   : > { %2721 = vperm.xlu0 %5049, %v2538_v12   ;;  %v2421_v12 = vld [vmem:[%s7763_s22 + $0x98] sm:$0xff]  ;;  %v5090_v47 = vpop.eup %5089  ;;  %5107 = vrsqrt.f32 %v2193_v54  ;;  %v2106_v21 = vmul.f32 0.0051020407, %v7817_v22 }
 0x220   : > { %v2542_v10 = vmul.f32 %v5080_v36, %v2421_v12  ;;  %v5092_v59 = vpop.eup %5091  ;;  %v2537_v46 = vmul.f32 %v5090_v47, %v2416_v16  ;;  %v2420_v16 = vld [vmem:[%s7763_s22 + $0x90] sm:$0xff] }
 0x221   : > { %v7822_v8 = vpop.xlane.xlu1 %1837  ;;  %2681 = vperm.xlu1 %5050, %v2530_v44   ;;  %v2227_v22 = vadd.f32 1e-05, %v2106_v21 }
 0x222   : > { %v7825_v27 = vpop.xlane.xlu0 %1833  ;;  %v5094_v31 = vpop.eup %5093 }
 0x223   : > { %2731 = vperm.xlu0 %5049, %v2540_v34   ;;  %v2423_v34 = vld [vmem:[%s7763_s22 + $0xa8] sm:$0xff]  ;;  %v5096_v60 = vpop.eup %5095  ;;  %v2539_v47 = vmul.f32 %v5094_v31, %v2418_v0  ;;  %v2422_v0 = vld [vmem:[%s7763_s22 + $0xa0] sm:$0xff]  ;;  %v2108_v20 = vmul.f32 0.0051020407, %v7825_v27 }
 0x224   : > { %v2544_v36 = vmul.f32 %v5084_v39, %v2423_v34  ;;  %v2063_v34 = vmul.f32 0.0051020407, %v9946_v26  ;;  %v5098_v4 = vpop.eup %5097 }
 0x225   : > { %v7830_v44 = vpop.xlane.xlu1 %1845  ;;  %2686 = vperm.xlu1 %5050, %v2531_v32   ;;  %v5100_v49 = vpop.eup %5099  ;;  %v2541_v31 = vmul.f32 %v5098_v4, %v2420_v16  ;;  %v2424_v16 = vld [vmem:[%s7763_s22 + $0xb0] sm:$0xff]  ;;  %v2229_v27 = vadd.f32 1e-05, %v2108_v20 }
 0x226   : > { %v7833_v51 = vpop.xlane.xlu0 %1841  ;;  %v2184_v3 = vadd.f32 1e-05, %v2063_v34  ;;  %v2067_v34 = vmul.f32 0.0051020407, %v7489_v62  ;;  %v5102_v54 = vpop.eup %5101 }
 0x227   : > { %2741 = vperm.xlu0 %5049, %v2542_v10   ;;  %v2425_v10 = vld [vmem:[%s7763_s22 + $0xb8] sm:$0xff]  ;;  %v2543_v4 = vmul.f32 %v5102_v54, %v2422_v0  ;;  %v2426_v0 = vld [vmem:[%s7763_s22 + $0xc0] sm:$0xff]  ;;  %v2110_v21 = vmul.f32 0.0051020407, %v7833_v51 }
 0x228   : > { %v2546_v39 = vmul.f32 %v5088_v19, %v2425_v10  ;;  %v2065_v10 = vmul.f32 0.0051020407, %v7463_v7  ;;  %5109 = vrsqrt.f32 %v2184_v3  ;;  %v5104_v3 = vpop.eup %5103  ;;  %v2188_v62 = vadd.f32 1e-05, %v2067_v34 }
 0x229   : > { %v7838_v32 = vpop.xlane.xlu1 %1853  ;;  %2696 = vperm.xlu1 %5050, %v2533_v56   ;;  %5111 = vrsqrt.f32 %v2195_v13  ;;  %v5106_v13 = vpop.eup %5105  ;;  %v2071_v34 = vmul.f32 0.0051020407, %v7548_v42  ;;  %v2231_v51 = vadd.f32 1e-05, %v2110_v21 }
 0x22a   : > { %9945 = vst [vmem:[#allocation185_spill] sm:$0xff] %v7838_v32  ;;  %v7841_v12 = vpop.xlane.xlu0 %1849  ;;  %v2186_v7 = vadd.f32 1e-05, %v2065_v10  ;;  %v2069_v10 = vmul.f32 0.0051020407, %v7518_v50  ;;  %v2545_v54 = vmul.f32 %v5106_v13, %v2424_v16  ;;  %v2428_v16 = vld [vmem:[%s7763_s22 + $0xd0] sm:$0xff] }
 0x22b   : > { %2751 = vperm.xlu0 %5049, %v2544_v36   ;;  %v2427_v36 = vld [vmem:[%s7763_s22 + $0xc8] sm:$0xff]  ;;  %v2192_v42 = vadd.f32 1e-05, %v2071_v34  ;;  %v2075_v34 = vmul.f32 0.0051020407, %v7603_v18 }
 0x22c   : > { %v2548_v19 = vmul.f32 %v5092_v59, %v2427_v36  ;;  %5113 = vrsqrt.f32 %v2186_v7  ;;  %v5108_v7 = vpop.eup %5107  ;;  %v2190_v50 = vadd.f32 1e-05, %v2069_v10  ;;  %v2073_v10 = vmul.f32 0.0051020407, %v7576_v11 }
 0x22d   : > { %v7846_v56 = vpop.xlane.xlu1 %1861  ;;  %2706 = vperm.xlu1 %5050, %v2535_v43   ;;  %5115 = vrsqrt.f32 %v2197_v35  ;;  %v2196_v18 = vadd.f32 1e-05, %v2075_v34  ;;  %v2079_v34 = vmul.f32 0.0051020407, %v7654_v52  ;;  %v2112_v20 = vmul.f32 0.0051020407, %v7841_v12 }
 0x22e   : > { %v7849_v32 = vpop.xlane.xlu0 %1857  ;;  %5117 = vrsqrt.f32 %v2188_v62  ;;  %v2194_v11 = vadd.f32 1e-05, %v2073_v10  ;;  %v2077_v10 = vmul.f32 0.0051020407, %v7628_v63 }
 0x22f   : > { %2761 = vperm.xlu0 %5049, %v2546_v39   ;;  %v2429_v39 = vld [vmem:[%s7763_s22 + $0xd8] sm:$0xff]  ;;  %5119 = vrsqrt.f32 %v2199_v17  ;;  %v2200_v52 = vadd.f32 1e-05, %v2079_v34  ;;  %v2083_v34 = vmul.f32 0.0051020407, %v7703_v28 }
 0x230   : > { %v2550_v59 = vmul.f32 %v5096_v60, %v2429_v39  ;;  %5121 = vrsqrt.f32 %v2190_v50  ;;  %v2198_v63 = vadd.f32 1e-05, %v2077_v10  ;;  %v2081_v10 = vmul.f32 0.0051020407, %v7679_v37 }
 0x231   : > { %v7854_v43 = vpop.xlane.xlu1 %1869  ;;  %2716 = vperm.xlu1 %5050, %v2537_v46   ;;  %5123 = vrsqrt.f32 %v2201_v29  ;;  %v2204_v28 = vadd.f32 1e-05, %v2083_v34  ;;  %v2087_v34 = vmul.f32 0.0051020407, %v7734_v15  ;;  %v2233_v12 = vadd.f32 1e-05, %v2112_v20 }
 0x232   : > { %v7857_v26 = vpop.xlane.xlu0 %1865  ;;  %v5110_v35 = vpop.eup %5109  ;;  %5125 = vrsqrt.f32 %v2192_v42  ;;  %v2202_v37 = vadd.f32 1e-05, %v2081_v10  ;;  %v2085_v10 = vmul.f32 0.0051020407, %v7723_v14 }
 0x233   : > { %2771 = vperm.xlu0 %5049, %v2548_v19   ;;  %v2431_v19 = vld [vmem:[%s7763_s22 + $0xe8] sm:$0xff]  ;;  %v5112_v62 = vpop.eup %5111  ;;  %v2547_v13 = vmul.f32 %v5110_v35, %v2426_v0  ;;  %5127 = vrsqrt.f32 %v2203_v38  ;;  %v2430_v0 = vld [vmem:[%s7763_s22 + $0xe0] sm:$0xff]  ;;  %v2208_v15 = vadd.f32 1e-05, %v2087_v34  ;;  %v2091_v34 = vmul.f32 0.0051020407, %v7746_v6 }
 0x234   : > { %v2552_v60 = vmul.f32 %v5100_v49, %v2431_v19  ;;  %5129 = vrsqrt.f32 %v2194_v11  ;;  %v2206_v14 = vadd.f32 1e-05, %v2085_v10  ;;  %v2089_v10 = vmul.f32 0.0051020407, %v7740_v5 }
 0x235   : > { %v7862_v46 = vpop.xlane.xlu1 %1877  ;;  %2726 = vperm.xlu1 %5050, %v2539_v47   ;;  %5131 = vrsqrt.f32 %v2205_v48  ;;  %v2212_v6 = vadd.f32 1e-05, %v2091_v34  ;;  %v2095_v34 = vmul.f32 0.0051020407, %v7767_v40 }
 0x236   : > { %v7865_v36 = vpop.xlane.xlu0 %1873  ;;  %v5114_v17 = vpop.eup %5113  ;;  %5133 = vrsqrt.f32 %v2196_v18  ;;  %v2210_v5 = vadd.f32 1e-05, %v2089_v10  ;;  %v2093_v10 = vmul.f32 0.0051020407, %v7753_v2 }
 0x237   : > { %2781 = vperm.xlu0 %5049, %v2550_v59   ;;  %v2433_v59 = vld [vmem:[%s7763_s22 + $0xf8] sm:$0xff]  ;;  %v5116_v50 = vpop.eup %5115  ;;  %v2549_v35 = vmul.f32 %v5114_v17, %v2428_v16  ;;  %v2432_v16 = vld [vmem:[%s7763_s22 + $0xf0] sm:$0xff]  ;;  %5135 = vrsqrt.f32 %v2207_v61  ;;  %v2216_v40 = vadd.f32 1e-05, %v2095_v34  ;;  %v2099_v34 = vmul.f32 0.0051020407, %v7782_v45 }
 0x238   : > { %v2554_v49 = vmul.f32 %v5104_v3, %v2433_v59  ;;  %v5118_v29 = vpop.eup %5117  ;;  %5137 = vrsqrt.f32 %v2198_v63  ;;  %v2214_v2 = vadd.f32 1e-05, %v2093_v10  ;;  %v2097_v10 = vmul.f32 0.0051020407, %v7774_v9 }
 0x239   : > { %v7870_v47 = vpop.xlane.xlu1 %1885  ;;  %2736 = vperm.xlu1 %5050, %v2541_v31   ;;  %v5120_v42 = vpop.eup %5119  ;;  %v2551_v17 = vmul.f32 %v5118_v29, %v2430_v0  ;;  %v2434_v0 = vld [vmem:[%s7763_s22 + $0x100] sm:$0xff]  ;;  %5139 = vrsqrt.f32 %v2209_v57  ;;  %v2220_v45 = vadd.f32 1e-05, %v2099_v34 }
 0x23a   : > { %v7873_v39 = vpop.xlane.xlu0 %1881  ;;  %v5122_v38 = vpop.eup %5121  ;;  %5141 = vrsqrt.f32 %v2200_v52  ;;  %v2218_v9 = vadd.f32 1e-05, %v2097_v10  ;;  %v9949_v10 = vld [vmem:[#allocation248_spill] sm:$0xff] }
 0x23b   : > { %2791 = vperm.xlu0 %5049, %v2552_v60   ;;  %v2435_v60 = vld [vmem:[%s7763_s22 + $0x108] sm:$0xff]  ;;  %v5124_v11 = vpop.eup %5123  ;;  %v2553_v29 = vmul.f32 %v5122_v38, %v2432_v16  ;;  %v2436_v16 = vld [vmem:[%s7763_s22 + $0x110] sm:$0xff]  ;;  %5143 = vrsqrt.f32 %v2211_v41 }
 0x23c   : > { %v2556_v3 = vmul.f32 %v5108_v7, %v2435_v60  ;;  %v5126_v48 = vpop.eup %5125  ;;  %5145 = vrsqrt.f32 %v2202_v37 }
 0x23d   : > { %v7878_v31 = vpop.xlane.xlu1 %1893  ;;  %2746 = vperm.xlu1 %5050, %v2543_v4   ;;  %v5128_v18 = vpop.eup %5127  ;;  %v2555_v38 = vmul.f32 %v5126_v48, %v2434_v0  ;;  %v2438_v0 = vld [vmem:[%s7763_s22 + $0x120] sm:$0xff]  ;;  %5147 = vrsqrt.f32 %v2213_v33 }
 0x23e   : > { %v7881_v19 = vpop.xlane.xlu0 %1889  ;;  %v5130_v61 = vpop.eup %5129  ;;  %5149 = vrsqrt.f32 %v2204_v28 }
 0x23f   : > { %2801 = vperm.xlu0 %5049, %v2554_v49   ;;  %v2437_v49 = vld [vmem:[%s7763_s22 + $0x118] sm:$0xff]  ;;  %v5132_v63 = vpop.eup %5131  ;;  %v2557_v48 = vmul.f32 %v5130_v61, %v2436_v16  ;;  %v2440_v16 = vld [vmem:[%s7763_s22 + $0x130] sm:$0xff]  ;;  %5151 = vrsqrt.f32 %v2215_v1 }
 0x240   : > { %v2558_v7 = vmul.f32 %v5112_v62, %v2437_v49  ;;  %v5134_v57 = vpop.eup %5133  ;;  %5153 = vrsqrt.f32 %v2206_v14 }
 0x241   : > { %v7886_v4 = vpop.xlane.xlu1 %1901  ;;  %2756 = vperm.xlu1 %5050, %v2545_v54   ;;  %v5136_v52 = vpop.eup %5135  ;;  %v2559_v61 = vmul.f32 %v5134_v57, %v2438_v0  ;;  %v2442_v0 = vld [vmem:[%s7763_s22 + $0x140] sm:$0xff]  ;;  %5155 = vrsqrt.f32 %v2217_v23 }
 0x242   : > { %v7889_v59 = vpop.xlane.xlu0 %1897  ;;  %v5138_v41 = vpop.eup %5137  ;;  %5157 = vrsqrt.f32 %v2208_v15 }
 0x243   : > { %2811 = vperm.xlu0 %5049, %v2556_v3   ;;  %v2439_v3 = vld [vmem:[%s7763_s22 + $0x128] sm:$0xff]  ;;  %v5140_v37 = vpop.eup %5139  ;;  %v2561_v57 = vmul.f32 %v5138_v41, %v2440_v16  ;;  %v2444_v16 = vld [vmem:[%s7763_s22 + $0x150] sm:$0xff]  ;;  %5159 = vrsqrt.f32 %v2219_v24 }
 0x244   : > { %v2560_v62 = vmul.f32 %v5116_v50, %v2439_v3  ;;  %v5142_v33 = vpop.eup %5141  ;;  %5161 = vrsqrt.f32 %v2210_v5 }
 0x245   : > { %v7894_v54 = vpop.xlane.xlu1 %1909  ;;  %2766 = vperm.xlu1 %5050, %v2547_v13   ;;  %v5144_v28 = vpop.eup %5143  ;;  %v2563_v41 = vmul.f32 %v5142_v33, %v2442_v0  ;;  %v2446_v0 = vld [vmem:[%s7763_s22 + $0x160] sm:$0xff]  ;;  %5163 = vrsqrt.f32 %v2221_v25 }
 0x246   : > { %v7897_v60 = vpop.xlane.xlu0 %1905  ;;  %v5146_v1 = vpop.eup %5145  ;;  %5165 = vrsqrt.f32 %v2212_v6 }
 0x247   : > { %2821 = vperm.xlu0 %5049, %v2558_v7   ;;  %v2441_v7 = vld [vmem:[%s7763_s22 + $0x138] sm:$0xff]  ;;  %v5148_v14 = vpop.eup %5147  ;;  %v2565_v33 = vmul.f32 %v5146_v1, %v2444_v16  ;;  %v2448_v16 = vld [vmem:[%s7763_s22 + $0x170] sm:$0xff]  ;;  %5167 = vrsqrt.f32 %v2223_v30 }
 0x248   : > { %v2562_v50 = vmul.f32 %v5120_v42, %v2441_v7  ;;  %v5150_v23 = vpop.eup %5149  ;;  %5169 = vrsqrt.f32 %v2214_v2 }
 0x249   : > { %v7902_v13 = vpop.xlane.xlu1 %1917  ;;  %2776 = vperm.xlu1 %5050, %v2549_v35   ;;  %v5152_v15 = vpop.eup %5151  ;;  %v2567_v1 = vmul.f32 %v5150_v23, %v2446_v0  ;;  %v2450_v0 = vld [vmem:[%s7763_s22 + $0x180] sm:$0xff]  ;;  %5171 = vrsqrt.f32 %v2225_v53 }
 0x24a   : > { %v7905_v49 = vpop.xlane.xlu0 %1913  ;;  %v5154_v24 = vpop.eup %5153  ;;  %5173 = vrsqrt.f32 %v2216_v40 }
 0x24b   : > { %2831 = vperm.xlu0 %5049, %v2560_v62   ;;  %v2443_v62 = vld [vmem:[%s7763_s22 + $0x148] sm:$0xff]  ;;  %v5156_v5 = vpop.eup %5155  ;;  %v2569_v23 = vmul.f32 %v5154_v24, %v2448_v16  ;;  %v2452_v16 = vld [vmem:[%s7763_s22 + $0x190] sm:$0xff]  ;;  %5175 = vrsqrt.f32 %v2227_v22 }
 0x24c   : > { %v2564_v42 = vmul.f32 %v5124_v11, %v2443_v62  ;;  %v5158_v25 = vpop.eup %5157  ;;  %5177 = vrsqrt.f32 %v2218_v9 }
 0x24d   : > { %v7910_v35 = vpop.xlane.xlu1 %1925  ;;  %2786 = vperm.xlu1 %5050, %v2551_v17   ;;  %v5160_v6 = vpop.eup %5159  ;;  %v2571_v24 = vmul.f32 %v5158_v25, %v2450_v0  ;;  %v2454_v0 = vld [vmem:[%s7763_s22 + $0x1a0] sm:$0xff]  ;;  %5179 = vrsqrt.f32 %v2229_v27 }
 0x24e   : > { %v7913_v3 = vpop.xlane.xlu0 %1921  ;;  %v5162_v30 = vpop.eup %5161  ;;  %5181 = vrsqrt.f32 %v2220_v45 }
 0x24f   : > { %2841 = vperm.xlu0 %5049, %v2562_v50   ;;  %v2445_v50 = vld [vmem:[%s7763_s22 + $0x158] sm:$0xff]  ;;  %v5164_v2 = vpop.eup %5163  ;;  %v2573_v25 = vmul.f32 %v5162_v30, %v2452_v16  ;;  %v2456_v16 = vld [vmem:[%s7763_s22 + $0x1b0] sm:$0xff]  ;;  %5183 = vrsqrt.f32 %v2231_v51 }
 0x250   : > { %v2566_v11 = vmul.f32 %v5128_v18, %v2445_v50  ;;  %v5166_v53 = vpop.eup %5165 }
 0x251   : > { %v7918_v17 = vpop.xlane.xlu1 %1933  ;;  %2796 = vperm.xlu1 %5050, %v2553_v29   ;;  %v5168_v40 = vpop.eup %5167  ;;  %v2575_v30 = vmul.f32 %v5166_v53, %v2454_v0  ;;  %v2467_v53 = vld [vmem:[%s7763_s22 + $0x208] sm:$0xff]  ;;  %v2114_v0 = vmul.f32 0.0051020407, %v7849_v32  ;;  %v2116_v32 = vmul.f32 0.0051020407, %v7857_v26 }
 0x252   : > { %v7921_v7 = vpop.xlane.xlu0 %1929  ;;  %v5170_v22 = vpop.eup %5169 }
 0x253   : > { %2851 = vperm.xlu0 %5049, %v2564_v42   ;;  %v2447_v42 = vld [vmem:[%s7763_s22 + $0x168] sm:$0xff]  ;;  %v5172_v9 = vpop.eup %5171  ;;  %v2577_v27 = vmul.f32 %v5170_v22, %v2456_v16  ;;  %v2235_v51 = vadd.f32 1e-05, %v2114_v0  ;;  %v2237_v26 = vadd.f32 1e-05, %v2116_v32 }
 0x254   : > { %v2568_v18 = vmul.f32 %v5132_v63, %v2447_v42  ;;  %v5174_v21 = vpop.eup %5173  ;;  %v2118_v0 = vmul.f32 0.0051020407, %v7865_v36  ;;  %v2120_v32 = vmul.f32 0.0051020407, %v7873_v39 }
 0x255   : > { %v7926_v29 = vpop.xlane.xlu1 %1941  ;;  %2806 = vperm.xlu1 %5050, %v2555_v38   ;;  %v5176_v45 = vpop.eup %5175 }
 0x256   : > { %v7929_v62 = vpop.xlane.xlu0 %1937  ;;  %v5178_v16 = vpop.eup %5177  ;;  %v2239_v36 = vadd.f32 1e-05, %v2118_v0  ;;  %v2241_v39 = vadd.f32 1e-05, %v2120_v32  ;;  %v2122_v0 = vmul.f32 0.0051020407, %v7881_v19 }
 0x257   : > { %2861 = vperm.xlu0 %5049, %v2566_v11   ;;  %v2449_v11 = vld [vmem:[%s7763_s22 + $0x178] sm:$0xff]  ;;  %v2124_v32 = vmul.f32 0.0051020407, %v7889_v59 }
 0x258   : > { %v2570_v63 = vmul.f32 %v5136_v52, %v2449_v11  ;;  %v2243_v19 = vadd.f32 1e-05, %v2122_v0  ;;  %v2126_v0 = vmul.f32 0.0051020407, %v7897_v60 }
 0x259   : > { %v7934_v38 = vpop.xlane.xlu1 %1949  ;;  %2816 = vperm.xlu1 %5050, %v2557_v48   ;;  %v2245_v59 = vadd.f32 1e-05, %v2124_v32  ;;  %v2128_v32 = vmul.f32 0.0051020407, %v7905_v49 }
 0x25a   : > { %v7937_v50 = vpop.xlane.xlu0 %1945  ;;  %v2247_v60 = vadd.f32 1e-05, %v2126_v0  ;;  %v2130_v0 = vmul.f32 0.0051020407, %v7913_v3 }
 0x25b   : > { %2871 = vperm.xlu0 %5049, %v2568_v18   ;;  %v2451_v18 = vld [vmem:[%s7763_s22 + $0x188] sm:$0xff]  ;;  %v2249_v49 = vadd.f32 1e-05, %v2128_v32  ;;  %v2132_v32 = vmul.f32 0.0051020407, %v7921_v7 }
 0x25c   : > { %v2572_v52 = vmul.f32 %v5140_v37, %v2451_v18  ;;  %v2251_v3 = vadd.f32 1e-05, %v2130_v0  ;;  %v2134_v0 = vmul.f32 0.0051020407, %v7929_v62 }
 0x25d   : > { %v7942_v48 = vpop.xlane.xlu1 %1957  ;;  %2826 = vperm.xlu1 %5050, %v2559_v61   ;;  %v2253_v7 = vadd.f32 1e-05, %v2132_v32  ;;  %v2136_v32 = vmul.f32 0.0051020407, %v7937_v50 }
 0x25e   : > { %v7945_v42 = vpop.xlane.xlu0 %1953  ;;  %v2255_v62 = vadd.f32 1e-05, %v2134_v0 }
 0x25f   : > { %2881 = vperm.xlu0 %5049, %v2570_v63   ;;  %v2453_v63 = vld [vmem:[%s7763_s22 + $0x198] sm:$0xff]  ;;  %v2257_v50 = vadd.f32 1e-05, %v2136_v32  ;;  %v2138_v0 = vmul.f32 0.0051020407, %v7945_v42 }
 0x260   : > { %v2574_v37 = vmul.f32 %v5144_v28, %v2453_v63 }
 0x261   : > { %v7950_v61 = vpop.xlane.xlu1 %1965  ;;  %2836 = vperm.xlu1 %5050, %v2561_v57   ;;  %v2259_v42 = vadd.f32 1e-05, %v2138_v0 }
 0x262   : > { %v7953_v11 = vpop.xlane.xlu0 %1961 }
 0x263   : > { %2891 = vperm.xlu0 %5049, %v2572_v52   ;;  %v2455_v52 = vld [vmem:[%s7763_s22 + $0x1a8] sm:$0xff]  ;;  %v2140_v32 = vmul.f32 0.0051020407, %v7953_v11 }
 0x264   : > { %v2576_v28 = vmul.f32 %v5148_v14, %v2455_v52 }
 0x265   : > { %v7958_v57 = vpop.xlane.xlu1 %1973  ;;  %2846 = vperm.xlu1 %5050, %v2563_v41   ;;  %v2261_v11 = vadd.f32 1e-05, %v2140_v32 }
 0x266   : > { %v7961_v18 = vpop.xlane.xlu0 %1969 }
 0x267   : > { %2901 = vperm.xlu0 %5049, %v2574_v37   ;;  %v2457_v37 = vld [vmem:[%s7763_s22 + $0x1b8] sm:$0xff]  ;;  %v2142_v0 = vmul.f32 0.0051020407, %v7961_v18 }
 0x268   : > { %v2578_v14 = vmul.f32 %v5152_v15, %v2457_v37 }
 0x269   : > { %v7966_v41 = vpop.xlane.xlu1 %1981  ;;  %2856 = vperm.xlu1 %5050, %v2565_v33   ;;  %v2263_v18 = vadd.f32 1e-05, %v2142_v0 }
 0x26a   : > { %v7969_v63 = vpop.xlane.xlu0 %1977 }
 0x26b   : > { %2911 = vperm.xlu0 %5049, %v2576_v28   ;;  %v2459_v28 = vld [vmem:[%s7763_s22 + $0x1c8] sm:$0xff]  ;;  %v2144_v32 = vmul.f32 0.0051020407, %v7969_v63 }
 0x26c   : > { %v2580_v15 = vmul.f32 %v5156_v5, %v2459_v28 }
 0x26d   : > { %v7974_v33 = vpop.xlane.xlu1 %1989  ;;  %2866 = vperm.xlu1 %5050, %v2567_v1   ;;  %v2265_v63 = vadd.f32 1e-05, %v2144_v32 }
 0x26e   : > { %v7977_v52 = vpop.xlane.xlu0 %1985 }
 0x26f   : > { %2921 = vperm.xlu0 %5049, %v2578_v14   ;;  %v2461_v14 = vld [vmem:[%s7763_s22 + $0x1d8] sm:$0xff]  ;;  %v2146_v0 = vmul.f32 0.0051020407, %v7977_v52 }
 0x270   : > { %v2582_v5 = vmul.f32 %v5160_v6, %v2461_v14  ;;  %v2101_v14 = vmul.f32 0.0051020407, %v9949_v10 }
 0x271   : > { %v7982_v1 = vpop.xlane.xlu1 %1997  ;;  %2876 = vperm.xlu1 %5050, %v2569_v23   ;;  %v2267_v52 = vadd.f32 1e-05, %v2146_v0 }
 0x272   : > { %v7985_v37 = vpop.xlane.xlu0 %1993  ;;  %v2222_v34 = vadd.f32 1e-05, %v2101_v14 }
 0x273   : > { %2931 = vperm.xlu0 %5049, %v2580_v15   ;;  %v2463_v15 = vld [vmem:[%s7763_s22 + $0x1e8] sm:$0xff]  ;;  %v2148_v32 = vmul.f32 0.0051020407, %v7985_v37 }
 0x274   : > { %v2584_v6 = vmul.f32 %v5164_v2, %v2463_v15  ;;  %v9950_v15 = vld [vmem:[#allocation180_spill] sm:$0xff]  ;;  %5185 = vrsqrt.f32 %v2222_v34  ;;  %v5180_v34 = vpop.eup %5179 }
 0x275   : > { %v7990_v23 = vpop.xlane.xlu1 %2005  ;;  %2886 = vperm.xlu1 %5050, %v2571_v24   ;;  %v2103_v10 = vmul.f32 0.0051020407, %v9950_v15  ;;  %v2469_v15 = vld [vmem:[%s7763_s22 + $0x218] sm:$0xff]  ;;  %5187 = vrsqrt.f32 %v2233_v12  ;;  %v5182_v12 = vpop.eup %5181  ;;  %v2269_v37 = vadd.f32 1e-05, %v2148_v32 }
 0x276   : > { %9947 = vst [vmem:[#allocation103_spill] sm:$0xff] %v7990_v23  ;;  %v7993_v28 = vpop.xlane.xlu0 %2001 }
 0x277   : > { %2941 = vperm.xlu0 %5049, %v2582_v5   ;;  %v2465_v5 = vld [vmem:[%s7763_s22 + $0x1f8] sm:$0xff]  ;;  %v2224_v14 = vadd.f32 1e-05, %v2103_v10  ;;  %v2107_v10 = vmul.f32 0.0051020407, %v7814_v55 }
 0x278   : > { %v2586_v2 = vmul.f32 %v5168_v40, %v2465_v5  ;;  %v2588_v40 = vmul.f32 %v5172_v9, %v2467_v53  ;;  %v2105_v5 = vmul.f32 0.0051020407, %v7806_v58  ;;  %v2590_v9 = vmul.f32 %v5176_v45, %v2469_v15  ;;  %v2471_v53 = vld [vmem:[%s7763_s22 + $0x228] sm:$0xff]  ;;  %v5184_v15 = vpop.eup %5183 }
 0x279   : > { %v7998_v24 = vpop.xlane.xlu1 %2013  ;;  %2896 = vperm.xlu1 %5050, %v2573_v25   ;;  %5189 = vrsqrt.f32 %v2224_v14  ;;  %v2592_v45 = vmul.f32 %v5180_v34, %v2471_v53  ;;  %v2228_v14 = vadd.f32 1e-05, %v2107_v10  ;;  %v2109_v55 = vmul.f32 0.0051020407, %v7822_v8 }
 0x27a   : > { %9948 = vst [vmem:[#allocation208_spill] sm:$0xff] %v7998_v24  ;;  %v8001_v23 = vpop.xlane.xlu0 %2009  ;;  %v2226_v58 = vadd.f32 1e-05, %v2105_v5  ;;  %5191 = vrsqrt.f32 %v2235_v51  ;;  %v2111_v10 = vmul.f32 0.0051020407, %v7830_v44 }
 0x27b   : > { %2951 = vperm.xlu0 %5049, %v2584_v6   ;;  %v2458_v6 = vld [vmem:[%s7763_s22 + $0x1c0] sm:$0xff]  ;;  %v2230_v8 = vadd.f32 1e-05, %v2109_v55  ;;  %v9951_v55 = vld [vmem:[#allocation185_spill] sm:$0xff]  ;;  %v2150_v0 = vmul.f32 0.0051020407, %v7993_v28 }
 0x27c   : > { %v2579_v22 = vmul.f32 %v5174_v21, %v2458_v6  ;;  %v2462_v6 = vld [vmem:[%s7763_s22 + $0x1e0] sm:$0xff]  ;;  %5193 = vrsqrt.f32 %v2226_v58  ;;  %v2232_v44 = vadd.f32 1e-05, %v2111_v10  ;;  %v2152_v32 = vmul.f32 0.0051020407, %v8001_v23 }
 0x27d   : > { %v8006_v25 = vpop.xlane.xlu1 %2021  ;;  %2906 = vperm.xlu1 %5050, %v2575_v30   ;;  %5195 = vrsqrt.f32 %v2237_v26  ;;  %v2271_v28 = vadd.f32 1e-05, %v2150_v0 }
 0x27e   : > { %v8009_v24 = vpop.xlane.xlu0 %2017  ;;  %v5186_v51 = vpop.eup %5185  ;;  %5197 = vrsqrt.f32 %v2228_v14  ;;  %v2273_v23 = vadd.f32 1e-05, %v2152_v32 }
 0x27f   : > { %2961 = vperm.xlu0 %5049, %v2586_v2   ;;  %v2460_v2 = vld [vmem:[%s7763_s22 + $0x1d0] sm:$0xff]  ;;  %v5188_v58 = vpop.eup %5187  ;;  %5199 = vrsqrt.f32 %v2239_v36  ;;  %v2154_v0 = vmul.f32 0.0051020407, %v8009_v24 }
 0x280   : > { %v2581_v21 = vmul.f32 %v5178_v16, %v2460_v2  ;;  %v2583_v16 = vmul.f32 %v5182_v12, %v2462_v6  ;;  %v2464_v2 = vld [vmem:[%s7763_s22 + $0x1f0] sm:$0xff]  ;;  %v2466_v6 = vld [vmem:[%s7763_s22 + $0x200] sm:$0xff]  ;;  %5201 = vrsqrt.f32 %v2230_v8 }
 0x281   : > { %v8014_v30 = vpop.xlane.xlu1 %2029  ;;  %2916 = vperm.xlu1 %5050, %v2577_v27   ;;  %v2585_v12 = vmul.f32 %v5186_v51, %v2464_v2  ;;  %5203 = vrsqrt.f32 %v2241_v39  ;;  %v2468_v2 = vld [vmem:[%s7763_s22 + $0x210] sm:$0xff]  ;;  %v2275_v24 = vadd.f32 1e-05, %v2154_v0 }
 0x282   : > { %v8019_v20 = vpop.xlane.xlu0 %2025  ;;  %5205 = vrsqrt.f32 %v2232_v44 }
 0x283   : > { %2971 = vperm.xlu0 %5049, %v2588_v40   ;;  %v5190_v26 = vpop.eup %5189  ;;  %5207 = vrsqrt.f32 %v2243_v19  ;;  %v2156_v32 = vmul.f32 0.0051020407, %v8019_v20 }
 0x284   : > { %v5192_v14 = vpop.eup %5191  ;;  %v2587_v51 = vmul.f32 %v5190_v26, %v2466_v6  ;;  %v2470_v6 = vld [vmem:[%s7763_s22 + $0x220] sm:$0xff] }
 0x285   : > { %v8022_v27 = vpop.xlane.xlu1 %2037  ;;  %2926 = vperm.xlu1 %5050, %v2579_v22   ;;  %v2473_v22 = vld [vmem:[%s7763_s22 + $0x238] sm:$0xff]  ;;  %v2277_v20 = vadd.f32 1e-05, %v2156_v32 }
 0x286   : > { %v8031_v5 = vpop.xlane.xlu0 %2033  ;;  %v2594_v34 = vmul.f32 %v5184_v15, %v2473_v22  ;;  %v2113_v22 = vmul.f32 0.0051020407, %v9951_v55  ;;  %v5194_v36 = vpop.eup %5193 }
 0x287   : > { %2981 = vperm.xlu0 %5049, %v2590_v9   ;;  %v5196_v8 = vpop.eup %5195  ;;  %v2589_v26 = vmul.f32 %v5194_v36, %v2468_v2  ;;  %v2472_v2 = vld [vmem:[%s7763_s22 + $0x230] sm:$0xff]  ;;  %v2158_v0 = vmul.f32 0.0051020407, %v8031_v5 }
 0x288   : > { %v2234_v10 = vadd.f32 1e-05, %v2113_v22  ;;  %v5198_v39 = vpop.eup %5197  ;;  %v2117_v22 = vmul.f32 0.0051020407, %v7854_v43 }
 0x289   : > { %v8028_v40 = vpop.permute.xlu1 %2651  ;;  %2936 = vperm.xlu1 %5050, %v2581_v21   ;;  %v2475_v21 = vld [vmem:[%s7763_s22 + $0x248] sm:$0xff]  ;;  %v5200_v44 = vpop.eup %5199  ;;  %v2591_v36 = vmul.f32 %v5198_v39, %v2470_v6  ;;  %v2474_v6 = vld [vmem:[%s7763_s22 + $0x240] sm:$0xff]  ;;  %v2279_v5 = vadd.f32 1e-05, %v2158_v0 }
 0x28a   : > { %v2596_v15 = vmul.f32 %v5188_v58, %v2475_v21  ;;  %v2115_v21 = vmul.f32 0.0051020407, %v7846_v56  ;;  %5209 = vrsqrt.f32 %v2234_v10  ;;  %v5202_v19 = vpop.eup %5201  ;;  %v2238_v43 = vadd.f32 1e-05, %v2117_v22  ;;  %v2506_v0 = vld [vmem:[%s7763_s22 + $0x340] sm:$0xff] }
 0x28b   : > { %2991 = vperm.xlu0 %5049, %v2592_v45   ;;  %5211 = vrsqrt.f32 %v2245_v59  ;;  %v5204_v10 = vpop.eup %5203  ;;  %v2593_v39 = vmul.f32 %v5202_v19, %v2472_v2  ;;  %v2476_v2 = vld [vmem:[%s7763_s22 + $0x250] sm:$0xff] }
 0x28c   : > { %v2236_v56 = vadd.f32 1e-05, %v2115_v21  ;;  %v2119_v21 = vmul.f32 0.0051020407, %v7862_v46  ;;  %v5206_v59 = vpop.eup %5205 }
 0x28d   : > { %v8036_v9 = vpop.permute.xlu1 %2656  ;;  %2946 = vperm.xlu1 %5050, %v2583_v16   ;;  %v5208_v22 = vpop.eup %5207  ;;  %v2595_v19 = vmul.f32 %v5206_v59, %v2474_v6  ;;  %v2478_v6 = vld [vmem:[%s7763_s22 + $0x260] sm:$0xff] }
 0x28e   : > { %v8039_v53 = vpop.permute.xlu0 %2646  ;;  %5213 = vrsqrt.f32 %v2236_v56  ;;  %v2240_v46 = vadd.f32 1e-05, %v2119_v21 }
 0x28f   : > { %3001 = vperm.xlu0 %5049, %v2594_v34   ;;  %v2477_v34 = vld [vmem:[%s7763_s22 + $0x258] sm:$0xff]  ;;  %5215 = vrsqrt.f32 %v2247_v60 }
 0x290   : > { %v2598_v58 = vmul.f32 %v5192_v14, %v2477_v34  ;;  %5217 = vrsqrt.f32 %v2238_v43 }
 0x291   : > { %v8044_v45 = vpop.permute.xlu1 %2661  ;;  %2956 = vperm.xlu1 %5050, %v2585_v12   ;;  %5219 = vrsqrt.f32 %v2249_v49 }
 0x292   : > { %v8047_v16 = vpop.permute.xlu0 %2691  ;;  %5221 = vrsqrt.f32 %v2240_v46 }
 0x293   : > { %3011 = vperm.xlu0 %5049, %v2596_v15   ;;  %v2479_v15 = vld [vmem:[%s7763_s22 + $0x268] sm:$0xff]  ;;  %5223 = vrsqrt.f32 %v2251_v3 }
 0x294   : > { %v2600_v14 = vmul.f32 %v5196_v8, %v2479_v15  ;;  %v5210_v60 = vpop.eup %5209 }
 0x295   : > { %v8052_v12 = vpop.permute.xlu1 %2666  ;;  %2966 = vperm.xlu1 %5050, %v2587_v51   ;;  %v5212_v21 = vpop.eup %5211  ;;  %v2597_v59 = vmul.f32 %v5210_v60, %v2476_v2  ;;  %v2480_v2 = vld [vmem:[%s7763_s22 + $0x270] sm:$0xff] }
 0x296   : > { %v8055_v55 = vpop.permute.xlu0 %2701 }
 0x297   : > { %3021 = vperm.xlu0 %5049, %v2598_v58   ;;  %v2481_v58 = vld [vmem:[%s7763_s22 + $0x278] sm:$0xff] }
 0x298   : > { %v2602_v8 = vmul.f32 %v5200_v44, %v2481_v58  ;;  %v2121_v58 = vmul.f32 0.0051020407, %v7870_v47  ;;  %v5214_v49 = vpop.eup %5213 }
 0x299   : > { %v8060_v51 = vpop.permute.xlu1 %2671  ;;  %2976 = vperm.xlu1 %5050, %v2589_v26   ;;  %v2599_v60 = vmul.f32 %v5214_v49, %v2478_v6  ;;  %v2482_v6 = vld [vmem:[%s7763_s22 + $0x280] sm:$0xff] }
 0x29a   : > { %v8063_v34 = vpop.permute.xlu0 %2711  ;;  %v2242_v47 = vadd.f32 1e-05, %v2121_v58  ;;  %v5216_v58 = vpop.eup %5215 }
 0x29b   : > { %3031 = vperm.xlu0 %5049, %v2600_v14   ;;  %v2483_v14 = vld [vmem:[%s7763_s22 + $0x288] sm:$0xff]  ;;  %v5218_v3 = vpop.eup %5217 }
 0x29c   : > { %v2604_v56 = vmul.f32 %v5204_v10, %v2483_v14  ;;  %v2123_v14 = vmul.f32 0.0051020407, %v7878_v31  ;;  %5225 = vrsqrt.f32 %v2242_v47  ;;  %v2601_v49 = vmul.f32 %v5218_v3, %v2480_v2  ;;  %v2484_v2 = vld [vmem:[%s7763_s22 + $0x290] sm:$0xff] }
 0x29d   : > { %v8068_v26 = vpop.permute.xlu1 %2676  ;;  %2986 = vperm.xlu1 %5050, %v2591_v36   ;;  %5227 = vrsqrt.f32 %v2253_v7 }
 0x29e   : > { %v8071_v15 = vpop.permute.xlu0 %2721  ;;  %v2244_v31 = vadd.f32 1e-05, %v2123_v14  ;;  %v5220_v14 = vpop.eup %5219 }
 0x29f   : > { %3041 = vperm.xlu0 %5049, %v2602_v8   ;;  %v2485_v8 = vld [vmem:[%s7763_s22 + $0x298] sm:$0xff]  ;;  %v5222_v7 = vpop.eup %5221 }
 0x2a0   : > { %v2606_v43 = vmul.f32 %v5208_v22, %v2485_v8  ;;  %v2125_v8 = vmul.f32 0.0051020407, %v7886_v4  ;;  %5229 = vrsqrt.f32 %v2244_v31  ;;  %v2603_v3 = vmul.f32 %v5222_v7, %v2482_v6  ;;  %v2486_v6 = vld [vmem:[%s7763_s22 + $0x2a0] sm:$0xff] }
 0x2a1   : > { %2996 = vperm.xlu1 %5050, %v2593_v39   ;;  %v8076_v44 = vpop.permute.xlu1 %2681  ;;  %5231 = vrsqrt.f32 %v2255_v62 }
 0x2a2   : > { %v8079_v36 = vpop.permute.xlu0 %2731  ;;  %v2246_v4 = vadd.f32 1e-05, %v2125_v8  ;;  %v5224_v8 = vpop.eup %5223 }
 0x2a3   : > { %3051 = vperm.xlu0 %5049, %v2604_v56   ;;  %v2487_v56 = vld [vmem:[%s7763_s22 + $0x2a8] sm:$0xff] }
 0x2a4   : > { %v2608_v46 = vmul.f32 %v5212_v21, %v2487_v56  ;;  %v2127_v56 = vmul.f32 0.0051020407, %v7894_v54  ;;  %5233 = vrsqrt.f32 %v2246_v4 }
 0x2a5   : > { %3006 = vperm.xlu1 %5050, %v2595_v19   ;;  %v8084_v10 = vpop.permute.xlu1 %2686  ;;  %5235 = vrsqrt.f32 %v2257_v50 }
 0x2a6   : > { %v8087_v39 = vpop.permute.xlu0 %2741  ;;  %v2248_v54 = vadd.f32 1e-05, %v2127_v56  ;;  %v5226_v62 = vpop.eup %5225 }
 0x2a7   : > { %3061 = vperm.xlu0 %5049, %v2606_v43   ;;  %v2489_v43 = vld [vmem:[%s7763_s22 + $0x2b8] sm:$0xff]  ;;  %v5228_v56 = vpop.eup %5227  ;;  %v2605_v7 = vmul.f32 %v5226_v62, %v2484_v2  ;;  %v2488_v2 = vld [vmem:[%s7763_s22 + $0x2b0] sm:$0xff] }
 0x2a8   : > { %v2610_v47 = vmul.f32 %v5216_v58, %v2489_v43  ;;  %v2129_v43 = vmul.f32 0.0051020407, %v7902_v13  ;;  %5237 = vrsqrt.f32 %v2248_v54 }
 0x2a9   : > { %3016 = vperm.xlu1 %5050, %v2597_v59   ;;  %v8092_v22 = vpop.permute.xlu1 %2696  ;;  %5239 = vrsqrt.f32 %v2259_v42 }
 0x2aa   : > { %v8095_v19 = vpop.permute.xlu0 %2751  ;;  %v2250_v13 = vadd.f32 1e-05, %v2129_v43  ;;  %v5230_v50 = vpop.eup %5229 }
 0x2ab   : > { %3071 = vperm.xlu0 %5049, %v2608_v46   ;;  %v2491_v46 = vld [vmem:[%s7763_s22 + $0x2c8] sm:$0xff]  ;;  %v5232_v43 = vpop.eup %5231  ;;  %v2607_v62 = vmul.f32 %v5230_v50, %v2486_v6  ;;  %v2490_v6 = vld [vmem:[%s7763_s22 + $0x2c0] sm:$0xff] }
 0x2ac   : > { %v2612_v31 = vmul.f32 %v5220_v14, %v2491_v46  ;;  %v2131_v46 = vmul.f32 0.0051020407, %v7910_v35  ;;  %5241 = vrsqrt.f32 %v2250_v13 }
 0x2ad   : > { %3026 = vperm.xlu1 %5050, %v2599_v60   ;;  %v8100_v21 = vpop.permute.xlu1 %2706  ;;  %5243 = vrsqrt.f32 %v2261_v11 }
 0x2ae   : > { %v8103_v59 = vpop.permute.xlu0 %2761  ;;  %v2252_v35 = vadd.f32 1e-05, %v2131_v46  ;;  %v5234_v42 = vpop.eup %5233 }
 0x2af   : > { %3081 = vperm.xlu0 %5049, %v2610_v47   ;;  %v2493_v47 = vld [vmem:[%s7763_s22 + $0x2d8] sm:$0xff]  ;;  %v5236_v46 = vpop.eup %5235  ;;  %v2609_v50 = vmul.f32 %v5234_v42, %v2488_v2  ;;  %v2492_v2 = vld [vmem:[%s7763_s22 + $0x2d0] sm:$0xff] }
 0x2b0   : > { %v2614_v4 = vmul.f32 %v5224_v8, %v2493_v47  ;;  %v2133_v47 = vmul.f32 0.0051020407, %v7918_v17  ;;  %5245 = vrsqrt.f32 %v2252_v35 }
 0x2b1   : > { %3036 = vperm.xlu1 %5050, %v2601_v49   ;;  %v8108_v58 = vpop.permute.xlu1 %2716  ;;  %5247 = vrsqrt.f32 %v2263_v18 }
 0x2b2   : > { %v8111_v60 = vpop.permute.xlu0 %2771  ;;  %v2254_v17 = vadd.f32 1e-05, %v2133_v47  ;;  %v5238_v11 = vpop.eup %5237 }
 0x2b3   : > { %3091 = vperm.xlu0 %5049, %v2612_v31   ;;  %v2495_v31 = vld [vmem:[%s7763_s22 + $0x2e8] sm:$0xff]  ;;  %v5240_v47 = vpop.eup %5239  ;;  %v2611_v42 = vmul.f32 %v5238_v11, %v2490_v6  ;;  %v2494_v6 = vld [vmem:[%s7763_s22 + $0x2e0] sm:$0xff] }
 0x2b4   : > { %v2616_v54 = vmul.f32 %v5228_v56, %v2495_v31  ;;  %v2135_v31 = vmul.f32 0.0051020407, %v7926_v29  ;;  %5249 = vrsqrt.f32 %v2254_v17 }
 0x2b5   : > { %3046 = vperm.xlu1 %5050, %v2603_v3   ;;  %v8116_v14 = vpop.permute.xlu1 %2726  ;;  %5251 = vrsqrt.f32 %v2265_v63 }
 0x2b6   : > { %v8119_v49 = vpop.permute.xlu0 %2781  ;;  %v2256_v29 = vadd.f32 1e-05, %v2135_v31  ;;  %v5242_v18 = vpop.eup %5241 }
 0x2b7   : > { %3101 = vperm.xlu0 %5049, %v2614_v4   ;;  %v2497_v4 = vld [vmem:[%s7763_s22 + $0x2f8] sm:$0xff]  ;;  %v5244_v31 = vpop.eup %5243  ;;  %v2613_v11 = vmul.f32 %v5242_v18, %v2492_v2  ;;  %v2496_v2 = vld [vmem:[%s7763_s22 + $0x2f0] sm:$0xff] }
 0x2b8   : > { %v2618_v13 = vmul.f32 %v5232_v43, %v2497_v4  ;;  %v2137_v4 = vmul.f32 0.0051020407, %v7934_v38  ;;  %5253 = vrsqrt.f32 %v2256_v29 }
 0x2b9   : > { %3056 = vperm.xlu1 %5050, %v2605_v7   ;;  %v8124_v8 = vpop.permute.xlu1 %2736  ;;  %5255 = vrsqrt.f32 %v2267_v52 }
 0x2ba   : > { %v8127_v3 = vpop.permute.xlu0 %2791  ;;  %v2258_v38 = vadd.f32 1e-05, %v2137_v4  ;;  %v5246_v63 = vpop.eup %5245 }
 0x2bb   : > { %3111 = vperm.xlu0 %5049, %v2616_v54   ;;  %v2499_v54 = vld [vmem:[%s7763_s22 + $0x308] sm:$0xff]  ;;  %v5248_v4 = vpop.eup %5247  ;;  %v2615_v18 = vmul.f32 %v5246_v63, %v2494_v6  ;;  %v2498_v6 = vld [vmem:[%s7763_s22 + $0x300] sm:$0xff] }
 0x2bc   : > { %v2620_v35 = vmul.f32 %v5236_v46, %v2499_v54  ;;  %v2139_v54 = vmul.f32 0.0051020407, %v7942_v48  ;;  %5257 = vrsqrt.f32 %v2258_v38 }
 0x2bd   : > { %3066 = vperm.xlu1 %5050, %v2607_v62   ;;  %v8132_v56 = vpop.permute.xlu1 %2746  ;;  %5259 = vrsqrt.f32 %v2269_v37 }
 0x2be   : > { %v8135_v7 = vpop.permute.xlu0 %2801  ;;  %v2260_v48 = vadd.f32 1e-05, %v2139_v54  ;;  %v5250_v52 = vpop.eup %5249 }
 0x2bf   : > { %3121 = vperm.xlu0 %5049, %v2618_v13   ;;  %v2501_v13 = vld [vmem:[%s7763_s22 + $0x318] sm:$0xff]  ;;  %v5252_v54 = vpop.eup %5251  ;;  %v2617_v63 = vmul.f32 %v5250_v52, %v2496_v2  ;;  %v2500_v2 = vld [vmem:[%s7763_s22 + $0x310] sm:$0xff] }
 0x2c0   : > { %v2622_v17 = vmul.f32 %v5240_v47, %v2501_v13  ;;  %v2141_v13 = vmul.f32 0.0051020407, %v7950_v61  ;;  %5261 = vrsqrt.f32 %v2260_v48 }
 0x2c1   : > { %3076 = vperm.xlu1 %5050, %v2609_v50   ;;  %v8140_v43 = vpop.permute.xlu1 %2756  ;;  %5263 = vrsqrt.f32 %v2271_v28 }
 0x2c2   : > { %v8143_v62 = vpop.permute.xlu0 %2811  ;;  %v2262_v61 = vadd.f32 1e-05, %v2141_v13  ;;  %v5254_v37 = vpop.eup %5253 }
 0x2c3   : > { %3131 = vperm.xlu0 %5049, %v2620_v35   ;;  %v2503_v35 = vld [vmem:[%s7763_s22 + $0x328] sm:$0xff]  ;;  %v5256_v13 = vpop.eup %5255  ;;  %v2619_v52 = vmul.f32 %v5254_v37, %v2498_v6  ;;  %v2502_v6 = vld [vmem:[%s7763_s22 + $0x320] sm:$0xff] }
 0x2c4   : > { %v2624_v29 = vmul.f32 %v5244_v31, %v2503_v35  ;;  %v2143_v35 = vmul.f32 0.0051020407, %v7958_v57  ;;  %5265 = vrsqrt.f32 %v2262_v61 }
 0x2c5   : > { %3086 = vperm.xlu1 %5050, %v2611_v42   ;;  %v8148_v46 = vpop.permute.xlu1 %2766  ;;  %5267 = vrsqrt.f32 %v2273_v23 }
 0x2c6   : > { %v8151_v50 = vpop.permute.xlu0 %2821  ;;  %v2264_v57 = vadd.f32 1e-05, %v2143_v35  ;;  %v5258_v28 = vpop.eup %5257 }
 0x2c7   : > { %3141 = vperm.xlu0 %5049, %v2622_v17   ;;  %v2505_v17 = vld [vmem:[%s7763_s22 + $0x338] sm:$0xff]  ;;  %v5260_v35 = vpop.eup %5259  ;;  %v2621_v37 = vmul.f32 %v5258_v28, %v2500_v2  ;;  %v2504_v2 = vld [vmem:[%s7763_s22 + $0x330] sm:$0xff] }
 0x2c8   : > { %v2626_v38 = vmul.f32 %v5248_v4, %v2505_v17  ;;  %v2145_v17 = vmul.f32 0.0051020407, %v7966_v41  ;;  %5269 = vrsqrt.f32 %v2264_v57  ;;  %v2513_v28 = vld [vmem:[%s7763_s22 + $0x378] sm:$0xff] }
 0x2c9   : > { %3096 = vperm.xlu1 %5050, %v2613_v11   ;;  %v8156_v47 = vpop.permute.xlu1 %2776  ;;  %5271 = vrsqrt.f32 %v2275_v24 }
 0x2ca   : > { %v8159_v42 = vpop.permute.xlu0 %2831  ;;  %v2266_v41 = vadd.f32 1e-05, %v2145_v17  ;;  %v5262_v23 = vpop.eup %5261 }
 0x2cb   : > { %3151 = vperm.xlu0 %5049, %v2624_v29   ;;  %v2507_v29 = vld [vmem:[%s7763_s22 + $0x348] sm:$0xff]  ;;  %v5264_v17 = vpop.eup %5263  ;;  %v2623_v24 = vmul.f32 %v5262_v23, %v2502_v6 }
 0x2cc   : > { %v2628_v48 = vmul.f32 %v5252_v54, %v2507_v29  ;;  %v2147_v29 = vmul.f32 0.0051020407, %v7974_v33  ;;  %5273 = vrsqrt.f32 %v2266_v41 }
 0x2cd   : > { %3106 = vperm.xlu1 %5050, %v2615_v18   ;;  %v8164_v31 = vpop.permute.xlu1 %2786  ;;  %5275 = vrsqrt.f32 %v2277_v20 }
 0x2ce   : > { %v8167_v11 = vpop.permute.xlu0 %2841  ;;  %v2268_v33 = vadd.f32 1e-05, %v2147_v29  ;;  %v5266_v32 = vpop.eup %5265  ;;  %v9953_v29 = vld [vmem:[#allocation103_spill] sm:$0xff] }
 0x2cf   : > { %3161 = vperm.xlu0 %5049, %v2626_v38   ;;  %v2509_v38 = vld [vmem:[%s7763_s22 + $0x358] sm:$0xff]  ;;  %v2625_v23 = vmul.f32 %v5266_v32, %v2504_v2 }
 0x2d0   : > { %v2630_v61 = vmul.f32 %v5256_v13, %v2509_v38  ;;  %v2149_v38 = vmul.f32 0.0051020407, %v7982_v1  ;;  %5277 = vrsqrt.f32 %v2268_v33  ;;  %v2151_v1 = vmul.f32 0.0051020407, %v9953_v29  ;;  %v2517_v29 = vld [vmem:[%s7763_s22 + $0x398] sm:$0xff] }
 0x2d1   : > { %3116 = vperm.xlu1 %5050, %v2617_v63   ;;  %v8172_v4 = vpop.permute.xlu1 %2796  ;;  %5279 = vrsqrt.f32 %v2279_v5 }
 0x2d2   : > { %v8175_v18 = vpop.permute.xlu0 %2851  ;;  %v2270_v41 = vadd.f32 1e-05, %v2149_v38  ;;  %v2272_v33 = vadd.f32 1e-05, %v2151_v1  ;;  %v9955_v38 = vld [vmem:[#allocation208_spill] sm:$0xff]  ;;  %v2519_v1 = vld [vmem:[%s7763_s22 + $0x3a8] sm:$0xff] }
 0x2d3   : > { %3171 = vperm.xlu0 %5049, %v2628_v48   ;;  %v2511_v48 = vld [vmem:[%s7763_s22 + $0x368] sm:$0xff] }
 0x2d4   : > { %v2632_v57 = vmul.f32 %v5260_v35, %v2511_v48  ;;  %v2634_v35 = vmul.f32 %v5264_v17, %v2513_v28  ;;  %v5268_v48 = vpop.eup %5267  ;;  %5281 = vrsqrt.f32 %v2270_v41  ;;  %v2153_v28 = vmul.f32 0.0051020407, %v9955_v38 }
 0x2d5   : > { %3126 = vperm.xlu1 %5050, %v2619_v52   ;;  %v8180_v54 = vpop.permute.xlu1 %2806  ;;  %v5270_v20 = vpop.eup %5269  ;;  %5283 = vrsqrt.f32 %v2272_v33 }
 0x2d6   : > { %v8183_v63 = vpop.permute.xlu0 %2861  ;;  %v5272_v17 = vpop.eup %5271  ;;  %v2627_v32 = vmul.f32 %v5270_v20, %v2506_v0  ;;  %v2510_v20 = vld [vmem:[%s7763_s22 + $0x360] sm:$0xff] }
 0x2d7   : > { %3181 = vperm.xlu0 %5049, %v2630_v61   ;;  %v5274_v2 = vpop.eup %5273 }
 0x2d9   : > { %3136 = vperm.xlu1 %5050, %v2621_v37   ;;  %v8188_v13 = vpop.permute.xlu1 %2816 }
 0x2da   : > { %v8191_v52 = vpop.permute.xlu0 %2871 }
 0x2db   : > { %9952 = vst [vmem:[#allocation248_spill] sm:$0xff] %v8191_v52  ;;  %3191 = vperm.xlu0 %5049, %v2632_v57   ;;  %v2515_v52 = vld [vmem:[%s7763_s22 + $0x388] sm:$0xff] }
 0x2dc   : > { %v2636_v57 = vmul.f32 %v5268_v48, %v2515_v52  ;;  %v2274_v52 = vadd.f32 1e-05, %v2153_v28  ;;  %v2155_v48 = vmul.f32 0.0051020407, %v8006_v25  ;;  %v2157_v28 = vmul.f32 0.0051020407, %v8014_v30 }
 0x2dd   : > { %3146 = vperm.xlu1 %5050, %v2623_v24   ;;  %v8195_v61 = vpop.permute.xlu1 %2826  ;;  %v2521_v25 = vld [vmem:[%s7763_s22 + $0x3b8] sm:$0xff] }
 0x2de   : > { %v8198_v37 = vpop.permute.xlu0 %2881  ;;  %5285 = vrsqrt.f32 %v2274_v52  ;;  %v2276_v33 = vadd.f32 1e-05, %v2155_v48  ;;  %v2278_v30 = vadd.f32 1e-05, %v2157_v28 }
 0x2df   : > { %9954 = vst [vmem:[#allocation180_spill] sm:$0xff] %v8198_v37  ;;  %3201 = vperm.xlu0 %5049, %v2634_v35   ;;  %v2508_v35 = vld [vmem:[%s7763_s22 + $0x350] sm:$0xff]  ;;  %v5276_v37 = vpop.eup %5275 }
 0x2e0   : > { %v5278_v38 = vpop.eup %5277  ;;  %5287 = vrsqrt.f32 %v2276_v33 }
 0x2e1   : > { %3156 = vperm.xlu1 %5050, %v2625_v23   ;;  %v8202_v6 = vpop.permute.xlu1 %2836  ;;  %v2638_v23 = vmul.f32 %v5272_v17, %v2517_v29  ;;  %v5280_v17 = vpop.eup %5279  ;;  %5289 = vrsqrt.f32 %v2278_v30 }
 0x2e2   : > { %v8205_v24 = vpop.permute.xlu0 %2891 }
 0x2e3   : > { %9956 = vst [vmem:[#allocation185_spill] sm:$0xff] %v8205_v24  ;;  %3211 = vperm.xlu0 %5049, %v2636_v57   ;;  %v2629_v57 = vmul.f32 %v5274_v2, %v2508_v35  ;;  %v2512_v2 = vld [vmem:[%s7763_s22 + $0x370] sm:$0xff] }
 0x2e5   : > { %3166 = vperm.xlu1 %5050, %v2627_v32   ;;  %v8209_v5 = vpop.permute.xlu1 %2846  ;;  %v2640_v32 = vmul.f32 %v5276_v37, %v2519_v1  ;;  %v2159_v37 = vmul.f32 0.0051020407, %v8022_v27 }
 0x2e6   : > { %v8212_v41 = vpop.permute.xlu0 %2901 }
 0x2e7   : > { %9957 = vst [vmem:[#allocation103_spill] sm:$0xff] %v8212_v41  ;;  %3221 = vperm.xlu0 %5049, %v2638_v23   ;;  %v2631_v23 = vmul.f32 %v5278_v38, %v2510_v20  ;;  %v5282_v41 = vpop.eup %5281  ;;  %v3491_v38 = vld [vmem:[%s8230_s25] sm:$0xff] }
 0x2e8   : > { %v2633_v48 = vmul.f32 %v5282_v41, %v2512_v2  ;;  %v5284_v1 = vpop.eup %5283  ;;  %v2514_v20 = vld [vmem:[%s7763_s22 + $0x380] sm:$0xff] }
 0x2e9   : > { %3176 = vperm.xlu1 %5050, %v2629_v57   ;;  %v8216_v0 = vpop.permute.xlu1 %2856  ;;  %v2642_v57 = vmul.f32 %v5280_v17, %v2521_v25  ;;  %v2280_v17 = vadd.f32 1e-05, %v2159_v37  ;;  %v2635_v28 = vmul.f32 %v5284_v1, %v2514_v20  ;;  %v5286_v27 = vpop.eup %5285  ;;  %v3493_v25 = vld [vmem:[%s8230_s25 + $0x10] sm:$0xff]  ;;  %v2518_v37 = vld [vmem:[%s7763_s22 + $0x3a0] sm:$0xff] }
 0x2ea   : > { %v8219_v29 = vpop.permute.xlu0 %2911  ;;  %v5288_v30 = vpop.eup %5287 }
 0x2eb   : > { %9958 = vst [vmem:[#allocation208_spill] sm:$0xff] %v8219_v29  ;;  %3231 = vperm.xlu0 %5049, %v2640_v32   ;;  %5291 = vrsqrt.f32 %v2280_v17  ;;  %v2639_v20 = vmul.f32 %v5288_v30, %v2518_v37  ;;  %v2520_v17 = vld [vmem:[%s7763_s22 + $0x3b0] sm:$0xff] }
 0x2ed   : > { %3186 = vperm.xlu1 %5050, %v2631_v23   ;;  %v8223_v35 = vpop.permute.xlu1 %2866  ;;  %v2516_v23 = vld [vmem:[%s7763_s22 + $0x390] sm:$0xff] }
 0x2ee   : > { %v8233_v52 = vpop.permute.xlu0 %2921 }
 0x2ef   : > { %9959 = vst [vmem:[#allocation249_spill] sm:$0xff] %v8233_v52  ;;  %3241 = vperm.xlu0 %5049, %v2642_v57   ;;  %v2637_v57 = vmul.f32 %v5286_v27, %v2516_v23  ;;  %v2522_v52 = vld [vmem:[%s7763_s22 + $0x3c0] sm:$0xff] }
 0x2f1   : > { %3196 = vperm.xlu1 %5050, %v2633_v48   ;;  %v8237_v32 = vpop.permute.xlu1 %2876  ;;  %v3495_v48 = vld [vmem:[%s8230_s25 + $0x20] sm:$0xff] }
 0x2f2   : > { %v8239_v33 = vpop.permute.xlu0 %2931 }
 0x2f3   : > { %9960 = vst [vmem:[#allocation250_spill] sm:$0xff] %v8239_v33  ;;  %3614 = vperm.xlu0 %5049, %v3491_v38   ;;  %v3497_v33 = vld [vmem:[%s8230_s25 + $0x30] sm:$0xff] }
 0x2f5   : > { %3206 = vperm.xlu1 %5050, %v2635_v28   ;;  %v8243_v41 = vpop.permute.xlu1 %2886  ;;  %v5290_v28 = vpop.eup %5289 }
 0x2f6   : > { %v8245_v2 = vpop.permute.xlu0 %2941  ;;  %v5292_v23 = vpop.eup %5291 }
 0x2f7   : > { %9961 = vst [vmem:[#allocation251_spill] sm:$0xff] %v8245_v2  ;;  %3624 = vperm.xlu0 %5049, %v3493_v25   ;;  %v2641_v25 = vmul.f32 %v5290_v28, %v2520_v17  ;;  %v2643_v37 = vmul.f32 %v5292_v23, %v2522_v52  ;;  %v3492_v28 = vld [vmem:[%s8230_s25 + $0x8] sm:$0xff]  ;;  %v3503_v17 = vld [vmem:[%s8230_s25 + $0x60] sm:$0xff]  ;;  %v3505_v52 = vld [vmem:[%s8230_s25 + $0x70] sm:$0xff] }
 0x2f9   : > { %3216 = vperm.xlu1 %5050, %v2637_v57   ;;  %v8249_v1 = vpop.permute.xlu1 %2896  ;;  %v3499_v57 = vld [vmem:[%s8230_s25 + $0x40] sm:$0xff] }
 0x2fa   : > { %v8251_v38 = vpop.permute.xlu0 %2951 }
 0x2fb   : > { %9962 = vst [vmem:[#allocation252_spill] sm:$0xff] %v8251_v38  ;;  %3634 = vperm.xlu0 %5049, %v3495_v48  }
 0x2fd   : > { %3226 = vperm.xlu1 %5050, %v2639_v20   ;;  %v8255_v2 = vpop.permute.xlu1 %2906  ;;  %v3501_v20 = vld [vmem:[%s8230_s25 + $0x50] sm:$0xff] }
 0x2fe   : > { %v8257_v27 = vpop.permute.xlu0 %2961 }
 0x2ff   : > { %9963 = vst [vmem:[#allocation253_spill] sm:$0xff] %v8257_v27  ;;  %3644 = vperm.xlu0 %5049, %v3497_v33  }
 0x301   : > { %3236 = vperm.xlu1 %5050, %v2641_v25   ;;  %v8261_v48 = vpop.permute.xlu1 %2916 }
 0x302   : > { %9964 = vst [vmem:[#allocation254_spill] sm:$0xff] %v8261_v48  ;;  %v8263_v30 = vpop.permute.xlu0 %2971  ;;  %v10026_v48 = vld [vmem:[#allocation15_spill] sm:$0xff] }
 0x303   : > { %9965 = vst [vmem:[#allocation255_spill] sm:$0xff] %v8263_v30  ;;  %3654 = vperm.xlu0 %5049, %v3499_v57   ;;  %v3494_v57 = vld [vmem:[%s8230_s25 + $0x18] sm:$0xff] }
 0x305   : > { %3246 = vperm.xlu1 %5050, %v2643_v37   ;;  %v8266_v38 = vpop.permute.xlu1 %2926 }
 0x306   : > { %9966 = vst [vmem:[#allocation256_spill] sm:$0xff] %v8266_v38  ;;  %v8268_v33 = vpop.permute.xlu0 %2981 }
 0x307   : > { %9967 = vst [vmem:[#allocation257_spill] sm:$0xff] %v8268_v33  ;;  %3664 = vperm.xlu0 %5049, %v3501_v20   ;;  %v3496_v33 = vld [vmem:[%s8230_s25 + $0x28] sm:$0xff]  ;;  %v3507_v20 = vld [vmem:[%s8230_s25 + $0x80] sm:$0xff] }
 0x309   : > { %3619 = vperm.xlu1 %5050, %v3492_v28   ;;  %v8272_v25 = vpop.permute.xlu1 %2936 }
 0x30a   : > { %9968 = vst [vmem:[#allocation258_spill] sm:$0xff] %v8272_v25  ;;  %v8274_v27 = vpop.permute.xlu0 %2991 }
 0x30b   : > { %9969 = vst [vmem:[#allocation259_spill] sm:$0xff] %v8274_v27  ;;  %3674 = vperm.xlu0 %5049, %v3503_v17   ;;  %v3498_v27 = vld [vmem:[%s8230_s25 + $0x38] sm:$0xff]  ;;  %v3509_v17 = vld [vmem:[%s8230_s25 + $0x90] sm:$0xff] }
 0x30d   : > { %3629 = vperm.xlu1 %5050, %v3494_v57   ;;  %v8278_v23 = vpop.permute.xlu1 %2946 }
 0x30e   : > { %9970 = vst [vmem:[#allocation260_spill] sm:$0xff] %v8278_v23  ;;  %v8280_v37 = vpop.permute.xlu0 %3001  ;;  %v10020_v23 = vld [vmem:[#allocation5_spill] sm:$0xff] }
 0x30f   : > { %9971 = vst [vmem:[#allocation261_spill] sm:$0xff] %v8280_v37  ;;  %3684 = vperm.xlu0 %5049, %v3505_v52   ;;  %v3500_v37 = vld [vmem:[%s8230_s25 + $0x48] sm:$0xff]  ;;  %v3511_v52 = vld [vmem:[%s8230_s25 + $0xa0] sm:$0xff] }
 0x311   : > { %3639 = vperm.xlu1 %5050, %v3496_v33   ;;  %v8284_v28 = vpop.permute.xlu1 %2956 }
 0x312   : > { %9972 = vst [vmem:[#allocation262_spill] sm:$0xff] %v8284_v28  ;;  %v8286_v30 = vpop.permute.xlu0 %3011 }
 0x313   : > { %9973 = vst [vmem:[#allocation263_spill] sm:$0xff] %v8286_v30  ;;  %3694 = vperm.xlu0 %5049, %v3507_v20   ;;  %v3502_v30 = vld [vmem:[%s8230_s25 + $0x58] sm:$0xff]  ;;  %v3513_v20 = vld [vmem:[%s8230_s25 + $0xb0] sm:$0xff] }
 0x315   : > { %3649 = vperm.xlu1 %5050, %v3498_v27   ;;  %v8290_v57 = vpop.permute.xlu1 %2966 }
 0x316   : > { %9974 = vst [vmem:[#allocation264_spill] sm:$0xff] %v8290_v57  ;;  %v8292_v29 = vpop.permute.xlu0 %3021 }
 0x317   : > { %9975 = vst [vmem:[#allocation265_spill] sm:$0xff] %v8292_v29  ;;  %3704 = vperm.xlu0 %5049, %v3509_v17   ;;  %v3504_v29 = vld [vmem:[%s8230_s25 + $0x68] sm:$0xff]  ;;  %v3515_v17 = vld [vmem:[%s8230_s25 + $0xc0] sm:$0xff] }
 0x319   : > { %3659 = vperm.xlu1 %5050, %v3500_v37   ;;  %v8296_v33 = vpop.permute.xlu1 %2976 }
 0x31a   : > { %9976 = vst [vmem:[#allocation266_spill] sm:$0xff] %v8296_v33  ;;  %v8298_v28 = vpop.permute.xlu0 %3031 }
 0x31b   : > { %9977 = vst [vmem:[#allocation267_spill] sm:$0xff] %v8298_v28  ;;  %3714 = vperm.xlu0 %5049, %v3511_v52   ;;  %v3506_v28 = vld [vmem:[%s8230_s25 + $0x78] sm:$0xff]  ;;  %v3517_v52 = vld [vmem:[%s8230_s25 + $0xd0] sm:$0xff] }
 0x31d   : > { %3669 = vperm.xlu1 %5050, %v3502_v30   ;;  %v8302_v27 = vpop.permute.xlu1 %2986 }
 0x31e   : > { %9978 = vst [vmem:[#allocation268_spill] sm:$0xff] %v8302_v27  ;;  %v8304_v57 = vpop.permute.xlu0 %3041 }
 0x31f   : > { %9979 = vst [vmem:[#allocation269_spill] sm:$0xff] %v8304_v57  ;;  %3724 = vperm.xlu0 %5049, %v3513_v20   ;;  %v3508_v57 = vld [vmem:[%s8230_s25 + $0x88] sm:$0xff]  ;;  %v3519_v20 = vld [vmem:[%s8230_s25 + $0xe0] sm:$0xff] }
 0x321   : > { %3679 = vperm.xlu1 %5050, %v3504_v29   ;;  %v8308_v37 = vpop.permute.xlu1 %2996 }
 0x322   : > { %9980 = vst [vmem:[#allocation270_spill] sm:$0xff] %v8308_v37  ;;  %v8310_v33 = vpop.permute.xlu0 %3051 }
 0x323   : > { %9981 = vst [vmem:[#allocation271_spill] sm:$0xff] %v8310_v33  ;;  %3734 = vperm.xlu0 %5049, %v3515_v17   ;;  %v3510_v33 = vld [vmem:[%s8230_s25 + $0x98] sm:$0xff]  ;;  %v3521_v17 = vld [vmem:[%s8230_s25 + $0xf0] sm:$0xff] }
 0x325   : > { %3689 = vperm.xlu1 %5050, %v3506_v28   ;;  %v8314_v30 = vpop.permute.xlu1 %3006 }
 0x326   : > { %9982 = vst [vmem:[#allocation272_spill] sm:$0xff] %v8314_v30  ;;  %v8316_v27 = vpop.permute.xlu0 %3061 }
 0x327   : > { %9983 = vst [vmem:[#allocation273_spill] sm:$0xff] %v8316_v27  ;;  %3744 = vperm.xlu0 %5049, %v3517_v52   ;;  %v3512_v27 = vld [vmem:[%s8230_s25 + $0xa8] sm:$0xff]  ;;  %v3523_v52 = vld [vmem:[%s8230_s25 + $0x100] sm:$0xff] }
 0x329   : > { %3699 = vperm.xlu1 %5050, %v3508_v57   ;;  %v8320_v29 = vpop.permute.xlu1 %3016 }
 0x32a   : > { %9984 = vst [vmem:[#allocation274_spill] sm:$0xff] %v8320_v29  ;;  %v8322_v37 = vpop.permute.xlu0 %3071 }
 0x32b   : > { %9985 = vst [vmem:[#allocation275_spill] sm:$0xff] %v8322_v37  ;;  %3754 = vperm.xlu0 %5049, %v3519_v20   ;;  %v3514_v37 = vld [vmem:[%s8230_s25 + $0xb8] sm:$0xff]  ;;  %v3525_v20 = vld [vmem:[%s8230_s25 + $0x110] sm:$0xff] }
 0x32d   : > { %3709 = vperm.xlu1 %5050, %v3510_v33   ;;  %v8326_v28 = vpop.permute.xlu1 %3026 }
 0x32e   : > { %9986 = vst [vmem:[#allocation276_spill] sm:$0xff] %v8326_v28  ;;  %v8328_v30 = vpop.permute.xlu0 %3081 }
 0x32f   : > { %9987 = vst [vmem:[#allocation277_spill] sm:$0xff] %v8328_v30  ;;  %3764 = vperm.xlu0 %5049, %v3521_v17   ;;  %v3516_v30 = vld [vmem:[%s8230_s25 + $0xc8] sm:$0xff]  ;;  %v3527_v17 = vld [vmem:[%s8230_s25 + $0x120] sm:$0xff] }
 0x331   : > { %3719 = vperm.xlu1 %5050, %v3512_v27   ;;  %v8332_v57 = vpop.permute.xlu1 %3036 }
 0x332   : > { %9988 = vst [vmem:[#allocation278_spill] sm:$0xff] %v8332_v57  ;;  %v8334_v29 = vpop.permute.xlu0 %3091 }
 0x333   : > { %9989 = vst [vmem:[#allocation279_spill] sm:$0xff] %v8334_v29  ;;  %3774 = vperm.xlu0 %5049, %v3523_v52   ;;  %v3518_v29 = vld [vmem:[%s8230_s25 + $0xd8] sm:$0xff]  ;;  %v3529_v52 = vld [vmem:[%s8230_s25 + $0x130] sm:$0xff] }
 0x335   : > { %3729 = vperm.xlu1 %5050, %v3514_v37   ;;  %v8338_v33 = vpop.permute.xlu1 %3046 }
 0x336   : > { %9990 = vst [vmem:[#allocation280_spill] sm:$0xff] %v8338_v33  ;;  %v8340_v28 = vpop.permute.xlu0 %3101 }
 0x337   : > { %9991 = vst [vmem:[#allocation281_spill] sm:$0xff] %v8340_v28  ;;  %3784 = vperm.xlu0 %5049, %v3525_v20   ;;  %v3520_v28 = vld [vmem:[%s8230_s25 + $0xe8] sm:$0xff]  ;;  %v3531_v20 = vld [vmem:[%s8230_s25 + $0x140] sm:$0xff] }
 0x339   : > { %3739 = vperm.xlu1 %5050, %v3516_v30   ;;  %v8344_v27 = vpop.permute.xlu1 %3056 }
 0x33a   : > { %9992 = vst [vmem:[#allocation282_spill] sm:$0xff] %v8344_v27  ;;  %v8346_v57 = vpop.permute.xlu0 %3111 }
 0x33b   : > { %9993 = vst [vmem:[#allocation283_spill] sm:$0xff] %v8346_v57  ;;  %3794 = vperm.xlu0 %5049, %v3527_v17   ;;  %v3522_v57 = vld [vmem:[%s8230_s25 + $0xf8] sm:$0xff]  ;;  %v3533_v17 = vld [vmem:[%s8230_s25 + $0x150] sm:$0xff] }
 0x33d   : > { %3749 = vperm.xlu1 %5050, %v3518_v29   ;;  %v8350_v37 = vpop.permute.xlu1 %3066 }
 0x33e   : > { %9994 = vst [vmem:[#allocation284_spill] sm:$0xff] %v8350_v37  ;;  %v8352_v33 = vpop.permute.xlu0 %3121 }
 0x33f   : > { %9995 = vst [vmem:[#allocation285_spill] sm:$0xff] %v8352_v33  ;;  %3804 = vperm.xlu0 %5049, %v3529_v52   ;;  %v3524_v33 = vld [vmem:[%s8230_s25 + $0x108] sm:$0xff]  ;;  %v3535_v52 = vld [vmem:[%s8230_s25 + $0x160] sm:$0xff] }
 0x341   : > { %3759 = vperm.xlu1 %5050, %v3520_v28   ;;  %v8356_v30 = vpop.permute.xlu1 %3076 }
 0x342   : > { %9996 = vst [vmem:[#allocation286_spill] sm:$0xff] %v8356_v30  ;;  %v8358_v27 = vpop.permute.xlu0 %3131 }
 0x343   : > { %9997 = vst [vmem:[#allocation287_spill] sm:$0xff] %v8358_v27  ;;  %3814 = vperm.xlu0 %5049, %v3531_v20   ;;  %v3526_v27 = vld [vmem:[%s8230_s25 + $0x118] sm:$0xff]  ;;  %v3537_v20 = vld [vmem:[%s8230_s25 + $0x170] sm:$0xff] }
 0x345   : > { %3769 = vperm.xlu1 %5050, %v3522_v57   ;;  %v8362_v29 = vpop.permute.xlu1 %3086 }
 0x346   : > { %9998 = vst [vmem:[#allocation288_spill] sm:$0xff] %v8362_v29  ;;  %v8364_v37 = vpop.permute.xlu0 %3141 }
 0x347   : > { %9999 = vst [vmem:[#allocation289_spill] sm:$0xff] %v8364_v37  ;;  %3824 = vperm.xlu0 %5049, %v3533_v17   ;;  %v3528_v37 = vld [vmem:[%s8230_s25 + $0x128] sm:$0xff]  ;;  %v3539_v17 = vld [vmem:[%s8230_s25 + $0x180] sm:$0xff] }
 0x349   : > { %3779 = vperm.xlu1 %5050, %v3524_v33   ;;  %v8368_v28 = vpop.permute.xlu1 %3096 }
 0x34a   : > { %10000 = vst [vmem:[#allocation290_spill] sm:$0xff] %v8368_v28  ;;  %v8370_v30 = vpop.permute.xlu0 %3151 }
 0x34b   : > { %10001 = vst [vmem:[#allocation291_spill] sm:$0xff] %v8370_v30  ;;  %3834 = vperm.xlu0 %5049, %v3535_v52   ;;  %v3530_v30 = vld [vmem:[%s8230_s25 + $0x138] sm:$0xff]  ;;  %v3541_v52 = vld [vmem:[%s8230_s25 + $0x190] sm:$0xff] }
 0x34d   : > { %3789 = vperm.xlu1 %5050, %v3526_v27   ;;  %v8374_v57 = vpop.permute.xlu1 %3106 }
 0x34e   : > { %10002 = vst [vmem:[#allocation292_spill] sm:$0xff] %v8374_v57  ;;  %v8376_v29 = vpop.permute.xlu0 %3161 }
 0x34f   : > { %10003 = vst [vmem:[#allocation293_spill] sm:$0xff] %v8376_v29  ;;  %3844 = vperm.xlu0 %5049, %v3537_v20   ;;  %v3532_v29 = vld [vmem:[%s8230_s25 + $0x148] sm:$0xff]  ;;  %v3543_v20 = vld [vmem:[%s8230_s25 + $0x1a0] sm:$0xff] }
 0x351   : > { %3799 = vperm.xlu1 %5050, %v3528_v37   ;;  %v8380_v33 = vpop.permute.xlu1 %3116 }
 0x352   : > { %10004 = vst [vmem:[#allocation294_spill] sm:$0xff] %v8380_v33  ;;  %v8382_v28 = vpop.permute.xlu0 %3171 }
 0x353   : > { %10005 = vst [vmem:[#allocation295_spill] sm:$0xff] %v8382_v28  ;;  %3854 = vperm.xlu0 %5049, %v3539_v17   ;;  %v3534_v28 = vld [vmem:[%s8230_s25 + $0x158] sm:$0xff]  ;;  %v3545_v17 = vld [vmem:[%s8230_s25 + $0x1b0] sm:$0xff] }
 0x355   : > { %3809 = vperm.xlu1 %5050, %v3530_v30   ;;  %v8386_v27 = vpop.permute.xlu1 %3126 }
 0x356   : > { %10006 = vst [vmem:[#allocation296_spill] sm:$0xff] %v8386_v27  ;;  %v8388_v57 = vpop.permute.xlu0 %3181 }
 0x357   : > { %10007 = vst [vmem:[#allocation297_spill] sm:$0xff] %v8388_v57  ;;  %3864 = vperm.xlu0 %5049, %v3541_v52   ;;  %v3536_v57 = vld [vmem:[%s8230_s25 + $0x168] sm:$0xff]  ;;  %v3547_v52 = vld [vmem:[%s8230_s25 + $0x1c0] sm:$0xff] }
 0x359   : > { %3819 = vperm.xlu1 %5050, %v3532_v29   ;;  %v8392_v37 = vpop.permute.xlu1 %3136 }
 0x35a   : > { %10008 = vst [vmem:[#allocation298_spill] sm:$0xff] %v8392_v37  ;;  %v8394_v33 = vpop.permute.xlu0 %3191 }
 0x35b   : > { %10009 = vst [vmem:[#allocation299_spill] sm:$0xff] %v8394_v33  ;;  %3874 = vperm.xlu0 %5049, %v3543_v20   ;;  %v3538_v33 = vld [vmem:[%s8230_s25 + $0x178] sm:$0xff]  ;;  %v3549_v20 = vld [vmem:[%s8230_s25 + $0x1d0] sm:$0xff] }
 0x35d   : > { %3829 = vperm.xlu1 %5050, %v3534_v28   ;;  %v8398_v30 = vpop.permute.xlu1 %3146 }
 0x35e   : > { %10010 = vst [vmem:[#allocation300_spill] sm:$0xff] %v8398_v30  ;;  %v8400_v27 = vpop.permute.xlu0 %3201 }
 0x35f   : > { %10011 = vst [vmem:[#allocation301_spill] sm:$0xff] %v8400_v27  ;;  %3884 = vperm.xlu0 %5049, %v3545_v17   ;;  %v3540_v27 = vld [vmem:[%s8230_s25 + $0x188] sm:$0xff]  ;;  %v3551_v17 = vld [vmem:[%s8230_s25 + $0x1e0] sm:$0xff] }
 0x361   : > { %3839 = vperm.xlu1 %5050, %v3536_v57   ;;  %v8404_v29 = vpop.permute.xlu1 %3156 }
 0x362   : > { %10012 = vst [vmem:[#allocation302_spill] sm:$0xff] %v8404_v29  ;;  %v8406_v37 = vpop.permute.xlu0 %3211 }
 0x363   : > { %10013 = vst [vmem:[#allocation303_spill] sm:$0xff] %v8406_v37  ;;  %3894 = vperm.xlu0 %5049, %v3547_v52   ;;  %v3542_v37 = vld [vmem:[%s8230_s25 + $0x198] sm:$0xff]  ;;  %v3553_v52 = vld [vmem:[%s8230_s25 + $0x1f0] sm:$0xff] }
 0x365   : > { %3849 = vperm.xlu1 %5050, %v3538_v33   ;;  %v8410_v28 = vpop.permute.xlu1 %3166 }
 0x366   : > { %10014 = vst [vmem:[#allocation304_spill] sm:$0xff] %v8410_v28  ;;  %v8412_v30 = vpop.permute.xlu0 %3221 }
 0x367   : > { %10015 = vst [vmem:[#allocation305_spill] sm:$0xff] %v8412_v30  ;;  %3904 = vperm.xlu0 %5049, %v3549_v20   ;;  %v3544_v30 = vld [vmem:[%s8230_s25 + $0x1a8] sm:$0xff]  ;;  %v3555_v20 = vld [vmem:[%s8230_s25 + $0x200] sm:$0xff] }
 0x369   : > { %3859 = vperm.xlu1 %5050, %v3540_v27   ;;  %v8416_v57 = vpop.permute.xlu1 %3176  ;;  %v3249_v27 = vmul.f32 %v8039_v53, %v10020_v23  ;;  %v3557_v23 = vld [vmem:[%s8230_s25 + $0x210] sm:$0xff] }
 0x36a   : > { %10016 = vst [vmem:[#allocation306_spill] sm:$0xff] %v8416_v57  ;;  %v8418_v29 = vpop.permute.xlu0 %3231  ;;  %v10021_v57 = vld [vmem:[#allocation2_spill] sm:$0xff] }
 0x36b   : > { %10017 = vst [vmem:[#allocation307_spill] sm:$0xff] %v8418_v29  ;;  %3914 = vperm.xlu0 %5049, %v3551_v17   ;;  %v3250_v24 = vmul.f32 %v8039_v53, %v10021_v57  ;;  %v10023_v53 = vld [vmem:[#allocation8_spill] sm:$0xff]  ;;  %v10024_v57 = vld [vmem:[#allocation3_spill] sm:$0xff] }
 0x36d   : > { %3869 = vperm.xlu1 %5050, %v3542_v37   ;;  %v8422_v33 = vpop.permute.xlu1 %3186  ;;  %v3546_v37 = vld [vmem:[%s8230_s25 + $0x1b8] sm:$0xff] }
 0x36e   : > { %10018 = vst [vmem:[#allocation308_spill] sm:$0xff] %v8422_v33  ;;  %v8424_v28 = vpop.permute.xlu0 %3241 }
 0x36f   : > { %10019 = vst [vmem:[#allocation309_spill] sm:$0xff] %v8424_v28  ;;  %3924 = vperm.xlu0 %5049, %v3553_v52   ;;  %v3254_v52 = vmul.f32 %v8036_v9, %v10024_v57 }
 0x371   : > { %3879 = vperm.xlu1 %5050, %v3544_v30   ;;  %v8432_v17 = vpop.permute.xlu1 %3196  ;;  %v3253_v30 = vmul.f32 %v8036_v9, %v10023_v53  ;;  %v3559_v53 = vld [vmem:[%s8230_s25 + $0x220] sm:$0xff]  ;;  %v3257_v9 = vmul.f32 %v8052_v12, %v10026_v48  ;;  %v3561_v48 = vld [vmem:[%s8230_s25 + $0x230] sm:$0xff] }
 0x372   : > { %10022 = vst [vmem:[#allocation5_spill] sm:$0xff] %v8432_v17  ;;  %v3615_v29 = vpop.permute.xlu0 %3614 }
 0x373   : > { %v4217_v25 = vadd.f32 %v3615_v29, %v3249_v27  ;;  %v4218_v38 = vadd.f32 %v3615_v29, %v3250_v24  ;;  %3934 = vperm.xlu0 %5049, %v3555_v20   ;;  %v3548_v20 = vld [vmem:[%s8230_s25 + $0x1c8] sm:$0xff] }
 0x375   : > { %v4459_v28 = vmax.f32 %v4217_v25, 0.0  ;;  %v4460_v27 = vmax.f32 %v4218_v38, 0.0  ;;  %3889 = vperm.xlu1 %5050, %v3546_v37   ;;  %v8447_v24 = vpop.permute.xlu1 %3206  ;;  %v10027_v38 = vld [vmem:[#allocation11_spill] sm:$0xff] }
 0x376   : > { %10025 = vst [vmem:[#allocation2_spill] sm:$0xff] %v8447_v24  ;;  %v3625_v29 = vpop.permute.xlu0 %3624  ;;  %v3258_v25 = vmul.f32 %v8052_v12, %v10027_v38 }
 0x377   : > { %4701 = vst [vmem:[%s8440_s28] sm:$0xff] %v4459_v28  ;;  %4702 = vst.msk [vmem:[%s8440_s28 + $0x8] sm:$0xff] %vm465_vm0, %v4460_v27  ;;  %v4221_v17 = vadd.f32 %v3625_v29, %v3253_v30  ;;  %v4222_v33 = vadd.f32 %v3625_v29, %v3254_v52  ;;  %3944 = vperm.xlu0 %5049, %v3557_v23   ;;  %v3550_v27 = vld [vmem:[%s8230_s25 + $0x1d8] sm:$0xff]  ;;  %v10028_v52 = vld [vmem:[#allocation19_spill] sm:$0xff] }
 0x378   : > { %v3261_v12 = vmul.f32 %v8068_v26, %v10028_v52 }
 0x379   : > { %v4463_v37 = vmax.f32 %v4221_v17, 0.0  ;;  %v4464_v57 = vmax.f32 %v4222_v33, 0.0  ;;  %3899 = vperm.xlu1 %5050, %v3548_v20   ;;  %v8458_v24 = vpop.permute.xlu1 %3216  ;;  %v10029_v33 = vld [vmem:[#allocation16_spill] sm:$0xff] }
 0x37a   : > { %v3635_v28 = vpop.permute.xlu0 %3634  ;;  %v3262_v17 = vmul.f32 %v8068_v26, %v10029_v33 }
 0x37b   : > { %4705 = vst [vmem:[%s8440_s28 + $0x20] sm:$0xff] %v4463_v37  ;;  %4706 = vst.msk [vmem:[%s8440_s28 + $0x28] sm:$0xff] %vm465_vm0, %v4464_v57  ;;  %v4225_v23 = vadd.f32 %v3635_v28, %v3257_v9  ;;  %v4226_v30 = vadd.f32 %v3635_v28, %v3258_v25  ;;  %3954 = vperm.xlu0 %5049, %v3559_v53   ;;  %v3552_v57 = vld [vmem:[%s8230_s25 + $0x1e8] sm:$0xff]  ;;  %v3563_v25 = vld [vmem:[%s8230_s25 + $0x240] sm:$0xff] }
 0x37c   : > { %v10030_v28 = vld [vmem:[#allocation24_spill] sm:$0xff] }
 0x37d   : > { %v4467_v29 = vmax.f32 %v4225_v23, 0.0  ;;  %v4468_v20 = vmax.f32 %v4226_v30, 0.0  ;;  %3909 = vperm.xlu1 %5050, %v3550_v27   ;;  %v8469_v38 = vpop.permute.xlu1 %3226  ;;  %v3265_v26 = vmul.f32 %v8084_v10, %v10030_v28  ;;  %v10031_v23 = vld [vmem:[#allocation20_spill] sm:$0xff] }
 0x37e   : > { %v3645_v37 = vpop.permute.xlu0 %3644  ;;  %v3266_v27 = vmul.f32 %v8084_v10, %v10031_v23 }
 0x37f   : > { %4709 = vst [vmem:[%s8440_s28 + $0x40] sm:$0xff] %v4467_v29  ;;  %4710 = vst.msk [vmem:[%s8440_s28 + $0x48] sm:$0xff] %vm465_vm0, %v4468_v20  ;;  %v4229_v53 = vadd.f32 %v3645_v37, %v3261_v12  ;;  %v4230_v9 = vadd.f32 %v3645_v37, %v3262_v17  ;;  %3964 = vperm.xlu0 %5049, %v3561_v48   ;;  %v3554_v20 = vld [vmem:[%s8230_s25 + $0x1f8] sm:$0xff]  ;;  %v3565_v17 = vld [vmem:[%s8230_s25 + $0x250] sm:$0xff] }
 0x380   : > { %v10033_v37 = vld [vmem:[#allocation29_spill] sm:$0xff] }
 0x381   : > { %v4471_v30 = vmax.f32 %v4229_v53, 0.0  ;;  %v4472_v52 = vmax.f32 %v4230_v9, 0.0  ;;  %3919 = vperm.xlu1 %5050, %v3552_v57   ;;  %v8480_v33 = vpop.permute.xlu1 %3236  ;;  %v3269_v10 = vmul.f32 %v8092_v22, %v10033_v37  ;;  %v10034_v53 = vld [vmem:[#allocation25_spill] sm:$0xff]  ;;  %v10039_v37 = vld [vmem:[#allocation30_spill] sm:$0xff] }
 0x382   : > { %10032 = vst [vmem:[#allocation8_spill] sm:$0xff] %v8480_v33  ;;  %v3655_v29 = vpop.permute.xlu0 %3654  ;;  %v3270_v57 = vmul.f32 %v8092_v22, %v10034_v53  ;;  %v10037_v22 = vld [vmem:[#allocation7_spill] sm:$0xff]  ;;  %v3274_v53 = vmul.f32 %v8100_v21, %v10039_v37 }
 0x383   : > { %4713 = vst [vmem:[%s8440_s28 + $0x60] sm:$0xff] %v4471_v30  ;;  %4714 = vst.msk [vmem:[%s8440_s28 + $0x68] sm:$0xff] %vm465_vm0, %v4472_v52  ;;  %v4233_v48 = vadd.f32 %v3655_v29, %v3265_v26  ;;  %v4234_v12 = vadd.f32 %v3655_v29, %v3266_v27  ;;  %3974 = vperm.xlu0 %5049, %v3563_v25   ;;  %v3556_v30 = vld [vmem:[%s8230_s25 + $0x208] sm:$0xff]  ;;  %v10036_v27 = vld [vmem:[#allocation10_spill] sm:$0xff]  ;;  %v3252_v29 = vmul.f32 %v8028_v40, %v10037_v22 }
 0x384   : > { %v3251_v52 = vmul.f32 %v8028_v40, %v10036_v27  ;;  %v10040_v22 = vld [vmem:[#allocation12_spill] sm:$0xff] }
 0x385   : > { %v4475_v9 = vmax.f32 %v4233_v48, 0.0  ;;  %v4476_v28 = vmax.f32 %v4234_v12, 0.0  ;;  %3929 = vperm.xlu1 %5050, %v3554_v20   ;;  %v8491_v23 = vpop.permute.xlu1 %3246  ;;  %v3567_v20 = vld [vmem:[%s8230_s25 + $0x260] sm:$0xff]  ;;  %v10038_v48 = vld [vmem:[#allocation33_spill] sm:$0xff] }
 0x386   : > { %10035 = vst [vmem:[#allocation3_spill] sm:$0xff] %v8491_v23  ;;  %v3665_v33 = vpop.permute.xlu0 %3664  ;;  %v3273_v12 = vmul.f32 %v8100_v21, %v10038_v48  ;;  %v3558_v23 = vld [vmem:[%s8230_s25 + $0x218] sm:$0xff]  ;;  %v3255_v21 = vmul.f32 %v8044_v45, %v10040_v22 }
 0x387   : > { %4717 = vst [vmem:[%s8440_s28 + $0x80] sm:$0xff] %v4475_v9  ;;  %4718 = vst.msk [vmem:[%s8440_s28 + $0x88] sm:$0xff] %vm465_vm0, %v4476_v28  ;;  %v4237_v25 = vadd.f32 %v3665_v33, %v3269_v10  ;;  %v4238_v26 = vadd.f32 %v3665_v33, %v3270_v57  ;;  %3984 = vperm.xlu0 %5049, %v3565_v17   ;;  %v10042_v48 = vld [vmem:[#allocation37_spill] sm:$0xff] }
 0x388   : > { %v3277_v37 = vmul.f32 %v8108_v58, %v10042_v48  ;;  %v10047_v48 = vld [vmem:[#allocation38_spill] sm:$0xff] }
 0x389   : > { %v4479_v9 = vmax.f32 %v4237_v25, 0.0  ;;  %v4480_v28 = vmax.f32 %v4238_v26, 0.0  ;;  %3939 = vperm.xlu1 %5050, %v3556_v30   ;;  %v3620_v33 = vpop.permute.xlu1 %3619  ;;  %v10041_v25 = vld [vmem:[#allocation9_spill] sm:$0xff] }
 0x38a   : > { %v4219_v10 = vadd.f32 %v3620_v33, %v3251_v52  ;;  %v4220_v17 = vadd.f32 %v3620_v33, %v3252_v29  ;;  %v3675_v57 = vpop.permute.xlu0 %3674  ;;  %v3256_v30 = vmul.f32 %v8044_v45, %v10041_v25  ;;  %v3569_v29 = vld [vmem:[%s8230_s25 + $0x270] sm:$0xff] }
 0x38b   : > { %4721 = vst [vmem:[%s8440_s28 + $0xa0] sm:$0xff] %v4479_v9  ;;  %4722 = vst.msk [vmem:[%s8440_s28 + $0xa8] sm:$0xff] %vm465_vm0, %v4480_v28  ;;  %v4241_v40 = vadd.f32 %v3675_v57, %v3273_v12  ;;  %v4242_v27 = vadd.f32 %v3675_v57, %v3274_v53  ;;  %3994 = vperm.xlu0 %5049, %v3567_v20   ;;  %v10043_v9 = vld [vmem:[#allocation34_spill] sm:$0xff]  ;;  %v3560_v57 = vld [vmem:[%s8230_s25 + $0x228] sm:$0xff] }
 0x38c   : > { %v4461_v26 = vmax.f32 %v4219_v10, 0.0  ;;  %v4462_v52 = vmax.f32 %v4220_v17, 0.0  ;;  %v3278_v12 = vmul.f32 %v8108_v58, %v10043_v9  ;;  %v10044_v58 = vld [vmem:[#allocation17_spill] sm:$0xff] }
 0x38d   : > { %v4483_v53 = vmax.f32 %v4241_v40, 0.0  ;;  %v4484_v20 = vmax.f32 %v4242_v27, 0.0  ;;  %3949 = vperm.xlu1 %5050, %v3558_v23   ;;  %v3630_v28 = vpop.permute.xlu1 %3629  ;;  %v3259_v23 = vmul.f32 %v8060_v51, %v10044_v58  ;;  %v10045_v40 = vld [vmem:[#allocation14_spill] sm:$0xff] }
 0x38e   : > { %4703 = vst [vmem:[%s8440_s28 + $0x10] sm:$0xff] %v4461_v26  ;;  %4704 = vst.msk [vmem:[%s8440_s28 + $0x18] sm:$0xff] %vm465_vm0, %v4462_v52  ;;  %v4223_v45 = vadd.f32 %v3630_v28, %v3255_v21  ;;  %v4224_v33 = vadd.f32 %v3630_v28, %v3256_v30  ;;  %v3685_v10 = vpop.permute.xlu0 %3684  ;;  %v3260_v27 = vmul.f32 %v8060_v51, %v10045_v40  ;;  %v3571_v30 = vld [vmem:[%s8230_s25 + $0x280] sm:$0xff]  ;;  %v10046_v26 = vld [vmem:[#allocation41_spill] sm:$0xff] }
 0x38f   : > { %4725 = vst [vmem:[%s8440_s28 + $0xc0] sm:$0xff] %v4483_v53  ;;  %4726 = vst.msk [vmem:[%s8440_s28 + $0xc8] sm:$0xff] %vm465_vm0, %v4484_v20  ;;  %v4245_v17 = vadd.f32 %v3685_v10, %v3277_v37  ;;  %v4246_v22 = vadd.f32 %v3685_v10, %v3278_v12  ;;  %4004 = vperm.xlu0 %5049, %v3569_v29   ;;  %v3281_v52 = vmul.f32 %v8116_v14, %v10046_v26  ;;  %v3562_v28 = vld [vmem:[%s8230_s25 + $0x238] sm:$0xff] }
 0x390   : > { %v4465_v21 = vmax.f32 %v4223_v45, 0.0  ;;  %v4466_v25 = vmax.f32 %v4224_v33, 0.0  ;;  %v3282_v37 = vmul.f32 %v8116_v14, %v10047_v48  ;;  %v10048_v14 = vld [vmem:[#allocation21_spill] sm:$0xff] }
 0x391   : > { %v4487_v9 = vmax.f32 %v4245_v17, 0.0  ;;  %v4488_v29 = vmax.f32 %v4246_v22, 0.0  ;;  %3959 = vperm.xlu1 %5050, %v3560_v57   ;;  %v3640_v12 = vpop.permute.xlu1 %3639  ;;  %v3263_v10 = vmul.f32 %v8076_v44, %v10048_v14  ;;  %v10049_v57 = vld [vmem:[#allocation18_spill] sm:$0xff]  ;;  %v10050_v40 = vld [vmem:[#allocation45_spill] sm:$0xff] }
 0x392   : > { %4707 = vst [vmem:[%s8440_s28 + $0x30] sm:$0xff] %v4465_v21  ;;  %4708 = vst.msk [vmem:[%s8440_s28 + $0x38] sm:$0xff] %vm465_vm0, %v4466_v25  ;;  %v4227_v51 = vadd.f32 %v3640_v12, %v3259_v23  ;;  %v4228_v53 = vadd.f32 %v3640_v12, %v3260_v27  ;;  %v3695_v20 = vpop.permute.xlu0 %3694  ;;  %v3264_v17 = vmul.f32 %v8076_v44, %v10049_v57  ;;  %v3573_v23 = vld [vmem:[%s8230_s25 + $0x290] sm:$0xff]  ;;  %v10051_v21 = vld [vmem:[#allocation42_spill] sm:$0xff] }
 0x393   : > { %4729 = vst [vmem:[%s8440_s28 + $0xe0] sm:$0xff] %v4487_v9  ;;  %4730 = vst.msk [vmem:[%s8440_s28 + $0xe8] sm:$0xff] %vm465_vm0, %v4488_v29  ;;  %v4249_v45 = vadd.f32 %v3695_v20, %v3281_v52  ;;  %v4250_v33 = vadd.f32 %v3695_v20, %v3282_v37  ;;  %4014 = vperm.xlu0 %5049, %v3571_v30   ;;  %v3285_v27 = vmul.f32 %v8124_v8, %v10050_v40  ;;  %v3564_v9 = vld [vmem:[%s8230_s25 + $0x248] sm:$0xff]  ;;  %v10054_v14 = vld [vmem:[#allocation49_spill] sm:$0xff] }
 0x394   : > { %v4469_v22 = vmax.f32 %v4227_v51, 0.0  ;;  %v4470_v58 = vmax.f32 %v4228_v53, 0.0  ;;  %v3286_v25 = vmul.f32 %v8124_v8, %v10051_v21  ;;  %v10052_v8 = vld [vmem:[#allocation26_spill] sm:$0xff]  ;;  %v3566_v21 = vld [vmem:[%s8230_s25 + $0x258] sm:$0xff] }
 0x395   : > { %v4491_v26 = vmax.f32 %v4249_v45, 0.0  ;;  %v4492_v30 = vmax.f32 %v4250_v33, 0.0  ;;  %3969 = vperm.xlu1 %5050, %v3562_v28   ;;  %v3650_v52 = vpop.permute.xlu1 %3649  ;;  %v3267_v51 = vmul.f32 %v8047_v16, %v10052_v8  ;;  %v10053_v53 = vld [vmem:[#allocation22_spill] sm:$0xff] }
 0x396   : > { %4711 = vst [vmem:[%s8440_s28 + $0x50] sm:$0xff] %v4469_v22  ;;  %4712 = vst.msk [vmem:[%s8440_s28 + $0x58] sm:$0xff] %vm465_vm0, %v4470_v58  ;;  %v4231_v44 = vadd.f32 %v3650_v52, %v3263_v10  ;;  %v4232_v48 = vadd.f32 %v3650_v52, %v3264_v17  ;;  %v3705_v37 = vpop.permute.xlu0 %3704  ;;  %v3268_v20 = vmul.f32 %v8047_v16, %v10053_v53  ;;  %v3575_v33 = vld [vmem:[%s8230_s25 + $0x2a0] sm:$0xff]  ;;  %v10057_v52 = vld [vmem:[#allocation27_spill] sm:$0xff] }
 0x397   : > { %4733 = vst [vmem:[%s8440_s28 + $0x100] sm:$0xff] %v4491_v26  ;;  %4734 = vst.msk [vmem:[%s8440_s28 + $0x108] sm:$0xff] %vm465_vm0, %v4492_v30  ;;  %v4253_v29 = vadd.f32 %v3705_v37, %v3285_v27  ;;  %v4254_v12 = vadd.f32 %v3705_v37, %v3286_v25  ;;  %4024 = vperm.xlu0 %5049, %v3573_v23   ;;  %v3289_v10 = vmul.f32 %v8132_v56, %v10054_v14  ;;  %v10055_v57 = vld [vmem:[#allocation46_spill] sm:$0xff]  ;;  %v3568_v14 = vld [vmem:[%s8230_s25 + $0x268] sm:$0xff] }
 0x398   : > { %v4473_v28 = vmax.f32 %v4231_v44, 0.0  ;;  %v4474_v45 = vmax.f32 %v4232_v48, 0.0  ;;  %v3290_v17 = vmul.f32 %v8132_v56, %v10055_v57  ;;  %v10056_v56 = vld [vmem:[#allocation31_spill] sm:$0xff]  ;;  %v3272_v44 = vmul.f32 %v8055_v55, %v10057_v52  ;;  %v10059_v8 = vld [vmem:[#allocation50_spill] sm:$0xff] }
 0x399   : > { %v4495_v22 = vmax.f32 %v4253_v29, 0.0  ;;  %v4496_v58 = vmax.f32 %v4254_v12, 0.0  ;;  %3979 = vperm.xlu1 %5050, %v3564_v9   ;;  %v3660_v23 = vpop.permute.xlu1 %3659  ;;  %v3271_v30 = vmul.f32 %v8055_v55, %v10056_v56  ;;  %v3577_v9 = vld [vmem:[%s8230_s25 + $0x2b0] sm:$0xff]  ;;  %v10058_v29 = vld [vmem:[#allocation53_spill] sm:$0xff] }
 0x39a   : > { %4715 = vst [vmem:[%s8440_s28 + $0x70] sm:$0xff] %v4473_v28  ;;  %4716 = vst.msk [vmem:[%s8440_s28 + $0x78] sm:$0xff] %vm465_vm0, %v4474_v45  ;;  %v4235_v16 = vadd.f32 %v3660_v23, %v3267_v51  ;;  %v4236_v40 = vadd.f32 %v3660_v23, %v3268_v20  ;;  %v3715_v27 = vpop.permute.xlu0 %3714  ;;  %v3293_v12 = vmul.f32 %v8140_v43, %v10058_v29 }
 0x39b   : > { %4737 = vst [vmem:[%s8440_s28 + $0x120] sm:$0xff] %v4495_v22  ;;  %4738 = vst.msk [vmem:[%s8440_s28 + $0x128] sm:$0xff] %vm465_vm0, %v4496_v58  ;;  %v4257_v25 = vadd.f32 %v3715_v27, %v3289_v10  ;;  %v4258_v26 = vadd.f32 %v3715_v27, %v3290_v17  ;;  %4034 = vperm.xlu0 %5049, %v3575_v33   ;;  %v3294_v51 = vmul.f32 %v8140_v43, %v10059_v8  ;;  %v10060_v43 = vld [vmem:[#allocation35_spill] sm:$0xff]  ;;  %v10061_v22 = vld [vmem:[#allocation32_spill] sm:$0xff] }
 0x39c   : > { %v4477_v48 = vmax.f32 %v4235_v16, 0.0  ;;  %v4478_v37 = vmax.f32 %v4236_v40, 0.0  ;;  %v3275_v17 = vmul.f32 %v8063_v34, %v10060_v43  ;;  %v3276_v58 = vmul.f32 %v8063_v34, %v10061_v22  ;;  %v3579_v40 = vld [vmem:[%s8230_s25 + $0x2c0] sm:$0xff]  ;;  %v10062_v27 = vld [vmem:[#allocation57_spill] sm:$0xff]  ;;  %v10065_v8 = vld [vmem:[#allocation36_spill] sm:$0xff] }
 0x39d   : > { %v4499_v53 = vmax.f32 %v4257_v25, 0.0  ;;  %v4500_v20 = vmax.f32 %v4258_v26, 0.0  ;;  %3989 = vperm.xlu1 %5050, %v3566_v21   ;;  %v3670_v28 = vpop.permute.xlu1 %3669  ;;  %v3297_v21 = vmul.f32 %v8148_v46, %v10062_v27  ;;  %v10063_v25 = vld [vmem:[#allocation54_spill] sm:$0xff]  ;;  %v10069_v27 = vld [vmem:[#allocation40_spill] sm:$0xff] }
 0x39e   : > { %4719 = vst [vmem:[%s8440_s28 + $0x90] sm:$0xff] %v4477_v48  ;;  %4720 = vst.msk [vmem:[%s8440_s28 + $0x98] sm:$0xff] %vm465_vm0, %v4478_v37  ;;  %v4239_v55 = vadd.f32 %v3670_v28, %v3271_v30  ;;  %v4240_v45 = vadd.f32 %v3670_v28, %v3272_v44  ;;  %v3725_v33 = vpop.permute.xlu0 %3724  ;;  %v3298_v26 = vmul.f32 %v8148_v46, %v10063_v25  ;;  %v3570_v37 = vld [vmem:[%s8230_s25 + $0x278] sm:$0xff]  ;;  %v10064_v46 = vld [vmem:[#allocation39_spill] sm:$0xff] }
 0x39f   : > { %4741 = vst [vmem:[%s8440_s28 + $0x140] sm:$0xff] %v4499_v53  ;;  %4742 = vst.msk [vmem:[%s8440_s28 + $0x148] sm:$0xff] %vm465_vm0, %v4500_v20  ;;  %v4261_v10 = vadd.f32 %v3725_v33, %v3293_v12  ;;  %v4262_v57 = vadd.f32 %v3725_v33, %v3294_v51  ;;  %4044 = vperm.xlu0 %5049, %v3577_v9   ;;  %v3279_v12 = vmul.f32 %v8071_v15, %v10064_v46  ;;  %v3581_v28 = vld [vmem:[%s8230_s25 + $0x2d0] sm:$0xff]  ;;  %v10067_v33 = vld [vmem:[#allocation58_spill] sm:$0xff] }
 0x3a0   : > { %v4481_v23 = vmax.f32 %v4239_v55, 0.0  ;;  %v4482_v16 = vmax.f32 %v4240_v45, 0.0  ;;  %v3280_v51 = vmul.f32 %v8071_v15, %v10065_v8  ;;  %v10066_v55 = vld [vmem:[#allocation61_spill] sm:$0xff] }
 0x3a1   : > { %v4503_v56 = vmax.f32 %v4261_v10, 0.0  ;;  %v4504_v30 = vmax.f32 %v4262_v57, 0.0  ;;  %3999 = vperm.xlu1 %5050, %v3568_v14   ;;  %v3680_v52 = vpop.permute.xlu1 %3679  ;;  %v3301_v45 = vmul.f32 %v8156_v47, %v10066_v55  ;;  %v3302_v14 = vmul.f32 %v8156_v47, %v10067_v33  ;;  %v10068_v47 = vld [vmem:[#allocation43_spill] sm:$0xff]  ;;  %v3585_v33 = vld [vmem:[%s8230_s25 + $0x2f0] sm:$0xff] }
 0x3a2   : > { %4723 = vst [vmem:[%s8440_s28 + $0xb0] sm:$0xff] %v4481_v23  ;;  %4724 = vst.msk [vmem:[%s8440_s28 + $0xb8] sm:$0xff] %vm465_vm0, %v4482_v16  ;;  %v4243_v34 = vadd.f32 %v3680_v52, %v3275_v17  ;;  %v4244_v44 = vadd.f32 %v3680_v52, %v3276_v58  ;;  %v3735_v48 = vpop.permute.xlu0 %3734  ;;  %v3572_v58 = vld [vmem:[%s8230_s25 + $0x288] sm:$0xff] }
 0x3a3   : > { %4745 = vst [vmem:[%s8440_s28 + $0x160] sm:$0xff] %v4503_v56  ;;  %4746 = vst.msk [vmem:[%s8440_s28 + $0x168] sm:$0xff] %vm465_vm0, %v4504_v30  ;;  %v4265_v9 = vadd.f32 %v3735_v48, %v3297_v21  ;;  %v4266_v29 = vadd.f32 %v3735_v48, %v3298_v26  ;;  %4054 = vperm.xlu0 %5049, %v3579_v40   ;;  %v3283_v40 = vmul.f32 %v8079_v36, %v10068_v47  ;;  %v3583_v56 = vld [vmem:[%s8230_s25 + $0x2e0] sm:$0xff]  ;;  %v10070_v30 = vld [vmem:[#allocation65_spill] sm:$0xff] }
 0x3a4   : > { %v4485_v53 = vmax.f32 %v4243_v34, 0.0  ;;  %v4486_v20 = vmax.f32 %v4244_v44, 0.0  ;;  %v3284_v21 = vmul.f32 %v8079_v36, %v10069_v27  ;;  %v3305_v52 = vmul.f32 %v8164_v31, %v10070_v30  ;;  %v10071_v34 = vld [vmem:[#allocation62_spill] sm:$0xff] }
 0x3a5   : > { %v4507_v10 = vmax.f32 %v4265_v9, 0.0  ;;  %v4508_v57 = vmax.f32 %v4266_v29, 0.0  ;;  %4009 = vperm.xlu1 %5050, %v3570_v37   ;;  %v3690_v43 = vpop.permute.xlu1 %3689  ;;  %v3306_v44 = vmul.f32 %v8164_v31, %v10071_v34  ;;  %v10072_v31 = vld [vmem:[#allocation47_spill] sm:$0xff]  ;;  %v3587_v30 = vld [vmem:[%s8230_s25 + $0x300] sm:$0xff] }
 0x3a6   : > { %4727 = vst [vmem:[%s8440_s28 + $0xd0] sm:$0xff] %v4485_v53  ;;  %4728 = vst.msk [vmem:[%s8440_s28 + $0xd8] sm:$0xff] %vm465_vm0, %v4486_v20  ;;  %v4247_v15 = vadd.f32 %v3690_v43, %v3279_v12  ;;  %v4248_v17 = vadd.f32 %v3690_v43, %v3280_v51  ;;  %v3745_v22 = vpop.permute.xlu0 %3744  ;;  %v3574_v12 = vld [vmem:[%s8230_s25 + $0x298] sm:$0xff]  ;;  %v3287_v53 = vmul.f32 %v8087_v39, %v10072_v31  ;;  %v10073_v20 = vld [vmem:[#allocation44_spill] sm:$0xff] }
 0x3a7   : > { %4749 = vst [vmem:[%s8440_s28 + $0x180] sm:$0xff] %v4507_v10  ;;  %4750 = vst.msk [vmem:[%s8440_s28 + $0x188] sm:$0xff] %vm465_vm0, %v4508_v57  ;;  %v4269_v23 = vadd.f32 %v3745_v22, %v3301_v45  ;;  %v4270_v16 = vadd.f32 %v3745_v22, %v3302_v14  ;;  %4064 = vperm.xlu0 %5049, %v3581_v28   ;;  %v3288_v28 = vmul.f32 %v8087_v39, %v10073_v20  ;;  %v10074_v14 = vld [vmem:[#allocation69_spill] sm:$0xff]  ;;  %v10075_v57 = vld [vmem:[#allocation66_spill] sm:$0xff] }
 0x3a8   : > { %v4489_v25 = vmax.f32 %v4247_v15, 0.0  ;;  %v4490_v26 = vmax.f32 %v4248_v17, 0.0  ;;  %v3309_v10 = vmul.f32 %v8172_v4, %v10074_v14  ;;  %v3310_v43 = vmul.f32 %v8172_v4, %v10075_v57  ;;  %v10076_v4 = vld [vmem:[#allocation51_spill] sm:$0xff] }
 0x3a9   : > { %v4511_v48 = vmax.f32 %v4269_v23, 0.0  ;;  %v4512_v37 = vmax.f32 %v4270_v16, 0.0  ;;  %4019 = vperm.xlu1 %5050, %v3572_v58   ;;  %v3700_v9 = vpop.permute.xlu1 %3699  ;;  %v3576_v16 = vld [vmem:[%s8230_s25 + $0x2a8] sm:$0xff]  ;;  %v3291_v27 = vmul.f32 %v8095_v19, %v10076_v4 }
 0x3aa   : > { %4731 = vst [vmem:[%s8440_s28 + $0xf0] sm:$0xff] %v4489_v25  ;;  %4732 = vst.msk [vmem:[%s8440_s28 + $0xf8] sm:$0xff] %vm465_vm0, %v4490_v26  ;;  %v4251_v36 = vadd.f32 %v3700_v9, %v3283_v40  ;;  %v4252_v29 = vadd.f32 %v3700_v9, %v3284_v21  ;;  %v3755_v46 = vpop.permute.xlu0 %3754  ;;  %v10077_v21 = vld [vmem:[#allocation48_spill] sm:$0xff] }
 0x3ab   : > { %4753 = vst [vmem:[%s8440_s28 + $0x1a0] sm:$0xff] %v4511_v48  ;;  %4754 = vst.msk [vmem:[%s8440_s28 + $0x1a8] sm:$0xff] %vm465_vm0, %v4512_v37  ;;  %v4273_v8 = vadd.f32 %v3755_v46, %v3305_v52  ;;  %v4274_v51 = vadd.f32 %v3755_v46, %v3306_v44  ;;  %4074 = vperm.xlu0 %5049, %v3583_v56   ;;  %v3292_v25 = vmul.f32 %v8095_v19, %v10077_v21  ;;  %v10078_v52 = vld [vmem:[#allocation73_spill] sm:$0xff]  ;;  %v10079_v44 = vld [vmem:[#allocation70_spill] sm:$0xff] }
 0x3ac   : > { %v4493_v55 = vmax.f32 %v4251_v36, 0.0  ;;  %v4494_v45 = vmax.f32 %v4252_v29, 0.0  ;;  %v3313_v34 = vmul.f32 %v8180_v54, %v10078_v52  ;;  %v3314_v48 = vmul.f32 %v8180_v54, %v10079_v44  ;;  %v10080_v54 = vld [vmem:[#allocation55_spill] sm:$0xff] }
 0x3ad   : > { %v4515_v15 = vmax.f32 %v4273_v8, 0.0  ;;  %v4516_v17 = vmax.f32 %v4274_v51, 0.0  ;;  %4029 = vperm.xlu1 %5050, %v3574_v12   ;;  %v3710_v22 = vpop.permute.xlu1 %3709  ;;  %v3578_v12 = vld [vmem:[%s8230_s25 + $0x2b8] sm:$0xff]  ;;  %v3295_v31 = vmul.f32 %v8103_v59, %v10080_v54 }
 0x3ae   : > { %4735 = vst [vmem:[%s8440_s28 + $0x110] sm:$0xff] %v4493_v55  ;;  %4736 = vst.msk [vmem:[%s8440_s28 + $0x118] sm:$0xff] %vm465_vm0, %v4494_v45  ;;  %v4255_v39 = vadd.f32 %v3710_v22, %v3287_v53  ;;  %v4256_v58 = vadd.f32 %v3710_v22, %v3288_v28  ;;  %v3765_v23 = vpop.permute.xlu0 %3764  ;;  %v10081_v53 = vld [vmem:[#allocation52_spill] sm:$0xff] }
 0x3af   : > { %4757 = vst [vmem:[%s8440_s28 + $0x1c0] sm:$0xff] %v4515_v15  ;;  %4758 = vst.msk [vmem:[%s8440_s28 + $0x1c8] sm:$0xff] %vm465_vm0, %v4516_v17  ;;  %v4277_v47 = vadd.f32 %v3765_v23, %v3309_v10  ;;  %v4278_v40 = vadd.f32 %v3765_v23, %v3310_v43  ;;  %4084 = vperm.xlu0 %5049, %v3585_v33   ;;  %v3296_v20 = vmul.f32 %v8103_v59, %v10081_v53  ;;  %v3589_v45 = vld [vmem:[%s8230_s25 + $0x310] sm:$0xff]  ;;  %v10082_v33 = vld [vmem:[#allocation77_spill] sm:$0xff] }
 0x3b0   : > { %v4497_v26 = vmax.f32 %v4255_v39, 0.0  ;;  %v4498_v56 = vmax.f32 %v4256_v58, 0.0  ;;  %v3317_v14 = vmul.f32 %v8188_v13, %v10082_v33  ;;  %v10083_v10 = vld [vmem:[#allocation74_spill] sm:$0xff]  ;;  %v3580_v58 = vld [vmem:[%s8230_s25 + $0x2c8] sm:$0xff]  ;;  %v10090_v53 = vld [vmem:[#allocation85_spill] sm:$0xff] }
 0x3b1   : > { %v4519_v37 = vmax.f32 %v4277_v47, 0.0  ;;  %v4520_v9 = vmax.f32 %v4278_v40, 0.0  ;;  %4039 = vperm.xlu1 %5050, %v3576_v16   ;;  %v3720_v36 = vpop.permute.xlu1 %3719  ;;  %v3318_v57 = vmul.f32 %v8188_v13, %v10083_v10  ;;  %v10084_v13 = vld [vmem:[#allocation59_spill] sm:$0xff]  ;;  %v10085_v40 = vld [vmem:[#allocation56_spill] sm:$0xff] }
 0x3b2   : > { %4739 = vst [vmem:[%s8440_s28 + $0x130] sm:$0xff] %v4497_v26  ;;  %4740 = vst.msk [vmem:[%s8440_s28 + $0x138] sm:$0xff] %vm465_vm0, %v4498_v56  ;;  %v4259_v19 = vadd.f32 %v3720_v36, %v3291_v27  ;;  %v4260_v29 = vadd.f32 %v3720_v36, %v3292_v25  ;;  %v3775_v46 = vpop.permute.xlu0 %3774  ;;  %v3299_v47 = vmul.f32 %v8111_v60, %v10084_v13  ;;  %v3591_v25 = vld [vmem:[%s8230_s25 + $0x320] sm:$0xff]  ;;  %v10086_v26 = vld [vmem:[#allocation81_spill] sm:$0xff] }
 0x3b3   : > { %4761 = vst [vmem:[%s8440_s28 + $0x1e0] sm:$0xff] %v4519_v37  ;;  %4762 = vst.msk [vmem:[%s8440_s28 + $0x1e8] sm:$0xff] %vm465_vm0, %v4520_v9  ;;  %v4281_v8 = vadd.f32 %v3775_v46, %v3313_v34  ;;  %v4282_v51 = vadd.f32 %v3775_v46, %v3314_v48  ;;  %4094 = vperm.xlu0 %5049, %v3587_v30   ;;  %v3300_v4 = vmul.f32 %v8111_v60, %v10085_v40  ;;  %v10087_v30 = vld [vmem:[#allocation78_spill] sm:$0xff]  ;;  %v3582_v36 = vld [vmem:[%s8230_s25 + $0x2d8] sm:$0xff] }
 0x3b4   : > { %v4501_v28 = vmax.f32 %v4259_v19, 0.0  ;;  %v4502_v55 = vmax.f32 %v4260_v29, 0.0  ;;  %v3321_v56 = vmul.f32 %v8195_v61, %v10086_v26  ;;  %v3322_v52 = vmul.f32 %v8195_v61, %v10087_v30  ;;  %v10088_v61 = vld [vmem:[#allocation63_spill] sm:$0xff]  ;;  %v10094_v13 = vld [vmem:[#allocation90_spill] sm:$0xff]  ;;  %v3586_v30 = vld [vmem:[%s8230_s25 + $0x2f8] sm:$0xff] }
 0x3b5   : > { %v4523_v43 = vmax.f32 %v4281_v8, 0.0  ;;  %v4524_v15 = vmax.f32 %v4282_v51, 0.0  ;;  %4049 = vperm.xlu1 %5050, %v3578_v12   ;;  %v3730_v17 = vpop.permute.xlu1 %3729  ;;  %v3303_v46 = vmul.f32 %v8119_v49, %v10088_v61  ;;  %v10089_v12 = vld [vmem:[#allocation60_spill] sm:$0xff]  ;;  %v10095_v40 = vld [vmem:[#allocation86_spill] sm:$0xff]  ;;  %v10099_v61 = vld [vmem:[#allocation91_spill] sm:$0xff] }
 0x3b6   : > { %4743 = vst [vmem:[%s8440_s28 + $0x150] sm:$0xff] %v4501_v28  ;;  %4744 = vst.msk [vmem:[%s8440_s28 + $0x158] sm:$0xff] %vm465_vm0, %v4502_v55  ;;  %v4263_v59 = vadd.f32 %v3730_v17, %v3295_v31  ;;  %v4264_v22 = vadd.f32 %v3730_v17, %v3296_v20  ;;  %v3785_v39 = vpop.permute.xlu0 %3784  ;;  %v3304_v8 = vmul.f32 %v8119_v49, %v10089_v12  ;;  %v3593_v31 = vld [vmem:[%s8230_s25 + $0x330] sm:$0xff]  ;;  %v10091_v28 = vld [vmem:[#allocation82_spill] sm:$0xff] }
 0x3b7   : > { %4765 = vst [vmem:[%s8440_s28 + $0x200] sm:$0xff] %v4523_v43  ;;  %4766 = vst.msk [vmem:[%s8440_s28 + $0x208] sm:$0xff] %vm465_vm0, %v4524_v15  ;;  %v4285_v23 = vadd.f32 %v3785_v39, %v3317_v14  ;;  %v4286_v16 = vadd.f32 %v3785_v39, %v3318_v57  ;;  %4104 = vperm.xlu0 %5049, %v3589_v45   ;;  %v3325_v20 = vmul.f32 %v8202_v6, %v10090_v53  ;;  %v3584_v43 = vld [vmem:[%s8230_s25 + $0x2e8] sm:$0xff] }
 0x3b8   : > { %v4505_v27 = vmax.f32 %v4263_v59, 0.0  ;;  %v4506_v21 = vmax.f32 %v4264_v22, 0.0  ;;  %v3326_v55 = vmul.f32 %v8202_v6, %v10091_v28  ;;  %v10092_v6 = vld [vmem:[#allocation67_spill] sm:$0xff]  ;;  %v10093_v22 = vld [vmem:[#allocation64_spill] sm:$0xff] }
 0x3b9   : > { %v4527_v34 = vmax.f32 %v4285_v23, 0.0  ;;  %v4528_v44 = vmax.f32 %v4286_v16, 0.0  ;;  %4059 = vperm.xlu1 %5050, %v3580_v58   ;;  %v3740_v48 = vpop.permute.xlu1 %3739  ;;  %v3307_v59 = vmul.f32 %v8127_v3, %v10092_v6  ;;  %v3308_v39 = vmul.f32 %v8127_v3, %v10093_v22  ;;  %v3595_v16 = vld [vmem:[%s8230_s25 + $0x340] sm:$0xff]  ;;  %v3588_v53 = vld [vmem:[%s8230_s25 + $0x308] sm:$0xff] }
 0x3ba   : > { %4747 = vst [vmem:[%s8440_s28 + $0x170] sm:$0xff] %v4505_v27  ;;  %4748 = vst.msk [vmem:[%s8440_s28 + $0x178] sm:$0xff] %vm465_vm0, %v4506_v21  ;;  %v4267_v60 = vadd.f32 %v3740_v48, %v3299_v47  ;;  %v4268_v37 = vadd.f32 %v3740_v48, %v3300_v4  ;;  %v3795_v9 = vpop.permute.xlu0 %3794  ;;  %v3329_v47 = vmul.f32 %v8209_v5, %v10094_v13  ;;  %v10097_v48 = vld [vmem:[#allocation68_spill] sm:$0xff] }
 0x3bb   : > { %4769 = vst [vmem:[%s8440_s28 + $0x220] sm:$0xff] %v4527_v34  ;;  %4770 = vst.msk [vmem:[%s8440_s28 + $0x228] sm:$0xff] %vm465_vm0, %v4528_v44  ;;  %v4289_v19 = vadd.f32 %v3795_v9, %v3321_v56  ;;  %v4290_v29 = vadd.f32 %v3795_v9, %v3322_v52  ;;  %4114 = vperm.xlu0 %5049, %v3591_v25   ;;  %v3330_v4 = vmul.f32 %v8209_v5, %v10095_v40  ;;  %v10096_v5 = vld [vmem:[#allocation71_spill] sm:$0xff]  ;;  %v10105_v40 = vld [vmem:[#allocation76_spill] sm:$0xff] }
 0x3bc   : > { %v4509_v51 = vmax.f32 %v4267_v60, 0.0  ;;  %v4510_v54 = vmax.f32 %v4268_v37, 0.0  ;;  %v3311_v44 = vmul.f32 %v8135_v7, %v10096_v5  ;;  %v3312_v60 = vmul.f32 %v8135_v7, %v10097_v48 }
 0x3bd   : > { %v4531_v45 = vmax.f32 %v4289_v19, 0.0  ;;  %v4532_v33 = vmax.f32 %v4290_v29, 0.0  ;;  %4069 = vperm.xlu1 %5050, %v3582_v36   ;;  %v3750_v14 = vpop.permute.xlu1 %3749  ;;  %v3597_v36 = vld [vmem:[%s8230_s25 + $0x350] sm:$0xff]  ;;  %v10098_v19 = vld [vmem:[#allocation93_spill] sm:$0xff] }
 0x3be   : > { %4751 = vst [vmem:[%s8440_s28 + $0x190] sm:$0xff] %v4509_v51  ;;  %4752 = vst.msk [vmem:[%s8440_s28 + $0x198] sm:$0xff] %vm465_vm0, %v4510_v54  ;;  %v4271_v49 = vadd.f32 %v3750_v14, %v3303_v46  ;;  %v4272_v10 = vadd.f32 %v3750_v14, %v3304_v8  ;;  %v3805_v57 = vpop.permute.xlu0 %3804  ;;  %v3333_v29 = vmul.f32 %v8216_v0, %v10098_v19  ;;  %v10109_v19 = vld [vmem:[#allocation80_spill] sm:$0xff] }
 0x3bf   : > { %4773 = vst [vmem:[%s8440_s28 + $0x240] sm:$0xff] %v4531_v45  ;;  %4774 = vst.msk [vmem:[%s8440_s28 + $0x248] sm:$0xff] %vm465_vm0, %v4532_v33  ;;  %v4293_v15 = vadd.f32 %v3805_v57, %v3325_v20  ;;  %v4294_v17 = vadd.f32 %v3805_v57, %v3326_v55  ;;  %4124 = vperm.xlu0 %5049, %v3593_v31   ;;  %v3334_v46 = vmul.f32 %v8216_v0, %v10099_v61  ;;  %v10100_v0 = vld [vmem:[#allocation75_spill] sm:$0xff]  ;;  %v10101_v45 = vld [vmem:[#allocation72_spill] sm:$0xff] }
 0x3c0   : > { %v4513_v58 = vmax.f32 %v4271_v49, 0.0  ;;  %v4514_v23 = vmax.f32 %v4272_v10, 0.0  ;;  %v3315_v55 = vmul.f32 %v8143_v62, %v10100_v0  ;;  %v3316_v33 = vmul.f32 %v8143_v62, %v10101_v45  ;;  %v3599_v10 = vld [vmem:[%s8230_s25 + $0x360] sm:$0xff]  ;;  %v10102_v57 = vld [vmem:[#allocation96_spill] sm:$0xff] }
 0x3c1   : > { %v4535_v27 = vmax.f32 %v4293_v15, 0.0  ;;  %v4536_v21 = vmax.f32 %v4294_v17, 0.0  ;;  %4079 = vperm.xlu1 %5050, %v3584_v43   ;;  %v3760_v25 = vpop.permute.xlu1 %3759  ;;  %v3337_v43 = vmul.f32 %v8223_v35, %v10102_v57  ;;  %v10103_v15 = vld [vmem:[#allocation4_spill] sm:$0xff] }
 0x3c2   : > { %4755 = vst [vmem:[%s8440_s28 + $0x1b0] sm:$0xff] %v4513_v58  ;;  %4756 = vst.msk [vmem:[%s8440_s28 + $0x1b8] sm:$0xff] %vm465_vm0, %v4514_v23  ;;  %v4275_v3 = vadd.f32 %v3760_v25, %v3307_v59  ;;  %v4276_v26 = vadd.f32 %v3760_v25, %v3308_v39  ;;  %v3815_v56 = vpop.permute.xlu0 %3814  ;;  %v3338_v17 = vmul.f32 %v8223_v35, %v10103_v15  ;;  %v3590_v23 = vld [vmem:[%s8230_s25 + $0x318] sm:$0xff]  ;;  %v10104_v35 = vld [vmem:[#allocation79_spill] sm:$0xff] }
 0x3c3   : > { %4777 = vst [vmem:[%s8440_s28 + $0x260] sm:$0xff] %v4535_v27  ;;  %4778 = vst.msk [vmem:[%s8440_s28 + $0x268] sm:$0xff] %vm465_vm0, %v4536_v21  ;;  %v4297_v52 = vadd.f32 %v3815_v56, %v3329_v47  ;;  %v4298_v34 = vadd.f32 %v3815_v56, %v3330_v4  ;;  %4134 = vperm.xlu0 %5049, %v3595_v16   ;;  %v3319_v47 = vmul.f32 %v8151_v50, %v10104_v35  ;;  %v3601_v25 = vld [vmem:[%s8230_s25 + $0x370] sm:$0xff]  ;;  %v10107_v56 = vld [vmem:[#allocation97_spill] sm:$0xff] }
 0x3c4   : > { %v4517_v37 = vmax.f32 %v4275_v3, 0.0  ;;  %v4518_v9 = vmax.f32 %v4276_v26, 0.0  ;;  %v3320_v4 = vmul.f32 %v8151_v50, %v10105_v40  ;;  %v10106_v3 = vld [vmem:[#allocation13_spill] sm:$0xff]  ;;  %v3605_v15 = vld [vmem:[%s8230_s25 + $0x390] sm:$0xff] }
 0x3c5   : > { %v4539_v12 = vmax.f32 %v4297_v52, 0.0  ;;  %v4540_v8 = vmax.f32 %v4298_v34, 0.0  ;;  %4089 = vperm.xlu1 %5050, %v3586_v30   ;;  %v3770_v51 = vpop.permute.xlu1 %3769  ;;  %v3341_v26 = vmul.f32 %v8237_v32, %v10106_v3  ;;  %v3342_v30 = vmul.f32 %v8237_v32, %v10107_v56  ;;  %v10108_v32 = vld [vmem:[#allocation83_spill] sm:$0xff]  ;;  %v3607_v3 = vld [vmem:[%s8230_s25 + $0x3a0] sm:$0xff] }
 0x3c6   : > { %4759 = vst [vmem:[%s8440_s28 + $0x1d0] sm:$0xff] %v4517_v37  ;;  %4760 = vst.msk [vmem:[%s8440_s28 + $0x1d8] sm:$0xff] %vm465_vm0, %v4518_v9  ;;  %v4279_v7 = vadd.f32 %v3770_v51, %v3311_v44  ;;  %v4280_v54 = vadd.f32 %v3770_v51, %v3312_v60  ;;  %v3825_v31 = vpop.permute.xlu0 %3824  ;;  %v3592_v60 = vld [vmem:[%s8230_s25 + $0x328] sm:$0xff] }
 0x3c7   : > { %4781 = vst [vmem:[%s8440_s28 + $0x280] sm:$0xff] %v4539_v12  ;;  %4782 = vst.msk [vmem:[%s8440_s28 + $0x288] sm:$0xff] %vm465_vm0, %v4540_v8  ;;  %v4301_v20 = vadd.f32 %v3825_v31, %v3333_v29  ;;  %v4302_v28 = vadd.f32 %v3825_v31, %v3334_v46  ;;  %4144 = vperm.xlu0 %5049, %v3597_v36   ;;  %v3323_v36 = vmul.f32 %v8159_v42, %v10108_v32  ;;  %v3603_v12 = vld [vmem:[%s8230_s25 + $0x380] sm:$0xff]  ;;  %v10110_v8 = vld [vmem:[#allocation104_spill] sm:$0xff] }
 0x3c8   : > { %v4521_v14 = vmax.f32 %v4279_v7, 0.0  ;;  %v4522_v49 = vmax.f32 %v4280_v54, 0.0  ;;  %v3324_v29 = vmul.f32 %v8159_v42, %v10109_v19  ;;  %v3345_v51 = vmul.f32 %v8243_v41, %v10110_v8  ;;  %v10111_v7 = vld [vmem:[#allocation100_spill] sm:$0xff]  ;;  %v10123_v8 = vld [vmem:[#allocation254_spill] sm:$0xff] }
 0x3c9   : > { %v4543_v6 = vmax.f32 %v4301_v20, 0.0  ;;  %v4544_v59 = vmax.f32 %v4302_v28, 0.0  ;;  %4099 = vperm.xlu1 %5050, %v3588_v53   ;;  %v3780_v22 = vpop.permute.xlu1 %3779  ;;  %v3346_v54 = vmul.f32 %v8243_v41, %v10111_v7  ;;  %v10112_v41 = vld [vmem:[#allocation87_spill] sm:$0xff]  ;;  %v10124_v7 = vld [vmem:[#allocation28_spill] sm:$0xff] }
 0x3ca   : > { %4763 = vst [vmem:[%s8440_s28 + $0x1f0] sm:$0xff] %v4521_v14  ;;  %4764 = vst.msk [vmem:[%s8440_s28 + $0x1f8] sm:$0xff] %vm465_vm0, %v4522_v49  ;;  %v4283_v62 = vadd.f32 %v3780_v22, %v3315_v55  ;;  %v4284_v39 = vadd.f32 %v3780_v22, %v3316_v33  ;;  %v3835_v58 = vpop.permute.xlu0 %3834  ;;  %v3594_v55 = vld [vmem:[%s8230_s25 + $0x338] sm:$0xff]  ;;  %v3327_v14 = vmul.f32 %v8167_v11, %v10112_v41  ;;  %v10113_v49 = vld [vmem:[#allocation84_spill] sm:$0xff] }
 0x3cb   : > { %4785 = vst [vmem:[%s8440_s28 + $0x2a0] sm:$0xff] %v4543_v6  ;;  %4786 = vst.msk [vmem:[%s8440_s28 + $0x2a8] sm:$0xff] %vm465_vm0, %v4544_v59  ;;  %v4305_v16 = vadd.f32 %v3835_v58, %v3337_v43  ;;  %v4306_v13 = vadd.f32 %v3835_v58, %v3338_v17  ;;  %4154 = vperm.xlu0 %5049, %v3599_v10   ;;  %v3328_v10 = vmul.f32 %v8167_v11, %v10113_v49  ;;  %v10114_v17 = vld [vmem:[#allocation109_spill] sm:$0xff]  ;;  %v10115_v59 = vld [vmem:[#allocation106_spill] sm:$0xff] }
 0x3cc   : > { %v4525_v27 = vmax.f32 %v4283_v62, 0.0  ;;  %v4526_v21 = vmax.f32 %v4284_v39, 0.0  ;;  %v3349_v6 = vmul.f32 %v8249_v1, %v10114_v17  ;;  %v3350_v22 = vmul.f32 %v8249_v1, %v10115_v59  ;;  %v10116_v1 = vld [vmem:[#allocation6_spill] sm:$0xff]  ;;  %v10126_v41 = vld [vmem:[#allocation248_spill] sm:$0xff]  ;;  %v10127_v49 = vld [vmem:[#allocation95_spill] sm:$0xff] }
 0x3cd   : > { %v4547_v52 = vmax.f32 %v4305_v16, 0.0  ;;  %v4548_v34 = vmax.f32 %v4306_v13, 0.0  ;;  %4109 = vperm.xlu1 %5050, %v3590_v23   ;;  %v3790_v5 = vpop.permute.xlu1 %3789  ;;  %v3596_v13 = vld [vmem:[%s8230_s25 + $0x348] sm:$0xff]  ;;  %v3331_v40 = vmul.f32 %v8175_v18, %v10116_v1  ;;  %v10128_v17 = vld [vmem:[#allocation120_spill] sm:$0xff] }
 0x3ce   : > { %4767 = vst [vmem:[%s8440_s28 + $0x210] sm:$0xff] %v4525_v27  ;;  %4768 = vst.msk [vmem:[%s8440_s28 + $0x218] sm:$0xff] %vm465_vm0, %v4526_v21  ;;  %v4287_v50 = vadd.f32 %v3790_v5, %v3319_v47  ;;  %v4288_v44 = vadd.f32 %v3790_v5, %v3320_v4  ;;  %v3845_v48 = vpop.permute.xlu0 %3844  ;;  %v10117_v4 = vld [vmem:[#allocation88_spill] sm:$0xff] }
 0x3cf   : > { %4789 = vst [vmem:[%s8440_s28 + $0x2c0] sm:$0xff] %v4547_v52  ;;  %4790 = vst.msk [vmem:[%s8440_s28 + $0x2c8] sm:$0xff] %vm465_vm0, %v4548_v34  ;;  %v4309_v37 = vadd.f32 %v3845_v48, %v3341_v26  ;;  %v4310_v9 = vadd.f32 %v3845_v48, %v3342_v30  ;;  %4164 = vperm.xlu0 %5049, %v3601_v25   ;;  %v3332_v27 = vmul.f32 %v8175_v18, %v10117_v4  ;;  %v10118_v26 = vld [vmem:[#allocation113_spill] sm:$0xff]  ;;  %v10119_v30 = vld [vmem:[#allocation110_spill] sm:$0xff] }
 0x3d0   : > { %v4529_v61 = vmax.f32 %v4287_v50, 0.0  ;;  %v4530_v46 = vmax.f32 %v4288_v44, 0.0  ;;  %v3353_v56 = vmul.f32 %v8255_v2, %v10118_v26  ;;  %v3354_v52 = vmul.f32 %v8255_v2, %v10119_v30  ;;  %v10120_v2 = vld [vmem:[#allocation94_spill] sm:$0xff]  ;;  %v10132_v4 = vld [vmem:[#allocation180_spill] sm:$0xff] }
 0x3d1   : > { %v4551_v31 = vmax.f32 %v4309_v37, 0.0  ;;  %v4552_v53 = vmax.f32 %v4310_v9, 0.0  ;;  %4119 = vperm.xlu1 %5050, %v3592_v60   ;;  %v3800_v20 = vpop.permute.xlu1 %3799  ;;  %v3598_v60 = vld [vmem:[%s8230_s25 + $0x358] sm:$0xff]  ;;  %v3335_v32 = vmul.f32 %v8183_v63, %v10120_v2  ;;  %v10135_v30 = vld [vmem:[#allocation258_spill] sm:$0xff] }
 0x3d2   : > { %4771 = vst [vmem:[%s8440_s28 + $0x230] sm:$0xff] %v4529_v61  ;;  %4772 = vst.msk [vmem:[%s8440_s28 + $0x238] sm:$0xff] %vm465_vm0, %v4530_v46  ;;  %v4291_v42 = vadd.f32 %v3800_v20, %v3323_v36  ;;  %v4292_v28 = vadd.f32 %v3800_v20, %v3324_v29  ;;  %v3855_v0 = vpop.permute.xlu0 %3854  ;;  %v10121_v36 = vld [vmem:[#allocation92_spill] sm:$0xff] }
 0x3d3   : > { %4793 = vst [vmem:[%s8440_s28 + $0x2e0] sm:$0xff] %v4551_v31  ;;  %4794 = vst.msk [vmem:[%s8440_s28 + $0x2e8] sm:$0xff] %vm465_vm0, %v4552_v53  ;;  %v4313_v45 = vadd.f32 %v3855_v0, %v3345_v51  ;;  %v4314_v33 = vadd.f32 %v3855_v0, %v3346_v54  ;;  %4174 = vperm.xlu0 %5049, %v3603_v12   ;;  %v3336_v19 = vmul.f32 %v8183_v63, %v10121_v36  ;;  %v3609_v46 = vld [vmem:[%s8230_s25 + $0x3b0] sm:$0xff]  ;;  %v3600_v0 = vld [vmem:[%s8230_s25 + $0x368] sm:$0xff] }
 0x3d4   : > { %v4533_v57 = vmax.f32 %v4291_v42, 0.0  ;;  %v4534_v43 = vmax.f32 %v4292_v28, 0.0  ;;  %v10122_v12 = vld [vmem:[#allocation116_spill] sm:$0xff]  ;;  %v3358_v54 = vmul.f32 %v10123_v8, %v10124_v7  ;;  %v10137_v36 = vld [vmem:[#allocation107_spill] sm:$0xff] }
 0x3d5   : > { %v4555_v62 = vmax.f32 %v4313_v45, 0.0  ;;  %v4556_v39 = vmax.f32 %v4314_v33, 0.0  ;;  %4129 = vperm.xlu1 %5050, %v3594_v55   ;;  %v3810_v58 = vpop.permute.xlu1 %3809  ;;  %v3357_v51 = vmul.f32 %v10123_v8, %v10122_v12  ;;  %v10125_v33 = vld [vmem:[#allocation98_spill] sm:$0xff]  ;;  %v10141_v7 = vld [vmem:[#allocation260_spill] sm:$0xff] }
 0x3d6   : > { %4775 = vst [vmem:[%s8440_s28 + $0x250] sm:$0xff] %v4533_v57  ;;  %4776 = vst.msk [vmem:[%s8440_s28 + $0x258] sm:$0xff] %vm465_vm0, %v4534_v43  ;;  %v4295_v11 = vadd.f32 %v3810_v58, %v3327_v14  ;;  %v4296_v23 = vadd.f32 %v3810_v58, %v3328_v10  ;;  %v3865_v16 = vpop.permute.xlu0 %3864  ;;  %v3339_v14 = vmul.f32 %v10126_v41, %v10125_v33 }
 0x3d7   : > { %4797 = vst [vmem:[%s8440_s28 + $0x300] sm:$0xff] %v4555_v62  ;;  %4798 = vst.msk [vmem:[%s8440_s28 + $0x308] sm:$0xff] %vm465_vm0, %v4556_v39  ;;  %v4317_v35 = vadd.f32 %v3865_v16, %v3349_v6  ;;  %v4318_v47 = vadd.f32 %v3865_v16, %v3350_v22  ;;  %4184 = vperm.xlu0 %5049, %v3605_v15   ;;  %v3340_v10 = vmul.f32 %v10126_v41, %v10127_v49  ;;  %v3611_v15 = vld [vmem:[%s8230_s25 + $0x3c0] sm:$0xff]  ;;  %v10129_v6 = vld [vmem:[#allocation256_spill] sm:$0xff] }
 0x3d8   : > { %v4537_v21 = vmax.f32 %v4295_v11, 0.0  ;;  %v4538_v25 = vmax.f32 %v4296_v23, 0.0  ;;  %v3361_v59 = vmul.f32 %v10129_v6, %v10128_v17  ;;  %v10130_v22 = vld [vmem:[#allocation117_spill] sm:$0xff]  ;;  %v10144_v49 = vld [vmem:[#allocation103_spill] sm:$0xff] }
 0x3d9   : > { %v4559_v34 = vmax.f32 %v4317_v35, 0.0  ;;  %v4560_v5 = vmax.f32 %v4318_v47, 0.0  ;;  %4139 = vperm.xlu1 %5050, %v3596_v13   ;;  %v3820_v50 = vpop.permute.xlu1 %3819  ;;  %v3362_v62 = vmul.f32 %v10129_v6, %v10130_v22  ;;  %v3602_v35 = vld [vmem:[%s8230_s25 + $0x378] sm:$0xff] }
 0x3da   : > { %4779 = vst [vmem:[%s8440_s28 + $0x270] sm:$0xff] %v4537_v21  ;;  %4780 = vst.msk [vmem:[%s8440_s28 + $0x278] sm:$0xff] %vm465_vm0, %v4538_v25  ;;  %v4299_v18 = vadd.f32 %v3820_v50, %v3331_v40  ;;  %v4300_v44 = vadd.f32 %v3820_v50, %v3332_v27  ;;  %v3875_v48 = vpop.permute.xlu0 %3874  ;;  %v10131_v40 = vld [vmem:[#allocation101_spill] sm:$0xff]  ;;  %v10133_v21 = vld [vmem:[#allocation99_spill] sm:$0xff] }
 0x3db   : > { %4801 = vst [vmem:[%s8440_s28 + $0x320] sm:$0xff] %v4559_v34  ;;  %4802 = vst.msk [vmem:[%s8440_s28 + $0x328] sm:$0xff] %vm465_vm0, %v4560_v5  ;;  %v4321_v37 = vadd.f32 %v3875_v48, %v3353_v56  ;;  %v4322_v9 = vadd.f32 %v3875_v48, %v3354_v52  ;;  %4194 = vperm.xlu0 %5049, %v3607_v3   ;;  %v3343_v27 = vmul.f32 %v10132_v4, %v10131_v40  ;;  %v10134_v56 = vld [vmem:[#allocation124_spill] sm:$0xff]  ;;  %v10136_v34 = vld [vmem:[#allocation121_spill] sm:$0xff] }
 0x3dc   : > { %v4541_v29 = vmax.f32 %v4299_v18, 0.0  ;;  %v4542_v61 = vmax.f32 %v4300_v44, 0.0  ;;  %v3344_v25 = vmul.f32 %v10132_v4, %v10133_v21  ;;  %v3365_v52 = vmul.f32 %v10135_v30, %v10134_v56  ;;  %v10146_v6 = vld [vmem:[#allocation133_spill] sm:$0xff]  ;;  %v10149_v4 = vld [vmem:[#allocation114_spill] sm:$0xff] }
 0x3dd   : > { %v4563_v31 = vmax.f32 %v4321_v37, 0.0  ;;  %v4564_v53 = vmax.f32 %v4322_v9, 0.0  ;;  %4149 = vperm.xlu1 %5050, %v3598_v60   ;;  %v3830_v20 = vpop.permute.xlu1 %3829  ;;  %v3366_v5 = vmul.f32 %v10135_v30, %v10136_v34  ;;  %v3604_v9 = vld [vmem:[%s8230_s25 + $0x388] sm:$0xff]  ;;  %v10152_v30 = vld [vmem:[#allocation137_spill] sm:$0xff] }
 0x3de   : > { %4783 = vst [vmem:[%s8440_s28 + $0x290] sm:$0xff] %v4541_v29  ;;  %4784 = vst.msk [vmem:[%s8440_s28 + $0x298] sm:$0xff] %vm465_vm0, %v4542_v61  ;;  %v4303_v63 = vadd.f32 %v3830_v20, %v3335_v32  ;;  %v4304_v42 = vadd.f32 %v3830_v20, %v3336_v19  ;;  %v3885_v28 = vpop.permute.xlu0 %3884  ;;  %v10138_v19 = vld [vmem:[#allocation185_spill] sm:$0xff]  ;;  %v10139_v61 = vld [vmem:[#allocation102_spill] sm:$0xff] }
 0x3df   : > { %4805 = vst [vmem:[%s8440_s28 + $0x340] sm:$0xff] %v4563_v31  ;;  %4806 = vst.msk [vmem:[%s8440_s28 + $0x348] sm:$0xff] %vm465_vm0, %v4564_v53  ;;  %v4325_v55 = vadd.f32 %v3885_v28, %v3357_v51  ;;  %v4326_v45 = vadd.f32 %v3885_v28, %v3358_v54  ;;  %4204 = vperm.xlu0 %5049, %v3609_v46   ;;  %v3347_v29 = vmul.f32 %v10138_v19, %v10137_v36  ;;  %v10140_v51 = vld [vmem:[#allocation129_spill] sm:$0xff] }
 0x3e0   : > { %v4545_v57 = vmax.f32 %v4303_v63, 0.0  ;;  %v4546_v43 = vmax.f32 %v4304_v42, 0.0  ;;  %v3348_v46 = vmul.f32 %v10138_v19, %v10139_v61  ;;  %v3369_v54 = vmul.f32 %v10141_v7, %v10140_v51  ;;  %v10142_v31 = vld [vmem:[#allocation125_spill] sm:$0xff]  ;;  %v10155_v19 = vld [vmem:[#allocation118_spill] sm:$0xff] }
 0x3e1   : > { %v4567_v39 = vmax.f32 %v4325_v55, 0.0  ;;  %v4568_v58 = vmax.f32 %v4326_v45, 0.0  ;;  %4159 = vperm.xlu1 %5050, %v3600_v0   ;;  %v3840_v11 = vpop.permute.xlu1 %3839  ;;  %v3370_v53 = vmul.f32 %v10141_v7, %v10142_v31  ;;  %v3606_v45 = vld [vmem:[%s8230_s25 + $0x398] sm:$0xff] }
 0x3e2   : > { %4787 = vst [vmem:[%s8440_s28 + $0x2b0] sm:$0xff] %v4545_v57  ;;  %4788 = vst.msk [vmem:[%s8440_s28 + $0x2b8] sm:$0xff] %vm465_vm0, %v4546_v43  ;;  %v4307_v23 = vadd.f32 %v3840_v11, %v3339_v14  ;;  %v4308_v16 = vadd.f32 %v3840_v11, %v3340_v10  ;;  %v3895_v13 = vpop.permute.xlu0 %3894  ;;  %v10143_v14 = vld [vmem:[#allocation111_spill] sm:$0xff]  ;;  %v10145_v57 = vld [vmem:[#allocation108_spill] sm:$0xff] }
 0x3e3   : > { %4809 = vst [vmem:[%s8440_s28 + $0x360] sm:$0xff] %v4567_v39  ;;  %4810 = vst.msk [vmem:[%s8440_s28 + $0x368] sm:$0xff] %vm465_vm0, %v4568_v58  ;;  %v4329_v47 = vadd.f32 %v3895_v13, %v3361_v59  ;;  %v4330_v1 = vadd.f32 %v3895_v13, %v3362_v62  ;;  %4214 = vperm.xlu0 %5049, %v3611_v15   ;;  %v3351_v10 = vmul.f32 %v10144_v49, %v10143_v14  ;;  %v10147_v59 = vld [vmem:[#allocation262_spill] sm:$0xff]  ;;  %v10158_v7 = vld [vmem:[#allocation141_spill] sm:$0xff] }
 0x3e4   : > { %v4549_v3 = vmax.f32 %v4307_v23, 0.0  ;;  %v4550_v26 = vmax.f32 %v4308_v16, 0.0  ;;  %v3352_v43 = vmul.f32 %v10144_v49, %v10145_v57  ;;  %v3373_v22 = vmul.f32 %v10147_v59, %v10146_v6  ;;  %v10148_v62 = vld [vmem:[#allocation130_spill] sm:$0xff]  ;;  %v10163_v57 = vld [vmem:[#allocation119_spill] sm:$0xff]  ;;  %v10164_v6 = vld [vmem:[#allocation145_spill] sm:$0xff] }
 0x3e5   : > { %v4571_v50 = vmax.f32 %v4329_v47, 0.0  ;;  %v4572_v18 = vmax.f32 %v4330_v1, 0.0  ;;  %4169 = vperm.xlu1 %5050, %v3602_v35   ;;  %v3850_v44 = vpop.permute.xlu1 %3849  ;;  %v3374_v39 = vmul.f32 %v10147_v59, %v10148_v62  ;;  %v3608_v47 = vld [vmem:[%s8230_s25 + $0x3a8] sm:$0xff]  ;;  %v10161_v14 = vld [vmem:[#allocation122_spill] sm:$0xff]  ;;  %v10165_v59 = vld [vmem:[#allocation268_spill] sm:$0xff] }
 0x3e6   : > { %4791 = vst [vmem:[%s8440_s28 + $0x2d0] sm:$0xff] %v4549_v3  ;;  %4792 = vst.msk [vmem:[%s8440_s28 + $0x2d8] sm:$0xff] %vm465_vm0, %v4550_v26  ;;  %v4311_v48 = vadd.f32 %v3850_v44, %v3343_v27  ;;  %v4312_v60 = vadd.f32 %v3850_v44, %v3344_v25  ;;  %v3905_v37 = vpop.permute.xlu0 %3904  ;;  %v10150_v27 = vld [vmem:[#allocation208_spill] sm:$0xff]  ;;  %v10162_v49 = vld [vmem:[#allocation250_spill] sm:$0xff] }
 0x3e7   : > { %4813 = vst [vmem:[%s8440_s28 + $0x380] sm:$0xff] %v4571_v50  ;;  %4814 = vst.msk [vmem:[%s8440_s28 + $0x388] sm:$0xff] %vm465_vm0, %v4572_v18  ;;  %v4333_v2 = vadd.f32 %v3905_v37, %v3365_v52  ;;  %v4334_v32 = vadd.f32 %v3905_v37, %v3366_v5  ;;  %v3355_v21 = vmul.f32 %v10150_v27, %v10149_v4  ;;  %v10151_v25 = vld [vmem:[#allocation112_spill] sm:$0xff]  ;;  %v10154_v5 = vld [vmem:[#allocation134_spill] sm:$0xff] }
 0x3e8   : > { %v4553_v12 = vmax.f32 %v4311_v48, 0.0  ;;  %v4554_v8 = vmax.f32 %v4312_v60, 0.0  ;;  %v3356_v3 = vmul.f32 %v10150_v27, %v10151_v25  ;;  %v10153_v52 = vld [vmem:[#allocation264_spill] sm:$0xff]  ;;  %v10166_v62 = vld [vmem:[#allocation142_spill] sm:$0xff]  ;;  %v10168_v4 = vld [vmem:[#allocation251_spill] sm:$0xff] }
 0x3e9   : > { %v4575_v20 = vmax.f32 %v4333_v2, 0.0  ;;  %v4576_v63 = vmax.f32 %v4334_v32, 0.0  ;;  %4179 = vperm.xlu1 %5050, %v3604_v9   ;;  %v3860_v42 = vpop.permute.xlu1 %3859  ;;  %v3377_v34 = vmul.f32 %v10153_v52, %v10152_v30  ;;  %v3378_v50 = vmul.f32 %v10153_v52, %v10154_v5  ;;  %v3610_v2 = vld [vmem:[%s8230_s25 + $0x3b8] sm:$0xff]  ;;  %v10171_v30 = vld [vmem:[#allocation270_spill] sm:$0xff] }
 0x3ea   : > { %4795 = vst [vmem:[%s8440_s28 + $0x2f0] sm:$0xff] %v4553_v12  ;;  %4796 = vst.msk [vmem:[%s8440_s28 + $0x2f8] sm:$0xff] %vm465_vm0, %v4554_v8  ;;  %v4315_v28 = vadd.f32 %v3860_v42, %v3347_v29  ;;  %v4316_v0 = vadd.f32 %v3860_v42, %v3348_v46  ;;  %v3915_v55 = vpop.permute.xlu0 %3914  ;;  %v10156_v29 = vld [vmem:[#allocation249_spill] sm:$0xff]  ;;  %v10157_v46 = vld [vmem:[#allocation115_spill] sm:$0xff] }
 0x3eb   : > { %4817 = vst [vmem:[%s8440_s28 + $0x3a0] sm:$0xff] %v4575_v20  ;;  %4818 = vst.msk [vmem:[%s8440_s28 + $0x3a8] sm:$0xff] %vm465_vm0, %v4576_v63  ;;  %v4337_v33 = vadd.f32 %v3915_v55, %v3369_v54  ;;  %v4338_v41 = vadd.f32 %v3915_v55, %v3370_v53  ;;  %v3359_v61 = vmul.f32 %v10156_v29, %v10155_v19  ;;  %v10159_v54 = vld [vmem:[#allocation266_spill] sm:$0xff] }
 0x3ec   : > { %v4557_v15 = vmax.f32 %v4315_v28, 0.0  ;;  %v4558_v17 = vmax.f32 %v4316_v0, 0.0  ;;  %v3360_v12 = vmul.f32 %v10156_v29, %v10157_v46  ;;  %v3381_v31 = vmul.f32 %v10159_v54, %v10158_v7  ;;  %v10160_v53 = vld [vmem:[#allocation138_spill] sm:$0xff]  ;;  %v10175_v29 = vld [vmem:[#allocation127_spill] sm:$0xff] }
 0x3ed   : > { %v4579_v58 = vmax.f32 %v4337_v33, 0.0  ;;  %v4580_v11 = vmax.f32 %v4338_v41, 0.0  ;;  %4189 = vperm.xlu1 %5050, %v3606_v45   ;;  %v3870_v23 = vpop.permute.xlu1 %3869  ;;  %v3382_v20 = vmul.f32 %v10159_v54, %v10160_v53  ;;  %v10178_v54 = vld [vmem:[#allocation150_spill] sm:$0xff] }
 0x3ee   : > { %4799 = vst [vmem:[%s8440_s28 + $0x310] sm:$0xff] %v4557_v15  ;;  %4800 = vst.msk [vmem:[%s8440_s28 + $0x318] sm:$0xff] %vm465_vm0, %v4558_v17  ;;  %v4319_v16 = vadd.f32 %v3870_v23, %v3351_v10  ;;  %v4320_v13 = vadd.f32 %v3870_v23, %v3352_v43  ;;  %v3925_v35 = vpop.permute.xlu0 %3924  ;;  %v3363_v10 = vmul.f32 %v10162_v49, %v10161_v14 }
 0x3ef   : > { %4821 = vst [vmem:[%s8440_s28 + $0x3c0] sm:$0xff] %v4579_v58  ;;  %4822 = vst.msk [vmem:[%s8440_s28 + $0x3c8] sm:$0xff] %vm465_vm0, %v4580_v11  ;;  %v4341_v1 = vadd.f32 %v3925_v35, %v3373_v22  ;;  %v4342_v40 = vadd.f32 %v3925_v35, %v3374_v39  ;;  %v3364_v43 = vmul.f32 %v10162_v49, %v10163_v57  ;;  %v10181_v49 = vld [vmem:[#allocation132_spill] sm:$0xff] }
 0x3f0   : > { %v4561_v26 = vmax.f32 %v4319_v16, 0.0  ;;  %v4562_v56 = vmax.f32 %v4320_v13, 0.0  ;;  %v3385_v22 = vmul.f32 %v10165_v59, %v10164_v6  ;;  %v3386_v39 = vmul.f32 %v10165_v59, %v10166_v62  ;;  %v10184_v59 = vld [vmem:[#allocation154_spill] sm:$0xff] }
 0x3f1   : > { %v4583_v18 = vmax.f32 %v4341_v1, 0.0  ;;  %v4584_v44 = vmax.f32 %v4342_v40, 0.0  ;;  %4199 = vperm.xlu1 %5050, %v3608_v47   ;;  %v3880_v48 = vpop.permute.xlu1 %3879  ;;  %v10167_v40 = vld [vmem:[#allocation126_spill] sm:$0xff] }
 0x3f2   : > { %4803 = vst [vmem:[%s8440_s28 + $0x330] sm:$0xff] %v4561_v26  ;;  %4804 = vst.msk [vmem:[%s8440_s28 + $0x338] sm:$0xff] %vm465_vm0, %v4562_v56  ;;  %v4323_v60 = vadd.f32 %v3880_v48, %v3355_v21  ;;  %v4324_v37 = vadd.f32 %v3880_v48, %v3356_v3  ;;  %v3935_v9 = vpop.permute.xlu0 %3934  ;;  %v3367_v27 = vmul.f32 %v10168_v4, %v10167_v40  ;;  %v10169_v21 = vld [vmem:[#allocation123_spill] sm:$0xff]  ;;  %v10170_v56 = vld [vmem:[#allocation149_spill] sm:$0xff] }
 0x3f3   : > { %4825 = vst [vmem:[%s8440_s28 + $0x3e0] sm:$0xff] %v4583_v18  ;;  %4826 = vst.msk [vmem:[%s8440_s28 + $0x3e8] sm:$0xff] %vm465_vm0, %v4584_v44  ;;  %v4345_v32 = vadd.f32 %v3935_v9, %v3377_v34  ;;  %v4346_v36 = vadd.f32 %v3935_v9, %v3378_v50  ;;  %v3368_v25 = vmul.f32 %v10168_v4, %v10169_v21  ;;  %v10172_v34 = vld [vmem:[#allocation146_spill] sm:$0xff]  ;;  %v10187_v4 = vld [vmem:[#allocation136_spill] sm:$0xff] }
 0x3f4   : > { %v4565_v8 = vmax.f32 %v4323_v60, 0.0  ;;  %v4566_v51 = vmax.f32 %v4324_v37, 0.0  ;;  %v3389_v52 = vmul.f32 %v10171_v30, %v10170_v56  ;;  %v3390_v5 = vmul.f32 %v10171_v30, %v10172_v34  ;;  %v10190_v30 = vld [vmem:[#allocation158_spill] sm:$0xff] }
 0x3f5   : > { %v4587_v63 = vmax.f32 %v4345_v32, 0.0  ;;  %v4588_v42 = vmax.f32 %v4346_v36, 0.0  ;;  %4209 = vperm.xlu1 %5050, %v3610_v2   ;;  %v3890_v28 = vpop.permute.xlu1 %3889  ;;  %v10173_v32 = vld [vmem:[#allocation131_spill] sm:$0xff]  ;;  %v10174_v36 = vld [vmem:[#allocation252_spill] sm:$0xff] }
 0x3f6   : > { %4807 = vst [vmem:[%s8440_s28 + $0x350] sm:$0xff] %v4565_v8  ;;  %4808 = vst.msk [vmem:[%s8440_s28 + $0x358] sm:$0xff] %vm465_vm0, %v4566_v51  ;;  %v4327_v0 = vadd.f32 %v3890_v28, %v3359_v61  ;;  %v4328_v55 = vadd.f32 %v3890_v28, %v3360_v12  ;;  %v3945_v45 = vpop.permute.xlu0 %3944  ;;  %v3371_v19 = vmul.f32 %v10174_v36, %v10173_v32  ;;  %v10176_v8 = vld [vmem:[#allocation153_spill] sm:$0xff]  ;;  %v10177_v51 = vld [vmem:[#allocation272_spill] sm:$0xff] }
 0x3f7   : > { %4829 = vst [vmem:[%s8440_s28 + $0x400] sm:$0xff] %v4587_v63  ;;  %4830 = vst.msk [vmem:[%s8440_s28 + $0x408] sm:$0xff] %vm465_vm0, %v4588_v42  ;;  %v4349_v33 = vadd.f32 %v3945_v45, %v3381_v31  ;;  %v4350_v41 = vadd.f32 %v3945_v45, %v3382_v20  ;;  %v3372_v61 = vmul.f32 %v10174_v36, %v10175_v29  ;;  %v10193_v36 = vld [vmem:[#allocation140_spill] sm:$0xff] }
 0x3f8   : > { %v4569_v15 = vmax.f32 %v4327_v0, 0.0  ;;  %v4570_v17 = vmax.f32 %v4328_v55, 0.0  ;;  %v3393_v7 = vmul.f32 %v10177_v51, %v10176_v8  ;;  %v3394_v31 = vmul.f32 %v10177_v51, %v10178_v54  ;;  %v10196_v51 = vld [vmem:[#allocation162_spill] sm:$0xff] }
 0x3f9   : > { %v4591_v58 = vmax.f32 %v4349_v33, 0.0  ;;  %v4592_v11 = vmax.f32 %v4350_v41, 0.0  ;;  %v3900_v23 = vpop.permute.xlu1 %3899  ;;  %v10179_v33 = vld [vmem:[#allocation135_spill] sm:$0xff]  ;;  %v10180_v41 = vld [vmem:[#allocation253_spill] sm:$0xff] }
 0x3fa   : > { %4811 = vst [vmem:[%s8440_s28 + $0x370] sm:$0xff] %v4569_v15  ;;  %4812 = vst.msk [vmem:[%s8440_s28 + $0x378] sm:$0xff] %vm465_vm0, %v4570_v17  ;;  %v4331_v16 = vadd.f32 %v3900_v23, %v3363_v10  ;;  %v4332_v13 = vadd.f32 %v3900_v23, %v3364_v43  ;;  %v3955_v35 = vpop.permute.xlu0 %3954  ;;  %v3375_v14 = vmul.f32 %v10180_v41, %v10179_v33  ;;  %v10182_v15 = vld [vmem:[#allocation157_spill] sm:$0xff]  ;;  %v10183_v17 = vld [vmem:[#allocation274_spill] sm:$0xff] }
 0x3fb   : > { %4833 = vst [vmem:[%s8440_s28 + $0x420] sm:$0xff] %v4591_v58  ;;  %4834 = vst.msk [vmem:[%s8440_s28 + $0x428] sm:$0xff] %vm465_vm0, %v4592_v11  ;;  %v4353_v47 = vadd.f32 %v3955_v35, %v3385_v22  ;;  %v4354_v1 = vadd.f32 %v3955_v35, %v3386_v39  ;;  %v3376_v10 = vmul.f32 %v10180_v41, %v10181_v49  ;;  %v10199_v41 = vld [vmem:[#allocation144_spill] sm:$0xff] }
 0x3fc   : > { %v4573_v3 = vmax.f32 %v4331_v16, 0.0  ;;  %v4574_v26 = vmax.f32 %v4332_v13, 0.0  ;;  %v3397_v6 = vmul.f32 %v10183_v17, %v10182_v15  ;;  %v3398_v22 = vmul.f32 %v10183_v17, %v10184_v59  ;;  %v10202_v17 = vld [vmem:[#allocation166_spill] sm:$0xff] }
 0x3fd   : > { %v4595_v50 = vmax.f32 %v4353_v47, 0.0  ;;  %v4596_v18 = vmax.f32 %v4354_v1, 0.0  ;;  %v3910_v44 = vpop.permute.xlu1 %3909  ;;  %v10185_v47 = vld [vmem:[#allocation139_spill] sm:$0xff] }
 0x3fe   : > { %4815 = vst [vmem:[%s8440_s28 + $0x390] sm:$0xff] %v4573_v3  ;;  %4816 = vst.msk [vmem:[%s8440_s28 + $0x398] sm:$0xff] %vm465_vm0, %v4574_v26  ;;  %v4335_v48 = vadd.f32 %v3910_v44, %v3367_v27  ;;  %v4336_v60 = vadd.f32 %v3910_v44, %v3368_v25  ;;  %v3965_v37 = vpop.permute.xlu0 %3964  ;;  %v10186_v1 = vld [vmem:[#allocation255_spill] sm:$0xff]  ;;  %v10188_v3 = vld [vmem:[#allocation161_spill] sm:$0xff] }
 0x3ff   : > { %4837 = vst [vmem:[%s8440_s28 + $0x440] sm:$0xff] %v4595_v50  ;;  %4838 = vst.msk [vmem:[%s8440_s28 + $0x448] sm:$0xff] %vm465_vm0, %v4596_v18  ;;  %v4357_v9 = vadd.f32 %v3965_v37, %v3389_v52  ;;  %v4358_v2 = vadd.f32 %v3965_v37, %v3390_v5  ;;  %v3379_v40 = vmul.f32 %v10186_v1, %v10185_v47  ;;  %v10189_v26 = vld [vmem:[#allocation276_spill] sm:$0xff] }
 0x400   : > { %v4577_v46 = vmax.f32 %v4335_v48, 0.0  ;;  %v4578_v12 = vmax.f32 %v4336_v60, 0.0  ;;  %v3380_v27 = vmul.f32 %v10186_v1, %v10187_v4  ;;  %v3401_v56 = vmul.f32 %v10189_v26, %v10188_v3  ;;  %v10205_v1 = vld [vmem:[#allocation148_spill] sm:$0xff] }
 0x401   : > { %v4599_v53 = vmax.f32 %v4357_v9, 0.0  ;;  %v4600_v20 = vmax.f32 %v4358_v2, 0.0  ;;  %v3920_v63 = vpop.permute.xlu1 %3919  ;;  %v3402_v52 = vmul.f32 %v10189_v26, %v10190_v30  ;;  %v10191_v9 = vld [vmem:[#allocation143_spill] sm:$0xff]  ;;  %v10192_v2 = vld [vmem:[#allocation257_spill] sm:$0xff]  ;;  %v10208_v26 = vld [vmem:[#allocation170_spill] sm:$0xff] }
 0x402   : > { %4819 = vst [vmem:[%s8440_s28 + $0x3b0] sm:$0xff] %v4577_v46  ;;  %4820 = vst.msk [vmem:[%s8440_s28 + $0x3b8] sm:$0xff] %vm465_vm0, %v4578_v12  ;;  %v4339_v42 = vadd.f32 %v3920_v63, %v3371_v19  ;;  %v4340_v28 = vadd.f32 %v3920_v63, %v3372_v61  ;;  %v3975_v0 = vpop.permute.xlu0 %3974  ;;  %v3383_v32 = vmul.f32 %v10192_v2, %v10191_v9  ;;  %v10194_v46 = vld [vmem:[#allocation165_spill] sm:$0xff]  ;;  %v10195_v12 = vld [vmem:[#allocation278_spill] sm:$0xff] }
 0x403   : > { %4841 = vst [vmem:[%s8440_s28 + $0x460] sm:$0xff] %v4599_v53  ;;  %4842 = vst.msk [vmem:[%s8440_s28 + $0x468] sm:$0xff] %vm465_vm0, %v4600_v20  ;;  %v4361_v55 = vadd.f32 %v3975_v0, %v3393_v7  ;;  %v4362_v45 = vadd.f32 %v3975_v0, %v3394_v31  ;;  %v3384_v19 = vmul.f32 %v10192_v2, %v10193_v36  ;;  %v10211_v2 = vld [vmem:[#allocation152_spill] sm:$0xff] }
 0x404   : > { %v4581_v57 = vmax.f32 %v4339_v42, 0.0  ;;  %v4582_v43 = vmax.f32 %v4340_v28, 0.0  ;;  %v3405_v8 = vmul.f32 %v10195_v12, %v10194_v46  ;;  %v3406_v7 = vmul.f32 %v10195_v12, %v10196_v51  ;;  %v10214_v12 = vld [vmem:[#allocation89_spill] sm:$0xff] }
 0x405   : > { %v4603_v62 = vmax.f32 %v4361_v55, 0.0  ;;  %v4604_v39 = vmax.f32 %v4362_v45, 0.0  ;;  %v3930_v58 = vpop.permute.xlu1 %3929  ;;  %v10197_v55 = vld [vmem:[#allocation147_spill] sm:$0xff] }
 0x406   : > { %4823 = vst [vmem:[%s8440_s28 + $0x3d0] sm:$0xff] %v4581_v57  ;;  %4824 = vst.msk [vmem:[%s8440_s28 + $0x3d8] sm:$0xff] %vm465_vm0, %v4582_v43  ;;  %v4343_v11 = vadd.f32 %v3930_v58, %v3375_v14  ;;  %v4344_v23 = vadd.f32 %v3930_v58, %v3376_v10  ;;  %v3985_v16 = vpop.permute.xlu0 %3984  ;;  %v10198_v45 = vld [vmem:[#allocation259_spill] sm:$0xff]  ;;  %v10200_v57 = vld [vmem:[#allocation169_spill] sm:$0xff] }
 0x407   : > { %4845 = vst [vmem:[%s8440_s28 + $0x480] sm:$0xff] %v4603_v62  ;;  %4846 = vst.msk [vmem:[%s8440_s28 + $0x488] sm:$0xff] %vm465_vm0, %v4604_v39  ;;  %v4365_v13 = vadd.f32 %v3985_v16, %v3397_v6  ;;  %v4366_v35 = vadd.f32 %v3985_v16, %v3398_v22  ;;  %v3387_v33 = vmul.f32 %v10198_v45, %v10197_v55  ;;  %v10201_v43 = vld [vmem:[#allocation280_spill] sm:$0xff] }
 0x408   : > { %v4585_v21 = vmax.f32 %v4343_v11, 0.0  ;;  %v4586_v25 = vmax.f32 %v4344_v23, 0.0  ;;  %v3388_v14 = vmul.f32 %v10198_v45, %v10199_v41  ;;  %v3409_v15 = vmul.f32 %v10201_v43, %v10200_v57  ;;  %v10217_v45 = vld [vmem:[#allocation156_spill] sm:$0xff] }
 0x409   : > { %v4607_v34 = vmax.f32 %v4365_v13, 0.0  ;;  %v4608_v5 = vmax.f32 %v4366_v35, 0.0  ;;  %v3940_v50 = vpop.permute.xlu1 %3939  ;;  %v3410_v6 = vmul.f32 %v10201_v43, %v10202_v17  ;;  %v10203_v13 = vld [vmem:[#allocation151_spill] sm:$0xff]  ;;  %v10204_v35 = vld [vmem:[#allocation261_spill] sm:$0xff] }
 0x40a   : > { %4827 = vst [vmem:[%s8440_s28 + $0x3f0] sm:$0xff] %v4585_v21  ;;  %4828 = vst.msk [vmem:[%s8440_s28 + $0x3f8] sm:$0xff] %vm465_vm0, %v4586_v25  ;;  %v4347_v18 = vadd.f32 %v3940_v50, %v3379_v40  ;;  %v4348_v44 = vadd.f32 %v3940_v50, %v3380_v27  ;;  %v3995_v48 = vpop.permute.xlu0 %3994  ;;  %v3391_v47 = vmul.f32 %v10204_v35, %v10203_v13  ;;  %v10206_v21 = vld [vmem:[#allocation173_spill] sm:$0xff]  ;;  %v10207_v25 = vld [vmem:[#allocation282_spill] sm:$0xff] }
 0x40b   : > { %4849 = vst [vmem:[%s8440_s28 + $0x4a0] sm:$0xff] %v4607_v34  ;;  %4850 = vst.msk [vmem:[%s8440_s28 + $0x4a8] sm:$0xff] %vm465_vm0, %v4608_v5  ;;  %v4369_v60 = vadd.f32 %v3995_v48, %v3401_v56  ;;  %v4370_v37 = vadd.f32 %v3995_v48, %v3402_v52  ;;  %v3392_v40 = vmul.f32 %v10204_v35, %v10205_v1  ;;  %v10220_v43 = vld [vmem:[#allocation177_spill] sm:$0xff]  ;;  %v10223_v35 = vld [vmem:[#allocation160_spill] sm:$0xff] }
 0x40c   : > { %v4589_v29 = vmax.f32 %v4347_v18, 0.0  ;;  %v4590_v61 = vmax.f32 %v4348_v44, 0.0  ;;  %v3413_v3 = vmul.f32 %v10207_v25, %v10206_v21  ;;  %v3414_v56 = vmul.f32 %v10207_v25, %v10208_v26  ;;  %v10226_v25 = vld [vmem:[#allocation182_spill] sm:$0xff] }
 0x40d   : > { %v4611_v54 = vmax.f32 %v4369_v60, 0.0  ;;  %v4612_v31 = vmax.f32 %v4370_v37, 0.0  ;;  %v3950_v53 = vpop.permute.xlu1 %3949  ;;  %v10209_v60 = vld [vmem:[#allocation155_spill] sm:$0xff] }
 0x40e   : > { %4831 = vst [vmem:[%s8440_s28 + $0x410] sm:$0xff] %v4589_v29  ;;  %4832 = vst.msk [vmem:[%s8440_s28 + $0x418] sm:$0xff] %vm465_vm0, %v4590_v61  ;;  %v4351_v20 = vadd.f32 %v3950_v53, %v3383_v32  ;;  %v4352_v63 = vadd.f32 %v3950_v53, %v3384_v19  ;;  %v4005_v42 = vpop.permute.xlu0 %4004  ;;  %v10210_v37 = vld [vmem:[#allocation263_spill] sm:$0xff]  ;;  %v10212_v29 = vld [vmem:[#allocation176_spill] sm:$0xff] }
 0x40f   : > { %4853 = vst [vmem:[%s8440_s28 + $0x4c0] sm:$0xff] %v4611_v54  ;;  %4854 = vst.msk [vmem:[%s8440_s28 + $0x4c8] sm:$0xff] %vm465_vm0, %v4612_v31  ;;  %v4373_v28 = vadd.f32 %v4005_v42, %v3405_v8  ;;  %v4374_v0 = vadd.f32 %v4005_v42, %v3406_v7  ;;  %v3395_v9 = vmul.f32 %v10210_v37, %v10209_v60  ;;  %v10213_v61 = vld [vmem:[#allocation284_spill] sm:$0xff] }
 0x410   : > { %v4593_v49 = vmax.f32 %v4351_v20, 0.0  ;;  %v4594_v10 = vmax.f32 %v4352_v63, 0.0  ;;  %v3396_v32 = vmul.f32 %v10210_v37, %v10211_v2  ;;  %v3417_v46 = vmul.f32 %v10213_v61, %v10212_v29  ;;  %v10229_v37 = vld [vmem:[#allocation164_spill] sm:$0xff] }
 0x411   : > { %v4615_v59 = vmax.f32 %v4373_v28, 0.0  ;;  %v4616_v22 = vmax.f32 %v4374_v0, 0.0  ;;  %v3960_v62 = vpop.permute.xlu1 %3959  ;;  %v3418_v8 = vmul.f32 %v10213_v61, %v10214_v12  ;;  %v10215_v28 = vld [vmem:[#allocation159_spill] sm:$0xff]  ;;  %v10216_v0 = vld [vmem:[#allocation265_spill] sm:$0xff] }
 0x412   : > { %4835 = vst [vmem:[%s8440_s28 + $0x430] sm:$0xff] %v4593_v49  ;;  %4836 = vst.msk [vmem:[%s8440_s28 + $0x438] sm:$0xff] %vm465_vm0, %v4594_v10  ;;  %v4355_v39 = vadd.f32 %v3960_v62, %v3387_v33  ;;  %v4356_v58 = vadd.f32 %v3960_v62, %v3388_v14  ;;  %v4015_v11 = vpop.permute.xlu0 %4014  ;;  %v3399_v55 = vmul.f32 %v10216_v0, %v10215_v28  ;;  %v10218_v49 = vld [vmem:[#allocation181_spill] sm:$0xff]  ;;  %v10219_v10 = vld [vmem:[#allocation286_spill] sm:$0xff] }
 0x413   : > { %4857 = vst [vmem:[%s8440_s28 + $0x4e0] sm:$0xff] %v4615_v59  ;;  %4858 = vst.msk [vmem:[%s8440_s28 + $0x4e8] sm:$0xff] %vm465_vm0, %v4616_v22  ;;  %v4377_v23 = vadd.f32 %v4015_v11, %v3409_v15  ;;  %v4378_v16 = vadd.f32 %v4015_v11, %v3410_v6  ;;  %v3400_v33 = vmul.f32 %v10216_v0, %v10217_v45  ;;  %v10232_v61 = vld [vmem:[#allocation187_spill] sm:$0xff]  ;;  %v10235_v0 = vld [vmem:[#allocation168_spill] sm:$0xff] }
 0x414   : > { %v4597_v4 = vmax.f32 %v4355_v39, 0.0  ;;  %v4598_v27 = vmax.f32 %v4356_v58, 0.0  ;;  %v3421_v57 = vmul.f32 %v10219_v10, %v10218_v49  ;;  %v3422_v15 = vmul.f32 %v10219_v10, %v10220_v43  ;;  %v10238_v10 = vld [vmem:[#allocation190_spill] sm:$0xff] }
 0x415   : > { %v4619_v30 = vmax.f32 %v4377_v23, 0.0  ;;  %v4620_v52 = vmax.f32 %v4378_v16, 0.0  ;;  %v3970_v34 = vpop.permute.xlu1 %3969  ;;  %v10221_v23 = vld [vmem:[#allocation163_spill] sm:$0xff] }
 0x416   : > { %4839 = vst [vmem:[%s8440_s28 + $0x450] sm:$0xff] %v4597_v4  ;;  %4840 = vst.msk [vmem:[%s8440_s28 + $0x458] sm:$0xff] %vm465_vm0, %v4598_v27  ;;  %v4359_v5 = vadd.f32 %v3970_v34, %v3391_v47  ;;  %v4360_v50 = vadd.f32 %v3970_v34, %v3392_v40  ;;  %v4025_v18 = vpop.permute.xlu0 %4024  ;;  %v10222_v16 = vld [vmem:[#allocation267_spill] sm:$0xff]  ;;  %v10224_v4 = vld [vmem:[#allocation186_spill] sm:$0xff] }
 0x417   : > { %4861 = vst [vmem:[%s8440_s28 + $0x500] sm:$0xff] %v4619_v30  ;;  %4862 = vst.msk [vmem:[%s8440_s28 + $0x508] sm:$0xff] %vm465_vm0, %v4620_v52  ;;  %v4381_v44 = vadd.f32 %v4025_v18, %v3413_v3  ;;  %v4382_v48 = vadd.f32 %v4025_v18, %v3414_v56  ;;  %v3403_v13 = vmul.f32 %v10222_v16, %v10221_v23  ;;  %v10225_v27 = vld [vmem:[#allocation288_spill] sm:$0xff] }
 0x418   : > { %v4601_v36 = vmax.f32 %v4359_v5, 0.0  ;;  %v4602_v19 = vmax.f32 %v4360_v50, 0.0  ;;  %v3404_v47 = vmul.f32 %v10222_v16, %v10223_v35  ;;  %v3425_v21 = vmul.f32 %v10225_v27, %v10224_v4  ;;  %v10241_v16 = vld [vmem:[#allocation172_spill] sm:$0xff] }
 0x419   : > { %v4623_v51 = vmax.f32 %v4381_v44, 0.0  ;;  %v4624_v7 = vmax.f32 %v4382_v48, 0.0  ;;  %v3980_v54 = vpop.permute.xlu1 %3979  ;;  %v3426_v3 = vmul.f32 %v10225_v27, %v10226_v25  ;;  %v10227_v44 = vld [vmem:[#allocation167_spill] sm:$0xff]  ;;  %v10228_v48 = vld [vmem:[#allocation269_spill] sm:$0xff] }
 0x41a   : > { %4843 = vst [vmem:[%s8440_s28 + $0x470] sm:$0xff] %v4601_v36  ;;  %4844 = vst.msk [vmem:[%s8440_s28 + $0x478] sm:$0xff] %vm465_vm0, %v4602_v19  ;;  %v4363_v31 = vadd.f32 %v3980_v54, %v3395_v9  ;;  %v4364_v53 = vadd.f32 %v3980_v54, %v3396_v32  ;;  %v4035_v20 = vpop.permute.xlu0 %4034  ;;  %v3407_v60 = vmul.f32 %v10228_v48, %v10227_v44  ;;  %v10230_v36 = vld [vmem:[#allocation189_spill] sm:$0xff]  ;;  %v10231_v19 = vld [vmem:[#allocation290_spill] sm:$0xff] }
 0x41b   : > { %4865 = vst [vmem:[%s8440_s28 + $0x520] sm:$0xff] %v4623_v51  ;;  %4866 = vst.msk [vmem:[%s8440_s28 + $0x528] sm:$0xff] %vm465_vm0, %v4624_v7  ;;  %v4385_v63 = vadd.f32 %v4035_v20, %v3417_v46  ;;  %v4386_v42 = vadd.f32 %v4035_v20, %v3418_v8  ;;  %v3408_v9 = vmul.f32 %v10228_v48, %v10229_v37  ;;  %v10244_v27 = vld [vmem:[#allocation23_spill] sm:$0xff] }
 0x41c   : > { %v4605_v41 = vmax.f32 %v4363_v31, 0.0  ;;  %v4606_v14 = vmax.f32 %v4364_v53, 0.0  ;;  %v3429_v29 = vmul.f32 %v10231_v19, %v10230_v36  ;;  %v3430_v46 = vmul.f32 %v10231_v19, %v10232_v61  ;;  %v10247_v48 = vld [vmem:[#allocation175_spill] sm:$0xff]  ;;  %v10250_v19 = vld [vmem:[#allocation197_spill] sm:$0xff] }
 0x41d   : > { %v4627_v17 = vmax.f32 %v4385_v63, 0.0  ;;  %v4628_v6 = vmax.f32 %v4386_v42, 0.0  ;;  %v3990_v59 = vpop.permute.xlu1 %3989  ;;  %v10233_v63 = vld [vmem:[#allocation171_spill] sm:$0xff] }
 0x41e   : > { %4847 = vst [vmem:[%s8440_s28 + $0x490] sm:$0xff] %v4605_v41  ;;  %4848 = vst.msk [vmem:[%s8440_s28 + $0x498] sm:$0xff] %vm465_vm0, %v4606_v14  ;;  %v4367_v22 = vadd.f32 %v3990_v59, %v3399_v55  ;;  %v4368_v62 = vadd.f32 %v3990_v59, %v3400_v33  ;;  %v4045_v39 = vpop.permute.xlu0 %4044  ;;  %v10234_v42 = vld [vmem:[#allocation271_spill] sm:$0xff]  ;;  %v10236_v41 = vld [vmem:[#allocation193_spill] sm:$0xff] }
 0x41f   : > { %4869 = vst [vmem:[%s8440_s28 + $0x540] sm:$0xff] %v4627_v17  ;;  %4870 = vst.msk [vmem:[%s8440_s28 + $0x548] sm:$0xff] %vm465_vm0, %v4628_v6  ;;  %v4389_v58 = vadd.f32 %v4045_v39, %v3421_v57  ;;  %v4390_v11 = vadd.f32 %v4045_v39, %v3422_v15  ;;  %v3411_v28 = vmul.f32 %v10234_v42, %v10233_v63  ;;  %v10237_v14 = vld [vmem:[#allocation292_spill] sm:$0xff] }
 0x420   : > { %v4609_v1 = vmax.f32 %v4367_v22, 0.0  ;;  %v4610_v40 = vmax.f32 %v4368_v62, 0.0  ;;  %v3412_v55 = vmul.f32 %v10234_v42, %v10235_v0  ;;  %v3433_v49 = vmul.f32 %v10237_v14, %v10236_v41  ;;  %v10253_v42 = vld [vmem:[#allocation179_spill] sm:$0xff] }
 0x421   : > { %v4631_v26 = vmax.f32 %v4389_v58, 0.0  ;;  %v4632_v56 = vmax.f32 %v4390_v11, 0.0  ;;  %v4000_v30 = vpop.permute.xlu1 %3999  ;;  %v3434_v57 = vmul.f32 %v10237_v14, %v10238_v10  ;;  %v10239_v58 = vld [vmem:[#allocation174_spill] sm:$0xff]  ;;  %v10240_v11 = vld [vmem:[#allocation273_spill] sm:$0xff] }
 0x422   : > { %4851 = vst [vmem:[%s8440_s28 + $0x4b0] sm:$0xff] %v4609_v1  ;;  %4852 = vst.msk [vmem:[%s8440_s28 + $0x4b8] sm:$0xff] %vm465_vm0, %v4610_v40  ;;  %v4371_v52 = vadd.f32 %v4000_v30, %v3403_v13  ;;  %v4372_v34 = vadd.f32 %v4000_v30, %v3404_v47  ;;  %v4055_v5 = vpop.permute.xlu0 %4054  ;;  %v3415_v23 = vmul.f32 %v10240_v11, %v10239_v58  ;;  %v10242_v1 = vld [vmem:[#allocation196_spill] sm:$0xff]  ;;  %v10243_v40 = vld [vmem:[#allocation294_spill] sm:$0xff] }
 0x423   : > { %4873 = vst [vmem:[%s8440_s28 + $0x560] sm:$0xff] %v4631_v26  ;;  %4874 = vst.msk [vmem:[%s8440_s28 + $0x568] sm:$0xff] %vm465_vm0, %v4632_v56  ;;  %v4393_v50 = vadd.f32 %v4055_v5, %v3425_v21  ;;  %v4394_v18 = vadd.f32 %v4055_v5, %v3426_v3  ;;  %v3416_v13 = vmul.f32 %v10240_v11, %v10241_v16  ;;  %v10256_v14 = vld [vmem:[#allocation201_spill] sm:$0xff]  ;;  %v10259_v11 = vld [vmem:[#allocation184_spill] sm:$0xff] }
 0x424   : > { %v4613_v2 = vmax.f32 %v4371_v52, 0.0  ;;  %v4614_v32 = vmax.f32 %v4372_v34, 0.0  ;;  %v3437_v4 = vmul.f32 %v10243_v40, %v10242_v1  ;;  %v3438_v21 = vmul.f32 %v10243_v40, %v10244_v27  ;;  %v10262_v40 = vld [vmem:[#allocation205_spill] sm:$0xff] }
 0x425   : > { %v4635_v12 = vmax.f32 %v4393_v50, 0.0  ;;  %v4636_v8 = vmax.f32 %v4394_v18, 0.0  ;;  %v4010_v51 = vpop.permute.xlu1 %4009  ;;  %v10245_v50 = vld [vmem:[#allocation178_spill] sm:$0xff]  ;;  %v10246_v18 = vld [vmem:[#allocation275_spill] sm:$0xff] }
 0x426   : > { %4855 = vst [vmem:[%s8440_s28 + $0x4d0] sm:$0xff] %v4613_v2  ;;  %4856 = vst.msk [vmem:[%s8440_s28 + $0x4d8] sm:$0xff] %vm465_vm0, %v4614_v32  ;;  %v4375_v7 = vadd.f32 %v4010_v51, %v3407_v60  ;;  %v4376_v54 = vadd.f32 %v4010_v51, %v3408_v9  ;;  %v4065_v31 = vpop.permute.xlu0 %4064  ;;  %v3419_v44 = vmul.f32 %v10246_v18, %v10245_v50  ;;  %v10248_v2 = vld [vmem:[#allocation200_spill] sm:$0xff] }
 0x427   : > { %4877 = vst [vmem:[%s8440_s28 + $0x580] sm:$0xff] %v4635_v12  ;;  %4878 = vst.msk [vmem:[%s8440_s28 + $0x588] sm:$0xff] %vm465_vm0, %v4636_v8  ;;  %v4397_v53 = vadd.f32 %v4065_v31, %v3429_v29  ;;  %v4398_v20 = vadd.f32 %v4065_v31, %v3430_v46  ;;  %v3420_v60 = vmul.f32 %v10246_v18, %v10247_v48  ;;  %v10249_v32 = vld [vmem:[#allocation296_spill] sm:$0xff] }
 0x428   : > { %v4617_v45 = vmax.f32 %v4375_v7, 0.0  ;;  %v4618_v33 = vmax.f32 %v4376_v54, 0.0  ;;  %v3441_v36 = vmul.f32 %v10249_v32, %v10248_v2  ;;  %v3442_v29 = vmul.f32 %v10249_v32, %v10250_v19  ;;  %v10265_v18 = vld [vmem:[#allocation188_spill] sm:$0xff]  ;;  %v10268_v32 = vld [vmem:[#allocation210_spill] sm:$0xff] }
 0x429   : > { %v4639_v43 = vmax.f32 %v4397_v53, 0.0  ;;  %v4640_v15 = vmax.f32 %v4398_v20, 0.0  ;;  %v4020_v17 = vpop.permute.xlu1 %4019  ;;  %v10251_v53 = vld [vmem:[#allocation183_spill] sm:$0xff]  ;;  %v10252_v20 = vld [vmem:[#allocation277_spill] sm:$0xff] }
 0x42a   : > { %4859 = vst [vmem:[%s8440_s28 + $0x4f0] sm:$0xff] %v4617_v45  ;;  %4860 = vst.msk [vmem:[%s8440_s28 + $0x4f8] sm:$0xff] %vm465_vm0, %v4618_v33  ;;  %v4379_v6 = vadd.f32 %v4020_v17, %v3411_v28  ;;  %v4380_v59 = vadd.f32 %v4020_v17, %v3412_v55  ;;  %v4075_v22 = vpop.permute.xlu0 %4074  ;;  %v3423_v63 = vmul.f32 %v10252_v20, %v10251_v53  ;;  %v10254_v45 = vld [vmem:[#allocation204_spill] sm:$0xff]  ;;  %v10255_v33 = vld [vmem:[#allocation298_spill] sm:$0xff] }
 0x42b   : > { %4881 = vst [vmem:[%s8440_s28 + $0x5a0] sm:$0xff] %v4639_v43  ;;  %4882 = vst.msk [vmem:[%s8440_s28 + $0x5a8] sm:$0xff] %vm465_vm0, %v4640_v15  ;;  %v4401_v62 = vadd.f32 %v4075_v22, %v3433_v49  ;;  %v4402_v39 = vadd.f32 %v4075_v22, %v3434_v57  ;;  %v3424_v28 = vmul.f32 %v10252_v20, %v10253_v42  ;;  %v10271_v20 = vld [vmem:[#allocation192_spill] sm:$0xff] }
 0x42c   : > { %v4621_v35 = vmax.f32 %v4379_v6, 0.0  ;;  %v4622_v47 = vmax.f32 %v4380_v59, 0.0  ;;  %v3445_v41 = vmul.f32 %v10255_v33, %v10254_v45  ;;  %v3446_v49 = vmul.f32 %v10255_v33, %v10256_v14  ;;  %v10274_v33 = vld [vmem:[#allocation128_spill] sm:$0xff] }
 0x42d   : > { %v4643_v25 = vmax.f32 %v4401_v62, 0.0  ;;  %v4644_v3 = vmax.f32 %v4402_v39, 0.0  ;;  %v4030_v26 = vpop.permute.xlu1 %4029  ;;  %v10257_v62 = vld [vmem:[#allocation105_spill] sm:$0xff]  ;;  %v10258_v39 = vld [vmem:[#allocation279_spill] sm:$0xff] }
 0x42e   : > { %4863 = vst [vmem:[%s8440_s28 + $0x510] sm:$0xff] %v4621_v35  ;;  %4864 = vst.msk [vmem:[%s8440_s28 + $0x518] sm:$0xff] %vm465_vm0, %v4622_v47  ;;  %v4383_v56 = vadd.f32 %v4030_v26, %v3415_v23  ;;  %v4384_v30 = vadd.f32 %v4030_v26, %v3416_v13  ;;  %v4085_v52 = vpop.permute.xlu0 %4084  ;;  %v3427_v58 = vmul.f32 %v10258_v39, %v10257_v62  ;;  %v10260_v35 = vld [vmem:[#allocation209_spill] sm:$0xff]  ;;  %v10261_v47 = vld [vmem:[#allocation300_spill] sm:$0xff] }
 0x42f   : > { %4885 = vst [vmem:[%s8440_s28 + $0x5c0] sm:$0xff] %v4643_v25  ;;  %4886 = vst.msk [vmem:[%s8440_s28 + $0x5c8] sm:$0xff] %vm465_vm0, %v4644_v3  ;;  %v4405_v34 = vadd.f32 %v4085_v52, %v3437_v4  ;;  %v4406_v5 = vadd.f32 %v4085_v52, %v3438_v21  ;;  %v3428_v23 = vmul.f32 %v10258_v39, %v10259_v11  ;;  %v10277_v39 = vld [vmem:[#allocation195_spill] sm:$0xff] }
 0x430   : > { %v4625_v37 = vmax.f32 %v4383_v56, 0.0  ;;  %v4626_v9 = vmax.f32 %v4384_v30, 0.0  ;;  %v3449_v1 = vmul.f32 %v10261_v47, %v10260_v35  ;;  %v3450_v4 = vmul.f32 %v10261_v47, %v10262_v40  ;;  %v10280_v47 = vld [vmem:[#allocation217_spill] sm:$0xff] }
 0x431   : > { %v4647_v61 = vmax.f32 %v4405_v34, 0.0  ;;  %v4648_v46 = vmax.f32 %v4406_v5, 0.0  ;;  %v4040_v12 = vpop.permute.xlu1 %4039  ;;  %v10263_v34 = vld [vmem:[#allocation191_spill] sm:$0xff]  ;;  %v10264_v5 = vld [vmem:[#allocation281_spill] sm:$0xff] }
 0x432   : > { %4867 = vst [vmem:[%s8440_s28 + $0x530] sm:$0xff] %v4625_v37  ;;  %4868 = vst.msk [vmem:[%s8440_s28 + $0x538] sm:$0xff] %vm465_vm0, %v4626_v9  ;;  %v4387_v8 = vadd.f32 %v4040_v12, %v3419_v44  ;;  %v4388_v51 = vadd.f32 %v4040_v12, %v3420_v60  ;;  %v4095_v7 = vpop.permute.xlu0 %4094  ;;  %v3431_v50 = vmul.f32 %v10264_v5, %v10263_v34  ;;  %v10266_v37 = vld [vmem:[#allocation213_spill] sm:$0xff]  ;;  %v10267_v9 = vld [vmem:[#allocation302_spill] sm:$0xff] }
 0x433   : > { %4889 = vst [vmem:[%s8440_s28 + $0x5e0] sm:$0xff] %v4647_v61  ;;  %4890 = vst.msk [vmem:[%s8440_s28 + $0x5e8] sm:$0xff] %vm465_vm0, %v4648_v46  ;;  %v4409_v54 = vadd.f32 %v4095_v7, %v3441_v36  ;;  %v4410_v31 = vadd.f32 %v4095_v7, %v3442_v29  ;;  %v3432_v44 = vmul.f32 %v10264_v5, %v10265_v18  ;;  %v10283_v5 = vld [vmem:[#allocation199_spill] sm:$0xff] }
 0x434   : > { %v4629_v0 = vmax.f32 %v4387_v8, 0.0  ;;  %v4630_v55 = vmax.f32 %v4388_v51, 0.0  ;;  %v3453_v2 = vmul.f32 %v10267_v9, %v10266_v37  ;;  %v3454_v36 = vmul.f32 %v10267_v9, %v10268_v32  ;;  %v10286_v9 = vld [vmem:[#allocation221_spill] sm:$0xff] }
 0x435   : > { %v4651_v10 = vmax.f32 %v4409_v54, 0.0  ;;  %v4652_v57 = vmax.f32 %v4410_v31, 0.0  ;;  %v4050_v43 = vpop.permute.xlu1 %4049  ;;  %v10269_v54 = vld [vmem:[#allocation194_spill] sm:$0xff]  ;;  %v10270_v31 = vld [vmem:[#allocation283_spill] sm:$0xff] }
 0x436   : > { %4871 = vst [vmem:[%s8440_s28 + $0x550] sm:$0xff] %v4629_v0  ;;  %4872 = vst.msk [vmem:[%s8440_s28 + $0x558] sm:$0xff] %vm465_vm0, %v4630_v55  ;;  %v4391_v15 = vadd.f32 %v4050_v43, %v3423_v63  ;;  %v4392_v17 = vadd.f32 %v4050_v43, %v3424_v28  ;;  %v4105_v6 = vpop.permute.xlu0 %4104  ;;  %v3435_v53 = vmul.f32 %v10270_v31, %v10269_v54  ;;  %v10272_v0 = vld [vmem:[#allocation216_spill] sm:$0xff] }
 0x437   : > { %4893 = vst [vmem:[%s8440_s28 + $0x600] sm:$0xff] %v4651_v10  ;;  %4894 = vst.msk [vmem:[%s8440_s28 + $0x608] sm:$0xff] %vm465_vm0, %v4652_v57  ;;  %v4413_v59 = vadd.f32 %v4105_v6, %v3445_v41  ;;  %v4414_v22 = vadd.f32 %v4105_v6, %v3446_v49  ;;  %v3436_v63 = vmul.f32 %v10270_v31, %v10271_v20  ;;  %v10273_v55 = vld [vmem:[#allocation304_spill] sm:$0xff]  ;;  %v10289_v31 = vld [vmem:[#allocation203_spill] sm:$0xff] }
 0x438   : > { %v4633_v16 = vmax.f32 %v4391_v15, 0.0  ;;  %v4634_v13 = vmax.f32 %v4392_v17, 0.0  ;;  %v3457_v45 = vmul.f32 %v10273_v55, %v10272_v0  ;;  %v3458_v41 = vmul.f32 %v10273_v55, %v10274_v33  ;;  %v10292_v55 = vld [vmem:[#allocation225_spill] sm:$0xff] }
 0x439   : > { %v4655_v27 = vmax.f32 %v4413_v59, 0.0  ;;  %v4656_v21 = vmax.f32 %v4414_v22, 0.0  ;;  %v4060_v25 = vpop.permute.xlu1 %4059  ;;  %v10275_v59 = vld [vmem:[#allocation198_spill] sm:$0xff]  ;;  %v10276_v22 = vld [vmem:[#allocation285_spill] sm:$0xff] }
 0x43a   : > { %4875 = vst [vmem:[%s8440_s28 + $0x570] sm:$0xff] %v4633_v16  ;;  %4876 = vst.msk [vmem:[%s8440_s28 + $0x578] sm:$0xff] %vm465_vm0, %v4634_v13  ;;  %v4395_v3 = vadd.f32 %v4060_v25, %v3427_v58  ;;  %v4396_v26 = vadd.f32 %v4060_v25, %v3428_v23  ;;  %v4115_v56 = vpop.permute.xlu0 %4114  ;;  %v3439_v62 = vmul.f32 %v10276_v22, %v10275_v59  ;;  %v10278_v16 = vld [vmem:[#allocation220_spill] sm:$0xff]  ;;  %v10279_v13 = vld [vmem:[#allocation306_spill] sm:$0xff] }
 0x43b   : > { %4897 = vst [vmem:[%s8440_s28 + $0x620] sm:$0xff] %v4655_v27  ;;  %4898 = vst.msk [vmem:[%s8440_s28 + $0x628] sm:$0xff] %vm465_vm0, %v4656_v21  ;;  %v4417_v30 = vadd.f32 %v4115_v56, %v3449_v1  ;;  %v4418_v52 = vadd.f32 %v4115_v56, %v3450_v4  ;;  %v3440_v58 = vmul.f32 %v10276_v22, %v10277_v39  ;;  %v10295_v22 = vld [vmem:[#allocation207_spill] sm:$0xff] }
 0x43c   : > { %v4637_v48 = vmax.f32 %v4395_v3, 0.0  ;;  %v4638_v60 = vmax.f32 %v4396_v26, 0.0  ;;  %v3461_v35 = vmul.f32 %v10279_v13, %v10278_v16  ;;  %v3462_v1 = vmul.f32 %v10279_v13, %v10280_v47  ;;  %v10298_v13 = vld [vmem:[#allocation229_spill] sm:$0xff] }
 0x43d   : > { %v4659_v19 = vmax.f32 %v4417_v30, 0.0  ;;  %v4660_v29 = vmax.f32 %v4418_v52, 0.0  ;;  %v4070_v61 = vpop.permute.xlu1 %4069  ;;  %v10281_v30 = vld [vmem:[#allocation202_spill] sm:$0xff]  ;;  %v10282_v52 = vld [vmem:[#allocation287_spill] sm:$0xff] }
 0x43e   : > { %4879 = vst [vmem:[%s8440_s28 + $0x590] sm:$0xff] %v4637_v48  ;;  %4880 = vst.msk [vmem:[%s8440_s28 + $0x598] sm:$0xff] %vm465_vm0, %v4638_v60  ;;  %v4399_v46 = vadd.f32 %v4070_v61, %v3431_v50  ;;  %v4400_v12 = vadd.f32 %v4070_v61, %v3432_v44  ;;  %v4125_v8 = vpop.permute.xlu0 %4124  ;;  %v3443_v34 = vmul.f32 %v10282_v52, %v10281_v30  ;;  %v10284_v48 = vld [vmem:[#allocation224_spill] sm:$0xff] }
 0x43f   : > { %4901 = vst [vmem:[%s8440_s28 + $0x640] sm:$0xff] %v4659_v19  ;;  %4902 = vst.msk [vmem:[%s8440_s28 + $0x648] sm:$0xff] %vm465_vm0, %v4660_v29  ;;  %v4421_v51 = vadd.f32 %v4125_v8, %v3453_v2  ;;  %v4422_v7 = vadd.f32 %v4125_v8, %v3454_v36  ;;  %v3444_v50 = vmul.f32 %v10282_v52, %v10283_v5  ;;  %v10285_v60 = vld [vmem:[#allocation308_spill] sm:$0xff] }
 0x440   : > { %v4641_v42 = vmax.f32 %v4399_v46, 0.0  ;;  %v4642_v28 = vmax.f32 %v4400_v12, 0.0  ;;  %v3465_v37 = vmul.f32 %v10285_v60, %v10284_v48  ;;  %v3466_v2 = vmul.f32 %v10285_v60, %v10286_v9  ;;  %v10301_v52 = vld [vmem:[#allocation212_spill] sm:$0xff]  ;;  %v10303_v48 = vld [vmem:[#allocation233_spill] sm:$0xff] }
 0x441   : > { %v4663_v14 = vmax.f32 %v4421_v51, 0.0  ;;  %v4664_v49 = vmax.f32 %v4422_v7, 0.0  ;;  %v4080_v10 = vpop.permute.xlu1 %4079  ;;  %v10287_v51 = vld [vmem:[#allocation206_spill] sm:$0xff]  ;;  %v10288_v7 = vld [vmem:[#allocation289_spill] sm:$0xff]  ;;  %v3478_v60 = vmul.f32 %v8458_v24, %v10303_v48 }
 0x442   : > { %4883 = vst [vmem:[%s8440_s28 + $0x5b0] sm:$0xff] %v4641_v42  ;;  %4884 = vst.msk [vmem:[%s8440_s28 + $0x5b8] sm:$0xff] %vm465_vm0, %v4642_v28  ;;  %v4403_v57 = vadd.f32 %v4080_v10, %v3435_v53  ;;  %v4404_v43 = vadd.f32 %v4080_v10, %v3436_v63  ;;  %v4135_v15 = vpop.permute.xlu0 %4134  ;;  %v3447_v54 = vmul.f32 %v10288_v7, %v10287_v51  ;;  %v10290_v42 = vld [vmem:[#allocation228_spill] sm:$0xff]  ;;  %v10291_v28 = vld [vmem:[#allocation5_spill] sm:$0xff] }
 0x443   : > { %4905 = vst [vmem:[%s8440_s28 + $0x660] sm:$0xff] %v4663_v14  ;;  %4906 = vst.msk [vmem:[%s8440_s28 + $0x668] sm:$0xff] %vm465_vm0, %v4664_v49  ;;  %v4425_v17 = vadd.f32 %v4135_v15, %v3457_v45  ;;  %v4426_v6 = vadd.f32 %v4135_v15, %v3458_v41  ;;  %v3448_v53 = vmul.f32 %v10288_v7, %v10289_v31  ;;  %v10307_v31 = vld [vmem:[#allocation239_spill] sm:$0xff] }
 0x444   : > { %v4645_v11 = vmax.f32 %v4403_v57, 0.0  ;;  %v4646_v23 = vmax.f32 %v4404_v43, 0.0  ;;  %v3469_v0 = vmul.f32 %v10291_v28, %v10290_v42  ;;  %v3470_v45 = vmul.f32 %v10291_v28, %v10292_v55 }
 0x445   : > { %v4667_v40 = vmax.f32 %v4425_v17, 0.0  ;;  %v4668_v4 = vmax.f32 %v4426_v6, 0.0  ;;  %v4090_v27 = vpop.permute.xlu1 %4089  ;;  %v10293_v17 = vld [vmem:[#allocation211_spill] sm:$0xff] }
 0x446   : > { %4887 = vst [vmem:[%s8440_s28 + $0x5d0] sm:$0xff] %v4645_v11  ;;  %4888 = vst.msk [vmem:[%s8440_s28 + $0x5d8] sm:$0xff] %vm465_vm0, %v4646_v23  ;;  %v4407_v21 = vadd.f32 %v4090_v27, %v3439_v62  ;;  %v4408_v25 = vadd.f32 %v4090_v27, %v3440_v58  ;;  %v4145_v3 = vpop.permute.xlu0 %4144  ;;  %v10294_v6 = vld [vmem:[#allocation291_spill] sm:$0xff]  ;;  %v10296_v11 = vld [vmem:[#allocation232_spill] sm:$0xff] }
 0x447   : > { %4909 = vst [vmem:[%s8440_s28 + $0x680] sm:$0xff] %v4667_v40  ;;  %4910 = vst.msk [vmem:[%s8440_s28 + $0x688] sm:$0xff] %vm465_vm0, %v4668_v4  ;;  %v4429_v26 = vadd.f32 %v4145_v3, %v3461_v35  ;;  %v4430_v56 = vadd.f32 %v4145_v3, %v3462_v1  ;;  %v3451_v59 = vmul.f32 %v10294_v6, %v10293_v17  ;;  %v10297_v23 = vld [vmem:[#allocation2_spill] sm:$0xff] }
 0x448   : > { %v4649_v18 = vmax.f32 %v4407_v21, 0.0  ;;  %v4650_v44 = vmax.f32 %v4408_v25, 0.0  ;;  %v3452_v62 = vmul.f32 %v10294_v6, %v10295_v22  ;;  %v3473_v16 = vmul.f32 %v10297_v23, %v10296_v11  ;;  %v10312_v6 = vld [vmem:[#allocation243_spill] sm:$0xff] }
 0x449   : > { %v4671_v32 = vmax.f32 %v4429_v26, 0.0  ;;  %v4672_v36 = vmax.f32 %v4430_v56, 0.0  ;;  %v4100_v19 = vpop.permute.xlu1 %4099  ;;  %v3474_v35 = vmul.f32 %v10297_v23, %v10298_v13  ;;  %v10299_v26 = vld [vmem:[#allocation214_spill] sm:$0xff]  ;;  %v10300_v56 = vld [vmem:[#allocation293_spill] sm:$0xff] }
 0x44a   : > { %4891 = vst [vmem:[%s8440_s28 + $0x5f0] sm:$0xff] %v4649_v18  ;;  %4892 = vst.msk [vmem:[%s8440_s28 + $0x5f8] sm:$0xff] %vm465_vm0, %v4650_v44  ;;  %v4411_v29 = vadd.f32 %v4100_v19, %v3443_v34  ;;  %v4412_v61 = vadd.f32 %v4100_v19, %v3444_v50  ;;  %v4155_v46 = vpop.permute.xlu0 %4154  ;;  %v3455_v30 = vmul.f32 %v10300_v56, %v10299_v26  ;;  %v10302_v18 = vld [vmem:[#allocation236_spill] sm:$0xff] }
 0x44b   : > { %4913 = vst [vmem:[%s8440_s28 + $0x6a0] sm:$0xff] %v4671_v32  ;;  %4914 = vst.msk [vmem:[%s8440_s28 + $0x6a8] sm:$0xff] %vm465_vm0, %v4672_v36  ;;  %v4433_v12 = vadd.f32 %v4155_v46, %v3465_v37  ;;  %v4434_v8 = vadd.f32 %v4155_v46, %v3466_v2  ;;  %v3456_v34 = vmul.f32 %v10300_v56, %v10301_v52  ;;  %v10304_v46 = vld [vmem:[#allocation218_spill] sm:$0xff] }
 0x44c   : > { %v4653_v20 = vmax.f32 %v4411_v29, 0.0  ;;  %v4654_v63 = vmax.f32 %v4412_v61, 0.0  ;;  %v3477_v44 = vmul.f32 %v8458_v24, %v10302_v18  ;;  %v10320_v18 = vld [vmem:[#allocation244_spill] sm:$0xff] }
 0x44d   : > { %v4675_v33 = vmax.f32 %v4433_v12, 0.0  ;;  %v4676_v41 = vmax.f32 %v4434_v8, 0.0  ;;  %v4110_v14 = vpop.permute.xlu1 %4109  ;;  %v10305_v12 = vld [vmem:[#allocation295_spill] sm:$0xff] }
 0x44e   : > { %4895 = vst [vmem:[%s8440_s28 + $0x610] sm:$0xff] %v4653_v20  ;;  %4896 = vst.msk [vmem:[%s8440_s28 + $0x618] sm:$0xff] %vm465_vm0, %v4654_v63  ;;  %v4415_v49 = vadd.f32 %v4110_v14, %v3447_v54  ;;  %v4416_v10 = vadd.f32 %v4110_v14, %v3448_v53  ;;  %v4165_v57 = vpop.permute.xlu0 %4164  ;;  %v3459_v24 = vmul.f32 %v10305_v12, %v10304_v46  ;;  %v10306_v8 = vld [vmem:[#allocation215_spill] sm:$0xff]  ;;  %v10308_v20 = vld [vmem:[#allocation237_spill] sm:$0xff] }
 0x44f   : > { %4917 = vst [vmem:[%s8440_s28 + $0x6c0] sm:$0xff] %v4675_v33  ;;  %4918 = vst.msk [vmem:[%s8440_s28 + $0x6c8] sm:$0xff] %vm465_vm0, %v4676_v41  ;;  %v4437_v43 = vadd.f32 %v4165_v57, %v3469_v0  ;;  %v4438_v15 = vadd.f32 %v4165_v57, %v3470_v45  ;;  %v3460_v51 = vmul.f32 %v10305_v12, %v10306_v8  ;;  %v10311_v57 = vld [vmem:[#allocation219_spill] sm:$0xff] }
 0x450   : > { %v4657_v39 = vmax.f32 %v4415_v49, 0.0  ;;  %v4658_v58 = vmax.f32 %v4416_v10, 0.0  ;;  %v3481_v53 = vmul.f32 %v8469_v38, %v10307_v31  ;;  %v3482_v63 = vmul.f32 %v8469_v38, %v10308_v20  ;;  %v10309_v49 = vld [vmem:[#allocation222_spill] sm:$0xff]  ;;  %v10310_v10 = vld [vmem:[#allocation297_spill] sm:$0xff] }
 0x451   : > { %v4679_v47 = vmax.f32 %v4437_v43, 0.0  ;;  %v4680_v1 = vmax.f32 %v4438_v15, 0.0  ;;  %v4120_v40 = vpop.permute.xlu1 %4119  ;;  %v3463_v38 = vmul.f32 %v10310_v10, %v10309_v49  ;;  %v3464_v43 = vmul.f32 %v10310_v10, %v10311_v57  ;;  %v10324_v31 = vld [vmem:[#allocation234_spill] sm:$0xff]  ;;  %v10329_v10 = vld [vmem:[#allocation235_spill] sm:$0xff] }
 0x452   : > { %4899 = vst [vmem:[%s8440_s28 + $0x630] sm:$0xff] %v4657_v39  ;;  %4900 = vst.msk [vmem:[%s8440_s28 + $0x638] sm:$0xff] %vm465_vm0, %v4658_v58  ;;  %v4419_v4 = vadd.f32 %v4120_v40, %v3451_v59  ;;  %v4420_v27 = vadd.f32 %v4120_v40, %v3452_v62  ;;  %v4175_v21 = vpop.permute.xlu0 %4174  ;;  %v10313_v59 = vld [vmem:[#allocation8_spill] sm:$0xff]  ;;  %v10315_v40 = vld [vmem:[#allocation226_spill] sm:$0xff] }
 0x453   : > { %4921 = vst [vmem:[%s8440_s28 + $0x6e0] sm:$0xff] %v4679_v47  ;;  %4922 = vst.msk [vmem:[%s8440_s28 + $0x6e8] sm:$0xff] %vm465_vm0, %v4680_v1  ;;  %v4441_v25 = vadd.f32 %v4175_v21, %v3473_v16  ;;  %v4442_v3 = vadd.f32 %v4175_v21, %v3474_v35  ;;  %v3485_v22 = vmul.f32 %v10313_v59, %v10312_v6  ;;  %v10314_v62 = vld [vmem:[#allocation240_spill] sm:$0xff]  ;;  %v10317_v21 = vld [vmem:[#allocation223_spill] sm:$0xff] }
 0x454   : > { %v4661_v5 = vmax.f32 %v4419_v4, 0.0  ;;  %v4662_v50 = vmax.f32 %v4420_v27, 0.0  ;;  %v3486_v39 = vmul.f32 %v10313_v59, %v10314_v62  ;;  %v10316_v4 = vld [vmem:[#allocation299_spill] sm:$0xff]  ;;  %v10330_v59 = vld [vmem:[#allocation242_spill] sm:$0xff] }
 0x455   : > { %v4683_v37 = vmax.f32 %v4441_v25, 0.0  ;;  %v4684_v9 = vmax.f32 %v4442_v3, 0.0  ;;  %v4130_v2 = vpop.permute.xlu1 %4129  ;;  %v3467_v27 = vmul.f32 %v10316_v4, %v10315_v40  ;;  %v3468_v25 = vmul.f32 %v10316_v4, %v10317_v21  ;;  %v10333_v40 = vld [vmem:[#allocation247_spill] sm:$0xff]  ;;  %v10334_v4 = vld [vmem:[#allocation309_spill] sm:$0xff] }
 0x456   : > { %4903 = vst [vmem:[%s8440_s28 + $0x650] sm:$0xff] %v4661_v5  ;;  %4904 = vst.msk [vmem:[%s8440_s28 + $0x658] sm:$0xff] %vm465_vm0, %v4662_v50  ;;  %v4423_v32 = vadd.f32 %v4130_v2, %v3455_v30  ;;  %v4424_v36 = vadd.f32 %v4130_v2, %v3456_v34  ;;  %v4185_v19 = vpop.permute.xlu0 %4184  ;;  %v10318_v34 = vld [vmem:[#allocation246_spill] sm:$0xff]  ;;  %v10319_v5 = vld [vmem:[#allocation3_spill] sm:$0xff] }
 0x457   : > { %4925 = vst [vmem:[%s8440_s28 + $0x700] sm:$0xff] %v4683_v37  ;;  %4926 = vst.msk [vmem:[%s8440_s28 + $0x708] sm:$0xff] %vm465_vm0, %v4684_v9  ;;  %v4445_v29 = vadd.f32 %v4185_v19, %v3477_v44  ;;  %v4446_v61 = vadd.f32 %v4185_v19, %v3478_v60  ;;  %v3489_v50 = vmul.f32 %v10319_v5, %v10318_v34  ;;  %v10335_v21 = vld [vmem:[#allocation245_spill] sm:$0xff] }
 0x458   : > { %v4665_v7 = vmax.f32 %v4423_v32, 0.0  ;;  %v4666_v54 = vmax.f32 %v4424_v36, 0.0  ;;  %v3490_v44 = vmul.f32 %v10319_v5, %v10320_v18  ;;  %v10321_v32 = vld [vmem:[#allocation230_spill] sm:$0xff]  ;;  %v10322_v36 = vld [vmem:[#allocation301_spill] sm:$0xff] }
 0x459   : > { %v4687_v42 = vmax.f32 %v4445_v29, 0.0  ;;  %v4688_v28 = vmax.f32 %v4446_v61, 0.0  ;;  %v4140_v0 = vpop.permute.xlu1 %4139  ;;  %v3471_v19 = vmul.f32 %v10322_v36, %v10321_v32  ;;  %v10323_v29 = vld [vmem:[#allocation227_spill] sm:$0xff] }
 0x45a   : > { %4907 = vst [vmem:[%s8440_s28 + $0x670] sm:$0xff] %v4665_v7  ;;  %4908 = vst.msk [vmem:[%s8440_s28 + $0x678] sm:$0xff] %vm465_vm0, %v4666_v54  ;;  %v4427_v55 = vadd.f32 %v4140_v0, %v3459_v24  ;;  %v4428_v45 = vadd.f32 %v4140_v0, %v3460_v51  ;;  %v4195_v33 = vpop.permute.xlu0 %4194  ;;  %v3472_v61 = vmul.f32 %v10322_v36, %v10323_v29 }
 0x45b   : > { %4929 = vst [vmem:[%s8440_s28 + $0x720] sm:$0xff] %v4687_v42  ;;  %4930 = vst.msk [vmem:[%s8440_s28 + $0x728] sm:$0xff] %vm465_vm0, %v4688_v28  ;;  %v4449_v41 = vadd.f32 %v4195_v33, %v3481_v53  ;;  %v4450_v14 = vadd.f32 %v4195_v33, %v3482_v63  ;;  %v10325_v53 = vld [vmem:[#allocation303_spill] sm:$0xff] }
 0x45c   : > { %v4669_v15 = vmax.f32 %v4427_v55, 0.0  ;;  %v4670_v17 = vmax.f32 %v4428_v45, 0.0  ;;  %v3475_v20 = vmul.f32 %v10325_v53, %v10324_v31  ;;  %v10326_v63 = vld [vmem:[#allocation231_spill] sm:$0xff] }
 0x45d   : > { %v4691_v58 = vmax.f32 %v4449_v41, 0.0  ;;  %v4692_v11 = vmax.f32 %v4450_v14, 0.0  ;;  %v4150_v23 = vpop.permute.xlu1 %4149  ;;  %v3476_v42 = vmul.f32 %v10325_v53, %v10326_v63  ;;  %v10327_v41 = vld [vmem:[#allocation238_spill] sm:$0xff]  ;;  %v10328_v14 = vld [vmem:[#allocation305_spill] sm:$0xff] }
 0x45e   : > { %4911 = vst [vmem:[%s8440_s28 + $0x690] sm:$0xff] %v4669_v15  ;;  %4912 = vst.msk [vmem:[%s8440_s28 + $0x698] sm:$0xff] %vm465_vm0, %v4670_v17  ;;  %v4431_v16 = vadd.f32 %v4150_v23, %v3463_v38  ;;  %v4432_v13 = vadd.f32 %v4150_v23, %v3464_v43  ;;  %v4205_v35 = vpop.permute.xlu0 %4204  ;;  %v3479_v49 = vmul.f32 %v10328_v14, %v10327_v41 }
 0x45f   : > { %4933 = vst [vmem:[%s8440_s28 + $0x740] sm:$0xff] %v4691_v58  ;;  %4934 = vst.msk [vmem:[%s8440_s28 + $0x748] sm:$0xff] %vm465_vm0, %v4692_v11  ;;  %v4453_v47 = vadd.f32 %v4205_v35, %v3485_v22  ;;  %v4454_v1 = vadd.f32 %v4205_v35, %v3486_v39  ;;  %v3480_v38 = vmul.f32 %v10328_v14, %v10329_v10  ;;  %v10331_v22 = vld [vmem:[#allocation307_spill] sm:$0xff]  ;;  %v10332_v39 = vld [vmem:[#allocation241_spill] sm:$0xff] }
 0x460   : > { %v4673_v3 = vmax.f32 %v4431_v16, 0.0  ;;  %v4674_v26 = vmax.f32 %v4432_v13, 0.0  ;;  %v3483_v62 = vmul.f32 %v10331_v22, %v10330_v59  ;;  %v3484_v58 = vmul.f32 %v10331_v22, %v10332_v39 }
 0x461   : > { %v4695_v56 = vmax.f32 %v4453_v47, 0.0  ;;  %v4696_v30 = vmax.f32 %v4454_v1, 0.0  ;;  %v4160_v52 = vpop.permute.xlu1 %4159 }
 0x462   : > { %4915 = vst [vmem:[%s8440_s28 + $0x6b0] sm:$0xff] %v4673_v3  ;;  %4916 = vst.msk [vmem:[%s8440_s28 + $0x6b8] sm:$0xff] %vm465_vm0, %v4674_v26  ;;  %v4435_v48 = vadd.f32 %v4160_v52, %v3467_v27  ;;  %v4436_v60 = vadd.f32 %v4160_v52, %v3468_v25  ;;  %v4215_v37 = vpop.permute.xlu0 %4214  ;;  %v3487_v27 = vmul.f32 %v10334_v4, %v10333_v40 }
 0x463   : > { %4937 = vst [vmem:[%s8440_s28 + $0x760] sm:$0xff] %v4695_v56  ;;  %4938 = vst.msk [vmem:[%s8440_s28 + $0x768] sm:$0xff] %vm465_vm0, %v4696_v30  ;;  %v4457_v9 = vadd.f32 %v4215_v37, %v3489_v50  ;;  %v4458_v2 = vadd.f32 %v4215_v37, %v3490_v44  ;;  %v3488_v25 = vmul.f32 %v10334_v4, %v10335_v21 }
 0x464   : > { %v4677_v46 = vmax.f32 %v4435_v48, 0.0  ;;  %v4678_v12 = vmax.f32 %v4436_v60, 0.0 }
 0x465   : > { %v4699_v24 = vmax.f32 %v4457_v9, 0.0  ;;  %v4700_v8 = vmax.f32 %v4458_v2, 0.0  ;;  %v4170_v51 = vpop.permute.xlu1 %4169 }
 0x466   : > { %4919 = vst [vmem:[%s8440_s28 + $0x6d0] sm:$0xff] %v4677_v46  ;;  %4920 = vst.msk [vmem:[%s8440_s28 + $0x6d8] sm:$0xff] %vm465_vm0, %v4678_v12  ;;  %v4439_v7 = vadd.f32 %v4170_v51, %v3471_v19  ;;  %v4440_v54 = vadd.f32 %v4170_v51, %v3472_v61 }
 0x467   : > { %4941 = vst [vmem:[%s8440_s28 + $0x780] sm:$0xff] %v4699_v24  ;;  %4942 = vst.msk [vmem:[%s8440_s28 + $0x788] sm:$0xff] %vm465_vm0, %v4700_v8 }
 0x468   : > { %v4681_v28 = vmax.f32 %v4439_v7, 0.0  ;;  %v4682_v0 = vmax.f32 %v4440_v54, 0.0 }
 0x469   : > { %v4180_v55 = vpop.permute.xlu1 %4179 }
 0x46a   : > { %4923 = vst [vmem:[%s8440_s28 + $0x6f0] sm:$0xff] %v4681_v28  ;;  %4924 = vst.msk [vmem:[%s8440_s28 + $0x6f8] sm:$0xff] %vm465_vm0, %v4682_v0  ;;  %v4443_v45 = vadd.f32 %v4180_v55, %v3475_v20  ;;  %v4444_v33 = vadd.f32 %v4180_v55, %v3476_v42 }
 0x46c   : > { %v4685_v57 = vmax.f32 %v4443_v45, 0.0  ;;  %v4686_v43 = vmax.f32 %v4444_v33, 0.0 }
 0x46d   : > { %v4190_v15 = vpop.permute.xlu1 %4189 }
 0x46e   : > { %4927 = vst [vmem:[%s8440_s28 + $0x710] sm:$0xff] %v4685_v57  ;;  %4928 = vst.msk [vmem:[%s8440_s28 + $0x718] sm:$0xff] %vm465_vm0, %v4686_v43  ;;  %v4447_v17 = vadd.f32 %v4190_v15, %v3479_v49  ;;  %v4448_v6 = vadd.f32 %v4190_v15, %v3480_v38 }
 0x470   : > { %v4689_v11 = vmax.f32 %v4447_v17, 0.0  ;;  %v4690_v23 = vmax.f32 %v4448_v6, 0.0 }
 0x471   : > { %v4200_v16 = vpop.permute.xlu1 %4199 }
 0x472   : > { %4931 = vst [vmem:[%s8440_s28 + $0x730] sm:$0xff] %v4689_v11  ;;  %4932 = vst.msk [vmem:[%s8440_s28 + $0x738] sm:$0xff] %vm465_vm0, %v4690_v23  ;;  %v4451_v13 = vadd.f32 %v4200_v16, %v3483_v62  ;;  %v4452_v35 = vadd.f32 %v4200_v16, %v3484_v58 }
 0x474   : > { %v4693_v47 = vmax.f32 %v4451_v13, 0.0  ;;  %v4694_v1 = vmax.f32 %v4452_v35, 0.0 }
 0x475   : > { %v4210_v3 = vpop.permute.xlu1 %4209 }
 0x476   : > { %4935 = vst [vmem:[%s8440_s28 + $0x750] sm:$0xff] %v4693_v47  ;;  %4936 = vst.msk [vmem:[%s8440_s28 + $0x758] sm:$0xff] %vm465_vm0, %v4694_v1  ;;  %v4455_v26 = vadd.f32 %v4210_v3, %v3487_v27  ;;  %v4456_v56 = vadd.f32 %v4210_v3, %v3488_v25 }
 0x478   : > { %v4697_v30 = vmax.f32 %v4455_v26, 0.0  ;;  %v4698_v52 = vmax.f32 %v4456_v56, 0.0 }
 0x47a   : > { %4939 = vst [vmem:[%s8440_s28 + $0x770] sm:$0xff] %v4697_v30  ;;  %4940 = vst.msk [vmem:[%s8440_s28 + $0x778] sm:$0xff] %vm465_vm0, %v4698_v52 }
 0x47b PF: > { %s13_s12 = sadd.s32 1, %s5541_s12  }
 0x47c   : > { %p10_p4 = scmp.ge.s32.totalorder %s13_s12, 5  }
 0x47e   :  { %12 = sbr.rel (!%p10_p4) target bundleno = 1 (0x1), region = 68 }

</bundles_post_ra>
